<compile_context>
chip_gen: v7x
topology: tpu7x:2x2x1
jax: 0.10.0
libtpu: 0.0.40
codegen_flags: <defaults>
</compile_context>

<pallas_src>
import functools
import math

import jax
import jax.numpy as jnp
from jax.experimental import pallas as pl
from jax.experimental.pallas import tpu as pltpu


def _round_up(x, m):
    return (x + m - 1) // m * m


# ---------------- kernel 1: multi-scale branches + BN + ReLU + conv_proj ----------------

def _ms_proj_kernel(pat_ref, wms_ref, bms_ref, wpr_ref, bpr_ref, o_ref):
    # pat_ref is bf16 already (im2col emitted in bf16 to halve its HBM traffic)
    h = jnp.dot(pat_ref[...], wms_ref[...], preferred_element_type=jnp.float32) + bms_ref[...]
    h = jnp.maximum(h, 0.0)                                                  # folded BN + ReLU
    o_ref[...] = (jnp.dot(h.astype(jnp.bfloat16), wpr_ref[...],
                          preferred_element_type=jnp.float32)
                  + bpr_ref[...]).astype(o_ref.dtype)


def ms_branches_proj(patches, wms, bms, wpr, bpr, tm=512):
    M, KT = patches.shape
    C1 = wms.shape[1]
    C2 = wpr.shape[1]
    # large tiles amortize the ~0.35us/step overhead, but keep >=2 grid steps so both
    # v7x TensorCores get work (harmless on v5e/v6e).
    tm = min(tm, _round_up(max(M // 2, 8), 8))
    Mp = _round_up(M, tm)
    if Mp != M:
        patches = jnp.pad(patches, ((0, Mp - M), (0, 0)))
    out = pl.pallas_call(
        _ms_proj_kernel,
        out_shape=jax.ShapeDtypeStruct((Mp, C2), jnp.bfloat16),
        grid=(Mp // tm,),
        in_specs=[
            pl.BlockSpec((tm, KT), lambda i: (i, 0)),
            pl.BlockSpec((KT, C1), lambda i: (0, 0)),
            pl.BlockSpec((1, C1), lambda i: (0, 0)),
            pl.BlockSpec((C1, C2), lambda i: (0, 0)),
            pl.BlockSpec((1, C2), lambda i: (0, 0)),
        ],
        out_specs=pl.BlockSpec((tm, C2), lambda i: (i, 0)),
        compiler_params=pltpu.CompilerParams(dimension_semantics=("parallel",)),
    )(patches, wms, bms, wpr, bpr)
    return out[:M]


# -------- kernel 2: conv_block1 + residual1 + conv_block2 + AdaptiveAvgPool + pos-enc --------

def _conv_fused_kernel(x_ref, w1_ref, b1_ref, wr_ref, br_ref, w2_ref, b2_ref,
                       pm_ref, pe_ref, o_ref, cols_scr, y_scr, *, H, W, k):
    # x_ref : (1, H+2p, W, Cin) bf16, zero-padded along H only (W taps handled by rolls)
    Cin = x_ref.shape[-1]
    Cmid = y_scr.shape[-1]
    p = k // 2
    Hp = H + 2 * p
    KK = k * k
    w_idx = jax.lax.broadcasted_iota(jnp.int32, (1, W, 1), 1)

    def im2col(src, C):
        # src: (Hp, W, C) f32 value, zero rows at the H borders.  For each tap (dy, dx):
        #   value(h, w) = src[h + dy, w + dx - p]  (0 outside) ; W-shift via an XLU sublane
        # roll + border mask, dy via a free major-dim slice.  Writes are lane-offset only.
        for dx in range(k):
            sh = (p - dx) % W                        # jnp.roll semantics: out[w] = x[w - sh]
            sdx = src if sh == 0 else pltpu.roll(src, shift=sh, axis=1)
            if dx != p:                              # zero the wrapped-around columns
                valid = (w_idx + (dx - p) >= 0) & (w_idx + (dx - p) < W)
                sdx = jnp.where(valid, sdx, 0.0)
            for dy in range(k):
                t = dy * k + dx
                cols_scr[:, t * C:(t + 1) * C] = (
                    sdx[dy:dy + H].reshape(H * W, C).astype(jnp.bfloat16))

    # ---- conv_block1 (3x3, BN folded, ReLU) as ONE K = 9*Cin GEMM ----
    im2col(x_ref[0].astype(jnp.float32), Cin)
    y = jnp.dot(cols_scr[:, :KK * Cin], w1_ref[...],
                preferred_element_type=jnp.float32) + b1_ref[...]
    y = jnp.maximum(y, 0.0)
    # residual1 (1x1) on the un-shifted input + add
    xc = x_ref[0, p:p + H].reshape(H * W, Cin)                       # bf16, centre rows
    y = y + jnp.dot(xc, wr_ref[...], preferred_element_type=jnp.float32) + br_ref[...]

    # keep the intermediate resident in VMEM, zero-padded along H for conv_block2
    y_scr[0:p] = jnp.zeros((p, W, Cmid), jnp.float32)
    y_scr[p + H:Hp] = jnp.zeros((p, W, Cmid), jnp.float32)
    y_scr[p:p + H] = y.reshape(H, W, Cmid)

    # ---- conv_block2 (3x3, BN folded, ReLU) as ONE K = 9*Cmid GEMM ----
    im2col(y_scr[...], Cmid)
    z = jnp.dot(cols_scr[:, :KK * Cmid], w2_ref[...],
                preferred_element_type=jnp.float32) + b2_ref[...]
    z = jnp.maximum(z, 0.0)

    # ---- AdaptiveAvgPool2d((max_len,1)) + squeeze + permute as a pooling matmul, + pos-enc ----
    o_ref[0] = (jnp.dot(pm_ref[...], z, preferred_element_type=jnp.float32)
                + pe_ref[...]).astype(o_ref.dtype)


def _build_pool_matrix(H, W, max_len):
    rows = []
    for m in range(max_len):
        h0 = (m * H) // max_len
        h1 = -(-((m + 1) * H) // max_len)            # ceil — exact AdaptiveAvgPool2d bins
        mask = jnp.zeros((H, W), jnp.float32).at[h0:h1, :].set(1.0 / ((h1 - h0) * W))
        rows.append(mask.reshape(H * W))
    return jnp.stack(rows)                           # (max_len, H*W)


def conv_blocks_pool(x_bhwc, p, *, max_len):
    B, H, W, Cin = x_bhwc.shape
    Cmid = p["cb1_b"].shape[-1]
    k = 3
    pd = k // 2
    xpH = jnp.pad(x_bhwc, ((0, 0), (pd, pd), (0, 0), (0, 0)))        # pad H only (bf16)
    Hp = H + 2 * pd
    pool_mat = _build_pool_matrix(H, W, max_len)
    Cmax = max(Cin, Cmid)
    kernel = functools.partial(_conv_fused_kernel, H=H, W=W, k=k)
    return pl.pallas_call(
        kernel,
        out_shape=jax.ShapeDtypeStruct((B, max_len, Cmid), jnp.float32),
        grid=(B,),
        in_specs=[
            pl.BlockSpec((1, Hp, W, Cin), lambda b: (b, 0, 0, 0)),
            pl.BlockSpec((k * k * Cin, Cmid), lambda b: (0, 0)),
            pl.BlockSpec((1, Cmid), lambda b: (0, 0)),
            pl.BlockSpec((Cin, Cmid), lambda b: (0, 0)),
            pl.BlockSpec((1, Cmid), lambda b: (0, 0)),
            pl.BlockSpec((k * k * Cmid, Cmid), lambda b: (0, 0)),
            pl.BlockSpec((1, Cmid), lambda b: (0, 0)),
            pl.BlockSpec((max_len, H * W), lambda b: (0, 0)),
            pl.BlockSpec((max_len, Cmid), lambda b: (0, 0)),
        ],
        out_specs=pl.BlockSpec((1, max_len, Cmid), lambda b: (b, 0, 0)),
        scratch_shapes=[pltpu.VMEM((H * W, k * k * Cmax), jnp.bfloat16),
                        pltpu.VMEM((Hp, W, Cmid), jnp.float32)],
        compiler_params=pltpu.CompilerParams(dimension_semantics=("parallel",)),
    )(xpH, p["cb1_w"], p["cb1_b"], p["res1_w"], p["res1_b"],
      p["cb2_w"], p["cb2_b"], pool_mat, p["pe"])


# ---------------- kernel 3: 4-layer transformer encoder + final fc, one call ----------------

def _encoder_fc_kernel(x_ref, wqkv_ref, bqkv_ref, wo_ref, bo_ref,
                       ln1g_ref, ln1b_ref, wff1_ref, bff1_ref,
                       wff2_ref, bff2_ref, ln2g_ref, ln2b_ref,
                       wfc_ref, bfc_ref, o_ref, x_scr,
                       *, nhead, n_layers, eps):
    layer = pl.program_id(1)

    @pl.when(layer == 0)
    def _():
        x_scr[...] = x_ref[...]              # load the (Bt, S, D) activation once per tile

    Bt, S, D = x_scr.shape
    M = Bt * S
    Dh = D // nhead
    scale = 1.0 / math.sqrt(Dh)

    xf = x_scr[...].reshape(M, D)            # f32, VMEM-resident carry across the layer axis
    xb = xf.astype(jnp.bfloat16)

    # ---- self-attention: ONE full-width QKV GEMM, tiny per-head softmax, ONE out-proj GEMM ----
    qkv = jnp.dot(xb, wqkv_ref[0], preferred_element_type=jnp.float32) + bqkv_ref[0]
    q = qkv[:, :D].reshape(Bt, S, D)
    kk = qkv[:, D:2 * D].reshape(Bt, S, D)
    v = qkv[:, 2 * D:].reshape(Bt, S, D)
    heads = []
    for h in range(nhead):
        sl = slice(h * Dh, (h + 1) * Dh)
        s = jnp.einsum("bqd,bkd->bqk", q[..., sl], kk[..., sl],
                       preferred_element_type=jnp.float32) * scale
        s = s - jnp.max(s, axis=-1, keepdims=True)
        pr = jnp.exp(s)
        pr = pr * pl.reciprocal(jnp.sum(pr, axis=-1, keepdims=True), approx=True)
        heads.append(jnp.einsum("bqk,bkd->bqd", pr, v[..., sl],
                                preferred_element_type=jnp.float32))
    attn = jnp.concatenate(heads, axis=-1).reshape(M, D)
    attn = jnp.dot(attn.astype(jnp.bfloat16), wo_ref[0],
                   preferred_element_type=jnp.float32) + bo_ref[0]

    def layer_norm(y, g, b):
        mu = jnp.mean(y, axis=-1, keepdims=True)
        yc = y - mu
        var = jnp.mean(yc * yc, axis=-1, keepdims=True)
        return yc * jax.lax.rsqrt(var + eps) * g + b

    x1 = layer_norm(xf + attn, ln1g_ref[0], ln1b_ref[0])             # post-norm 1

    # ---- feed-forward (weights streamed once per batch tile, MXU rows = Bt*S) ----
    h1 = jnp.dot(x1.astype(jnp.bfloat16), wff1_ref[0],
                 preferred_element_type=jnp.float32) + bff1_ref[0]
    h1 = jnp.maximum(h1, 0.0)
    ff = jnp.dot(h1.astype(jnp.bfloat16), wff2_ref[0],
                 preferred_element_type=jnp.float32) + bff2_ref[0]
    x2 = layer_norm(x1 + ff, ln2g_ref[0], ln2b_ref[0])               # post-norm 2

    x_scr[...] = x2.reshape(Bt, S, D)        # carry to the next layer (same b, next l)

    # ---- final classifier fused into the last layer's epilogue (lane-dense, N padded to 128) ----
    @pl.when(layer == n_layers - 1)
    def _():
        logits = jnp.dot(x2.astype(jnp.bfloat16), wfc_ref[...],
                         preferred_element_type=jnp.float32) + bfc_ref[...]
        o_ref[...] = logits.reshape(Bt, S, -1).astype(o_ref.dtype)


def encoder_stack_fc(x, p, *, nhead, n_layers, eps=1e-5, bt=None):
    B, S, D = x.shape
    F = p["wff1"].shape[-1]
    NPAD = p["fc_w"].shape[-1]
    if bt is None:
        # amortize the per-layer weight stream over the batch, keep >=2 parallel grid steps
        # (v7x megacore), and cap so the (bt*S, dff) f32 FF intermediate stays far below
        # v7x's 32 MiB default scoped-VMEM limit.
        bt = max(1, min(64, -(-B // 2)))
    Bp = _round_up(B, bt)
    if Bp != B:
        x = jnp.pad(x, ((0, Bp - B), (0, 0), (0, 0)))
    kernel = functools.partial(_encoder_fc_kernel, nhead=nhead,
                               n_layers=n_layers, eps=eps)
    out = pl.pallas_call(
        kernel,
        out_shape=jax.ShapeDtypeStruct((Bp, S, NPAD), jnp.float32),
        grid=(Bp // bt, n_layers),                   # batch tiles parallel, layers sequential
        in_specs=[
            pl.BlockSpec((bt, S, D), lambda b, l: (b, 0, 0)),                # activations
            pl.BlockSpec((1, D, 3 * D), lambda b, l: (l, 0, 0)),             # wqkv (bf16)
            pl.BlockSpec((1, 1, 3 * D), lambda b, l: (l, 0, 0)),             # bqkv
            pl.BlockSpec((1, D, D), lambda b, l: (l, 0, 0)),                 # wo   (bf16)
            pl.BlockSpec((1, 1, D), lambda b, l: (l, 0, 0)),                 # bo
            pl.BlockSpec((1, 1, D), lambda b, l: (l, 0, 0)),                 # ln1g
            pl.BlockSpec((1, 1, D), lambda b, l: (l, 0, 0)),                 # ln1b
            pl.BlockSpec((1, D, F), lambda b, l: (l, 0, 0)),                 # wff1 (bf16)
            pl.BlockSpec((1, 1, F), lambda b, l: (l, 0, 0)),                 # bff1
            pl.BlockSpec((1, F, D), lambda b, l: (l, 0, 0)),                 # wff2 (bf16)
            pl.BlockSpec((1, 1, D), lambda b, l: (l, 0, 0)),                 # bff2
            pl.BlockSpec((1, 1, D), lambda b, l: (l, 0, 0)),                 # ln2g
            pl.BlockSpec((1, 1, D), lambda b, l: (l, 0, 0)),                 # ln2b
            pl.BlockSpec((D, NPAD), lambda b, l: (0, 0)),                    # fc_w (bf16, padded)
            pl.BlockSpec((1, NPAD), lambda b, l: (0, 0)),                    # fc_b
        ],
        out_specs=pl.BlockSpec((bt, S, NPAD), lambda b, l: (b, 0, 0)),
        scratch_shapes=[pltpu.VMEM((bt, S, D), jnp.float32)],
        compiler_params=pltpu.CompilerParams(
            dimension_semantics=("parallel", "arbitrary")),
    )(x, p["wqkv"], p["bqkv"], p["wo"], p["bo"],
      p["ln1g"], p["ln1b"], p["wff1"], p["bff1"],
      p["wff2"], p["bff2"], p["ln2g"], p["ln2b"],
      p["fc_w"], p["fc_b"])
    return out[:B]


# --------------------------------- glue (JAX) ---------------------------------

def extract_patches_7x7(dist_input):
    """(B,1,H,W) -> (B*H*W, 49) bf16 'same'-padded 7x7 patches (shared by the 3/5/7 branches)."""
    B, _, H, W = dist_input.shape
    x = dist_input[:, 0]
    xp = jnp.pad(x, ((0, 0), (3, 3), (3, 3)))
    cols = [xp[:, dy:dy + H, dx:dx + W] for dy in range(7) for dx in range(7)]
    pat = jnp.stack(cols, axis=-1)                   # (B, H, W, 49)
    return pat.reshape(B * H * W, 49).astype(jnp.bfloat16)


def init_params(key, *, max_len, num_aa, latent_dim, d_model, nhead, dff, n_layers):
    keys = iter(jax.random.split(key, 256))

    def nrm(shape, s=0.05):
        return (s * jax.random.normal(next(keys), shape)).astype(jnp.float32)

    eps = 1e-5
    p = {}

    # ---- multi-scale branches (torch layout), BN(96) folded, combined into one 7x7-tap GEMM ----
    w3, b3 = nrm((32, 1, 3, 3)), nrm((32,))
    w5, b5 = nrm((32, 1, 5, 5)), nrm((32,))
    w7, b7 = nrm((32, 1, 7, 7)), nrm((32,))
    g96, be96 = 1.0 + nrm((96,), 0.1), nrm((96,), 0.05)
    rm96, rv96 = jnp.zeros((96,), jnp.float32), jnp.ones((96,), jnp.float32)
    w3p = jnp.pad(w3, ((0, 0), (0, 0), (2, 2), (2, 2)))        # embed 3x3 at the 7x7 centre
    w5p = jnp.pad(w5, ((0, 0), (0, 0), (1, 1), (1, 1)))        # embed 5x5 at the 7x7 centre
    wall = jnp.concatenate([w3p, w5p, w7], axis=0)             # (96,1,7,7), torch.cat order
    wms = wall.reshape(96, 49).T                               # (49, 96), tap index = dy*7+dx
    bms = jnp.concatenate([b3, b5, b7])
    scale = g96 / jnp.sqrt(rv96 + eps)
    wms = wms * scale[None, :]
    bms = bms * scale + (be96 - rm96 * scale)
    C1P = 128                                                  # pad 96 -> 128 (lane-dense)
    p["ms_w"] = jnp.zeros((49, C1P), jnp.float32).at[:, :96].set(wms).astype(jnp.bfloat16)
    p["ms_b"] = jnp.zeros((1, C1P), jnp.float32).at[0, :96].set(bms)

    # conv_proj (1x1, 96 -> latent); extra zero rows absorb the padded branch channels
    wpr, bpr = nrm((latent_dim, 96, 1, 1)), nrm((latent_dim,))
    p["proj_w"] = jnp.zeros((C1P, latent_dim), jnp.float32).at[:96].set(
        wpr.reshape(latent_dim, 96).T).astype(jnp.bfloat16)
    p["proj_b"] = bpr.reshape(1, latent_dim)

    def conv_taps_bn(w, b):
        """torch (Cout,Cin,k,k) conv + eval BN -> (k*k*Cin, Cout) flat taps + (1,Cout) bias."""
        Cout, Cin, kk, _ = w.shape
        g, be = 1.0 + nrm((Cout,), 0.1), nrm((Cout,), 0.05)
        rm, rv = jnp.zeros((Cout,), jnp.float32), jnp.ones((Cout,), jnp.float32)
        sc = g / jnp.sqrt(rv + eps)
        taps = jnp.transpose(w, (2, 3, 1, 0)).reshape(kk * kk * Cin, Cout) * sc
        return taps.astype(jnp.bfloat16), ((b - rm) * sc + be).reshape(1, Cout)

    # conv_block1 (3x3 latent -> d_model) + BN; residual1 (1x1)
    p["cb1_w"], p["cb1_b"] = conv_taps_bn(nrm((d_model, latent_dim, 3, 3)), nrm((d_model,)))
    wr, br = nrm((d_model, latent_dim, 1, 1)), nrm((d_model,))
    p["res1_w"] = wr.reshape(d_model, latent_dim).T.astype(jnp.bfloat16)
    p["res1_b"] = br.reshape(1, d_model)

    # conv_block2 (3x3 d_model -> d_model) + BN
    p["cb2_w"], p["cb2_b"] = conv_taps_bn(nrm((d_model, d_model, 3, 3)), nrm((d_model,)))

    # sinusoidal positional encoding (added inside the fused conv/pool kernel)
    pos = jnp.arange(max_len, dtype=jnp.float32)[:, None]
    div = jnp.exp(jnp.arange(0, d_model, 2, dtype=jnp.float32)
                  * (-math.log(10000.0) / d_model))
    pe = jnp.zeros((max_len, d_model), jnp.float32)
    pe = pe.at[:, 0::2].set(jnp.sin(pos * div))
    pe = pe.at[:, 1::2].set(jnp.cos(pos * div))
    p["pe"] = pe

    # ---- transformer layers: full-width torch in_proj/out_proj layouts (x @ W.T) ----
    D, F = d_model, dff
    wqkv, bqkv, wo, bo = [], [], [], []
    ln1g, ln1b, ln2g, ln2b = [], [], [], []
    wff1, bff1, wff2, bff2 = [], [], [], []
    for _ in range(n_layers):
        in_w = nrm((3 * D, D))                       # torch in_proj_weight
        in_b = nrm((3 * D,))
        wqkv.append(in_w.T)                          # (D, 3D): q/k/v thirds, head-contiguous
        bqkv.append(in_b.reshape(1, 3 * D))
        ow = nrm((D, D))                             # torch out_proj.weight
        wo.append(ow.T)
        bo.append(nrm((D,)).reshape(1, D))
        ln1g.append((1.0 + nrm((D,), 0.1)).reshape(1, D))
        ln1b.append(nrm((D,), 0.05).reshape(1, D))
        wff1.append(nrm((F, D)).T)                   # linear1.weight -> (D, dff)
        bff1.append(nrm((F,)).reshape(1, F))
        wff2.append(nrm((D, F)).T)                   # linear2.weight -> (dff, D)
        bff2.append(nrm((D,)).reshape(1, D))
        ln2g.append((1.0 + nrm((D,), 0.1)).reshape(1, D))
        ln2b.append(nrm((D,), 0.05).reshape(1, D))
    p["wqkv"] = jnp.stack(wqkv).astype(jnp.bfloat16)
    p["bqkv"] = jnp.stack(bqkv)
    p["wo"] = jnp.stack(wo).astype(jnp.bfloat16)
    p["bo"] = jnp.stack(bo)
    p["ln1g"], p["ln1b"] = jnp.stack(ln1g), jnp.stack(ln1b)
    p["wff1"] = jnp.stack(wff1).astype(jnp.bfloat16)
    p["bff1"] = jnp.stack(bff1)
    p["wff2"] = jnp.stack(wff2).astype(jnp.bfloat16)
    p["bff2"] = jnp.stack(bff2)
    p["ln2g"], p["ln2b"] = jnp.stack(ln2g), jnp.stack(ln2b)

    # ---- final classifier, padded to a lane-dense 128-wide output (sliced to num_aa outside) ----
    npad = _round_up(num_aa, 128)
    fcw, fcb = nrm((num_aa, d_model)), nrm((num_aa,))
    p["fc_w"] = jnp.zeros((d_model, npad), jnp.float32).at[:, :num_aa].set(fcw.T).astype(jnp.bfloat16)
    p["fc_b"] = jnp.zeros((1, npad), jnp.float32).at[0, :num_aa].set(fcb)
    return p


def forward(params, dist_input, *, max_len, latent_dim, d_model, nhead, num_aa, n_layers):
    B, Cin, H, W = dist_input.shape
    assert Cin == 1

    # branch3/5/7 + BN(96) + ReLU + concat + conv_proj (Dropout2d identity) -- one fused kernel
    patches = extract_patches_7x7(dist_input)                               # (B*H*W, 49) bf16
    x = ms_branches_proj(patches, params["ms_w"], params["ms_b"],
                         params["proj_w"], params["proj_b"])                # (B*H*W, latent) bf16
    x = x.reshape(B, H, W, latent_dim)

    # conv_block1 + BN + ReLU + residual1 + add + conv_block2 + BN + ReLU
    # + AdaptiveAvgPool2d((max_len,1)) + positional encoding -- one fused kernel per image
    x = conv_blocks_pool(x, params, max_len=max_len)                        # (B, max_len, d_model)

    # 4-layer transformer encoder + final Linear -- one fused, batch-tiled kernel
    logits = encoder_stack_fc(x, params, nhead=nhead, n_layers=n_layers)    # (B, max_len, 128)
    return logits[:, :, :num_aa]


# ------------------------------------- main -------------------------------------

if __name__ == "__main__":
    # small config consistent with the module (latent_dim keeps its 128 default so everything
    # stays lane-dense; d_model=128, nhead=8, dff=2048 = nn.TransformerEncoderLayer default)
    B, H, W = 2, 16, 16
    max_len, num_aa = 8, 20
    latent_dim, d_model, nhead, dff, n_layers = 128, 128, 8, 2048, 4

    root = jax.random.PRNGKey(0)
    k_param, k_input = jax.random.split(root)
    params = init_params(k_param, max_len=max_len, num_aa=num_aa, latent_dim=latent_dim,
                         d_model=d_model, nhead=nhead, dff=dff, n_layers=n_layers)
    dist_input = jax.random.normal(k_input, (B, 1, H, W), dtype=jnp.float32)

    fwd = jax.jit(functools.partial(forward, max_len=max_len, latent_dim=latent_dim,
                                    d_model=d_model, nhead=nhead, num_aa=num_aa,
                                    n_layers=n_layers))
    logits = fwd(params, dist_input)
    jax.block_until_ready(logits)
    assert logits.shape == (B, max_len, num_aa)
    assert bool(jnp.all(jnp.isfinite(logits)))
    print("KERNEL_OK")
</pallas_src>

<mosaic_0001>
module attributes {stable_mosaic.version = 11 : i64} {
  func.func @_ms_proj_kernel(%arg0: i32, %arg1: memref<256x49xbf16, #tpu.memory_space<vmem>>, %arg2: memref<49x128xbf16, #tpu.memory_space<vmem>>, %arg3: memref<1x128xf32, #tpu.memory_space<vmem>>, %arg4: memref<128x128xbf16, #tpu.memory_space<vmem>>, %arg5: memref<1x128xf32, #tpu.memory_space<vmem>>, %arg6: memref<256x128xbf16, #tpu.memory_space<vmem>>) attributes {dimension_semantics = [#tpu.dimension_semantics<parallel>], iteration_bounds = array<i64: 2>, scalar_prefetch = 0 : i64, scratch_operands = 0 : i64, tpu.core_type = #tpu.core_type<tc>, window_params = [{transform_indices = @transform_0, window_bounds = array<i64: 256, 49>}, {pipeline_mode = #tpu.pipeline_mode<synchronous>, transform_indices = @transform_1, window_bounds = array<i64: 49, 128>}, {pipeline_mode = #tpu.pipeline_mode<synchronous>, transform_indices = @transform_2, window_bounds = array<i64: 1, 128>}, {pipeline_mode = #tpu.pipeline_mode<synchronous>, transform_indices = @transform_3, window_bounds = array<i64: 128, 128>}, {pipeline_mode = #tpu.pipeline_mode<synchronous>, transform_indices = @transform_4, window_bounds = array<i64: 1, 128>}, {transform_indices = @transform_5, window_bounds = array<i64: 256, 128>}]} {
    %c0 = arith.constant 0 : index
    %c0_0 = arith.constant 0 : index
    %0 = vector.load %arg1[%c0, %c0_0] : memref<256x49xbf16, #tpu.memory_space<vmem>>, vector<256x49xbf16>
    %c0_1 = arith.constant 0 : index
    %c0_2 = arith.constant 0 : index
    %1 = vector.load %arg2[%c0_1, %c0_2] : memref<49x128xbf16, #tpu.memory_space<vmem>>, vector<49x128xbf16>
    %cst = arith.constant dense<0.000000e+00> : vector<256x128xf32>
    %2 = tpu.matmul %0, %1, %cst {dimension_numbers = #tpu.dot_dimension_numbers<[1], [0], [0], [1], [0, 0, 1, 1], [], []>} : vector<256x49xbf16>, vector<49x128xbf16>, vector<256x128xf32> -> vector<256x128xf32>
    %c0_3 = arith.constant 0 : index
    %c0_4 = arith.constant 0 : index
    %3 = vector.load %arg3[%c0_3, %c0_4] : memref<1x128xf32, #tpu.memory_space<vmem>>, vector<1x128xf32>
    %4 = vector.broadcast %3 : vector<1x128xf32> to vector<256x128xf32>
    %5 = arith.addf %2, %4 : vector<256x128xf32>
    %cst_5 = arith.constant 0.000000e+00 : f32
    %6 = vector.broadcast %cst_5 : f32 to vector<256x128xf32>
    %7 = arith.maximumf %5, %6 : vector<256x128xf32>
    %8 = arith.truncf %7 : vector<256x128xf32> to vector<256x128xbf16>
    %c0_6 = arith.constant 0 : index
    %c0_7 = arith.constant 0 : index
    %9 = vector.load %arg4[%c0_6, %c0_7] : memref<128x128xbf16, #tpu.memory_space<vmem>>, vector<128x128xbf16>
    %cst_8 = arith.constant dense<0.000000e+00> : vector<256x128xf32>
    %10 = tpu.matmul %8, %9, %cst_8 {dimension_numbers = #tpu.dot_dimension_numbers<[1], [0], [0], [1], [0, 0, 1, 1], [], []>} : vector<256x128xbf16>, vector<128x128xbf16>, vector<256x128xf32> -> vector<256x128xf32>
    %c0_9 = arith.constant 0 : index
    %c0_10 = arith.constant 0 : index
    %11 = vector.load %arg5[%c0_9, %c0_10] : memref<1x128xf32, #tpu.memory_space<vmem>>, vector<1x128xf32>
    %12 = vector.broadcast %11 : vector<1x128xf32> to vector<256x128xf32>
    %13 = arith.addf %10, %12 : vector<256x128xf32>
    %14 = arith.truncf %13 : vector<256x128xf32> to vector<256x128xbf16>
    %c0_11 = arith.constant 0 : index
    %c0_12 = arith.constant 0 : index
    %15 = vector.load %arg6[%c0_11, %c0_12] : memref<256x128xbf16, #tpu.memory_space<vmem>>, vector<256x128xbf16>
    tpu.vector_store %arg6[%c0_11, %c0_12], %14 {strides = array<i32>} : memref<256x128xbf16, #tpu.memory_space<vmem>>, vector<256x128xbf16>,
    return
  }
  func.func @transform_0(%arg0: i32) -> (i32, i32) {
    %c0_i32 = arith.constant 0 : i32
    %c0_i32_0 = arith.constant 0 : i32
    return %arg0, %c0_i32 : i32, i32
  }
  func.func @transform_1(%arg0: i32) -> (i32, i32) {
    %c0_i32 = arith.constant 0 : i32
    %c0_i32_0 = arith.constant 0 : i32
    %c0_i32_1 = arith.constant 0 : i32
    return %c0_i32, %c0_i32_0 : i32, i32
  }
  func.func @transform_2(%arg0: i32) -> (i32, i32) {
    %c0_i32 = arith.constant 0 : i32
    %c0_i32_0 = arith.constant 0 : i32
    %c0_i32_1 = arith.constant 0 : i32
    return %c0_i32, %c0_i32_0 : i32, i32
  }
  func.func @transform_3(%arg0: i32) -> (i32, i32) {
    %c0_i32 = arith.constant 0 : i32
    %c0_i32_0 = arith.constant 0 : i32
    %c0_i32_1 = arith.constant 0 : i32
    return %c0_i32, %c0_i32_0 : i32, i32
  }
  func.func @transform_4(%arg0: i32) -> (i32, i32) {
    %c0_i32 = arith.constant 0 : i32
    %c0_i32_0 = arith.constant 0 : i32
    %c0_i32_1 = arith.constant 0 : i32
    return %c0_i32, %c0_i32_0 : i32, i32
  }
  func.func @transform_5(%arg0: i32) -> (i32, i32) {
    %c0_i32 = arith.constant 0 : i32
    %c0_i32_0 = arith.constant 0 : i32
    return %arg0, %c0_i32 : i32, i32
  }
}

module attributes {stable_mosaic.version = 11 : i64} {
  func.func @_conv_fused_kernel(%arg0: i32, %arg1: memref<1x18x16x128xbf16, #tpu.memory_space<vmem>>, %arg2: memref<1152x128xbf16, #tpu.memory_space<vmem>>, %arg3: memref<1x128xf32, #tpu.memory_space<vmem>>, %arg4: memref<128x128xbf16, #tpu.memory_space<vmem>>, %arg5: memref<1x128xf32, #tpu.memory_space<vmem>>, %arg6: memref<1152x128xbf16, #tpu.memory_space<vmem>>, %arg7: memref<1x128xf32, #tpu.memory_space<vmem>>, %arg8: memref<8x256xf32, #tpu.memory_space<vmem>>, %arg9: memref<8x128xf32, #tpu.memory_space<vmem>>, %arg10: memref<1x8x128xf32, #tpu.memory_space<vmem>>, %arg11: memref<256x1152xbf16, #tpu.memory_space<vmem>>, %arg12: memref<18x16x128xf32, #tpu.memory_space<vmem>>) attributes {dimension_semantics = [#tpu.dimension_semantics<parallel>], iteration_bounds = array<i64: 2>, scalar_prefetch = 0 : i64, scratch_operands = 2 : i64, tpu.core_type = #tpu.core_type<tc>, window_params = [{transform_indices = @transform_0, window_bounds = array<i64: 1, 18, 16, 128>}, {pipeline_mode = #tpu.pipeline_mode<synchronous>, transform_indices = @transform_1, window_bounds = array<i64: 1152, 128>}, {pipeline_mode = #tpu.pipeline_mode<synchronous>, transform_indices = @transform_2, window_bounds = array<i64: 1, 128>}, {pipeline_mode = #tpu.pipeline_mode<synchronous>, transform_indices = @transform_3, window_bounds = array<i64: 128, 128>}, {pipeline_mode = #tpu.pipeline_mode<synchronous>, transform_indices = @transform_4, window_bounds = array<i64: 1, 128>}, {pipeline_mode = #tpu.pipeline_mode<synchronous>, transform_indices = @transform_5, window_bounds = array<i64: 1152, 128>}, {pipeline_mode = #tpu.pipeline_mode<synchronous>, transform_indices = @transform_6, window_bounds = array<i64: 1, 128>}, {pipeline_mode = #tpu.pipeline_mode<synchronous>, transform_indices = @transform_7, window_bounds = array<i64: 8, 256>}, {pipeline_mode = #tpu.pipeline_mode<synchronous>, transform_indices = @transform_8, window_bounds = array<i64: 8, 128>}, {transform_indices = @transform_9, window_bounds = array<i64: 1, 8, 128>}]} {
    %0 = tpu.iota {dimensions = array<i32: 1>} : vector<1x16x1xi32>
    %c0 = arith.constant 0 : index
    %c0_0 = arith.constant 0 : index
    %c0_1 = arith.constant 0 : index
    %c0_2 = arith.constant 0 : index
    %1 = vector.load %arg1[%c0, %c0_0, %c0_1, %c0_2] : memref<1x18x16x128xbf16, #tpu.memory_space<vmem>>, vector<1x18x16x128xbf16>
    %2 = vector.shape_cast %1 : vector<1x18x16x128xbf16> to vector<18x16x128xbf16>
    %3 = arith.extf %2 : vector<18x16x128xbf16> to vector<18x16x128xf32>
    %c1_i32 = arith.constant 1 : i32
    %4 = tpu.dynamic_rotate %3 by %c1_i32 dim 1 : vector<18x16x128xf32>, i32 -> vector<18x16x128xf32>
    %c-1_i32 = arith.constant -1 : i32
    %5 = vector.broadcast %c-1_i32 : i32 to vector<1x16x1xi32>
    %6 = arith.addi %0, %5 : vector<1x16x1xi32>
    %c0_i32 = arith.constant 0 : i32
    %7 = vector.broadcast %c0_i32 : i32 to vector<1x16x1xi32>
    %8 = arith.cmpi sge, %6, %7 : vector<1x16x1xi32>
    %c-1_i32_3 = arith.constant -1 : i32
    %9 = vector.broadcast %c-1_i32_3 : i32 to vector<1x16x1xi32>
    %10 = arith.addi %0, %9 : vector<1x16x1xi32>
    %c16_i32 = arith.constant 16 : i32
    %11 = vector.broadcast %c16_i32 : i32 to vector<1x16x1xi32>
    %12 = arith.cmpi slt, %10, %11 : vector<1x16x1xi32>
    %13 = arith.andi %8, %12 : vector<1x16x1xi1>
    %cst = arith.constant 0.000000e+00 : f32
    %14 = vector.shape_cast %13 : vector<1x16x1xi1> to vector<1x16x1xi1>
    %15 = vector.broadcast %14 : vector<1x16x1xi1> to vector<18x16x128xi1>
    %16 = vector.broadcast %cst : f32 to vector<18x16x128xf32>
    %17 = arith.select %15, %4, %16 : vector<18x16x128xi1>, vector<18x16x128xf32>
    %18 = vector.extract_strided_slice %17 {offsets = [0, 0, 0], sizes = [16, 16, 128], strides = [1, 1, 1]} : vector<18x16x128xf32> to vector<16x16x128xf32>
    %19 = vector.shape_cast %18 : vector<16x16x128xf32> to vector<256x128xf32>
    %20 = arith.truncf %19 : vector<256x128xf32> to vector<256x128xbf16>
    %c0_4 = arith.constant 0 : index
    %c0_5 = arith.constant 0 : index
    %21 = vector.load %arg11[%c0_4, %c0_5] : memref<256x1152xbf16, #tpu.memory_space<vmem>>, vector<256x128xbf16>
    tpu.vector_store %arg11[%c0_4, %c0_5], %20 {strides = array<i32>} : memref<256x1152xbf16, #tpu.memory_space<vmem>>, vector<256x128xbf16>,
    %22 = vector.extract_strided_slice %17 {offsets = [1, 0, 0], sizes = [16, 16, 128], strides = [1, 1, 1]} : vector<18x16x128xf32> to vector<16x16x128xf32>
    %23 = vector.shape_cast %22 : vector<16x16x128xf32> to vector<256x128xf32>
    %24 = arith.truncf %23 : vector<256x128xf32> to vector<256x128xbf16>
    %c0_6 = arith.constant 0 : index
    %c384 = arith.constant 384 : index
    %25 = vector.load %arg11[%c0_6, %c384] : memref<256x1152xbf16, #tpu.memory_space<vmem>>, vector<256x128xbf16>
    tpu.vector_store %arg11[%c0_6, %c384], %24 {strides = array<i32>} : memref<256x1152xbf16, #tpu.memory_space<vmem>>, vector<256x128xbf16>,
    %26 = vector.extract_strided_slice %17 {offsets = [2, 0, 0], sizes = [16, 16, 128], strides = [1, 1, 1]} : vector<18x16x128xf32> to vector<16x16x128xf32>
    %27 = vector.shape_cast %26 : vector<16x16x128xf32> to vector<256x128xf32>
    %28 = arith.truncf %27 : vector<256x128xf32> to vector<256x128xbf16>
    %c0_7 = arith.constant 0 : index
    %c768 = arith.constant 768 : index
    %29 = vector.load %arg11[%c0_7, %c768] : memref<256x1152xbf16, #tpu.memory_space<vmem>>, vector<256x128xbf16>
    tpu.vector_store %arg11[%c0_7, %c768], %28 {strides = array<i32>} : memref<256x1152xbf16, #tpu.memory_space<vmem>>, vector<256x128xbf16>,
    %30 = vector.extract_strided_slice %3 {offsets = [0, 0, 0], sizes = [16, 16, 128], strides = [1, 1, 1]} : vector<18x16x128xf32> to vector<16x16x128xf32>
    %31 = vector.shape_cast %30 : vector<16x16x128xf32> to vector<256x128xf32>
    %32 = arith.truncf %31 : vector<256x128xf32> to vector<256x128xbf16>
    %c0_8 = arith.constant 0 : index
    %c128 = arith.constant 128 : index
    %33 = vector.load %arg11[%c0_8, %c128] : memref<256x1152xbf16, #tpu.memory_space<vmem>>, vector<256x128xbf16>
    tpu.vector_store %arg11[%c0_8, %c128], %32 {strides = array<i32>} : memref<256x1152xbf16, #tpu.memory_space<vmem>>, vector<256x128xbf16>,
    %34 = vector.extract_strided_slice %3 {offsets = [1, 0, 0], sizes = [16, 16, 128], strides = [1, 1, 1]} : vector<18x16x128xf32> to vector<16x16x128xf32>
    %35 = vector.shape_cast %34 : vector<16x16x128xf32> to vector<256x128xf32>
    %36 = arith.truncf %35 : vector<256x128xf32> to vector<256x128xbf16>
    %c0_9 = arith.constant 0 : index
    %c512 = arith.constant 512 : index
    %37 = vector.load %arg11[%c0_9, %c512] : memref<256x1152xbf16, #tpu.memory_space<vmem>>, vector<256x128xbf16>
    tpu.vector_store %arg11[%c0_9, %c512], %36 {strides = array<i32>} : memref<256x1152xbf16, #tpu.memory_space<vmem>>, vector<256x128xbf16>,
    %38 = vector.extract_strided_slice %3 {offsets = [2, 0, 0], sizes = [16, 16, 128], strides = [1, 1, 1]} : vector<18x16x128xf32> to vector<16x16x128xf32>
    %39 = vector.shape_cast %38 : vector<16x16x128xf32> to vector<256x128xf32>
    %40 = arith.truncf %39 : vector<256x128xf32> to vector<256x128xbf16>
    %c0_10 = arith.constant 0 : index
    %c896 = arith.constant 896 : index
    %41 = vector.load %arg11[%c0_10, %c896] : memref<256x1152xbf16, #tpu.memory_space<vmem>>, vector<256x128xbf16>
    tpu.vector_store %arg11[%c0_10, %c896], %40 {strides = array<i32>} : memref<256x1152xbf16, #tpu.memory_space<vmem>>, vector<256x128xbf16>,
    %c15_i32 = arith.constant 15 : i32
    %42 = tpu.dynamic_rotate %3 by %c15_i32 dim 1 : vector<18x16x128xf32>, i32 -> vector<18x16x128xf32>
    %c1_i32_11 = arith.constant 1 : i32
    %43 = vector.broadcast %c1_i32_11 : i32 to vector<1x16x1xi32>
    %44 = arith.addi %0, %43 : vector<1x16x1xi32>
    %c0_i32_12 = arith.constant 0 : i32
    %45 = vector.broadcast %c0_i32_12 : i32 to vector<1x16x1xi32>
    %46 = arith.cmpi sge, %44, %45 : vector<1x16x1xi32>
    %c1_i32_13 = arith.constant 1 : i32
    %47 = vector.broadcast %c1_i32_13 : i32 to vector<1x16x1xi32>
    %48 = arith.addi %0, %47 : vector<1x16x1xi32>
    %c16_i32_14 = arith.constant 16 : i32
    %49 = vector.broadcast %c16_i32_14 : i32 to vector<1x16x1xi32>
    %50 = arith.cmpi slt, %48, %49 : vector<1x16x1xi32>
    %51 = arith.andi %46, %50 : vector<1x16x1xi1>
    %cst_15 = arith.constant 0.000000e+00 : f32
    %52 = vector.shape_cast %51 : vector<1x16x1xi1> to vector<1x16x1xi1>
    %53 = vector.broadcast %52 : vector<1x16x1xi1> to vector<18x16x128xi1>
    %54 = vector.broadcast %cst_15 : f32 to vector<18x16x128xf32>
    %55 = arith.select %53, %42, %54 : vector<18x16x128xi1>, vector<18x16x128xf32>
    %56 = vector.extract_strided_slice %55 {offsets = [0, 0, 0], sizes = [16, 16, 128], strides = [1, 1, 1]} : vector<18x16x128xf32> to vector<16x16x128xf32>
    %57 = vector.shape_cast %56 : vector<16x16x128xf32> to vector<256x128xf32>
    %58 = arith.truncf %57 : vector<256x128xf32> to vector<256x128xbf16>
    %c0_16 = arith.constant 0 : index
    %c256 = arith.constant 256 : index
    %59 = vector.load %arg11[%c0_16, %c256] : memref<256x1152xbf16, #tpu.memory_space<vmem>>, vector<256x128xbf16>
    tpu.vector_store %arg11[%c0_16, %c256], %58 {strides = array<i32>} : memref<256x1152xbf16, #tpu.memory_space<vmem>>, vector<256x128xbf16>,
    %60 = vector.extract_strided_slice %55 {offsets = [1, 0, 0], sizes = [16, 16, 128], strides = [1, 1, 1]} : vector<18x16x128xf32> to vector<16x16x128xf32>
    %61 = vector.shape_cast %60 : vector<16x16x128xf32> to vector<256x128xf32>
    %62 = arith.truncf %61 : vector<256x128xf32> to vector<256x128xbf16>
    %c0_17 = arith.constant 0 : index
    %c640 = arith.constant 640 : index
    %63 = vector.load %arg11[%c0_17, %c640] : memref<256x1152xbf16, #tpu.memory_space<vmem>>, vector<256x128xbf16>
    tpu.vector_store %arg11[%c0_17, %c640], %62 {strides = array<i32>} : memref<256x1152xbf16, #tpu.memory_space<vmem>>, vector<256x128xbf16>,
    %64 = vector.extract_strided_slice %55 {offsets = [2, 0, 0], sizes = [16, 16, 128], strides = [1, 1, 1]} : vector<18x16x128xf32> to vector<16x16x128xf32>
    %65 = vector.shape_cast %64 : vector<16x16x128xf32> to vector<256x128xf32>
    %66 = arith.truncf %65 : vector<256x128xf32> to vector<256x128xbf16>
    %c0_18 = arith.constant 0 : index
    %c1024 = arith.constant 1024 : index
    %67 = vector.load %arg11[%c0_18, %c1024] : memref<256x1152xbf16, #tpu.memory_space<vmem>>, vector<256x128xbf16>
    tpu.vector_store %arg11[%c0_18, %c1024], %66 {strides = array<i32>} : memref<256x1152xbf16, #tpu.memory_space<vmem>>, vector<256x128xbf16>,
    %c0_19 = arith.constant 0 : index
    %c0_20 = arith.constant 0 : index
    %68 = vector.load %arg11[%c0_19, %c0_20] : memref<256x1152xbf16, #tpu.memory_space<vmem>>, vector<256x1152xbf16>
    %c0_21 = arith.constant 0 : index
    %c0_22 = arith.constant 0 : index
    %69 = vector.load %arg2[%c0_21, %c0_22] : memref<1152x128xbf16, #tpu.memory_space<vmem>>, vector<1152x128xbf16>
    %cst_23 = arith.constant dense<0.000000e+00> : vector<256x128xf32>
    %70 = tpu.matmul %68, %69, %cst_23 {dimension_numbers = #tpu.dot_dimension_numbers<[1], [0], [0], [1], [0, 0, 1, 1], [], []>} : vector<256x1152xbf16>, vector<1152x128xbf16>, vector<256x128xf32> -> vector<256x128xf32>
    %c0_24 = arith.constant 0 : index
    %c0_25 = arith.constant 0 : index
    %71 = vector.load %arg3[%c0_24, %c0_25] : memref<1x128xf32, #tpu.memory_space<vmem>>, vector<1x128xf32>
    %72 = vector.broadcast %71 : vector<1x128xf32> to vector<256x128xf32>
    %73 = arith.addf %70, %72 : vector<256x128xf32>
    %cst_26 = arith.constant 0.000000e+00 : f32
    %74 = vector.broadcast %cst_26 : f32 to vector<256x128xf32>
    %75 = arith.maximumf %73, %74 : vector<256x128xf32>
    %c0_27 = arith.constant 0 : index
    %c1 = arith.constant 1 : index
    %c0_28 = arith.constant 0 : index
    %c0_29 = arith.constant 0 : index
    %76 = vector.load %arg1[%c0_27, %c1, %c0_28, %c0_29] : memref<1x18x16x128xbf16, #tpu.memory_space<vmem>>, vector<1x16x16x128xbf16>
    %77 = vector.shape_cast %76 : vector<1x16x16x128xbf16> to vector<16x16x128xbf16>
    %78 = vector.shape_cast %77 : vector<16x16x128xbf16> to vector<256x128xbf16>
    %c0_30 = arith.constant 0 : index
    %c0_31 = arith.constant 0 : index
    %79 = vector.load %arg4[%c0_30, %c0_31] : memref<128x128xbf16, #tpu.memory_space<vmem>>, vector<128x128xbf16>
    %cst_32 = arith.constant dense<0.000000e+00> : vector<256x128xf32>
    %80 = tpu.matmul %78, %79, %cst_32 {dimension_numbers = #tpu.dot_dimension_numbers<[1], [0], [0], [1], [0, 0, 1, 1], [], []>} : vector<256x128xbf16>, vector<128x128xbf16>, vector<256x128xf32> -> vector<256x128xf32>
    %81 = arith.addf %75, %80 : vector<256x128xf32>
    %c0_33 = arith.constant 0 : index
    %c0_34 = arith.constant 0 : index
    %82 = vector.load %arg5[%c0_33, %c0_34] : memref<1x128xf32, #tpu.memory_space<vmem>>, vector<1x128xf32>
    %83 = vector.broadcast %82 : vector<1x128xf32> to vector<256x128xf32>
    %84 = arith.addf %81, %83 : vector<256x128xf32>
    %cst_35 = arith.constant 0.000000e+00 : f32
    %85 = vector.broadcast %cst_35 : f32 to vector<1x16x128xf32>
    %c0_36 = arith.constant 0 : index
    %c0_37 = arith.constant 0 : index
    %c0_38 = arith.constant 0 : index
    %86 = vector.load %arg12[%c0_36, %c0_37, %c0_38] : memref<18x16x128xf32, #tpu.memory_space<vmem>>, vector<1x16x128xf32>
    tpu.vector_store %arg12[%c0_36, %c0_37, %c0_38], %85 {strides = array<i32>} : memref<18x16x128xf32, #tpu.memory_space<vmem>>, vector<1x16x128xf32>,
    %cst_39 = arith.constant 0.000000e+00 : f32
    %87 = vector.broadcast %cst_39 : f32 to vector<1x16x128xf32>
    %c17 = arith.constant 17 : index
    %c0_40 = arith.constant 0 : index
    %c0_41 = arith.constant 0 : index
    %88 = vector.load %arg12[%c17, %c0_40, %c0_41] : memref<18x16x128xf32, #tpu.memory_space<vmem>>, vector<1x16x128xf32>
    tpu.vector_store %arg12[%c17, %c0_40, %c0_41], %87 {strides = array<i32>} : memref<18x16x128xf32, #tpu.memory_space<vmem>>, vector<1x16x128xf32>,
    %89 = vector.shape_cast %84 : vector<256x128xf32> to vector<16x16x128xf32>
    %c1_42 = arith.constant 1 : index
    %c0_43 = arith.constant 0 : index
    %c0_44 = arith.constant 0 : index
    %90 = vector.load %arg12[%c1_42, %c0_43, %c0_44] : memref<18x16x128xf32, #tpu.memory_space<vmem>>, vector<16x16x128xf32>
    tpu.vector_store %arg12[%c1_42, %c0_43, %c0_44], %89 {strides = array<i32>} : memref<18x16x128xf32, #tpu.memory_space<vmem>>, vector<16x16x128xf32>,
    %c0_45 = arith.constant 0 : index
    %c0_46 = arith.constant 0 : index
    %c0_47 = arith.constant 0 : index
    %91 = vector.load %arg12[%c0_45, %c0_46, %c0_47] : memref<18x16x128xf32, #tpu.memory_space<vmem>>, vector<18x16x128xf32>
    %c1_i32_48 = arith.constant 1 : i32
    %92 = tpu.dynamic_rotate %91 by %c1_i32_48 dim 1 : vector<18x16x128xf32>, i32 -> vector<18x16x128xf32>
    %c-1_i32_49 = arith.constant -1 : i32
    %93 = vector.broadcast %c-1_i32_49 : i32 to vector<1x16x1xi32>
    %94 = arith.addi %0, %93 : vector<1x16x1xi32>
    %c0_i32_50 = arith.constant 0 : i32
    %95 = vector.broadcast %c0_i32_50 : i32 to vector<1x16x1xi32>
    %96 = arith.cmpi sge, %94, %95 : vector<1x16x1xi32>
    %c-1_i32_51 = arith.constant -1 : i32
    %97 = vector.broadcast %c-1_i32_51 : i32 to vector<1x16x1xi32>
    %98 = arith.addi %0, %97 : vector<1x16x1xi32>
    %c16_i32_52 = arith.constant 16 : i32
    %99 = vector.broadcast %c16_i32_52 : i32 to vector<1x16x1xi32>
    %100 = arith.cmpi slt, %98, %99 : vector<1x16x1xi32>
    %101 = arith.andi %96, %100 : vector<1x16x1xi1>
    %cst_53 = arith.constant 0.000000e+00 : f32
    %102 = vector.shape_cast %101 : vector<1x16x1xi1> to vector<1x16x1xi1>
    %103 = vector.broadcast %102 : vector<1x16x1xi1> to vector<18x16x128xi1>
    %104 = vector.broadcast %cst_53 : f32 to vector<18x16x128xf32>
    %105 = arith.select %103, %92, %104 : vector<18x16x128xi1>, vector<18x16x128xf32>
    %106 = vector.extract_strided_slice %105 {offsets = [0, 0, 0], sizes = [16, 16, 128], strides = [1, 1, 1]} : vector<18x16x128xf32> to vector<16x16x128xf32>
    %107 = vector.shape_cast %106 : vector<16x16x128xf32> to vector<256x128xf32>
    %108 = arith.truncf %107 : vector<256x128xf32> to vector<256x128xbf16>
    %c0_54 = arith.constant 0 : index
    %c0_55 = arith.constant 0 : index
    %109 = vector.load %arg11[%c0_54, %c0_55] : memref<256x1152xbf16, #tpu.memory_space<vmem>>, vector<256x128xbf16>
    tpu.vector_store %arg11[%c0_54, %c0_55], %108 {strides = array<i32>} : memref<256x1152xbf16, #tpu.memory_space<vmem>>, vector<256x128xbf16>,
    %110 = vector.extract_strided_slice %105 {offsets = [1, 0, 0], sizes = [16, 16, 128], strides = [1, 1, 1]} : vector<18x16x128xf32> to vector<16x16x128xf32>
    %111 = vector.shape_cast %110 : vector<16x16x128xf32> to vector<256x128xf32>
    %112 = arith.truncf %111 : vector<256x128xf32> to vector<256x128xbf16>
    %c0_56 = arith.constant 0 : index
    %c384_57 = arith.constant 384 : index
    %113 = vector.load %arg11[%c0_56, %c384_57] : memref<256x1152xbf16, #tpu.memory_space<vmem>>, vector<256x128xbf16>
    tpu.vector_store %arg11[%c0_56, %c384_57], %112 {strides = array<i32>} : memref<256x1152xbf16, #tpu.memory_space<vmem>>, vector<256x128xbf16>,
    %114 = vector.extract_strided_slice %105 {offsets = [2, 0, 0], sizes = [16, 16, 128], strides = [1, 1, 1]} : vector<18x16x128xf32> to vector<16x16x128xf32>
    %115 = vector.shape_cast %114 : vector<16x16x128xf32> to vector<256x128xf32>
    %116 = arith.truncf %115 : vector<256x128xf32> to vector<256x128xbf16>
    %c0_58 = arith.constant 0 : index
    %c768_59 = arith.constant 768 : index
    %117 = vector.load %arg11[%c0_58, %c768_59] : memref<256x1152xbf16, #tpu.memory_space<vmem>>, vector<256x128xbf16>
    tpu.vector_store %arg11[%c0_58, %c768_59], %116 {strides = array<i32>} : memref<256x1152xbf16, #tpu.memory_space<vmem>>, vector<256x128xbf16>,
    %118 = vector.extract_strided_slice %91 {offsets = [0, 0, 0], sizes = [16, 16, 128], strides = [1, 1, 1]} : vector<18x16x128xf32> to vector<16x16x128xf32>
    %119 = vector.shape_cast %118 : vector<16x16x128xf32> to vector<256x128xf32>
    %120 = arith.truncf %119 : vector<256x128xf32> to vector<256x128xbf16>
    %c0_60 = arith.constant 0 : index
    %c128_61 = arith.constant 128 : index
    %121 = vector.load %arg11[%c0_60, %c128_61] : memref<256x1152xbf16, #tpu.memory_space<vmem>>, vector<256x128xbf16>
    tpu.vector_store %arg11[%c0_60, %c128_61], %120 {strides = array<i32>} : memref<256x1152xbf16, #tpu.memory_space<vmem>>, vector<256x128xbf16>,
    %122 = vector.extract_strided_slice %91 {offsets = [1, 0, 0], sizes = [16, 16, 128], strides = [1, 1, 1]} : vector<18x16x128xf32> to vector<16x16x128xf32>
    %123 = vector.shape_cast %122 : vector<16x16x128xf32> to vector<256x128xf32>
    %124 = arith.truncf %123 : vector<256x128xf32> to vector<256x128xbf16>
    %c0_62 = arith.constant 0 : index
    %c512_63 = arith.constant 512 : index
    %125 = vector.load %arg11[%c0_62, %c512_63] : memref<256x1152xbf16, #tpu.memory_space<vmem>>, vector<256x128xbf16>
    tpu.vector_store %arg11[%c0_62, %c512_63], %124 {strides = array<i32>} : memref<256x1152xbf16, #tpu.memory_space<vmem>>, vector<256x128xbf16>,
    %126 = vector.extract_strided_slice %91 {offsets = [2, 0, 0], sizes = [16, 16, 128], strides = [1, 1, 1]} : vector<18x16x128xf32> to vector<16x16x128xf32>
    %127 = vector.shape_cast %126 : vector<16x16x128xf32> to vector<256x128xf32>
    %128 = arith.truncf %127 : vector<256x128xf32> to vector<256x128xbf16>
    %c0_64 = arith.constant 0 : index
    %c896_65 = arith.constant 896 : index
    %129 = vector.load %arg11[%c0_64, %c896_65] : memref<256x1152xbf16, #tpu.memory_space<vmem>>, vector<256x128xbf16>
    tpu.vector_store %arg11[%c0_64, %c896_65], %128 {strides = array<i32>} : memref<256x1152xbf16, #tpu.memory_space<vmem>>, vector<256x128xbf16>,
    %c15_i32_66 = arith.constant 15 : i32
    %130 = tpu.dynamic_rotate %91 by %c15_i32_66 dim 1 : vector<18x16x128xf32>, i32 -> vector<18x16x128xf32>
    %c1_i32_67 = arith.constant 1 : i32
    %131 = vector.broadcast %c1_i32_67 : i32 to vector<1x16x1xi32>
    %132 = arith.addi %0, %131 : vector<1x16x1xi32>
    %c0_i32_68 = arith.constant 0 : i32
    %133 = vector.broadcast %c0_i32_68 : i32 to vector<1x16x1xi32>
    %134 = arith.cmpi sge, %132, %133 : vector<1x16x1xi32>
    %c1_i32_69 = arith.constant 1 : i32
    %135 = vector.broadcast %c1_i32_69 : i32 to vector<1x16x1xi32>
    %136 = arith.addi %0, %135 : vector<1x16x1xi32>
    %c16_i32_70 = arith.constant 16 : i32
    %137 = vector.broadcast %c16_i32_70 : i32 to vector<1x16x1xi32>
    %138 = arith.cmpi slt, %136, %137 : vector<1x16x1xi32>
    %139 = arith.andi %134, %138 : vector<1x16x1xi1>
    %cst_71 = arith.constant 0.000000e+00 : f32
    %140 = vector.shape_cast %139 : vector<1x16x1xi1> to vector<1x16x1xi1>
    %141 = vector.broadcast %140 : vector<1x16x1xi1> to vector<18x16x128xi1>
    %142 = vector.broadcast %cst_71 : f32 to vector<18x16x128xf32>
    %143 = arith.select %141, %130, %142 : vector<18x16x128xi1>, vector<18x16x128xf32>
    %144 = vector.extract_strided_slice %143 {offsets = [0, 0, 0], sizes = [16, 16, 128], strides = [1, 1, 1]} : vector<18x16x128xf32> to vector<16x16x128xf32>
    %145 = vector.shape_cast %144 : vector<16x16x128xf32> to vector<256x128xf32>
    %146 = arith.truncf %145 : vector<256x128xf32> to vector<256x128xbf16>
    %c0_72 = arith.constant 0 : index
    %c256_73 = arith.constant 256 : index
    %147 = vector.load %arg11[%c0_72, %c256_73] : memref<256x1152xbf16, #tpu.memory_space<vmem>>, vector<256x128xbf16>
    tpu.vector_store %arg11[%c0_72, %c256_73], %146 {strides = array<i32>} : memref<256x1152xbf16, #tpu.memory_space<vmem>>, vector<256x128xbf16>,
    %148 = vector.extract_strided_slice %143 {offsets = [1, 0, 0], sizes = [16, 16, 128], strides = [1, 1, 1]} : vector<18x16x128xf32> to vector<16x16x128xf32>
    %149 = vector.shape_cast %148 : vector<16x16x128xf32> to vector<256x128xf32>
    %150 = arith.truncf %149 : vector<256x128xf32> to vector<256x128xbf16>
    %c0_74 = arith.constant 0 : index
    %c640_75 = arith.constant 640 : index
    %151 = vector.load %arg11[%c0_74, %c640_75] : memref<256x1152xbf16, #tpu.memory_space<vmem>>, vector<256x128xbf16>
    tpu.vector_store %arg11[%c0_74, %c640_75], %150 {strides = array<i32>} : memref<256x1152xbf16, #tpu.memory_space<vmem>>, vector<256x128xbf16>,
    %152 = vector.extract_strided_slice %143 {offsets = [2, 0, 0], sizes = [16, 16, 128], strides = [1, 1, 1]} : vector<18x16x128xf32> to vector<16x16x128xf32>
    %153 = vector.shape_cast %152 : vector<16x16x128xf32> to vector<256x128xf32>
    %154 = arith.truncf %153 : vector<256x128xf32> to vector<256x128xbf16>
    %c0_76 = arith.constant 0 : index
    %c1024_77 = arith.constant 1024 : index
    %155 = vector.load %arg11[%c0_76, %c1024_77] : memref<256x1152xbf16, #tpu.memory_space<vmem>>, vector<256x128xbf16>
    tpu.vector_store %arg11[%c0_76, %c1024_77], %154 {strides = array<i32>} : memref<256x1152xbf16, #tpu.memory_space<vmem>>, vector<256x128xbf16>,
    %c0_78 = arith.constant 0 : index
    %c0_79 = arith.constant 0 : index
    %156 = vector.load %arg11[%c0_78, %c0_79] : memref<256x1152xbf16, #tpu.memory_space<vmem>>, vector<256x1152xbf16>
    %c0_80 = arith.constant 0 : index
    %c0_81 = arith.constant 0 : index
    %157 = vector.load %arg6[%c0_80, %c0_81] : memref<1152x128xbf16, #tpu.memory_space<vmem>>, vector<1152x128xbf16>
    %cst_82 = arith.constant dense<0.000000e+00> : vector<256x128xf32>
    %158 = tpu.matmul %156, %157, %cst_82 {dimension_numbers = #tpu.dot_dimension_numbers<[1], [0], [0], [1], [0, 0, 1, 1], [], []>} : vector<256x1152xbf16>, vector<1152x128xbf16>, vector<256x128xf32> -> vector<256x128xf32>
    %c0_83 = arith.constant 0 : index
    %c0_84 = arith.constant 0 : index
    %159 = vector.load %arg7[%c0_83, %c0_84] : memref<1x128xf32, #tpu.memory_space<vmem>>, vector<1x128xf32>
    %160 = vector.broadcast %159 : vector<1x128xf32> to vector<256x128xf32>
    %161 = arith.addf %158, %160 : vector<256x128xf32>
    %cst_85 = arith.constant 0.000000e+00 : f32
    %162 = vector.broadcast %cst_85 : f32 to vector<256x128xf32>
    %163 = arith.maximumf %161, %162 : vector<256x128xf32>
    %c0_86 = arith.constant 0 : index
    %c0_87 = arith.constant 0 : index
    %164 = vector.load %arg8[%c0_86, %c0_87] : memref<8x256xf32, #tpu.memory_space<vmem>>, vector<8x256xf32>
    %cst_88 = arith.constant dense<0.000000e+00> : vector<8x128xf32>
    %165 = tpu.matmul %164, %163, %cst_88 {dimension_numbers = #tpu.dot_dimension_numbers<[1], [0], [0], [1], [0, 0, 1, 1], [], []>} : vector<8x256xf32>, vector<256x128xf32>, vector<8x128xf32> -> vector<8x128xf32>
    %c0_89 = arith.constant 0 : index
    %c0_90 = arith.constant 0 : index
    %166 = vector.load %arg9[%c0_89, %c0_90] : memref<8x128xf32, #tpu.memory_space<vmem>>, vector<8x128xf32>
    %167 = arith.addf %165, %166 : vector<8x128xf32>
    %c0_91 = arith.constant 0 : index
    %c0_92 = arith.constant 0 : index
    %c0_93 = arith.constant 0 : index
    %168 = vector.load %arg10[%c0_91, %c0_92, %c0_93] : memref<1x8x128xf32, #tpu.memory_space<vmem>>, vector<1x8x128xf32>
    %169 = vector.shape_cast %168 : vector<1x8x128xf32> to vector<8x128xf32>
    %170 = vector.shape_cast %167 : vector<8x128xf32> to vector<1x8x128xf32>
    tpu.vector_store %arg10[%c0_91, %c0_92, %c0_93], %170 {strides = array<i32>} : memref<1x8x128xf32, #tpu.memory_space<vmem>>, vector<1x8x128xf32>,
    return
  }
  func.func @transform_0(%arg0: i32) -> (i32, i32, i32, i32) {
    %c0_i32 = arith.constant 0 : i32
    %c0_i32_0 = arith.constant 0 : i32
    %c0_i32_1 = arith.constant 0 : i32
    %c0_i32_2 = arith.constant 0 : i32
    return %arg0, %c0_i32, %c0_i32_0, %c0_i32_1 : i32, i32, i32, i32
  }
  func.func @transform_1(%arg0: i32) -> (i32, i32) {
    %c0_i32 = arith.constant 0 : i32
    %c0_i32_0 = arith.constant 0 : i32
    %c0_i32_1 = arith.constant 0 : i32
    return %c0_i32, %c0_i32_0 : i32, i32
  }
  func.func @transform_2(%arg0: i32) -> (i32, i32) {
    %c0_i32 = arith.constant 0 : i32
    %c0_i32_0 = arith.constant 0 : i32
    %c0_i32_1 = arith.constant 0 : i32
    return %c0_i32, %c0_i32_0 : i32, i32
  }
  func.func @transform_3(%arg0: i32) -> (i32, i32) {
    %c0_i32 = arith.constant 0 : i32
    %c0_i32_0 = arith.constant 0 : i32
    %c0_i32_1 = arith.constant 0 : i32
    return %c0_i32, %c0_i32_0 : i32, i32
  }
  func.func @transform_4(%arg0: i32) -> (i32, i32) {
    %c0_i32 = arith.constant 0 : i32
    %c0_i32_0 = arith.constant 0 : i32
    %c0_i32_1 = arith.constant 0 : i32
    return %c0_i32, %c0_i32_0 : i32, i32
  }
  func.func @transform_5(%arg0: i32) -> (i32, i32) {
    %c0_i32 = arith.constant 0 : i32
    %c0_i32_0 = arith.constant 0 : i32
    %c0_i32_1 = arith.constant 0 : i32
    return %c0_i32, %c0_i32_0 : i32, i32
  }
  func.func @transform_6(%arg0: i32) -> (i32, i32) {
    %c0_i32 = arith.constant 0 : i32
    %c0_i32_0 = arith.constant 0 : i32
    %c0_i32_1 = arith.constant 0 : i32
    return %c0_i32, %c0_i32_0 : i32, i32
  }
  func.func @transform_7(%arg0: i32) -> (i32, i32) {
    %c0_i32 = arith.constant 0 : i32
    %c0_i32_0 = arith.constant 0 : i32
    %c0_i32_1 = arith.constant 0 : i32
    return %c0_i32, %c0_i32_0 : i32, i32
  }
  func.func @transform_8(%arg0: i32) -> (i32, i32) {
    %c0_i32 = arith.constant 0 : i32
    %c0_i32_0 = arith.constant 0 : i32
    %c0_i32_1 = arith.constant 0 : i32
    return %c0_i32, %c0_i32_0 : i32, i32
  }
  func.func @transform_9(%arg0: i32) -> (i32, i32, i32) {
    %c0_i32 = arith.constant 0 : i32
    %c0_i32_0 = arith.constant 0 : i32
    %c0_i32_1 = arith.constant 0 : i32
    return %arg0, %c0_i32, %c0_i32_0 : i32, i32, i32
  }
}

module attributes {stable_mosaic.version = 11 : i64} {
  func.func @_encoder_fc_kernel(%arg0: i32, %arg1: i32, %arg2: memref<1x8x128xf32, #tpu.memory_space<vmem>>, %arg3: memref<1x128x384xbf16, #tpu.memory_space<vmem>>, %arg4: memref<1x1x384xf32, #tpu.memory_space<vmem>>, %arg5: memref<1x128x128xbf16, #tpu.memory_space<vmem>>, %arg6: memref<1x1x128xf32, #tpu.memory_space<vmem>>, %arg7: memref<1x1x128xf32, #tpu.memory_space<vmem>>, %arg8: memref<1x1x128xf32, #tpu.memory_space<vmem>>, %arg9: memref<1x128x2048xbf16, #tpu.memory_space<vmem>>, %arg10: memref<1x1x2048xf32, #tpu.memory_space<vmem>>, %arg11: memref<1x2048x128xbf16, #tpu.memory_space<vmem>>, %arg12: memref<1x1x128xf32, #tpu.memory_space<vmem>>, %arg13: memref<1x1x128xf32, #tpu.memory_space<vmem>>, %arg14: memref<1x1x128xf32, #tpu.memory_space<vmem>>, %arg15: memref<128x128xbf16, #tpu.memory_space<vmem>>, %arg16: memref<1x128xf32, #tpu.memory_space<vmem>>, %arg17: memref<1x8x128xf32, #tpu.memory_space<vmem>>, %arg18: memref<1x8x128xf32, #tpu.memory_space<vmem>>) attributes {dimension_semantics = [#tpu.dimension_semantics<parallel>, #tpu.dimension_semantics<arbitrary>], iteration_bounds = array<i64: 2, 4>, scalar_prefetch = 0 : i64, scratch_operands = 1 : i64, tpu.core_type = #tpu.core_type<tc>, window_params = [{transform_indices = @transform_0, window_bounds = array<i64: 1, 8, 128>}, {transform_indices = @transform_1, window_bounds = array<i64: 1, 128, 384>}, {transform_indices = @transform_2, window_bounds = array<i64: 1, 1, 384>}, {transform_indices = @transform_3, window_bounds = array<i64: 1, 128, 128>}, {transform_indices = @transform_4, window_bounds = array<i64: 1, 1, 128>}, {transform_indices = @transform_5, window_bounds = array<i64: 1, 1, 128>}, {transform_indices = @transform_6, window_bounds = array<i64: 1, 1, 128>}, {transform_indices = @transform_7, window_bounds = array<i64: 1, 128, 2048>}, {transform_indices = @transform_8, window_bounds = array<i64: 1, 1, 2048>}, {transform_indices = @transform_9, window_bounds = array<i64: 1, 2048, 128>}, {transform_indices = @transform_10, window_bounds = array<i64: 1, 1, 128>}, {transform_indices = @transform_11, window_bounds = array<i64: 1, 1, 128>}, {transform_indices = @transform_12, window_bounds = array<i64: 1, 1, 128>}, {pipeline_mode = #tpu.pipeline_mode<synchronous>, transform_indices = @transform_13, window_bounds = array<i64: 128, 128>}, {pipeline_mode = #tpu.pipeline_mode<synchronous>, transform_indices = @transform_14, window_bounds = array<i64: 1, 128>}, {transform_indices = @transform_15, window_bounds = array<i64: 1, 8, 128>}]} {
    %c0_i32 = arith.constant 0 : i32
    %0 = arith.cmpi eq, %arg1, %c0_i32 : i32
    %1 = arith.extui %0 : i1 to i32
    %c0_i32_0 = arith.constant 0 : i32
    %2 = arith.cmpi ne, %1, %c0_i32_0 : i32
    scf.if %2 {
      %c0_97 = arith.constant 0 : index
      %c0_98 = arith.constant 0 : index
      %c0_99 = arith.constant 0 : index
      %238 = vector.load %arg2[%c0_97, %c0_98, %c0_99] : memref<1x8x128xf32, #tpu.memory_space<vmem>>, vector<1x8x128xf32>
      %c0_100 = arith.constant 0 : index
      %c0_101 = arith.constant 0 : index
      %c0_102 = arith.constant 0 : index
      %239 = vector.load %arg18[%c0_100, %c0_101, %c0_102] : memref<1x8x128xf32, #tpu.memory_space<vmem>>, vector<1x8x128xf32>
      tpu.vector_store %arg18[%c0_100, %c0_101, %c0_102], %238 {strides = array<i32>} : memref<1x8x128xf32, #tpu.memory_space<vmem>>, vector<1x8x128xf32>,
    } else {
    }
    %c0 = arith.constant 0 : index
    %c0_1 = arith.constant 0 : index
    %c0_2 = arith.constant 0 : index
    %3 = vector.load %arg18[%c0, %c0_1, %c0_2] : memref<1x8x128xf32, #tpu.memory_space<vmem>>, vector<1x8x128xf32>
    %4 = vector.shape_cast %3 : vector<1x8x128xf32> to vector<8x128xf32>
    %5 = arith.truncf %4 : vector<8x128xf32> to vector<8x128xbf16>
    %c0_3 = arith.constant 0 : index
    %c0_4 = arith.constant 0 : index
    %c0_5 = arith.constant 0 : index
    %6 = vector.load %arg3[%c0_3, %c0_4, %c0_5] : memref<1x128x384xbf16, #tpu.memory_space<vmem>>, vector<1x128x384xbf16>
    %7 = vector.shape_cast %6 : vector<1x128x384xbf16> to vector<128x384xbf16>
    %cst = arith.constant dense<0.000000e+00> : vector<8x384xf32>
    %8 = tpu.matmul %5, %7, %cst {dimension_numbers = #tpu.dot_dimension_numbers<[1], [0], [0], [1], [0, 0, 1, 1], [], []>} : vector<8x128xbf16>, vector<128x384xbf16>, vector<8x384xf32> -> vector<8x384xf32>
    %c0_6 = arith.constant 0 : index
    %c0_7 = arith.constant 0 : index
    %c0_8 = arith.constant 0 : index
    %9 = vector.load %arg4[%c0_6, %c0_7, %c0_8] : memref<1x1x384xf32, #tpu.memory_space<vmem>>, vector<1x1x384xf32>
    %10 = vector.shape_cast %9 : vector<1x1x384xf32> to vector<1x384xf32>
    %11 = vector.broadcast %10 : vector<1x384xf32> to vector<8x384xf32>
    %12 = arith.addf %8, %11 : vector<8x384xf32>
    %13 = vector.extract_strided_slice %12 {offsets = [0, 0], sizes = [8, 128], strides = [1, 1]} : vector<8x384xf32> to vector<8x128xf32>
    %14 = vector.shape_cast %13 : vector<8x128xf32> to vector<1x8x128xf32>
    %15 = vector.extract_strided_slice %12 {offsets = [0, 128], sizes = [8, 128], strides = [1, 1]} : vector<8x384xf32> to vector<8x128xf32>
    %16 = vector.shape_cast %15 : vector<8x128xf32> to vector<1x8x128xf32>
    %17 = vector.extract_strided_slice %12 {offsets = [0, 256], sizes = [8, 128], strides = [1, 1]} : vector<8x384xf32> to vector<8x128xf32>
    %18 = vector.shape_cast %17 : vector<8x128xf32> to vector<1x8x128xf32>
    %19 = vector.extract_strided_slice %14 {offsets = [0, 0, 0], sizes = [1, 8, 16], strides = [1, 1, 1]} : vector<1x8x128xf32> to vector<1x8x16xf32>
    %20 = vector.extract_strided_slice %16 {offsets = [0, 0, 0], sizes = [1, 8, 16], strides = [1, 1, 1]} : vector<1x8x128xf32> to vector<1x8x16xf32>
    "tpu.trace_start"() <{level = 10 : i32, message = "bqd,bkd->bqk"}> : () -> ()
    %cst_9 = arith.constant dense<0.000000e+00> : vector<1x8x8xf32>
    %21 = tpu.matmul %19, %20, %cst_9 {dimension_numbers = #tpu.dot_dimension_numbers<[2], [2], [1], [1], [0, 0, 0, 1, 1, 1], [0], [0]>} : vector<1x8x16xf32>, vector<1x8x16xf32>, vector<1x8x8xf32> -> vector<1x8x8xf32>
    "tpu.trace_stop"() : () -> ()
    %cst_10 = arith.constant 2.500000e-01 : f32
    %22 = vector.broadcast %cst_10 : f32 to vector<1x8x8xf32>
    %23 = arith.mulf %21, %22 : vector<1x8x8xf32>
    %cst_11 = arith.constant dense<0xFF800000> : vector<1x8xf32>
    %24 = vector.multi_reduction <maximumf>, %23, %cst_11 [2] : vector<1x8x8xf32> to vector<1x8xf32>
    %25 = vector.shape_cast %24 : vector<1x8xf32> to vector<1x8x1xf32>
    %26 = vector.broadcast %25 : vector<1x8x1xf32> to vector<1x8x8xf32>
    %27 = arith.subf %23, %26 : vector<1x8x8xf32>
    %28 = math.exp %27 : vector<1x8x8xf32>
    %cst_12 = arith.constant dense<0.000000e+00> : vector<1x8xf32>
    %29 = vector.multi_reduction <add>, %28, %cst_12 [2] : vector<1x8x8xf32> to vector<1x8xf32>
    %30 = vector.shape_cast %29 : vector<1x8xf32> to vector<1x8x1xf32>
    %31 = tpu.reciprocal %30 {approx = true} : vector<1x8x1xf32> -> vector<1x8x1xf32>
    %32 = vector.broadcast %31 : vector<1x8x1xf32> to vector<1x8x8xf32>
    %33 = arith.mulf %28, %32 : vector<1x8x8xf32>
    %34 = vector.extract_strided_slice %18 {offsets = [0, 0, 0], sizes = [1, 8, 16], strides = [1, 1, 1]} : vector<1x8x128xf32> to vector<1x8x16xf32>
    "tpu.trace_start"() <{level = 10 : i32, message = "bqk,bkd->bqd"}> : () -> ()
    %cst_13 = arith.constant dense<0.000000e+00> : vector<1x8x16xf32>
    %35 = tpu.matmul %33, %34, %cst_13 {dimension_numbers = #tpu.dot_dimension_numbers<[2], [1], [1], [2], [0, 0, 0, 1, 1, 2], [0], [0]>} : vector<1x8x8xf32>, vector<1x8x16xf32>, vector<1x8x16xf32> -> vector<1x8x16xf32>
    "tpu.trace_stop"() : () -> ()
    %36 = vector.extract_strided_slice %14 {offsets = [0, 0, 16], sizes = [1, 8, 16], strides = [1, 1, 1]} : vector<1x8x128xf32> to vector<1x8x16xf32>
    %37 = vector.extract_strided_slice %16 {offsets = [0, 0, 16], sizes = [1, 8, 16], strides = [1, 1, 1]} : vector<1x8x128xf32> to vector<1x8x16xf32>
    "tpu.trace_start"() <{level = 10 : i32, message = "bqd,bkd->bqk"}> : () -> ()
    %cst_14 = arith.constant dense<0.000000e+00> : vector<1x8x8xf32>
    %38 = tpu.matmul %36, %37, %cst_14 {dimension_numbers = #tpu.dot_dimension_numbers<[2], [2], [1], [1], [0, 0, 0, 1, 1, 1], [0], [0]>} : vector<1x8x16xf32>, vector<1x8x16xf32>, vector<1x8x8xf32> -> vector<1x8x8xf32>
    "tpu.trace_stop"() : () -> ()
    %cst_15 = arith.constant 2.500000e-01 : f32
    %39 = vector.broadcast %cst_15 : f32 to vector<1x8x8xf32>
    %40 = arith.mulf %38, %39 : vector<1x8x8xf32>
    %cst_16 = arith.constant dense<0xFF800000> : vector<1x8xf32>
    %41 = vector.multi_reduction <maximumf>, %40, %cst_16 [2] : vector<1x8x8xf32> to vector<1x8xf32>
    %42 = vector.shape_cast %41 : vector<1x8xf32> to vector<1x8x1xf32>
    %43 = vector.broadcast %42 : vector<1x8x1xf32> to vector<1x8x8xf32>
    %44 = arith.subf %40, %43 : vector<1x8x8xf32>
    %45 = math.exp %44 : vector<1x8x8xf32>
    %cst_17 = arith.constant dense<0.000000e+00> : vector<1x8xf32>
    %46 = vector.multi_reduction <add>, %45, %cst_17 [2] : vector<1x8x8xf32> to vector<1x8xf32>
    %47 = vector.shape_cast %46 : vector<1x8xf32> to vector<1x8x1xf32>
    %48 = tpu.reciprocal %47 {approx = true} : vector<1x8x1xf32> -> vector<1x8x1xf32>
    %49 = vector.broadcast %48 : vector<1x8x1xf32> to vector<1x8x8xf32>
    %50 = arith.mulf %45, %49 : vector<1x8x8xf32>
    %51 = vector.extract_strided_slice %18 {offsets = [0, 0, 16], sizes = [1, 8, 16], strides = [1, 1, 1]} : vector<1x8x128xf32> to vector<1x8x16xf32>
    "tpu.trace_start"() <{level = 10 : i32, message = "bqk,bkd->bqd"}> : () -> ()
    %cst_18 = arith.constant dense<0.000000e+00> : vector<1x8x16xf32>
    %52 = tpu.matmul %50, %51, %cst_18 {dimension_numbers = #tpu.dot_dimension_numbers<[2], [1], [1], [2], [0, 0, 0, 1, 1, 2], [0], [0]>} : vector<1x8x8xf32>, vector<1x8x16xf32>, vector<1x8x16xf32> -> vector<1x8x16xf32>
    "tpu.trace_stop"() : () -> ()
    %53 = vector.extract_strided_slice %14 {offsets = [0, 0, 32], sizes = [1, 8, 16], strides = [1, 1, 1]} : vector<1x8x128xf32> to vector<1x8x16xf32>
    %54 = vector.extract_strided_slice %16 {offsets = [0, 0, 32], sizes = [1, 8, 16], strides = [1, 1, 1]} : vector<1x8x128xf32> to vector<1x8x16xf32>
    "tpu.trace_start"() <{level = 10 : i32, message = "bqd,bkd->bqk"}> : () -> ()
    %cst_19 = arith.constant dense<0.000000e+00> : vector<1x8x8xf32>
    %55 = tpu.matmul %53, %54, %cst_19 {dimension_numbers = #tpu.dot_dimension_numbers<[2], [2], [1], [1], [0, 0, 0, 1, 1, 1], [0], [0]>} : vector<1x8x16xf32>, vector<1x8x16xf32>, vector<1x8x8xf32> -> vector<1x8x8xf32>
    "tpu.trace_stop"() : () -> ()
    %cst_20 = arith.constant 2.500000e-01 : f32
    %56 = vector.broadcast %cst_20 : f32 to vector<1x8x8xf32>
    %57 = arith.mulf %55, %56 : vector<1x8x8xf32>
    %cst_21 = arith.constant dense<0xFF800000> : vector<1x8xf32>
    %58 = vector.multi_reduction <maximumf>, %57, %cst_21 [2] : vector<1x8x8xf32> to vector<1x8xf32>
    %59 = vector.shape_cast %58 : vector<1x8xf32> to vector<1x8x1xf32>
    %60 = vector.broadcast %59 : vector<1x8x1xf32> to vector<1x8x8xf32>
    %61 = arith.subf %57, %60 : vector<1x8x8xf32>
    %62 = math.exp %61 : vector<1x8x8xf32>
    %cst_22 = arith.constant dense<0.000000e+00> : vector<1x8xf32>
    %63 = vector.multi_reduction <add>, %62, %cst_22 [2] : vector<1x8x8xf32> to vector<1x8xf32>
    %64 = vector.shape_cast %63 : vector<1x8xf32> to vector<1x8x1xf32>
    %65 = tpu.reciprocal %64 {approx = true} : vector<1x8x1xf32> -> vector<1x8x1xf32>
    %66 = vector.broadcast %65 : vector<1x8x1xf32> to vector<1x8x8xf32>
    %67 = arith.mulf %62, %66 : vector<1x8x8xf32>
    %68 = vector.extract_strided_slice %18 {offsets = [0, 0, 32], sizes = [1, 8, 16], strides = [1, 1, 1]} : vector<1x8x128xf32> to vector<1x8x16xf32>
    "tpu.trace_start"() <{level = 10 : i32, message = "bqk,bkd->bqd"}> : () -> ()
    %cst_23 = arith.constant dense<0.000000e+00> : vector<1x8x16xf32>
    %69 = tpu.matmul %67, %68, %cst_23 {dimension_numbers = #tpu.dot_dimension_numbers<[2], [1], [1], [2], [0, 0, 0, 1, 1, 2], [0], [0]>} : vector<1x8x8xf32>, vector<1x8x16xf32>, vector<1x8x16xf32> -> vector<1x8x16xf32>
    "tpu.trace_stop"() : () -> ()
    %70 = vector.extract_strided_slice %14 {offsets = [0, 0, 48], sizes = [1, 8, 16], strides = [1, 1, 1]} : vector<1x8x128xf32> to vector<1x8x16xf32>
    %71 = vector.extract_strided_slice %16 {offsets = [0, 0, 48], sizes = [1, 8, 16], strides = [1, 1, 1]} : vector<1x8x128xf32> to vector<1x8x16xf32>
    "tpu.trace_start"() <{level = 10 : i32, message = "bqd,bkd->bqk"}> : () -> ()
    %cst_24 = arith.constant dense<0.000000e+00> : vector<1x8x8xf32>
    %72 = tpu.matmul %70, %71, %cst_24 {dimension_numbers = #tpu.dot_dimension_numbers<[2], [2], [1], [1], [0, 0, 0, 1, 1, 1], [0], [0]>} : vector<1x8x16xf32>, vector<1x8x16xf32>, vector<1x8x8xf32> -> vector<1x8x8xf32>
    "tpu.trace_stop"() : () -> ()
    %cst_25 = arith.constant 2.500000e-01 : f32
    %73 = vector.broadcast %cst_25 : f32 to vector<1x8x8xf32>
    %74 = arith.mulf %72, %73 : vector<1x8x8xf32>
    %cst_26 = arith.constant dense<0xFF800000> : vector<1x8xf32>
    %75 = vector.multi_reduction <maximumf>, %74, %cst_26 [2] : vector<1x8x8xf32> to vector<1x8xf32>
    %76 = vector.shape_cast %75 : vector<1x8xf32> to vector<1x8x1xf32>
    %77 = vector.broadcast %76 : vector<1x8x1xf32> to vector<1x8x8xf32>
    %78 = arith.subf %74, %77 : vector<1x8x8xf32>
    %79 = math.exp %78 : vector<1x8x8xf32>
    %cst_27 = arith.constant dense<0.000000e+00> : vector<1x8xf32>
    %80 = vector.multi_reduction <add>, %79, %cst_27 [2] : vector<1x8x8xf32> to vector<1x8xf32>
    %81 = vector.shape_cast %80 : vector<1x8xf32> to vector<1x8x1xf32>
    %82 = tpu.reciprocal %81 {approx = true} : vector<1x8x1xf32> -> vector<1x8x1xf32>
    %83 = vector.broadcast %82 : vector<1x8x1xf32> to vector<1x8x8xf32>
    %84 = arith.mulf %79, %83 : vector<1x8x8xf32>
    %85 = vector.extract_strided_slice %18 {offsets = [0, 0, 48], sizes = [1, 8, 16], strides = [1, 1, 1]} : vector<1x8x128xf32> to vector<1x8x16xf32>
    "tpu.trace_start"() <{level = 10 : i32, message = "bqk,bkd->bqd"}> : () -> ()
    %cst_28 = arith.constant dense<0.000000e+00> : vector<1x8x16xf32>
    %86 = tpu.matmul %84, %85, %cst_28 {dimension_numbers = #tpu.dot_dimension_numbers<[2], [1], [1], [2], [0, 0, 0, 1, 1, 2], [0], [0]>} : vector<1x8x8xf32>, vector<1x8x16xf32>, vector<1x8x16xf32> -> vector<1x8x16xf32>
    "tpu.trace_stop"() : () -> ()
    %87 = vector.extract_strided_slice %14 {offsets = [0, 0, 64], sizes = [1, 8, 16], strides = [1, 1, 1]} : vector<1x8x128xf32> to vector<1x8x16xf32>
    %88 = vector.extract_strided_slice %16 {offsets = [0, 0, 64], sizes = [1, 8, 16], strides = [1, 1, 1]} : vector<1x8x128xf32> to vector<1x8x16xf32>
    "tpu.trace_start"() <{level = 10 : i32, message = "bqd,bkd->bqk"}> : () -> ()
    %cst_29 = arith.constant dense<0.000000e+00> : vector<1x8x8xf32>
    %89 = tpu.matmul %87, %88, %cst_29 {dimension_numbers = #tpu.dot_dimension_numbers<[2], [2], [1], [1], [0, 0, 0, 1, 1, 1], [0], [0]>} : vector<1x8x16xf32>, vector<1x8x16xf32>, vector<1x8x8xf32> -> vector<1x8x8xf32>
    "tpu.trace_stop"() : () -> ()
    %cst_30 = arith.constant 2.500000e-01 : f32
    %90 = vector.broadcast %cst_30 : f32 to vector<1x8x8xf32>
    %91 = arith.mulf %89, %90 : vector<1x8x8xf32>
    %cst_31 = arith.constant dense<0xFF800000> : vector<1x8xf32>
    %92 = vector.multi_reduction <maximumf>, %91, %cst_31 [2] : vector<1x8x8xf32> to vector<1x8xf32>
    %93 = vector.shape_cast %92 : vector<1x8xf32> to vector<1x8x1xf32>
    %94 = vector.broadcast %93 : vector<1x8x1xf32> to vector<1x8x8xf32>
    %95 = arith.subf %91, %94 : vector<1x8x8xf32>
    %96 = math.exp %95 : vector<1x8x8xf32>
    %cst_32 = arith.constant dense<0.000000e+00> : vector<1x8xf32>
    %97 = vector.multi_reduction <add>, %96, %cst_32 [2] : vector<1x8x8xf32> to vector<1x8xf32>
    %98 = vector.shape_cast %97 : vector<1x8xf32> to vector<1x8x1xf32>
    %99 = tpu.reciprocal %98 {approx = true} : vector<1x8x1xf32> -> vector<1x8x1xf32>
    %100 = vector.broadcast %99 : vector<1x8x1xf32> to vector<1x8x8xf32>
    %101 = arith.mulf %96, %100 : vector<1x8x8xf32>
    %102 = vector.extract_strided_slice %18 {offsets = [0, 0, 64], sizes = [1, 8, 16], strides = [1, 1, 1]} : vector<1x8x128xf32> to vector<1x8x16xf32>
    "tpu.trace_start"() <{level = 10 : i32, message = "bqk,bkd->bqd"}> : () -> ()
    %cst_33 = arith.constant dense<0.000000e+00> : vector<1x8x16xf32>
    %103 = tpu.matmul %101, %102, %cst_33 {dimension_numbers = #tpu.dot_dimension_numbers<[2], [1], [1], [2], [0, 0, 0, 1, 1, 2], [0], [0]>} : vector<1x8x8xf32>, vector<1x8x16xf32>, vector<1x8x16xf32> -> vector<1x8x16xf32>
    "tpu.trace_stop"() : () -> ()
    %104 = vector.extract_strided_slice %14 {offsets = [0, 0, 80], sizes = [1, 8, 16], strides = [1, 1, 1]} : vector<1x8x128xf32> to vector<1x8x16xf32>
    %105 = vector.extract_strided_slice %16 {offsets = [0, 0, 80], sizes = [1, 8, 16], strides = [1, 1, 1]} : vector<1x8x128xf32> to vector<1x8x16xf32>
    "tpu.trace_start"() <{level = 10 : i32, message = "bqd,bkd->bqk"}> : () -> ()
    %cst_34 = arith.constant dense<0.000000e+00> : vector<1x8x8xf32>
    %106 = tpu.matmul %104, %105, %cst_34 {dimension_numbers = #tpu.dot_dimension_numbers<[2], [2], [1], [1], [0, 0, 0, 1, 1, 1], [0], [0]>} : vector<1x8x16xf32>, vector<1x8x16xf32>, vector<1x8x8xf32> -> vector<1x8x8xf32>
    "tpu.trace_stop"() : () -> ()
    %cst_35 = arith.constant 2.500000e-01 : f32
    %107 = vector.broadcast %cst_35 : f32 to vector<1x8x8xf32>
    %108 = arith.mulf %106, %107 : vector<1x8x8xf32>
    %cst_36 = arith.constant dense<0xFF800000> : vector<1x8xf32>
    %109 = vector.multi_reduction <maximumf>, %108, %cst_36 [2] : vector<1x8x8xf32> to vector<1x8xf32>
    %110 = vector.shape_cast %109 : vector<1x8xf32> to vector<1x8x1xf32>
    %111 = vector.broadcast %110 : vector<1x8x1xf32> to vector<1x8x8xf32>
    %112 = arith.subf %108, %111 : vector<1x8x8xf32>
    %113 = math.exp %112 : vector<1x8x8xf32>
    %cst_37 = arith.constant dense<0.000000e+00> : vector<1x8xf32>
    %114 = vector.multi_reduction <add>, %113, %cst_37 [2] : vector<1x8x8xf32> to vector<1x8xf32>
    %115 = vector.shape_cast %114 : vector<1x8xf32> to vector<1x8x1xf32>
    %116 = tpu.reciprocal %115 {approx = true} : vector<1x8x1xf32> -> vector<1x8x1xf32>
    %117 = vector.broadcast %116 : vector<1x8x1xf32> to vector<1x8x8xf32>
    %118 = arith.mulf %113, %117 : vector<1x8x8xf32>
    %119 = vector.extract_strided_slice %18 {offsets = [0, 0, 80], sizes = [1, 8, 16], strides = [1, 1, 1]} : vector<1x8x128xf32> to vector<1x8x16xf32>
    "tpu.trace_start"() <{level = 10 : i32, message = "bqk,bkd->bqd"}> : () -> ()
    %cst_38 = arith.constant dense<0.000000e+00> : vector<1x8x16xf32>
    %120 = tpu.matmul %118, %119, %cst_38 {dimension_numbers = #tpu.dot_dimension_numbers<[2], [1], [1], [2], [0, 0, 0, 1, 1, 2], [0], [0]>} : vector<1x8x8xf32>, vector<1x8x16xf32>, vector<1x8x16xf32> -> vector<1x8x16xf32>
    "tpu.trace_stop"() : () -> ()
    %121 = vector.extract_strided_slice %14 {offsets = [0, 0, 96], sizes = [1, 8, 16], strides = [1, 1, 1]} : vector<1x8x128xf32> to vector<1x8x16xf32>
    %122 = vector.extract_strided_slice %16 {offsets = [0, 0, 96], sizes = [1, 8, 16], strides = [1, 1, 1]} : vector<1x8x128xf32> to vector<1x8x16xf32>
    "tpu.trace_start"() <{level = 10 : i32, message = "bqd,bkd->bqk"}> : () -> ()
    %cst_39 = arith.constant dense<0.000000e+00> : vector<1x8x8xf32>
    %123 = tpu.matmul %121, %122, %cst_39 {dimension_numbers = #tpu.dot_dimension_numbers<[2], [2], [1], [1], [0, 0, 0, 1, 1, 1], [0], [0]>} : vector<1x8x16xf32>, vector<1x8x16xf32>, vector<1x8x8xf32> -> vector<1x8x8xf32>
    "tpu.trace_stop"() : () -> ()
    %cst_40 = arith.constant 2.500000e-01 : f32
    %124 = vector.broadcast %cst_40 : f32 to vector<1x8x8xf32>
    %125 = arith.mulf %123, %124 : vector<1x8x8xf32>
    %cst_41 = arith.constant dense<0xFF800000> : vector<1x8xf32>
    %126 = vector.multi_reduction <maximumf>, %125, %cst_41 [2] : vector<1x8x8xf32> to vector<1x8xf32>
    %127 = vector.shape_cast %126 : vector<1x8xf32> to vector<1x8x1xf32>
    %128 = vector.broadcast %127 : vector<1x8x1xf32> to vector<1x8x8xf32>
    %129 = arith.subf %125, %128 : vector<1x8x8xf32>
    %130 = math.exp %129 : vector<1x8x8xf32>
    %cst_42 = arith.constant dense<0.000000e+00> : vector<1x8xf32>
    %131 = vector.multi_reduction <add>, %130, %cst_42 [2] : vector<1x8x8xf32> to vector<1x8xf32>
    %132 = vector.shape_cast %131 : vector<1x8xf32> to vector<1x8x1xf32>
    %133 = tpu.reciprocal %132 {approx = true} : vector<1x8x1xf32> -> vector<1x8x1xf32>
    %134 = vector.broadcast %133 : vector<1x8x1xf32> to vector<1x8x8xf32>
    %135 = arith.mulf %130, %134 : vector<1x8x8xf32>
    %136 = vector.extract_strided_slice %18 {offsets = [0, 0, 96], sizes = [1, 8, 16], strides = [1, 1, 1]} : vector<1x8x128xf32> to vector<1x8x16xf32>
    "tpu.trace_start"() <{level = 10 : i32, message = "bqk,bkd->bqd"}> : () -> ()
    %cst_43 = arith.constant dense<0.000000e+00> : vector<1x8x16xf32>
    %137 = tpu.matmul %135, %136, %cst_43 {dimension_numbers = #tpu.dot_dimension_numbers<[2], [1], [1], [2], [0, 0, 0, 1, 1, 2], [0], [0]>} : vector<1x8x8xf32>, vector<1x8x16xf32>, vector<1x8x16xf32> -> vector<1x8x16xf32>
    "tpu.trace_stop"() : () -> ()
    %138 = vector.extract_strided_slice %14 {offsets = [0, 0, 112], sizes = [1, 8, 16], strides = [1, 1, 1]} : vector<1x8x128xf32> to vector<1x8x16xf32>
    %139 = vector.extract_strided_slice %16 {offsets = [0, 0, 112], sizes = [1, 8, 16], strides = [1, 1, 1]} : vector<1x8x128xf32> to vector<1x8x16xf32>
    "tpu.trace_start"() <{level = 10 : i32, message = "bqd,bkd->bqk"}> : () -> ()
    %cst_44 = arith.constant dense<0.000000e+00> : vector<1x8x8xf32>
    %140 = tpu.matmul %138, %139, %cst_44 {dimension_numbers = #tpu.dot_dimension_numbers<[2], [2], [1], [1], [0, 0, 0, 1, 1, 1], [0], [0]>} : vector<1x8x16xf32>, vector<1x8x16xf32>, vector<1x8x8xf32> -> vector<1x8x8xf32>
    "tpu.trace_stop"() : () -> ()
    %cst_45 = arith.constant 2.500000e-01 : f32
    %141 = vector.broadcast %cst_45 : f32 to vector<1x8x8xf32>
    %142 = arith.mulf %140, %141 : vector<1x8x8xf32>
    %cst_46 = arith.constant dense<0xFF800000> : vector<1x8xf32>
    %143 = vector.multi_reduction <maximumf>, %142, %cst_46 [2] : vector<1x8x8xf32> to vector<1x8xf32>
    %144 = vector.shape_cast %143 : vector<1x8xf32> to vector<1x8x1xf32>
    %145 = vector.broadcast %144 : vector<1x8x1xf32> to vector<1x8x8xf32>
    %146 = arith.subf %142, %145 : vector<1x8x8xf32>
    %147 = math.exp %146 : vector<1x8x8xf32>
    %cst_47 = arith.constant dense<0.000000e+00> : vector<1x8xf32>
    %148 = vector.multi_reduction <add>, %147, %cst_47 [2] : vector<1x8x8xf32> to vector<1x8xf32>
    %149 = vector.shape_cast %148 : vector<1x8xf32> to vector<1x8x1xf32>
    %150 = tpu.reciprocal %149 {approx = true} : vector<1x8x1xf32> -> vector<1x8x1xf32>
    %151 = vector.broadcast %150 : vector<1x8x1xf32> to vector<1x8x8xf32>
    %152 = arith.mulf %147, %151 : vector<1x8x8xf32>
    %153 = vector.extract_strided_slice %18 {offsets = [0, 0, 112], sizes = [1, 8, 16], strides = [1, 1, 1]} : vector<1x8x128xf32> to vector<1x8x16xf32>
    "tpu.trace_start"() <{level = 10 : i32, message = "bqk,bkd->bqd"}> : () -> ()
    %cst_48 = arith.constant dense<0.000000e+00> : vector<1x8x16xf32>
    %154 = tpu.matmul %152, %153, %cst_48 {dimension_numbers = #tpu.dot_dimension_numbers<[2], [1], [1], [2], [0, 0, 0, 1, 1, 2], [0], [0]>} : vector<1x8x8xf32>, vector<1x8x16xf32>, vector<1x8x16xf32> -> vector<1x8x16xf32>
    "tpu.trace_stop"() : () -> ()
    %155 = tpu.concatenate %35, %52, %69, %86, %103, %120, %137, %154 in 2 : vector<1x8x16xf32>, vector<1x8x16xf32>, vector<1x8x16xf32>, vector<1x8x16xf32>, vector<1x8x16xf32>, vector<1x8x16xf32>, vector<1x8x16xf32>, vector<1x8x16xf32> -> vector<1x8x128xf32>
    %156 = vector.shape_cast %155 : vector<1x8x128xf32> to vector<8x128xf32>
    %157 = arith.truncf %156 : vector<8x128xf32> to vector<8x128xbf16>
    %c0_49 = arith.constant 0 : index
    %c0_50 = arith.constant 0 : index
    %c0_51 = arith.constant 0 : index
    %158 = vector.load %arg5[%c0_49, %c0_50, %c0_51] : memref<1x128x128xbf16, #tpu.memory_space<vmem>>, vector<1x128x128xbf16>
    %159 = vector.shape_cast %158 : vector<1x128x128xbf16> to vector<128x128xbf16>
    %cst_52 = arith.constant dense<0.000000e+00> : vector<8x128xf32>
    %160 = tpu.matmul %157, %159, %cst_52 {dimension_numbers = #tpu.dot_dimension_numbers<[1], [0], [0], [1], [0, 0, 1, 1], [], []>} : vector<8x128xbf16>, vector<128x128xbf16>, vector<8x128xf32> -> vector<8x128xf32>
    %c0_53 = arith.constant 0 : index
    %c0_54 = arith.constant 0 : index
    %c0_55 = arith.constant 0 : index
    %161 = vector.load %arg6[%c0_53, %c0_54, %c0_55] : memref<1x1x128xf32, #tpu.memory_space<vmem>>, vector<1x1x128xf32>
    %162 = vector.shape_cast %161 : vector<1x1x128xf32> to vector<1x128xf32>
    %163 = vector.broadcast %162 : vector<1x128xf32> to vector<8x128xf32>
    %164 = arith.addf %160, %163 : vector<8x128xf32>
    %165 = arith.addf %4, %164 : vector<8x128xf32>
    %c0_56 = arith.constant 0 : index
    %c0_57 = arith.constant 0 : index
    %c0_58 = arith.constant 0 : index
    %166 = vector.load %arg7[%c0_56, %c0_57, %c0_58] : memref<1x1x128xf32, #tpu.memory_space<vmem>>, vector<1x1x128xf32>
    %167 = vector.shape_cast %166 : vector<1x1x128xf32> to vector<1x128xf32>
    %c0_59 = arith.constant 0 : index
    %c0_60 = arith.constant 0 : index
    %c0_61 = arith.constant 0 : index
    %168 = vector.load %arg8[%c0_59, %c0_60, %c0_61] : memref<1x1x128xf32, #tpu.memory_space<vmem>>, vector<1x1x128xf32>
    %169 = vector.shape_cast %168 : vector<1x1x128xf32> to vector<1x128xf32>
    %cst_62 = arith.constant dense<0.000000e+00> : vector<8xf32>
    %170 = vector.multi_reduction <add>, %165, %cst_62 [1] : vector<8x128xf32> to vector<8xf32>
    %171 = vector.shape_cast %170 : vector<8xf32> to vector<8x1xf32>
    %cst_63 = arith.constant 1.280000e+02 : f32
    %172 = vector.broadcast %cst_63 : f32 to vector<8x1xf32>
    %173 = arith.divf %171, %172 : vector<8x1xf32>
    %174 = vector.broadcast %173 : vector<8x1xf32> to vector<8x128xf32>
    %175 = arith.subf %165, %174 : vector<8x128xf32>
    %176 = arith.mulf %175, %175 : vector<8x128xf32>
    %cst_64 = arith.constant dense<0.000000e+00> : vector<8xf32>
    %177 = vector.multi_reduction <add>, %176, %cst_64 [1] : vector<8x128xf32> to vector<8xf32>
    %178 = vector.shape_cast %177 : vector<8xf32> to vector<8x1xf32>
    %cst_65 = arith.constant 1.280000e+02 : f32
    %179 = vector.broadcast %cst_65 : f32 to vector<8x1xf32>
    %180 = arith.divf %178, %179 : vector<8x1xf32>
    %cst_66 = arith.constant 9.99999974E-6 : f32
    %181 = vector.broadcast %cst_66 : f32 to vector<8x1xf32>
    %182 = arith.addf %180, %181 : vector<8x1xf32>
    %183 = math.rsqrt %182 : vector<8x1xf32>
    %184 = vector.broadcast %183 : vector<8x1xf32> to vector<8x128xf32>
    %185 = arith.mulf %175, %184 : vector<8x128xf32>
    %186 = vector.broadcast %167 : vector<1x128xf32> to vector<8x128xf32>
    %187 = arith.mulf %185, %186 : vector<8x128xf32>
    %188 = vector.broadcast %169 : vector<1x128xf32> to vector<8x128xf32>
    %189 = arith.addf %187, %188 : vector<8x128xf32>
    %190 = arith.truncf %189 : vector<8x128xf32> to vector<8x128xbf16>
    %c0_67 = arith.constant 0 : index
    %c0_68 = arith.constant 0 : index
    %c0_69 = arith.constant 0 : index
    %191 = vector.load %arg9[%c0_67, %c0_68, %c0_69] : memref<1x128x2048xbf16, #tpu.memory_space<vmem>>, vector<1x128x2048xbf16>
    %192 = vector.shape_cast %191 : vector<1x128x2048xbf16> to vector<128x2048xbf16>
    %cst_70 = arith.constant dense<0.000000e+00> : vector<8x2048xf32>
    %193 = tpu.matmul %190, %192, %cst_70 {dimension_numbers = #tpu.dot_dimension_numbers<[1], [0], [0], [1], [0, 0, 1, 1], [], []>} : vector<8x128xbf16>, vector<128x2048xbf16>, vector<8x2048xf32> -> vector<8x2048xf32>
    %c0_71 = arith.constant 0 : index
    %c0_72 = arith.constant 0 : index
    %c0_73 = arith.constant 0 : index
    %194 = vector.load %arg10[%c0_71, %c0_72, %c0_73] : memref<1x1x2048xf32, #tpu.memory_space<vmem>>, vector<1x1x2048xf32>
    %195 = vector.shape_cast %194 : vector<1x1x2048xf32> to vector<1x2048xf32>
    %196 = vector.broadcast %195 : vector<1x2048xf32> to vector<8x2048xf32>
    %197 = arith.addf %193, %196 : vector<8x2048xf32>
    %cst_74 = arith.constant 0.000000e+00 : f32
    %198 = vector.broadcast %cst_74 : f32 to vector<8x2048xf32>
    %199 = arith.maximumf %197, %198 : vector<8x2048xf32>
    %200 = arith.truncf %199 : vector<8x2048xf32> to vector<8x2048xbf16>
    %c0_75 = arith.constant 0 : index
    %c0_76 = arith.constant 0 : index
    %c0_77 = arith.constant 0 : index
    %201 = vector.load %arg11[%c0_75, %c0_76, %c0_77] : memref<1x2048x128xbf16, #tpu.memory_space<vmem>>, vector<1x2048x128xbf16>
    %202 = vector.shape_cast %201 : vector<1x2048x128xbf16> to vector<2048x128xbf16>
    %cst_78 = arith.constant dense<0.000000e+00> : vector<8x128xf32>
    %203 = tpu.matmul %200, %202, %cst_78 {dimension_numbers = #tpu.dot_dimension_numbers<[1], [0], [0], [1], [0, 0, 1, 1], [], []>} : vector<8x2048xbf16>, vector<2048x128xbf16>, vector<8x128xf32> -> vector<8x128xf32>
    %c0_79 = arith.constant 0 : index
    %c0_80 = arith.constant 0 : index
    %c0_81 = arith.constant 0 : index
    %204 = vector.load %arg12[%c0_79, %c0_80, %c0_81] : memref<1x1x128xf32, #tpu.memory_space<vmem>>, vector<1x1x128xf32>
    %205 = vector.shape_cast %204 : vector<1x1x128xf32> to vector<1x128xf32>
    %206 = vector.broadcast %205 : vector<1x128xf32> to vector<8x128xf32>
    %207 = arith.addf %203, %206 : vector<8x128xf32>
    %208 = arith.addf %189, %207 : vector<8x128xf32>
    %c0_82 = arith.constant 0 : index
    %c0_83 = arith.constant 0 : index
    %c0_84 = arith.constant 0 : index
    %209 = vector.load %arg13[%c0_82, %c0_83, %c0_84] : memref<1x1x128xf32, #tpu.memory_space<vmem>>, vector<1x1x128xf32>
    %210 = vector.shape_cast %209 : vector<1x1x128xf32> to vector<1x128xf32>
    %c0_85 = arith.constant 0 : index
    %c0_86 = arith.constant 0 : index
    %c0_87 = arith.constant 0 : index
    %211 = vector.load %arg14[%c0_85, %c0_86, %c0_87] : memref<1x1x128xf32, #tpu.memory_space<vmem>>, vector<1x1x128xf32>
    %212 = vector.shape_cast %211 : vector<1x1x128xf32> to vector<1x128xf32>
    %cst_88 = arith.constant dense<0.000000e+00> : vector<8xf32>
    %213 = vector.multi_reduction <add>, %208, %cst_88 [1] : vector<8x128xf32> to vector<8xf32>
    %214 = vector.shape_cast %213 : vector<8xf32> to vector<8x1xf32>
    %cst_89 = arith.constant 1.280000e+02 : f32
    %215 = vector.broadcast %cst_89 : f32 to vector<8x1xf32>
    %216 = arith.divf %214, %215 : vector<8x1xf32>
    %217 = vector.broadcast %216 : vector<8x1xf32> to vector<8x128xf32>
    %218 = arith.subf %208, %217 : vector<8x128xf32>
    %219 = arith.mulf %218, %218 : vector<8x128xf32>
    %cst_90 = arith.constant dense<0.000000e+00> : vector<8xf32>
    %220 = vector.multi_reduction <add>, %219, %cst_90 [1] : vector<8x128xf32> to vector<8xf32>
    %221 = vector.shape_cast %220 : vector<8xf32> to vector<8x1xf32>
    %cst_91 = arith.constant 1.280000e+02 : f32
    %222 = vector.broadcast %cst_91 : f32 to vector<8x1xf32>
    %223 = arith.divf %221, %222 : vector<8x1xf32>
    %cst_92 = arith.constant 9.99999974E-6 : f32
    %224 = vector.broadcast %cst_92 : f32 to vector<8x1xf32>
    %225 = arith.addf %223, %224 : vector<8x1xf32>
    %226 = math.rsqrt %225 : vector<8x1xf32>
    %227 = vector.broadcast %226 : vector<8x1xf32> to vector<8x128xf32>
    %228 = arith.mulf %218, %227 : vector<8x128xf32>
    %229 = vector.broadcast %210 : vector<1x128xf32> to vector<8x128xf32>
    %230 = arith.mulf %228, %229 : vector<8x128xf32>
    %231 = vector.broadcast %212 : vector<1x128xf32> to vector<8x128xf32>
    %232 = arith.addf %230, %231 : vector<8x128xf32>
    %233 = vector.shape_cast %232 : vector<8x128xf32> to vector<1x8x128xf32>
    %c0_93 = arith.constant 0 : index
    %c0_94 = arith.constant 0 : index
    %c0_95 = arith.constant 0 : index
    %234 = vector.load %arg18[%c0_93, %c0_94, %c0_95] : memref<1x8x128xf32, #tpu.memory_space<vmem>>, vector<1x8x128xf32>
    tpu.vector_store %arg18[%c0_93, %c0_94, %c0_95], %233 {strides = array<i32>} : memref<1x8x128xf32, #tpu.memory_space<vmem>>, vector<1x8x128xf32>,
    %c3_i32 = arith.constant 3 : i32
    %235 = arith.cmpi eq, %arg1, %c3_i32 : i32
    %236 = arith.extui %235 : i1 to i32
    %c0_i32_96 = arith.constant 0 : i32
    %237 = arith.cmpi ne, %236, %c0_i32_96 : i32
    scf.if %237 {
      %238 = arith.truncf %232 : vector<8x128xf32> to vector<8x128xbf16>
      %c0_97 = arith.constant 0 : index
      %c0_98 = arith.constant 0 : index
      %239 = vector.load %arg15[%c0_97, %c0_98] : memref<128x128xbf16, #tpu.memory_space<vmem>>, vector<128x128xbf16>
      %cst_99 = arith.constant dense<0.000000e+00> : vector<8x128xf32>
      %240 = tpu.matmul %238, %239, %cst_99 {dimension_numbers = #tpu.dot_dimension_numbers<[1], [0], [0], [1], [0, 0, 1, 1], [], []>} : vector<8x128xbf16>, vector<128x128xbf16>, vector<8x128xf32> -> vector<8x128xf32>
      %c0_100 = arith.constant 0 : index
      %c0_101 = arith.constant 0 : index
      %241 = vector.load %arg16[%c0_100, %c0_101] : memref<1x128xf32, #tpu.memory_space<vmem>>, vector<1x128xf32>
      %242 = vector.broadcast %241 : vector<1x128xf32> to vector<8x128xf32>
      %243 = arith.addf %240, %242 : vector<8x128xf32>
      %244 = vector.shape_cast %243 : vector<8x128xf32> to vector<1x8x128xf32>
      %c0_102 = arith.constant 0 : index
      %c0_103 = arith.constant 0 : index
      %c0_104 = arith.constant 0 : index
      %245 = vector.load %arg17[%c0_102, %c0_103, %c0_104] : memref<1x8x128xf32, #tpu.memory_space<vmem>>, vector<1x8x128xf32>
      tpu.vector_store %arg17[%c0_102, %c0_103, %c0_104], %244 {strides = array<i32>} : memref<1x8x128xf32, #tpu.memory_space<vmem>>, vector<1x8x128xf32>,
    } else {
    }
    return
  }
  func.func @transform_0(%arg0: i32, %arg1: i32) -> (i32, i32, i32) {
    %c0_i32 = arith.constant 0 : i32
    %c0_i32_0 = arith.constant 0 : i32
    %c0_i32_1 = arith.constant 0 : i32
    return %arg0, %c0_i32, %c0_i32_0 : i32, i32, i32
  }
  func.func @transform_1(%arg0: i32, %arg1: i32) -> (i32, i32, i32) {
    %c0_i32 = arith.constant 0 : i32
    %c0_i32_0 = arith.constant 0 : i32
    %c0_i32_1 = arith.constant 0 : i32
    return %arg1, %c0_i32, %c0_i32_0 : i32, i32, i32
  }
  func.func @transform_2(%arg0: i32, %arg1: i32) -> (i32, i32, i32) {
    %c0_i32 = arith.constant 0 : i32
    %c0_i32_0 = arith.constant 0 : i32
    %c0_i32_1 = arith.constant 0 : i32
    return %arg1, %c0_i32, %c0_i32_0 : i32, i32, i32
  }
  func.func @transform_3(%arg0: i32, %arg1: i32) -> (i32, i32, i32) {
    %c0_i32 = arith.constant 0 : i32
    %c0_i32_0 = arith.constant 0 : i32
    %c0_i32_1 = arith.constant 0 : i32
    return %arg1, %c0_i32, %c0_i32_0 : i32, i32, i32
  }
  func.func @transform_4(%arg0: i32, %arg1: i32) -> (i32, i32, i32) {
    %c0_i32 = arith.constant 0 : i32
    %c0_i32_0 = arith.constant 0 : i32
    %c0_i32_1 = arith.constant 0 : i32
    return %arg1, %c0_i32, %c0_i32_0 : i32, i32, i32
  }
  func.func @transform_5(%arg0: i32, %arg1: i32) -> (i32, i32, i32) {
    %c0_i32 = arith.constant 0 : i32
    %c0_i32_0 = arith.constant 0 : i32
    %c0_i32_1 = arith.constant 0 : i32
    return %arg1, %c0_i32, %c0_i32_0 : i32, i32, i32
  }
  func.func @transform_6(%arg0: i32, %arg1: i32) -> (i32, i32, i32) {
    %c0_i32 = arith.constant 0 : i32
    %c0_i32_0 = arith.constant 0 : i32
    %c0_i32_1 = arith.constant 0 : i32
    return %arg1, %c0_i32, %c0_i32_0 : i32, i32, i32
  }
  func.func @transform_7(%arg0: i32, %arg1: i32) -> (i32, i32, i32) {
    %c0_i32 = arith.constant 0 : i32
    %c0_i32_0 = arith.constant 0 : i32
    %c0_i32_1 = arith.constant 0 : i32
    return %arg1, %c0_i32, %c0_i32_0 : i32, i32, i32
  }
  func.func @transform_8(%arg0: i32, %arg1: i32) -> (i32, i32, i32) {
    %c0_i32 = arith.constant 0 : i32
    %c0_i32_0 = arith.constant 0 : i32
    %c0_i32_1 = arith.constant 0 : i32
    return %arg1, %c0_i32, %c0_i32_0 : i32, i32, i32
  }
  func.func @transform_9(%arg0: i32, %arg1: i32) -> (i32, i32, i32) {
    %c0_i32 = arith.constant 0 : i32
    %c0_i32_0 = arith.constant 0 : i32
    %c0_i32_1 = arith.constant 0 : i32
    return %arg1, %c0_i32, %c0_i32_0 : i32, i32, i32
  }
  func.func @transform_10(%arg0: i32, %arg1: i32) -> (i32, i32, i32) {
    %c0_i32 = arith.constant 0 : i32
    %c0_i32_0 = arith.constant 0 : i32
    %c0_i32_1 = arith.constant 0 : i32
    return %arg1, %c0_i32, %c0_i32_0 : i32, i32, i32
  }
  func.func @transform_11(%arg0: i32, %arg1: i32) -> (i32, i32, i32) {
    %c0_i32 = arith.constant 0 : i32
    %c0_i32_0 = arith.constant 0 : i32
    %c0_i32_1 = arith.constant 0 : i32
    return %arg1, %c0_i32, %c0_i32_0 : i32, i32, i32
  }
  func.func @transform_12(%arg0: i32, %arg1: i32) -> (i32, i32, i32) {
    %c0_i32 = arith.constant 0 : i32
    %c0_i32_0 = arith.constant 0 : i32
    %c0_i32_1 = arith.constant 0 : i32
    return %arg1, %c0_i32, %c0_i32_0 : i32, i32, i32
  }
  func.func @transform_13(%arg0: i32, %arg1: i32) -> (i32, i32) {
    %c0_i32 = arith.constant 0 : i32
    %c0_i32_0 = arith.constant 0 : i32
    %c0_i32_1 = arith.constant 0 : i32
    return %c0_i32, %c0_i32_0 : i32, i32
  }
  func.func @transform_14(%arg0: i32, %arg1: i32) -> (i32, i32) {
    %c0_i32 = arith.constant 0 : i32
    %c0_i32_0 = arith.constant 0 : i32
    %c0_i32_1 = arith.constant 0 : i32
    return %c0_i32, %c0_i32_0 : i32, i32
  }
  func.func @transform_15(%arg0: i32, %arg1: i32) -> (i32, i32, i32) {
    %c0_i32 = arith.constant 0 : i32
    %c0_i32_0 = arith.constant 0 : i32
    %c0_i32_1 = arith.constant 0 : i32
    return %arg0, %c0_i32, %c0_i32_0 : i32, i32, i32
  }
}

</mosaic_0001>

<bundles_post_ra>
// kernel: forward.3
= control target key start
LH: loop header
LB: loop body
LE: loop exit
PB: predicated region body
PF: predicated region fallthrough
CT: control target
= control target key end

     0   :  { %10 = vsyncpa [#allocation3], 0  ;;  %s2086_s0 = inlined_call_operand.vmem [shape: bf16[512,49], index: 0, kind: input, shape index: {}]   ;;  %s2087_s1 = inlined_call_operand.hbm [shape: bf16[49,128], index: 1, kind: input, shape index: {}]   ;;  %s2088_s2 = inlined_call_operand.hbm [shape: f32[1,128], index: 2, kind: input, shape index: {}]   ;;  %s2089_s3 = inlined_call_operand.hbm [shape: bf16[128,128], index: 3, kind: input, shape index: {}]   ;;  %s2090_s4 = inlined_call_operand.hbm [shape: f32[1,128], index: 4, kind: input, shape index: {}]   ;;  %s2091_s5 = inlined_call_operand.vmem [shape: bf16[512,128], index: 5, kind: output, shape index: {}]  }
   0x1   :  { %11 = vsyncpa [#allocation5], 0 }
   0x2   :  { %12 = vsyncpa [#allocation8], 0  ;;  %s1805_s18 = smov 0  }
   0x3 LB: > { %s1768_s19 = smov [#allocation4]   ;;  %s1184_s21 = sadd.s32 4294967295, %s1766_s18   ;;  %s1766_s18 = sphi %s1805_s18, %s18_s18  }
   0x4   : > { %s185_s20 = sshll.u32 %s1768_s19, 4  ;;  %p1186_p0 = scmp.ge.s32.totalorder %s1766_s18, 1  ;;  %s1819_s20 = int_to_ptr.vmem [resolvable:$true] %s185_s20 }
   0x5   : > { %p159_p1 = scmp.lt.s32.totalorder %s1766_s18, 3  ;;  %p1815_p2 = scmp.eq.s32.totalorder %s1184_s21, 0 }
   0x6   : > { %s1769_s24 = smov [#allocation2]   ;;  %s1770_s27 = smov [#allocation6]  }
   0x7   : > { %s2095_s22 = scalar_select %p1815_p2, 1, 0 }
   0x8   : > { %p1821_p3 = pnand %p1186_p0, %p159_p1  ;;  %s171_s25 = sshll.u32 %s1769_s24, 4  ;;  %s1827_s25 = int_to_ptr.vmem [resolvable:$true] %s171_s25 }
   0x9   : > { %s195_s28 = sshll.u32 %s1770_s27, 4  ;;  %s1771_s29 = smov [#allocation7]   ;;  %s1835_s28 = int_to_ptr.vmem [resolvable:$true] %s195_s28 }
   0xa   : > { %s2096_s23 = scalar_select %p1821_p3, 1, 0 }
   0xb   : > { %p1572_p4 = pneg %p1821_p3  ;;  %s1837_s30 = sshll.u32 %s1771_s29, 4  ;;  %s210_s30 = int_to_ptr.vmem [resolvable:$true] %s1837_s30 }
   0xc   : > { %s1636_s8 = scalar_lea.hbm %s2088_s2, 16 }
   0xd   : > { %p1831_p5 = pnand %p1815_p2, %p1572_p4  ;;  %p1637_p6 = scmp.ne.s32.totalorder %s2088_s2, %s1636_s8 }
   0xe   : > { %p1643_p10 = scmp.lt.u32.totalorder %s1636_s8, %s2088_s2 }
   0xf   : > { %p1847_p7 = pneg %p1831_p5 }
  0x11   : > { %p1639_p8 = pnand %p1847_p7, %p1637_p6 }
  0x13   : > { %p1640_p9 = pneg %p1639_p8 }
  0x15   : > { %p1645_p11 = pnand %p1643_p10, %p1640_p9 }
  0x17   : > { %1648 = shalt.err (!%p1645_p11)
}
  0x18   : > { %s1649_s14 = scalar_lea.vmem %s1819_s20, 16  ;;  %s1656_s15 = scalar_lea.vmem %s1819_s20, 32 }
  0x19   : > { %p1650_p12 = scmp.ne.s32.totalorder %s1819_s20, %s1649_s14  ;;  %p1657_p1 = scmp.lt.s32.totalorder %s1819_s20, %s1819_s20 }
  0x1a   : > { %p1658_p4 = scmp.lt.s32.totalorder %s1656_s15, %s1649_s14 }
  0x1b   : > { %p1652_p13 = pnand %p1650_p12, %p1847_p7 }
  0x1c   : > { %p1659_p6 = por %p1658_p4, %p1657_p1 }
  0x1d   : > { %p1653_p0 = pneg %p1652_p13 }
  0x1f   : > { %p1660_p8 = pnand %p1659_p6, %p1653_p0 }
  0x21   : > { %1663 = shalt.err (!%p1660_p8)
}
  0x22   : > { %1578 = dma.hbm_to_vmem [thread:$0]  (!%p1831_p5), %s2088_s2, 16, %s1819_s20, [#allocation5]  }
  0x23   : > { %s1664_s27 = scalar_lea.hbm %s2087_s1, 448 }
  0x24   : > { %p1665_p9 = scmp.ne.s32.totalorder %s2087_s1, %s1664_s27  ;;  %p1671_p12 = scmp.lt.u32.totalorder %s1664_s27, %s2087_s1 }
  0x26   : > { %p1667_p10 = pnand %p1665_p9, %p1847_p7 }
  0x28   : > { %p1668_p11 = pneg %p1667_p10 }
  0x2a   : > { %p1673_p13 = pnand %p1671_p12, %p1668_p11 }
  0x2c   : > { %1676 = shalt.err (!%p1673_p13)
}
  0x2d   : > { %s1677_s20 = scalar_lea.vmem %s1827_s25, 448  ;;  %p1685_p6 = scmp.lt.s32.totalorder %s1827_s25, %s1827_s25 }
  0x2e   : > { %p1678_p0 = scmp.ne.s32.totalorder %s1827_s25, %s1677_s20  ;;  %p1686_p8 = scmp.lt.s32.totalorder %s1677_s20, %s1677_s20 }
  0x30   : > { %p1680_p1 = pnand %p1678_p0, %p1847_p7  ;;  %p1687_p9 = por %p1686_p8, %p1685_p6 }
  0x32   : > { %p1681_p4 = pneg %p1680_p1 }
  0x34   : > { %p1688_p10 = pnand %p1687_p9, %p1681_p4 }
  0x36   : > { %1691 = shalt.err (!%p1688_p10)
}
  0x37   : > { %s1772_s9 = smov 64   ;;  %s1773_s10 = smov 4  }
  0x38   : > { %1575 = dma.hbm_to_vmem [thread:$0]  (!%p1831_p5), %s2087_s1, 448, %s1827_s25, [#allocation3], %s1772_s9, %s1772_s9, %s1773_s10  }
  0x39   : > { %s1692_s16 = scalar_lea.hbm %s2089_s3, 1024 }
  0x3a   : > { %p1693_p11 = scmp.ne.s32.totalorder %s2089_s3, %s1692_s16  ;;  %p1699_p0 = scmp.lt.u32.totalorder %s1692_s16, %s2089_s3 }
  0x3c   : > { %p1695_p12 = pnand %p1693_p11, %p1847_p7 }
  0x3e   : > { %p1696_p13 = pneg %p1695_p12 }
  0x40   : > { %p1701_p1 = pnand %p1699_p0, %p1696_p13 }
  0x42   : > { %1704 = shalt.err (!%p1701_p1)
}
  0x43   : > { %s1705_s25 = scalar_lea.vmem %s1835_s28, 1024  ;;  %p1713_p9 = scmp.lt.s32.totalorder %s1835_s28, %s1835_s28 }
  0x44   : > { %p1706_p4 = scmp.ne.s32.totalorder %s1835_s28, %s1705_s25  ;;  %p1714_p10 = scmp.lt.s32.totalorder %s1705_s25, %s1705_s25 }
  0x46   : > { %p1708_p6 = pnand %p1706_p4, %p1847_p7  ;;  %p1715_p11 = por %p1714_p10, %p1713_p9 }
  0x48   : > { %p1709_p8 = pneg %p1708_p6 }
  0x4a   : > { %p1716_p12 = pnand %p1715_p11, %p1709_p8 }
  0x4c   : > { %1719 = shalt.err (!%p1716_p12)
}
  0x4d   : > { %1581 = dma.hbm_to_vmem [thread:$0]  (!%p1831_p5), %s2089_s3, 1024, %s1835_s28, [#allocation5], %s1772_s9, %s1772_s9, %s1773_s10  }
  0x4e   : > { %s1720_s20 = scalar_lea.hbm %s2090_s4, 16 }
  0x4f   : > { %p1721_p13 = scmp.ne.s32.totalorder %s2090_s4, %s1720_s20  ;;  %p1727_p4 = scmp.lt.u32.totalorder %s1720_s20, %s2090_s4 }
  0x51   : > { %p1723_p0 = pnand %p1721_p13, %p1847_p7 }
  0x53   : > { %p1724_p1 = pneg %p1723_p0 }
  0x55   : > { %p1729_p6 = pnand %p1727_p4, %p1724_p1 }
  0x57   : > { %1732 = shalt.err (!%p1729_p6)
}
  0x58   : > { %s1733_s16 = scalar_lea.vmem %s210_s30, 16  ;;  %s1740_s28 = scalar_lea.vmem %s210_s30, 32 }
  0x59   : > { %p1734_p8 = scmp.ne.s32.totalorder %s210_s30, %s1733_s16  ;;  %p1741_p11 = scmp.lt.s32.totalorder %s210_s30, %s210_s30 }
  0x5a   : > { %p1742_p12 = scmp.lt.s32.totalorder %s1740_s28, %s1733_s16 }
  0x5b   : > { %p1736_p9 = pnand %p1734_p8, %p1847_p7 }
  0x5c   : > { %p1743_p2 = por %p1742_p12, %p1741_p11 }
  0x5d   : > { %p1737_p10 = pneg %p1736_p9 }
  0x5f   : > { %p1744_p3 = pnand %p1743_p2, %p1737_p10 }
  0x61   : > { %1747 = shalt.err (!%p1744_p3)
}
  0x62   : > { %1584 = dma.hbm_to_vmem [thread:$0]  (!%p1831_p5), %s2090_s4, 16, %s210_s30, [#allocation8]  }
  0x63   : > { %p2099_p13 = scmp.ne.s32.totalorder %s2096_s23, 0 }
  0x64   : > { %p2100_p0 = scmp.ne.s32.totalorder (!%p2099_p13), %s2095_s22, 0 }
  0x65   : > { %231 = sbr.rel (%p2099_p13) target bundleno = 628 (0x274), region = 40 }
  0x6c   : > { %1753 = dma.done.wait (%p2100_p0), [#allocation3], 448  }
  0x6d   : > { %1755 = vsyncadd (%p2100_p0), [#allocation3], 4294966848 }
  0x6e   : > { %1757 = dma.done.wait (%p2100_p0), [#allocation5], 1040  }
  0x6f   : > { %1759 = vsyncadd (%p2100_p0), [#allocation5], 4294966256 }
  0x70   : > { %1761 = dma.done.wait (%p2100_p0), [#allocation8], 16  }
  0x71   : > { %1763 = vsyncadd (%p2100_p0), [#allocation8], 4294967280  ;;  %s1197_s23 = sshll.u32 %s1184_s21, 5  ;;  %v1608_v0 = vld [vmem:[#allocation2] sm:$0xff]   ;;  %vm480_vm0 = vcmask 1040384   ;;  %v1609_v1 = vld [vmem:[#allocation2 + $0x8] sm:$0xff]  }
  0x72   : > { %p272_p2 = scmp.lt.s32.totalorder %s1197_s23, 63  ;;  %1452 = vmatprep.subr.bf16.mxu0 %v1608_v0  ;;  %v1610_v2 = vld [vmem:[#allocation2 + $0x10] sm:$0xff]   ;;  %vm431_vm1 = vcmask 400384   ;;  %v1611_v3 = vld [vmem:[#allocation2 + $0x18] ss:$0 sps:$4 sm:$0x11]  }
  0x73   : > { %1453 = vmatpush3.bf16.msra.mxu0 %v1608_v0  ;;  %v1774_v5 = vmov 0   ;;  %v1628_v10 = vld [vmem:[#allocation6] sm:$0xff]   ;;  %v1629_v11 = vld [vmem:[#allocation6 + $0x8] sm:$0xff]   ;;  %v1630_v14 = vld [vmem:[#allocation6 + $0x10] sm:$0xff]  }
  0x74   : > { %s2102_s23 = smov (!%p272_p2, %s1197_s23), 63  ;;  %1454 = vmatprep.subr.bf16.mxu0 %v1609_v1  ;;  %v482_v6 = vsel %vm480_vm0, 65535, %v1774_v5  ;;  %1540 = vmatprep.subr.bf16.mxu1 %v1628_v10  ;;  %v1631_v15 = vld [vmem:[#allocation6 + $0x18] sm:$0xff]   ;;  %v1632_v18 = vld [vmem:[#allocation6 + $0x20] sm:$0xff]   ;;  %v1633_v19 = vld [vmem:[#allocation6 + $0x28] sm:$0xff]  }
  0x75   : > { %s1198_s26 = sshll.u32 %s2102_s23, 2  ;;  %v484_v7 = vand.u32 %v1611_v3, %v482_v6  ;;  %1548 = vmatpush3.bf16.msra.mxu1 %v1628_v10  ;;  %v1634_v29 = vld [vmem:[#allocation6 + $0x30] sm:$0xff]   ;;  %v1635_v30 = vld [vmem:[#allocation6 + $0x38] sm:$0xff]  }
  0x76   : > { %s1958_s17 = scalar_lea.vmem %s2086_s0, %s1198_s26  ;;  %1541 = vmatprep.subr.bf16.mxu1 %v1629_v11  ;;  %v1992_v31 = vld [vmem:[#allocation4] ss:$0 sm:$0xff]  ;;  %s2036_s19 = scalar_lea.vmem %s2091_s5, %s1198_s26 }
  0x77   : > { %v1612_v4 = vld [vmem:[%s1958_s17] sm:$0xff]   ;;  %1455 = vmatpush3.bf16.msra.mxu0 %v1609_v1  ;;  %v1613_v8 = vld [vmem:[%s1958_s17 + $0x8] sm:$0xff]   ;;  %v1614_v9 = vld [vmem:[%s1958_s17 + $0x10] sm:$0xff]  }
  0x78   : > { %1460 = vmatprep.mubr.msk.bf16.mxu0 %vm431_vm1, %v1612_v4  ;;  %1456 = vmatprep.subr.bf16.mxu0 %v1610_v2  ;;  %v1615_v12 = vld [vmem:[%s1958_s17 + $0x18] sm:$0xff]   ;;  %v1616_v13 = vld [vmem:[%s1958_s17 + $0x20] sm:$0xff]   ;;  %v1617_v16 = vld [vmem:[%s1958_s17 + $0x28] sm:$0xff]  }
  0x79   : > { %1549 = vmatpush3.bf16.msra.mxu1 %v1629_v11  ;;  %v1618_v17 = vld [vmem:[%s1958_s17 + $0x30] sm:$0xff]   ;;  %v1619_v20 = vld [vmem:[%s1958_s17 + $0x38] sm:$0xff]   ;;  %v1620_v21 = vld [vmem:[%s1958_s17 + $0x40] sm:$0xff]  }
  0x7a   : > { %1542 = vmatprep.subr.bf16.mxu1 %v1630_v14  ;;  %v1621_v22 = vld [vmem:[%s1958_s17 + $0x48] sm:$0xff]   ;;  %v1622_v23 = vld [vmem:[%s1958_s17 + $0x50] sm:$0xff]   ;;  %v1623_v24 = vld [vmem:[%s1958_s17 + $0x58] sm:$0xff]  }
  0x7b   : > { %1457 = vmatpush3.bf16.msra.mxu0 %v1610_v2  ;;  %v1624_v25 = vld [vmem:[%s1958_s17 + $0x60] sm:$0xff]   ;;  %v1625_v26 = vld [vmem:[%s1958_s17 + $0x68] sm:$0xff]   ;;  %v1626_v27 = vld [vmem:[%s1958_s17 + $0x70] sm:$0xff]  }
  0x7c   : > { %1458 = vmatprep.subr.bf16.mxu0 %v484_v7  ;;  %v1627_v28 = vld [vmem:[%s1958_s17 + $0x78] sm:$0xff]  }
  0x7d   : > { %1550 = vmatpush3.bf16.msra.mxu1 %v1630_v14 }
  0x7e   : > { %1543 = vmatprep.subr.bf16.mxu1 %v1631_v15 }
  0x7f   : > { %1459 = vmatpush3.bf16.msra.mxu0 %v484_v7 }
  0x80   : > { %1492 = vmatprep.subr.bf16.mxu0 %v1628_v10 }
  0x81   : > { %1551 = vmatpush3.bf16.msra.mxu1 %v1631_v15 }
  0x82   : > { %1461 = vmatmul.mubr.msk.bf16.vlgmr.msra.gmra.mrb[0].mxu0 %vm431_vm1, %v1613_v8  ;;  %1544 = vmatprep.subr.bf16.mxu1 %v1632_v18 }
  0x83   : > { %1464 = vmatprep.mubr.msk.bf16.mxu0 %vm431_vm1, %v1614_v9  ;;  %1493 = vmatpush3.bf16.msra.mxu0 %v1628_v10 }
  0x84   : > { %1494 = vmatprep.subr.bf16.mxu0 %v1629_v11 }
  0x85   : > { %1552 = vmatpush3.bf16.msra.mxu1 %v1632_v18 }
  0x86   : > { %1545 = vmatprep.subr.bf16.mxu1 %v1633_v19 }
  0x87   : > { %1495 = vmatpush3.bf16.msra.mxu0 %v1629_v11 }
  0x88   : > { %1496 = vmatprep.subr.bf16.mxu0 %v1630_v14 }
  0x89   : > { %1553 = vmatpush3.bf16.msra.mxu1 %v1633_v19 }
  0x8a   : > { %1465 = vmatmul.mubr.msk.bf16.gmra.mrb[4].mxu0 %vm431_vm1, %v1615_v12  ;;  %1546 = vmatprep.subr.bf16.mxu1 %v1634_v29 }
  0x8b   : > { %1468 = vmatprep.mubr.msk.bf16.mxu0 %vm431_vm1, %v1616_v13  ;;  %1497 = vmatpush3.bf16.msra.mxu0 %v1630_v14 }
  0x8c   : > { %1498 = vmatprep.subr.bf16.mxu0 %v1631_v15 }
  0x8d   : > { %1554 = vmatpush3.bf16.msra.mxu1 %v1634_v29 }
  0x8e   : > { %1547 = vmatprep.subr.bf16.mxu1 %v1635_v30 }
  0x8f   : > { %1499 = vmatpush3.bf16.msra.mxu0 %v1631_v15 }
  0x90   : > { %1500 = vmatprep.subr.bf16.mxu0 %v1632_v18 }
  0x91   : > { %1555 = vmatpush3.bf16.msra.mxu1 %v1635_v30 }
  0x92   : > { %1469 = vmatmul.mubr.msk.bf16.gmra.mrb[8].mxu0 %vm431_vm1, %v1617_v16 }
  0x93   : > { %1472 = vmatprep.mubr.msk.bf16.mxu0 %vm431_vm1, %v1618_v17  ;;  %1501 = vmatpush3.bf16.msra.mxu0 %v1632_v18 }
  0x94   : > { %1502 = vmatprep.subr.bf16.mxu0 %v1633_v19 }
  0x97   : > { %1503 = vmatpush3.bf16.msra.mxu0 %v1633_v19 }
  0x98   : > { %1504 = vmatprep.subr.bf16.mxu0 %v1634_v29 }
  0x9a   : > { %1473 = vmatmul.mubr.msk.bf16.gmra.mrb[12].mxu0 %vm431_vm1, %v1619_v20 }
  0x9b   : > { %1476 = vmatprep.mubr.msk.bf16.mxu0 %vm431_vm1, %v1620_v21  ;;  %1505 = vmatpush3.bf16.msra.mxu0 %v1634_v29 }
  0x9c   : > { %1506 = vmatprep.subr.bf16.mxu0 %v1635_v30 }
  0x9f   : > { %1507 = vmatpush3.bf16.msra.mxu0 %v1635_v30 }
  0xa2   : > { %1477 = vmatmul.mubr.msk.bf16.gmra.mrb[16].mxu0 %vm431_vm1, %v1621_v22 }
  0xa3   : > { %1480 = vmatprep.mubr.msk.bf16.mxu0 %vm431_vm1, %v1622_v23 }
  0xaa   : > { %1481 = vmatmul.mubr.msk.bf16.gmra.mrb[20].mxu0 %vm431_vm1, %v1623_v24 }
  0xab   : > { %1484 = vmatprep.mubr.msk.bf16.mxu0 %vm431_vm1, %v1624_v25 }
  0xb2   : > { %1485 = vmatmul.mubr.msk.bf16.gmra.mrb[24].mxu0 %vm431_vm1, %v1625_v26 }
  0xb3   : > { %1488 = vmatprep.mubr.msk.bf16.mxu0 %vm431_vm1, %v1626_v27 }
  0xba   : > { %1489 = vmatmul.mubr.msk.bf16.gmra.mrb[28].mxu0 %vm431_vm1, %v1627_v28 }
 0x155   : > { %v1462_v32 = vpop.f32.mrb[0].mxu0 }
 0x156   : > { %v529_v33 = vadd.f32 %v1462_v32, %v1992_v31  ;;  %v520_v34 = vpop.f32.mrb[1].mxu0 }
 0x157   : > { %v521_v35 = vadd.f32 %v1992_v31, %v520_v34  ;;  %v1463_v36 = vpop.f32.mrb[2].mxu0 }
 0x158   : > { %v532_v37 = vadd.f32 %v1463_v36, %v1992_v31  ;;  %v523_v38 = vpop.f32.mrb[3].mxu0  ;;  %v649_v40 = vmax.f32 %v529_v33, 0.0 }
 0x159   : > { %v524_v39 = vadd.f32 %v1992_v31, %v523_v38  ;;  %v647_v42 = vmax.f32 %v521_v35, 0.0 }
 0x15a   : > { %v650_v41 = vmax.f32 %v532_v37, 0.0 }
 0x15b   : > { %v648_v43 = vmax.f32 %v524_v39, 0.0 }
 0x15c   : > { %v680_v44 = vpack.c.bf16 %v650_v41, %v649_v40 }
 0x15d   : > { %v679_v45 = vpack.c.bf16 %v648_v43, %v647_v42  ;;  %v1466_v46 = vpop.f32.mrb[4].mxu0 }
 0x15e   : > { %v545_v47 = vadd.f32 %v1466_v46, %v1992_v31  ;;  %v536_v48 = vpop.f32.mrb[5].mxu0 }
 0x15f   : > { %v537_v49 = vadd.f32 %v1992_v31, %v536_v48  ;;  %v1467_v50 = vpop.f32.mrb[6].mxu0  ;;  %1508 = vmatprep.mubr.bf16.mxu0 %v679_v45 }
 0x160   : > { %v548_v51 = vadd.f32 %v1467_v50, %v1992_v31  ;;  %v539_v52 = vpop.f32.mrb[7].mxu0  ;;  %1509 = vmatmul.mubr.bf16.vlgmr.msra.gmra.mrb[32].mxu0 %v680_v44  ;;  %v653_v54 = vmax.f32 %v545_v47, 0.0 }
 0x161   : > { %v540_v53 = vadd.f32 %v1992_v31, %v539_v52  ;;  %v651_v56 = vmax.f32 %v537_v49, 0.0 }
 0x162   : > { %v654_v55 = vmax.f32 %v548_v51, 0.0 }
 0x163   : > { %v652_v57 = vmax.f32 %v540_v53, 0.0 }
 0x164   : > { %v682_v58 = vpack.c.bf16 %v654_v55, %v653_v54 }
 0x165   : > { %v1470_v59 = vpop.f32.mrb[8].mxu0  ;;  %v681_v60 = vpack.c.bf16 %v652_v57, %v651_v56 }
 0x166   : > { %v561_v61 = vadd.f32 %v1470_v59, %v1992_v31  ;;  %v552_v62 = vpop.f32.mrb[9].mxu0 }
 0x167   : > { %v553_v63 = vadd.f32 %v1992_v31, %v552_v62  ;;  %v1471_v0 = vpop.f32.mrb[10].mxu0  ;;  %1512 = vmatprep.mubr.bf16.mxu1 %v681_v60 }
 0x168   : > { %v564_v1 = vadd.f32 %v1471_v0, %v1992_v31  ;;  %v555_v2 = vpop.f32.mrb[11].mxu0  ;;  %1513 = vmatmul.mubr.bf16.vlgmr.msra.gmra.mrb[0].mxu1 %v682_v58  ;;  %v657_v4 = vmax.f32 %v561_v61, 0.0 }
 0x169   : > { %v556_v3 = vadd.f32 %v1992_v31, %v555_v2  ;;  %v655_v6 = vmax.f32 %v553_v63, 0.0 }
 0x16a   : > { %v658_v5 = vmax.f32 %v564_v1, 0.0 }
 0x16b   : > { %v656_v7 = vmax.f32 %v556_v3, 0.0 }
 0x16c   : > { %v684_v8 = vpack.c.bf16 %v658_v5, %v657_v4 }
 0x16d   : > { %v683_v9 = vpack.c.bf16 %v656_v7, %v655_v6  ;;  %v1474_v10 = vpop.f32.mrb[12].mxu0 }
 0x16e   : > { %v577_v11 = vadd.f32 %v1474_v10, %v1992_v31  ;;  %v568_v12 = vpop.f32.mrb[13].mxu0 }
 0x16f   : > { %v569_v13 = vadd.f32 %v1992_v31, %v568_v12  ;;  %v1475_v14 = vpop.f32.mrb[14].mxu0  ;;  %1516 = vmatprep.mubr.bf16.mxu1 %v683_v9 }
 0x170   : > { %v580_v15 = vadd.f32 %v1475_v14, %v1992_v31  ;;  %v571_v16 = vpop.f32.mrb[15].mxu0  ;;  %1517 = vmatmul.mubr.bf16.gmra.mrb[4].mxu1 %v684_v8  ;;  %v661_v18 = vmax.f32 %v577_v11, 0.0 }
 0x171   : > { %v572_v17 = vadd.f32 %v1992_v31, %v571_v16  ;;  %v659_v20 = vmax.f32 %v569_v13, 0.0 }
 0x172   : > { %v662_v19 = vmax.f32 %v580_v15, 0.0 }
 0x173   : > { %v660_v21 = vmax.f32 %v572_v17, 0.0 }
 0x174   : > { %v686_v22 = vpack.c.bf16 %v662_v19, %v661_v18  ;;  %v2026_v18 = vld [vmem:[#allocation7] ss:$0 sm:$0xff] }
 0x175   : > { %v685_v23 = vpack.c.bf16 %v660_v21, %v659_v20  ;;  %v1478_v24 = vpop.f32.mrb[16].mxu0 }
 0x176   : > { %v593_v25 = vadd.f32 %v1478_v24, %v1992_v31  ;;  %v584_v26 = vpop.f32.mrb[17].mxu0 }
 0x177   : > { %v585_v27 = vadd.f32 %v1992_v31, %v584_v26  ;;  %v1479_v28 = vpop.f32.mrb[18].mxu0  ;;  %1520 = vmatprep.mubr.bf16.mxu1 %v685_v23 }
 0x178   : > { %v596_v29 = vadd.f32 %v1479_v28, %v1992_v31  ;;  %v587_v30 = vpop.f32.mrb[19].mxu0  ;;  %1521 = vmatmul.mubr.bf16.gmra.mrb[8].mxu1 %v686_v22  ;;  %v665_v33 = vmax.f32 %v593_v25, 0.0 }
 0x179   : > { %v588_v32 = vadd.f32 %v1992_v31, %v587_v30  ;;  %v663_v35 = vmax.f32 %v585_v27, 0.0 }
 0x17a   : > { %v666_v34 = vmax.f32 %v596_v29, 0.0 }
 0x17b   : > { %v664_v36 = vmax.f32 %v588_v32, 0.0 }
 0x17c   : > { %v688_v37 = vpack.c.bf16 %v666_v34, %v665_v33 }
 0x17d   : > { %v687_v38 = vpack.c.bf16 %v664_v36, %v663_v35  ;;  %v1482_v39 = vpop.f32.mrb[20].mxu0 }
 0x17e   : > { %v609_v40 = vadd.f32 %v1482_v39, %v1992_v31  ;;  %v600_v41 = vpop.f32.mrb[21].mxu0 }
 0x17f   : > { %v601_v42 = vadd.f32 %v1992_v31, %v600_v41  ;;  %v1483_v43 = vpop.f32.mrb[22].mxu0  ;;  %1524 = vmatprep.mubr.bf16.mxu1 %v687_v38 }
 0x180   : > { %v612_v44 = vadd.f32 %v1483_v43, %v1992_v31  ;;  %v603_v45 = vpop.f32.mrb[23].mxu0  ;;  %1525 = vmatmul.mubr.bf16.gmra.mrb[12].mxu1 %v688_v37  ;;  %v669_v47 = vmax.f32 %v609_v40, 0.0 }
 0x181   : > { %v604_v46 = vadd.f32 %v1992_v31, %v603_v45  ;;  %v667_v49 = vmax.f32 %v601_v42, 0.0 }
 0x182   : > { %v670_v48 = vmax.f32 %v612_v44, 0.0 }
 0x183   : > { %v668_v50 = vmax.f32 %v604_v46, 0.0 }
 0x184   : > { %v690_v51 = vpack.c.bf16 %v670_v48, %v669_v47 }
 0x185   : > { %v689_v52 = vpack.c.bf16 %v668_v50, %v667_v49  ;;  %v1486_v53 = vpop.f32.mrb[24].mxu0 }
 0x186   : > { %v625_v54 = vadd.f32 %v1486_v53, %v1992_v31  ;;  %v616_v55 = vpop.f32.mrb[25].mxu0 }
 0x187   : > { %v617_v56 = vadd.f32 %v1992_v31, %v616_v55  ;;  %v1487_v57 = vpop.f32.mrb[26].mxu0  ;;  %1528 = vmatprep.mubr.bf16.mxu1 %v689_v52 }
 0x188   : > { %v628_v58 = vadd.f32 %v1487_v57, %v1992_v31  ;;  %v619_v59 = vpop.f32.mrb[27].mxu0  ;;  %1529 = vmatmul.mubr.bf16.gmra.mrb[16].mxu1 %v690_v51  ;;  %v673_v61 = vmax.f32 %v625_v54, 0.0 }
 0x189   : > { %v620_v60 = vadd.f32 %v1992_v31, %v619_v59  ;;  %v671_v63 = vmax.f32 %v617_v56, 0.0 }
 0x18a   : > { %v674_v62 = vmax.f32 %v628_v58, 0.0 }
 0x18b   : > { %v672_v0 = vmax.f32 %v620_v60, 0.0 }
 0x18c   : > { %v692_v1 = vpack.c.bf16 %v674_v62, %v673_v61 }
 0x18d   : > { %v691_v2 = vpack.c.bf16 %v672_v0, %v671_v63  ;;  %v1490_v3 = vpop.f32.mrb[28].mxu0 }
 0x18e   : > { %v641_v4 = vadd.f32 %v1490_v3, %v1992_v31  ;;  %v632_v5 = vpop.f32.mrb[29].mxu0 }
 0x18f   : > { %v633_v6 = vadd.f32 %v1992_v31, %v632_v5  ;;  %v1491_v7 = vpop.f32.mrb[30].mxu0  ;;  %1532 = vmatprep.mubr.bf16.mxu1 %v691_v2 }
 0x190   : > { %v644_v8 = vadd.f32 %v1491_v7, %v1992_v31  ;;  %v635_v9 = vpop.f32.mrb[31].mxu0  ;;  %1533 = vmatmul.mubr.bf16.gmra.mrb[20].mxu1 %v692_v1  ;;  %v677_v11 = vmax.f32 %v641_v4, 0.0 }
 0x191   : > { %v636_v10 = vadd.f32 %v1992_v31, %v635_v9  ;;  %v675_v13 = vmax.f32 %v633_v6, 0.0 }
 0x192   : > { %v678_v12 = vmax.f32 %v644_v8, 0.0 }
 0x193   : > { %v676_v14 = vmax.f32 %v636_v10, 0.0 }
 0x194   : > { %v694_v15 = vpack.c.bf16 %v678_v12, %v677_v11 }
 0x195   : > { %v693_v16 = vpack.c.bf16 %v676_v14, %v675_v13 }
 0x197   : > { %1536 = vmatprep.mubr.bf16.mxu1 %v693_v16 }
 0x198   : > { %1537 = vmatmul.mubr.bf16.gmra.mrb[24].mxu1 %v694_v15 }
 0x233   : > { %v1510_v17 = vpop.f32.mrb[32].mxu0 }
 0x234   : > { %v800_v19 = vpop.f32.mrb[33].mxu0  ;;  %v809_v21 = vadd.f32 %v1510_v17, %v2026_v18 }
 0x235   : > { %v1511_v20 = vpop.f32.mrb[34].mxu0  ;;  %v801_v31 = vadd.f32 %v2026_v18, %v800_v19 }
 0x236   : > { %v812_v22 = vadd.f32 %v1511_v20, %v2026_v18  ;;  %v803_v23 = vpop.f32.mrb[35].mxu0 }
 0x237   : > { %v804_v24 = vadd.f32 %v2026_v18, %v803_v23 }
 0x238   : > { %v1321_v25 = vpack.c.bf16 %v812_v22, %v809_v21 }
 0x239   : > { %v1316_v26 = vpack.c.bf16 %v804_v24, %v801_v31 }
 0x23a   : > { %1393 = vst [vmem:[%s2036_s19 + $0x8] sm:$0xff] %v1321_v25  }
 0x23b   : > { %1317 = vst [vmem:[%s2036_s19] sm:$0xff] %v1316_v26   ;;  %v1514_v27 = vpop.f32.mrb[0].mxu1 }
 0x23c   : > { %v816_v28 = vpop.f32.mrb[1].mxu1  ;;  %v825_v30 = vadd.f32 %v1514_v27, %v2026_v18 }
 0x23d   : > { %v1515_v29 = vpop.f32.mrb[2].mxu1  ;;  %v817_v34 = vadd.f32 %v2026_v18, %v816_v28 }
 0x23e   : > { %v828_v32 = vadd.f32 %v1515_v29, %v2026_v18  ;;  %v819_v33 = vpop.f32.mrb[3].mxu1 }
 0x23f   : > { %v820_v35 = vadd.f32 %v2026_v18, %v819_v33 }
 0x240   : > { %v1331_v36 = vpack.c.bf16 %v828_v32, %v825_v30 }
 0x241   : > { %v1326_v37 = vpack.c.bf16 %v820_v35, %v817_v34 }
 0x242   : > { %1395 = vst [vmem:[%s2036_s19 + $0x18] sm:$0xff] %v1331_v36  }
 0x243   : > { %1394 = vst [vmem:[%s2036_s19 + $0x10] sm:$0xff] %v1326_v37   ;;  %v1518_v38 = vpop.f32.mrb[4].mxu1 }
 0x244   : > { %v832_v39 = vpop.f32.mrb[5].mxu1  ;;  %v841_v41 = vadd.f32 %v1518_v38, %v2026_v18 }
 0x245   : > { %v1519_v40 = vpop.f32.mrb[6].mxu1  ;;  %v833_v44 = vadd.f32 %v2026_v18, %v832_v39 }
 0x246   : > { %v844_v42 = vadd.f32 %v1519_v40, %v2026_v18  ;;  %v835_v43 = vpop.f32.mrb[7].mxu1 }
 0x247   : > { %v836_v45 = vadd.f32 %v2026_v18, %v835_v43 }
 0x248   : > { %v1341_v46 = vpack.c.bf16 %v844_v42, %v841_v41 }
 0x249   : > { %v1336_v47 = vpack.c.bf16 %v836_v45, %v833_v44 }
 0x24a   : > { %1397 = vst [vmem:[%s2036_s19 + $0x28] sm:$0xff] %v1341_v46  }
 0x24b   : > { %1396 = vst [vmem:[%s2036_s19 + $0x20] sm:$0xff] %v1336_v47   ;;  %v1522_v48 = vpop.f32.mrb[8].mxu1 }
 0x24c   : > { %v848_v49 = vpop.f32.mrb[9].mxu1  ;;  %v857_v51 = vadd.f32 %v1522_v48, %v2026_v18 }
 0x24d   : > { %v1523_v50 = vpop.f32.mrb[10].mxu1  ;;  %v849_v54 = vadd.f32 %v2026_v18, %v848_v49 }
 0x24e   : > { %v860_v52 = vadd.f32 %v1523_v50, %v2026_v18  ;;  %v851_v53 = vpop.f32.mrb[11].mxu1 }
 0x24f   : > { %v852_v55 = vadd.f32 %v2026_v18, %v851_v53 }
 0x250   : > { %v1351_v56 = vpack.c.bf16 %v860_v52, %v857_v51 }
 0x251   : > { %v1346_v57 = vpack.c.bf16 %v852_v55, %v849_v54 }
 0x252   : > { %1399 = vst [vmem:[%s2036_s19 + $0x38] sm:$0xff] %v1351_v56  }
 0x253   : > { %1398 = vst [vmem:[%s2036_s19 + $0x30] sm:$0xff] %v1346_v57   ;;  %v1526_v58 = vpop.f32.mrb[12].mxu1 }
 0x254   : > { %v864_v59 = vpop.f32.mrb[13].mxu1  ;;  %v873_v61 = vadd.f32 %v1526_v58, %v2026_v18 }
 0x255   : > { %v1527_v60 = vpop.f32.mrb[14].mxu1  ;;  %v865_v0 = vadd.f32 %v2026_v18, %v864_v59 }
 0x256   : > { %v876_v62 = vadd.f32 %v1527_v60, %v2026_v18  ;;  %v867_v63 = vpop.f32.mrb[15].mxu1 }
 0x257   : > { %v868_v1 = vadd.f32 %v2026_v18, %v867_v63 }
 0x258   : > { %v1361_v2 = vpack.c.bf16 %v876_v62, %v873_v61 }
 0x259   : > { %v1356_v3 = vpack.c.bf16 %v868_v1, %v865_v0 }
 0x25a   : > { %1401 = vst [vmem:[%s2036_s19 + $0x48] sm:$0xff] %v1361_v2  }
 0x25b   : > { %1400 = vst [vmem:[%s2036_s19 + $0x40] sm:$0xff] %v1356_v3   ;;  %v1530_v4 = vpop.f32.mrb[16].mxu1 }
 0x25c   : > { %v880_v5 = vpop.f32.mrb[17].mxu1  ;;  %v889_v7 = vadd.f32 %v1530_v4, %v2026_v18 }
 0x25d   : > { %v1531_v6 = vpop.f32.mrb[18].mxu1  ;;  %v881_v10 = vadd.f32 %v2026_v18, %v880_v5 }
 0x25e   : > { %v892_v8 = vadd.f32 %v1531_v6, %v2026_v18  ;;  %v883_v9 = vpop.f32.mrb[19].mxu1 }
 0x25f   : > { %v884_v11 = vadd.f32 %v2026_v18, %v883_v9 }
 0x260   : > { %v1371_v12 = vpack.c.bf16 %v892_v8, %v889_v7 }
 0x261   : > { %v1366_v13 = vpack.c.bf16 %v884_v11, %v881_v10 }
 0x262   : > { %1403 = vst [vmem:[%s2036_s19 + $0x58] sm:$0xff] %v1371_v12  }
 0x263   : > { %1402 = vst [vmem:[%s2036_s19 + $0x50] sm:$0xff] %v1366_v13   ;;  %v1534_v14 = vpop.f32.mrb[20].mxu1 }
 0x264   : > { %v896_v15 = vpop.f32.mrb[21].mxu1  ;;  %v905_v17 = vadd.f32 %v1534_v14, %v2026_v18 }
 0x265   : > { %v1535_v16 = vpop.f32.mrb[22].mxu1  ;;  %v897_v21 = vadd.f32 %v2026_v18, %v896_v15 }
 0x266   : > { %v908_v19 = vadd.f32 %v1535_v16, %v2026_v18  ;;  %v899_v20 = vpop.f32.mrb[23].mxu1 }
 0x267   : > { %v900_v22 = vadd.f32 %v2026_v18, %v899_v20 }
 0x268   : > { %v1381_v23 = vpack.c.bf16 %v908_v19, %v905_v17 }
 0x269   : > { %v1376_v31 = vpack.c.bf16 %v900_v22, %v897_v21 }
 0x26a   : > { %1405 = vst [vmem:[%s2036_s19 + $0x68] sm:$0xff] %v1381_v23  }
 0x26b   : > { %1404 = vst [vmem:[%s2036_s19 + $0x60] sm:$0xff] %v1376_v31   ;;  %v1538_v24 = vpop.f32.mrb[24].mxu1 }
 0x26c   : > { %v912_v25 = vpop.f32.mrb[25].mxu1  ;;  %v921_v27 = vadd.f32 %v1538_v24, %v2026_v18 }
 0x26d   : > { %v1539_v26 = vpop.f32.mrb[26].mxu1  ;;  %v913_v30 = vadd.f32 %v2026_v18, %v912_v25 }
 0x26e   : > { %v924_v28 = vadd.f32 %v1539_v26, %v2026_v18  ;;  %v915_v29 = vpop.f32.mrb[27].mxu1 }
 0x26f   : > { %v916_v32 = vadd.f32 %v2026_v18, %v915_v29 }
 0x270   : > { %v1391_v33 = vpack.c.bf16 %v924_v28, %v921_v27 }
 0x271   : > { %v1386_v34 = vpack.c.bf16 %v916_v32, %v913_v30 }
 0x272   : > { %1407 = vst [vmem:[%s2036_s19 + $0x78] sm:$0xff] %v1391_v33  }
 0x273   : > { %1406 = vst [vmem:[%s2036_s19 + $0x70] sm:$0xff] %v1386_v34  }
 0x274 PF: > { %s18_s18 = sadd.s32 1, %s1766_s18  }
 0x275   : > { %p15_p3 = scmp.ge.s32.totalorder %s18_s18, 4  }
 0x277   :  { %17 = sbr.rel (!%p15_p3) target bundleno = 3 (0x3), region = 87 }
 0x27e   :  { %1109 = vsyncpa [#allocation3], 1 }
 0x27f   :  { %1111 = vsyncpa [#allocation3 + $0x1], 1 }
 0x280   :  { %1112 = vsyncpa [#allocation5], 1 }
 0x281   :  { %1113 = vsyncpa [#allocation8], 1 }

// kernel: forward.5
= control target key start
LH: loop header
LB: loop body
LE: loop exit
PB: predicated region body
PF: predicated region fallthrough
CT: control target
= control target key end

     0   :  { %s7638_s0 = inlined_call_operand.vmem [shape: f32[2,8,128], index: 0, kind: input, shape index: {}]   ;;  %s7639_s1 = inlined_call_operand.vmem [shape: bf16[4,128,384], index: 1, kind: input, shape index: {}]   ;;  %s7640_s2 = inlined_call_operand.vmem [shape: f32[4,1,384], index: 2, kind: input, shape index: {}]   ;;  %s7641_s3 = inlined_call_operand.vmem [shape: bf16[4,128,128], index: 3, kind: input, shape index: {}]   ;;  %s7642_s4 = inlined_call_operand.vmem [shape: f32[4,1,128], index: 4, kind: input, shape index: {}]   ;;  %s7643_s5 = inlined_call_operand.vmem [shape: f32[4,1,128], index: 5, kind: input, shape index: {}]   ;;  %s7644_s6 = inlined_call_operand.vmem [shape: f32[4,1,128], index: 6, kind: input, shape index: {}]   ;;  %s7645_s7 = inlined_call_operand.vmem [shape: bf16[4,128,2048], index: 7, kind: input, shape index: {}]   ;;  %s7646_s8 = inlined_call_operand.vmem [shape: f32[4,1,2048], index: 8, kind: input, shape index: {}]   ;;  %s7647_s9 = inlined_call_operand.hbm [shape: bf16[4,2048,128], index: 9, kind: input, shape index: {}]   ;;  %s7648_s10 = inlined_call_operand.vmem [shape: f32[4,1,128], index: 10, kind: input, shape index: {}]   ;;  %s7649_s11 = inlined_call_operand.vmem [shape: f32[4,1,128], index: 11, kind: input, shape index: {}]   ;;  %s7650_s12 = inlined_call_operand.vmem [shape: f32[4,1,128], index: 12, kind: input, shape index: {}]   ;;  %s7651_s13 = inlined_call_operand.vmem [shape: bf16[128,128], index: 13, kind: input, shape index: {}]   ;;  %s7652_s14 = inlined_call_operand.vmem [shape: f32[1,128], index: 14, kind: input, shape index: {}]   ;;  %s7653_s15 = inlined_call_operand.hbm [shape: f32[2,8,128], index: 15, kind: output, shape index: {}]  }
   0x1   :  { %7674 = sst [smem:[#allocation25_spill]] %s7638_s0 }
   0x2   :  { %7675 = sst [smem:[#allocation26_spill]] %s7639_s1 }
   0x3   :  { %7676 = sst [smem:[#allocation27_spill]] %s7640_s2 }
   0x4   :  { %7677 = sst [smem:[#allocation28_spill]] %s7641_s3 }
   0x5   :  { %7678 = sst [smem:[#allocation29_spill]] %s7644_s6 }
   0x6   :  { %7679 = sst [smem:[#allocation30_spill]] %s7646_s8 }
   0x7   :  { %7680 = sst [smem:[#allocation31_spill]] %s7647_s9 }
   0x8   :  { %7681 = sst [smem:[#allocation32_spill]] %s7648_s10 }
   0x9   :  { %7682 = sst [smem:[#allocation33_spill]] %s7649_s11 }
   0xa   :  { %7683 = sst [smem:[#allocation34_spill]] %s7650_s12 }
   0xb   :  { %7684 = sst [smem:[#allocation35_spill]] %s7651_s13 }
   0xc   :  { %7685 = sst [smem:[#allocation36_spill]] %s7652_s14 }
   0xd   :  { %7686 = sst [smem:[#allocation37_spill]] %s7653_s15 }
   0xe   :  { %20 = vsyncpa [#allocation4], 0 }
   0xf   :  { %22 = vsyncpa [#allocation4 + $0x1], 0 }
  0x10   :  { %23 = vsyncpa [#allocation5], 0 }
  0x11   :  { %25 = vsyncpa [#allocation5 + $0x1], 0  ;;  %s6735_s18 = smov 0   ;;  %s6737_s19 = smov 0  }
  0x12   :  { %s6739_s20 = smov 0   ;;  %s6741_s21 = smov 0  }
  0x13   :  { %s6743_s22 = smov 0   ;;  %s6745_s23 = smov 0  }
  0x14   :  { %s6747_s24 = smov 0   ;;  %s6749_s25 = smov 0  }
  0x15   :  { %s6751_s26 = smov 0   ;;  %s6753_s27 = smov 0  }
  0x16   :  { %s6755_s28 = smov 0  }
  0x17 LB: > { %7687 = sst [smem:[#allocation9_spill]] %s6597_s18  ;;  %s5426_s29 = sadd.s32 4294967295, %s6637_s28   ;;  %s6637_s28 = sphi %s6755_s28, %s31_s28   ;;  %s6633_s27 = sphi %s6753_s27, %s7748_s27   ;;  %s6629_s26 = sphi %s6751_s26, %s7747_s26   ;;  %s6625_s25 = sphi %s6749_s25, %s7746_s25   ;;  %s6621_s24 = sphi %s6747_s24, %s7745_s24   ;;  %s6617_s23 = sphi %s6745_s23, %s7744_s23   ;;  %s6613_s22 = sphi %s6743_s22, %s7743_s22   ;;  %s6609_s21 = sphi %s6741_s21, %s7742_s21   ;;  %s6605_s20 = sphi %s6739_s20, %s7741_s20   ;;  %s6601_s19 = sphi %s6737_s19, %s7740_s19   ;;  %s6597_s18 = sphi %s6735_s18, %s7739_s18  }
  0x18   : > { %7688 = sst [smem:[#allocation10_spill]] %s6601_s19  ;;  %s5427_s30 = sadd.s32 4294967294, %s6637_s28  }
  0x19   : > { %7689 = sst [smem:[#allocation11_spill]] %s6605_s20  ;;  %s40_s16 = sadd.s32 1, %s6629_s26 }
  0x1a   : > { %7690 = sst [smem:[#allocation12_spill]] %s6613_s22  ;;  %s43_s17 = sadd.s32 1, %s6633_s27 }
  0x1b   : > { %7691 = sst [smem:[#allocation13_spill]] %s6617_s23  ;;  %p41_p0 = scmp.ge.s32.totalorder %s40_s16, 4 }
  0x1c   : > { %7692 = sst [smem:[#allocation14_spill]] %s6625_s25  ;;  %s284_s15 = sadd.s32 1, %s6617_s23 }
  0x1d   : > { %7693 = sst [smem:[#allocation15_spill]] %s6629_s26  ;;  %p291_p1 = scmp.ne.s32.totalorder %s6617_s23, %s6613_s22 }
  0x1e   : > { %7694 = sst [smem:[#allocation16_spill]] %s6633_s27  ;;  %p292_p2 = scmp.eq.s32.totalorder %s6637_s28, 0 }
  0x1f   : > { %7695 = sst [smem:[#allocation17_spill]] %s6637_s28  ;;  %s7750_s16 = smov (%p41_p0, %s40_s16), 0 }
  0x20   : > { %7696 = sst [smem:[#allocation18_spill]] %s7750_s16  ;;  %s7752_s17 = smov (!%p41_p0, %s43_s17), %s6633_s27 }
  0x21   : > { %s281_s14 = ssub.s32 %s6629_s26, %s7750_s16  ;;  %p6801_p3 = por %p292_p2, %p291_p1 }
  0x22   : > { %p45_p4 = scmp.ge.s32.totalorder %s7752_s17, 2  ;;  %p282_p5 = scmp.eq.s32.totalorder %s281_s14, 0 }
  0x23   : > { %p297_p6 = scmp.ne.s32.totalorder %s6613_s22, %s6609_s21  ;;  %p298_p7 = scmp.eq.s32.totalorder %s5426_s29, 0 }
  0x24   : > { %s7754_s17 = smov (%p45_p4, %s7752_s17), 0  ;;  %s430_s10 = sadd.s32 1, %s6605_s20 }
  0x25   : > { %7698 = sst [smem:[#allocation19_spill]] %s7754_s17  ;;  %p6811_p8 = por %p298_p7, %p297_p6 }
  0x26   : > { %s6809_s12 = scalar_select %p282_p5, %s6617_s23, %s284_s15  }
  0x27   : > { %s427_s11 = ssub.s32 %s6633_s27, %s7754_s17  ;;  %p440_p10 = scmp.ne.s32.totalorder %s6605_s20, %s6601_s19 }
  0x28   : > { %7699 = sst [smem:[#allocation20_spill]] %s6809_s12  ;;  %p428_p9 = scmp.eq.s32.totalorder %s427_s11, 0 }
  0x29   : > { %p441_p11 = scmp.eq.s32.totalorder %s5426_s29, 7  ;;  %p446_p13 = scmp.ne.s32.totalorder %s6601_s19, %s6597_s18 }
  0x2a   : > { %s6821_s14 = scalar_select %p428_p9, %s6605_s20, %s430_s10  }
  0x2b   : > { %p6823_p12 = por %p441_p11, %p440_p10  ;;  %p447_p0 = scmp.eq.s32.totalorder %s5427_s30, 7 }
  0x2c   : > { %7701 = sst [smem:[#allocation21_spill]] %s6821_s14  ;;  %p6168_p1 = scmp.lt.s32.totalorder %s6637_s28, 8 }
  0x2d   : > { %s7702_s21 = scalar_select %p6823_p12, 1, 0 }
  0x2e   : > { %s536_s15 = sand.u32 1, %s6617_s23   ;;  %p6831_p2 = por %p447_p0, %p446_p13 }
  0x2f   : > { %7703 = sst [smem:[#allocation22_spill]] %s7702_s21  ;;  %s5430_s17 = sshll.u32 %s536_s15, 10 }
  0x30   : > { %s7704_s12 = scalar_select %p6831_p2, 1, 0 }
  0x31   : > { %s5776_s11 = sshll.u32 %s6629_s26, 14  ;;  %s7706_s9 = sld [smem:[#allocation31_spill]] }
  0x32   : > { %7705 = sst [smem:[#allocation23_spill]] %s7704_s12  ;;  %s540_s10 = scalar_lea.vmem [#allocation3], %s5430_s17 }
  0x33   : > { %s547_s14 = sshll.u32 %s540_s10, 4  ;;  %p6843_p4 = pnand %p6168_p1, %p6801_p3  ;;  %s6847_s14 = int_to_ptr.vmem [resolvable:$true] %s547_s14 }
  0x34   : > { %s6849_s26 = scalar_lea.sflag [#allocation4], %s536_s15 }
  0x35   : > { %p6487_p6 = pneg %p6843_p4 }
  0x37   : > { %s6839_s29 = scalar_lea.hbm %s7706_s9, %s5776_s11  ;;  %s6490_s17 = scalar_lea.hbm %s7706_s9, 65536 }
  0x38   : > { %s6485_s8 = scalar_lea.hbm %s6839_s29, 16384  ;;  %p6491_p3 = scmp.lt.u32.totalorder %s6839_s29, %s7706_s9 }
  0x39   : > { %p6486_p5 = scmp.ne.s32.totalorder %s6839_s29, %s6485_s8  ;;  %p6492_p10 = scmp.lt.u32.totalorder %s6490_s17, %s6485_s8 }
  0x3a   : > { %p6494_p13 = scmp.lt.u32.totalorder %s6485_s8, %s6839_s29 }
  0x3b   : > { %p6488_p7 = pnand %p6487_p6, %p6486_p5  ;;  %p6493_p11 = por %p6492_p10, %p6491_p3 }
  0x3d   : > { %p6489_p9 = pneg %p6488_p7  ;;  %p6495_p0 = por %p6494_p13, %p6493_p11 }
  0x3f   : > { %p6496_p1 = pnand %p6495_p0, %p6489_p9 }
  0x41   : > { %6499 = shalt.err (!%p6496_p1)
}
  0x42   : > { %s6500_s15 = scalar_lea.vmem %s6847_s14, 16384  ;;  %s6639_s27 = smov [#allocation3]  }
  0x43   : > { %p6501_p5 = scmp.ne.s32.totalorder %s6847_s14, %s6500_s15  ;;  %s6505_s13 = sshll.u32 %s6639_s27, 4  ;;  %s6506_s13 = int_to_ptr.vmem [resolvable:$false] %s6505_s13 }
  0x44   : > { %s6507_s11 = scalar_lea.vmem %s6506_s13, 32768  ;;  %p6508_p12 = scmp.lt.s32.totalorder %s6847_s14, %s6506_s13 }
  0x45   : > { %p6503_p7 = pnand %p6501_p5, %p6487_p6  ;;  %p6509_p3 = scmp.lt.s32.totalorder %s6507_s11, %s6500_s15 }
  0x47   : > { %p6504_p2 = pneg %p6503_p7  ;;  %p6510_p10 = por %p6509_p3, %p6508_p12 }
  0x49   : > { %p6511_p11 = pnand %p6510_p10, %p6504_p2 }
  0x4b   : > { %6514 = shalt.err (!%p6511_p11)
}
  0x4c   : > { %s6640_s8 = smov 64   ;;  %s6641_s17 = smov 4  }
  0x4d   : > { %6163 = dma.hbm_to_vmem [thread:$0]  (!%p6843_p4), %s6839_s29, 16384, %s6847_s14, %s6849_s26, %s6640_s8, %s6640_s8, %s6641_s17  }
  0x4e   : > { %p5433_p6 = scmp.ge.s32.totalorder %s6637_s28, 1  ;;  %p573_p9 = scmp.lt.s32.totalorder %s6637_s28, 9 }
  0x50   : > { %p574_p13 = pnand %p5433_p6, %p573_p9 }
  0x52   : > { %577 = sbr.rel (%p574_p13) target bundleno = 4512 (0x11a0), region = 80 }
  0x59   : > { %s579_s10 = sand.u32 1, %s6613_s22  }
  0x5a   : > { %s5434_s15 = sshll.u32 %s579_s10, 10  ;;  %s580_s27 = scalar_lea.sflag [#allocation4], %s579_s10 }
  0x5b   : > { %s6880_s13 = scalar_lea.vmem [#allocation3], %s5434_s15 }
  0x5c   : > { %7708 = sst [smem:[#allocation24_spill]] %s6880_s13 }
  0x5d   : > { %6588 = dma.done.wait (%p6811_p8), %s580_s27, 16384  }
  0x5e   : > { %6590 = vsyncadd (%p6811_p8), %s580_s27, 4294950912  ;;  %s7661_s26 = sand.u32 1, %s6601_s19   ;;  %p675_p12 = scmp.lt.s32.totalorder %s6625_s25, 1 }
  0x5f   : > { %s6890_s14 = sshll.u32 %s7661_s26, 3  ;;  %p679_p2 = scmp.lt.s32.totalorder %s6621_s24, 3 }
  0x60   : > { %s676_s29 = scalar_select %p675_p12, %s6625_s25, 1 }
  0x61   : > { %s6895_s30 = scalar_select %p679_p2, %s6621_s24, 3 }
  0x62   : > { %s5436_s16 = sshll.u32 %s676_s29, 3  ;;  %s7709_s0 = sld [smem:[#allocation25_spill]] }
  0x63   : > { %s6154_s10 = smul.u32 192, %s6895_s30  ;;  %s5777_s27 = sshll.u32 %s6895_s30, 6 }
  0x64   : > { %s6155_s15 = smul.u32 3, %s6895_s30  ;;  %s7710_s1 = sld [smem:[#allocation26_spill]] }
  0x65   : > { %s7711_s3 = sld [smem:[#allocation28_spill]]  ;;  %s7712_s2 = sld [smem:[#allocation27_spill]] }
  0x66   : > { %s5778_s20 = sshll.u32 %s6895_s30, 10  ;;  %s5442_s22 = sshll.u32 %s6895_s30, 4 }
  0x67   : > { %s6935_s18 = scalar_lea.vmem %s7645_s7, %s5778_s20  ;;  %s7715_s28 = sld [smem:[#allocation32_spill]] }
  0x68   : > { %s678_s17 = scalar_lea.vmem %s7709_s0, %s5436_s16  ;;  %s7716_s26 = sld [smem:[#allocation33_spill]] }
  0x69   : > { %s7717_s13 = sld [smem:[#allocation34_spill]]  ;;  %p5443_p8 = scmp.ne.s32.totalorder %s6621_s24, 0 }
  0x6a   : > { %s6906_s23 = scalar_lea.vmem %s7710_s1, %s6154_s10  ;;  %v725_v0 = vld [vmem:[%s678_s17] sm:$0xff] (!%p5443_p8) }
  0x6b   : > { %s6911_s12 = scalar_lea.vmem %s7711_s3, %s5777_s27  ;;  %s6916_s11 = scalar_lea.vmem %s7712_s2, %s6155_s15  ;;  %726 = vst [vmem:[#allocation2] sm:$0xff] (!%p5443_p8), %v725_v0 }
  0x6c   : > { %s7714_s2 = sld [smem:[#allocation30_spill]]  ;;  %s674_s3 = scalar_lea.vmem [#allocation6], %s6890_s14 }
  0x6d   : > { %s713_s21 = scalar_lea.vmem %s7715_s28, %s6895_s30  ;;  %724 = sbr.rel (%p5443_p8) target bundleno = 116 (0x74), region = 88 }
  0x6e   : > { %s716_s10 = scalar_lea.vmem %s7716_s26, %s6895_s30 }
  0x6f   : > { %s719_s6 = scalar_lea.vmem %s7717_s13, %s6895_s30 }
  0x72   : > { %s6940_s16 = scalar_lea.vmem %s7714_s2, %s5442_s22 }
  0x74 PF: > { %v6272_v1 = vld [vmem:[%s6906_s23 + $0x4] ss:$12 sps:$4 sm:$0xff]   ;;  %v6274_v2 = vld [vmem:[%s6906_s23] ss:$12 sps:$4 sm:$0xff]   ;;  %v6642_v3 = vmov 0   ;;  %v6643_v4 = vmov 0.0   ;;  %v763_v29 = vlaneseq  ;;  %s7719_s22 = scalar_lea.vmem %s7643_s5, %s6895_s30 }
  0x75   : > { %938 = vmatprep.mubr.bf16.mxu0 %v6642_v3  ;;  %6014 = vmatprep.subr.bf16.mxu1 %v6643_v4  ;;  %v6275_v5 = vld [vmem:[%s6906_s23 + $0x1c] ss:$12 sps:$4 sm:$0xff]   ;;  %vm6644_vm0 = vmmov 0   ;;  %v6277_v6 = vld [vmem:[%s6906_s23 + $0x18] ss:$12 sps:$4 sm:$0xff]   ;;  %vm987_vm1 = vcmask 130048  }
  0x76   : > { %906 = vmatprep.subr.bf16.mxu0 %v6272_v1  ;;  %6030 = vmatprep.mubr.msk.bf16.mxu1 %vm6644_vm0, %v6643_v4  ;;  %v6278_v7 = vld [vmem:[%s6906_s23 + $0x34] ss:$12 sps:$4 sm:$0xff]   ;;  %v6280_v8 = vld [vmem:[%s6906_s23 + $0x30] ss:$12 sps:$4 sm:$0xff]   ;;  %v6281_v9 = vld [vmem:[%s6906_s23 + $0x4c] ss:$12 sps:$4 sm:$0xff]  }
  0x77   : > { %907 = vmatpush1.bf16.msra.mxu0 %v6274_v2  ;;  %v6283_v10 = vld [vmem:[%s6906_s23 + $0x48] ss:$12 sps:$4 sm:$0xff]   ;;  %v6284_v12 = vld [vmem:[%s6906_s23 + $0x64] ss:$12 sps:$4 sm:$0xff]   ;;  %v6297_v13 = vld [vmem:[%s6906_s23 + $0x20] ss:$12 sps:$4 sm:$0xff]  }
  0x78   : > { %908 = vmatprep.subr.bf16.mxu0 %v6275_v5  ;;  %v6296_v11 = vld [vmem:[%s6906_s23 + $0x8] ss:$12 sps:$4 sm:$0xff]   ;;  %v6286_v14 = vld [vmem:[%s6906_s23 + $0x60] ss:$12 sps:$4 sm:$0xff]   ;;  %v6289_v16 = vld [vmem:[%s6906_s23 + $0x78] ss:$12 sps:$4 sm:$0xff]  }
  0x79   : > { %6015 = vmatpush3.bf16.msra.mxu1 %v6296_v11  ;;  %v6287_v15 = vld [vmem:[%s6906_s23 + $0x7c] ss:$12 sps:$4 sm:$0xff]   ;;  %v6298_v17 = vld [vmem:[%s6906_s23 + $0x38] ss:$12 sps:$4 sm:$0xff]   ;;  %v6290_v18 = vld [vmem:[%s6906_s23 + $0x94] ss:$12 sps:$4 sm:$0xff]  }
  0x7a   : > { %6016 = vmatprep.subr.bf16.mxu1 %v6643_v4  ;;  %v6299_v19 = vld [vmem:[%s6906_s23 + $0x50] ss:$12 sps:$4 sm:$0xff]   ;;  %v6293_v21 = vld [vmem:[%s6906_s23 + $0xac] ss:$12 sps:$4 sm:$0xff]   ;;  %v6300_v22 = vld [vmem:[%s6906_s23 + $0x68] ss:$12 sps:$4 sm:$0xff]  }
  0x7b   : > { %909 = vmatpush1.bf16.msra.mxu0 %v6277_v6  ;;  %v6292_v20 = vld [vmem:[%s6906_s23 + $0x90] ss:$12 sps:$4 sm:$0xff]   ;;  %v6295_v23 = vld [vmem:[%s6906_s23 + $0xa8] ss:$12 sps:$4 sm:$0xff]   ;;  %v727_v24 = vld [vmem:[#allocation2] sm:$0xff]  ;;  %v6997_v30 = vshrl.u32 %v763_v29, 7 }
  0x7c   : > { %910 = vmatprep.subr.bf16.mxu0 %v6278_v7  ;;  %v6301_v25 = vld [vmem:[%s6906_s23 + $0x80] ss:$12 sps:$4 sm:$0xff]   ;;  %v728_v26 = vpack.c.bf16 %v727_v24, %v727_v24  ;;  %v6302_v27 = vld [vmem:[%s6906_s23 + $0x98] ss:$12 sps:$4 sm:$0xff]   ;;  %v6303_v28 = vld [vmem:[%s6906_s23 + $0xb0] ss:$12 sps:$4 sm:$0xff]  }
  0x7d   : > { %6017 = vmatpush3.bf16.msra.mxu1 %v6297_v13  ;;  %v7000_v31 = vsub.s32 1, %v6997_v30  ;;  %v761_v32 = vld [vmem:[%s6916_s11] sm:$0x7]  ;;  %v7004_v33 = vsub.s32 0, %v6997_v30  ;;  %v7011_v41 = vsub.s32 2, %v6997_v30  ;;  %s6645_s0 = smov 112   ;;  %s7718_s11 = scalar_lea.vmem %s7642_s4, %s6895_s30 }
  0x7e   : > { %6018 = vmatprep.subr.bf16.mxu1 %v6643_v4  ;;  %vm1065_vm2 = vcmask 64512   ;;  %s6646_s1 = smov 96   ;;  %s6647_s2 = smov 80   ;;  %vm2342_vm3 = vcmask 261120   ;;  %vm2344_vm4 = vcmask 392192   ;;  %vm2346_vm5 = vcmask 523264  }
  0x7f   : > { %911 = vmatpush1.bf16.msra.mxu0 %v6280_v8  ;;  %v770_v34 = vrot.slane %v761_v32, %v7000_v31  ;;  %v766_v36 = vrot.slane %v761_v32, %v7004_v33  ;;  %v774_v43 = vrot.slane %v761_v32, %v7011_v41  ;;  %s6648_s19 = smov 64   ;;  %s6649_s23 = smov 48   ;;  %vm2348_vm6 = vcmask 654336  }
  0x80   : > { %912 = vmatprep.subr.bf16.mxu0 %v6281_v9  ;;  %s6650_s25 = smov 16   ;;  %s6651_s13 = smov 32   ;;  %vm2350_vm7 = vcmask 785408   ;;  %vm2352_vm8 = vcmask 916480  }
  0x81   : > { %6019 = vmatpush3.bf16.msra.mxu1 %v6298_v17  ;;  %s7720_s29 = sld [smem:[#allocation29_spill]]  ;;  %p5762_p4 = scmp.ne.s32.totalorder %s6621_s24, 3 }
  0x82   : > { %6020 = vmatprep.subr.bf16.mxu1 %v6643_v4  ;;  %s7722_s28 = sld [smem:[#allocation24_spill]]  ;;  %vm6653_vm9 = vmmov (!%p5762_p4), 0   ;;  %s7727_s26 = sld [smem:[#allocation36_spill]] (!%p5762_p4) }
  0x83   : > { %913 = vmatpush1.bf16.msra.mxu0 %v6283_v10 }
  0x84   : > { %914 = vmatprep.subr.bf16.mxu0 %v6284_v12 }
  0x85   : > { %6021 = vmatpush3.bf16.msra.mxu1 %v6299_v19 }
  0x86   : > { %6022 = vmatprep.subr.bf16.mxu1 %v6643_v4 }
  0x87   : > { %915 = vmatpush1.bf16.msra.mxu0 %v6286_v14  ;;  %s7721_s8 = scalar_lea.vmem %s7720_s29, %s6895_s30 }
  0x88   : > { %916 = vmatprep.subr.bf16.mxu0 %v6287_v15 }
  0x89   : > { %6023 = vmatpush3.bf16.msra.mxu1 %v6300_v22 }
  0x8a   : > { %6024 = vmatprep.subr.bf16.mxu1 %v6643_v4 }
  0x8b   : > { %917 = vmatpush1.bf16.msra.mxu0 %v6289_v16 }
  0x8c   : > { %918 = vmatprep.subr.bf16.mxu0 %v6290_v18 }
  0x8d   : > { %6025 = vmatpush3.bf16.msra.mxu1 %v6301_v25 }
  0x8e   : > { %6026 = vmatprep.subr.bf16.mxu1 %v6643_v4 }
  0x8f   : > { %919 = vmatpush1.bf16.msra.mxu0 %v6292_v20 }
  0x90   : > { %920 = vmatprep.subr.bf16.mxu0 %v6293_v21 }
  0x91   : > { %6027 = vmatpush3.bf16.msra.mxu1 %v6302_v27 }
  0x92   : > { %6028 = vmatprep.subr.bf16.mxu1 %v6643_v4 }
  0x93   : > { %921 = vmatpush1.bf16.msra.mxu0 %v6295_v23 }
  0x94   : > { %6074 = vmatprep.subr.mxu0 %v6643_v4 }
  0x95   : > { %6029 = vmatpush3.bf16.msra.mxu1 %v6303_v28 }
  0x96   : > { %939 = vmatmul.mubr.bf16.vlgmr.msra.gmra.mrb[0].mxu0 %v728_v26  ;;  %6034 = vmatprep.subr.mxu1 %v6643_v4 }
  0x97   : > { %6076 = vmatprep.mubr.msk.f32.mxu0 %vm6644_vm0, %v6643_v4 }
  0x98   : > { %6031 = vmatmul.mubr.bf16.vlgmr.msra.gmra.mrb[0].mxu1 %v728_v26 }
  0x99   : > { %6036 = vmatprep.mubr.msk.f32.mxu1 %vm6644_vm0, %v6643_v4 }
 0x169   : > { %v940_v35 = vpop.f32.mrb[0].mxu0 }
 0x16a   : > { %v942_v37 = vpop.f32.mrb[1].mxu0  ;;  %v7017_v42 = vadd.f32 %v940_v35, %v766_v36 }
 0x16b   : > { %v7008_v38 = vadd.f32 %v942_v37, %v770_v34  ;;  %v944_v39 = vpop.f32.mrb[2].mxu0  ;;  %v981_v44 = vpop.f32.mrb[0].mxu1 }
 0x16c   : > { %v945_v40 = vpop.f32.mrb[3].mxu0  ;;  %v7027_v45 = vadd.f32 %v981_v44, %v774_v43  ;;  %v6032_v46 = vpop.f32.mrb[1].mxu1 }
 0x16d   : > { %1152 = vrot.lane.b32.xlu1 %v7008_v38, %s6645_s0  ;;  %6035 = vmatpush3.xpose.msk.msra.mxu1 %vm987_vm1, %v7008_v38  ;;  %v984_v47 = vpop.f32.mrb[2].mxu1 }
 0x16e   : > { %6039 = vmatprep.subr.mxu1 %v6643_v4  ;;  %v6033_v48 = vpop.f32.mrb[3].mxu1 }
 0x170   : > { %6037 = vmatmul.mubr.msk.f32.vlgmr.msra.gmra.mrb[4].mxu1 %vm987_vm1, %v7017_v42 }
 0x171   : > { %1150 = vrot.lane.b32.xlu1 %v7017_v42, %s6645_s0  ;;  %6041 = vmatprep.mubr.msk.f32.mxu1 %vm6644_vm0, %v6643_v4 }
 0x172   : > { %6040 = vmatpush3.msra.mxu1 %v7027_v45 }
 0x173   : > { %6044 = vmatprep.subr.mxu1 %v6643_v4 }
 0x1df   : > { %v1153_v60 = vpop.permute.xlu1 %1152 }
 0x1e3   : > { %v1151_v62 = vpop.permute.xlu1 %1150 }
 0x243   : > { %v1060_v49 = vpop.f32.mrb[4].mxu1 }
 0x244   : > { %v1064_v50 = vmul.f32 0.25, %v1060_v49  ;;  %v6038_v51 = vpop.f32.mrb[5].mxu1 }
 0x246   : > { %v1066_v52 = vsel %vm1065_vm2, %v1064_v50, -inf }
 0x247   : > { %1067 = vmax.xlane.f32.xlu0 %v1066_v52 }
 0x2d4   : > { %v1068_v53 = vpop.xlane.xlu0 %1067 }
 0x2d5   : > { %v1069_v54 = vsub.f32 %v1064_v50, %v1068_v53 }
 0x2d7   : > { %v1070_v55 = vmul.f32 1.442695, %v1069_v54 }
 0x2d9   : > { %6440 = vpow2.f32 %v1070_v55 }
 0x2e3   : > { %v6441_v56 = vpop.eup %6440 }
 0x2e4   : > { %v1072_v57 = vsel %vm1065_vm2, %v6441_v56, 0.0 }
 0x2e5   : > { %1073 = vadd.xlane.f32.xlu0 %v1072_v57 }
 0x372   : > { %v1074_v58 = vpop.xlane.xlu0 %1073 }
 0x373   : > { %6442 = vrcp.f32 %v1074_v58 }
 0x37d   : > { %v6443_v59 = vpop.eup %6442 }
 0x37e   : > { %v1076_v61 = vmul.f32 %v6443_v59, %v6441_v56 }
 0x380   : > { %6042 = vmatmul.mubr.msk.f32.vlgmr.msra.gmra.mrb[6].mxu1 %vm1065_vm2, %v1076_v61 }
 0x381   : > { %6045 = vmatpush3.xpose.msk.msra.mxu1 %vm987_vm1, %v1153_v60  ;;  %6046 = vmatprep.mubr.msk.f32.mxu1 %vm6644_vm0, %v6643_v4 }
 0x382   : > { %6049 = vmatprep.subr.mxu1 %v6643_v4 }
 0x384   : > { %6047 = vmatmul.mubr.msk.f32.vlgmr.msra.gmra.mrb[8].mxu1 %vm987_vm1, %v1151_v62 }
 0x385   : > { %6051 = vmatprep.mubr.msk.f32.mxu1 %vm6644_vm0, %v6643_v4 }
 0x453   : > { %v7041_v63 = vpop.f32.mrb[6].mxu1 }
 0x454   : > { %v6043_v0 = vpop.f32.mrb[7].mxu1 }
 0x457   : > { %v1224_v1 = vpop.f32.mrb[8].mxu1 }
 0x458   : > { %v1228_v2 = vmul.f32 0.25, %v1224_v1  ;;  %v6048_v5 = vpop.f32.mrb[9].mxu1 }
 0x45a   : > { %v1229_v6 = vsel %vm1065_vm2, %v1228_v2, -inf }
 0x45b   : > { %1230 = vmax.xlane.f32.xlu0 %v1229_v6 }
 0x471   : > { %1241 = vrot.lane.b32.xlu0 %v7027_v45, %s6645_s0 }
 0x475   : > { %1319 = vrot.lane.b32.xlu0 %v7008_v38, %s6646_s1 }
 0x479   : > { %1317 = vrot.lane.b32.xlu0 %v7017_v42, %s6646_s1 }
 0x4e8   : > { %v1231_v7 = vpop.xlane.xlu0 %1230 }
 0x4e9   : > { %v1232_v8 = vsub.f32 %v1228_v2, %v1231_v7 }
 0x4eb   : > { %v1233_v9 = vmul.f32 1.442695, %v1232_v8 }
 0x4ec   : > { %v1242_v10 = vpop.permute.xlu0 %1241 }
 0x4ed   : > { %6444 = vpow2.f32 %v1233_v9  ;;  %6050 = vmatpush3.msra.mxu1 %v1242_v10 }
 0x4ee   : > { %6054 = vmatprep.subr.mxu1 %v6643_v4 }
 0x4f0   : > { %v1320_v15 = vpop.permute.xlu0 %1319 }
 0x4f4   : > { %v1318_v17 = vpop.permute.xlu0 %1317 }
 0x4f7   : > { %v6445_v11 = vpop.eup %6444 }
 0x4f8   : > { %v1235_v12 = vsel %vm1065_vm2, %v6445_v11, 0.0 }
 0x4f9   : > { %1236 = vadd.xlane.f32.xlu1 %v1235_v12 }
 0x50a   : > { %1407 = vrot.lane.b32.xlu1 %v7027_v45, %s6646_s1 }
 0x50e   : > { %1485 = vrot.lane.b32.xlu1 %v7008_v38, %s6647_s2 }
 0x512   : > { %1483 = vrot.lane.b32.xlu1 %v7017_v42, %s6647_s2 }
 0x516   : > { %1649 = vrot.lane.b32.xlu1 %v7017_v42, %s6648_s19 }
 0x51a   : > { %1817 = vrot.lane.b32.xlu1 %v7008_v38, %s6649_s23 }
 0x51e   : > { %1815 = vrot.lane.b32.xlu1 %v7017_v42, %s6649_s23 }
 0x586   : > { %v1237_v13 = vpop.xlane.xlu1 %1236 }
 0x587   : > { %6446 = vrcp.f32 %v1237_v13 }
 0x58a   : > { %v1408_v18 = vpop.permute.xlu1 %1407 }
 0x58e   : > { %v1486_v25 = vpop.permute.xlu1 %1485 }
 0x591   : > { %v6447_v14 = vpop.eup %6446 }
 0x592   : > { %v1239_v16 = vmul.f32 %v6447_v14, %v6445_v11  ;;  %v1484_v26 = vpop.permute.xlu1 %1483 }
 0x594   : > { %6052 = vmatmul.mubr.msk.f32.vlgmr.msra.gmra.mrb[10].mxu1 %vm1065_vm2, %v1239_v16 }
 0x595   : > { %6055 = vmatpush3.xpose.msk.msra.mxu1 %vm987_vm1, %v1320_v15  ;;  %6056 = vmatprep.mubr.msk.f32.mxu1 %vm6644_vm0, %v6643_v4 }
 0x596   : > { %6059 = vmatprep.subr.mxu1 %v6643_v4  ;;  %v1650_v27 = vpop.permute.xlu1 %1649 }
 0x598   : > { %6057 = vmatmul.mubr.msk.f32.vlgmr.msra.gmra.mrb[12].mxu1 %vm987_vm1, %v1318_v17 }
 0x599   : > { %6060 = vmatpush3.msra.mxu1 %v1408_v18  ;;  %6061 = vmatprep.mubr.msk.f32.mxu1 %vm6644_vm0, %v6643_v4 }
 0x59a   : > { %6064 = vmatprep.subr.mxu1 %v6643_v4  ;;  %v1818_v35 = vpop.permute.xlu1 %1817 }
 0x59e   : > { %v1816_v36 = vpop.permute.xlu1 %1815 }
 0x667   : > { %v7073_v19 = vpop.f32.mrb[10].mxu1 }
 0x668   : > { %v6053_v20 = vpop.f32.mrb[11].mxu1 }
 0x66b   : > { %v1391_v21 = vpop.f32.mrb[12].mxu1 }
 0x66c   : > { %v1395_v22 = vmul.f32 0.25, %v1391_v21  ;;  %v6058_v23 = vpop.f32.mrb[13].mxu1 }
 0x66e   : > { %v1396_v24 = vsel %vm1065_vm2, %v1395_v22, -inf }
 0x66f   : > { %1397 = vmax.xlane.f32.xlu0 %v1396_v24 }
 0x685   : > { %1651 = vrot.lane.b32.xlu0 %v7008_v38, %s6648_s19 }
 0x689   : > { %2147 = vrot.lane.b32.xlu0 %v7017_v42, %s6650_s25 }
 0x6fc   : > { %v1398_v28 = vpop.xlane.xlu0 %1397 }
 0x6fd   : > { %v1399_v29 = vsub.f32 %v1395_v22, %v1398_v28 }
 0x6ff   : > { %v1400_v32 = vmul.f32 1.442695, %v1399_v29 }
 0x700   : > { %v1652_v34 = vpop.permute.xlu0 %1651 }
 0x701   : > { %6448 = vpow2.f32 %v1400_v32  ;;  %6075 = vmatpush3.xpose.msk.msra.mxu0 %vm987_vm1, %v1652_v34 }
 0x702   : > { %6084 = vmatprep.subr.mxu0 %v6643_v4 }
 0x704   : > { %6077 = vmatmul.mubr.msk.f32.vlgmr.msra.gmra.mrb[4].mxu0 %vm987_vm1, %v1650_v27 }
 0x705   : > { %6085 = vmatpush3.xpose.msk.msra.mxu0 %vm987_vm1, %v1818_v35  ;;  %6086 = vmatprep.mubr.msk.f32.mxu0 %vm6644_vm0, %v6643_v4 }
 0x706   : > { %6094 = vmatprep.subr.mxu0 %v6643_v4 }
 0x708   : > { %6087 = vmatmul.mubr.msk.f32.vlgmr.msra.gmra.mrb[6].mxu0 %vm987_vm1, %v1816_v36 }
 0x709   : > { %6096 = vmatprep.mubr.msk.f32.mxu0 %vm6644_vm0, %v6643_v4 }
 0x70b   : > { %v6449_v37 = vpop.eup %6448 }
 0x70c   : > { %v1402_v39 = vsel %vm1065_vm2, %v6449_v37, 0.0 }
 0x70d   : > { %1403 = vadd.xlane.f32.xlu1 %v1402_v39 }
 0x71e   : > { %1983 = vrot.lane.b32.xlu1 %v7008_v38, %s6651_s13 }
 0x722   : > { %1981 = vrot.lane.b32.xlu1 %v7017_v42, %s6651_s13 }
 0x726   : > { %2149 = vrot.lane.b32.xlu1 %v7008_v38, %s6650_s25  ;;  %v2148_v38 = vpop.permute.xlu0 %2147 }
 0x79a   : > { %v1404_v40 = vpop.xlane.xlu1 %1403 }
 0x79b   : > { %6450 = vrcp.f32 %v1404_v40 }
 0x79e   : > { %v1984_v43 = vpop.permute.xlu1 %1983 }
 0x79f   : > { %6095 = vmatpush3.xpose.msk.msra.mxu0 %vm987_vm1, %v1984_v43 }
 0x7a0   : > { %6104 = vmatprep.subr.mxu0 %v6643_v4 }
 0x7a2   : > { %v1982_v44 = vpop.permute.xlu1 %1981 }
 0x7a3   : > { %6097 = vmatmul.mubr.msk.f32.vlgmr.msra.gmra.mrb[8].mxu0 %vm987_vm1, %v1982_v44 }
 0x7a4   : > { %6106 = vmatprep.mubr.msk.f32.mxu0 %vm6644_vm0, %v6643_v4 }
 0x7a5   : > { %v6451_v46 = vpop.eup %6450 }
 0x7a6   : > { %v1406_v47 = vmul.f32 %v6451_v46, %v6449_v37  ;;  %v2150_v48 = vpop.permute.xlu1 %2149 }
 0x7a7   : > { %6105 = vmatpush3.xpose.msk.msra.mxu0 %vm987_vm1, %v2150_v48 }
 0x7a8   : > { %6062 = vmatmul.mubr.msk.f32.vlgmr.msra.gmra.mrb[14].mxu1 %vm1065_vm2, %v1406_v47  ;;  %6114 = vmatprep.subr.bf16.mxu0 %v6643_v4 }
 0x7a9   : > { %6065 = vmatpush3.xpose.msk.msra.mxu1 %vm987_vm1, %v1486_v25  ;;  %6066 = vmatprep.mubr.msk.f32.mxu1 %vm6644_vm0, %v6643_v4 }
 0x7aa   : > { %6107 = vmatmul.mubr.msk.f32.vlgmr.msra.gmra.mrb[10].mxu0 %vm987_vm1, %v2148_v38  ;;  %6069 = vmatprep.subr.mxu1 %v6643_v4 }
 0x7ab   : > { %6130 = vmatprep.mubr.msk.bf16.mxu0 %vm6644_vm0, %v6643_v4 }
 0x7ac   : > { %6067 = vmatmul.mubr.msk.f32.vlgmr.msra.gmra.mrb[16].mxu1 %vm987_vm1, %v1484_v26 }
 0x7ad   : > { %6071 = vmatprep.mubr.msk.f32.mxu1 %vm6644_vm0, %v6643_v4 }
 0x7d7   : > { %v1723_v42 = vpop.f32.mrb[4].mxu0 }
 0x7d8   : > { %v1727_v49 = vmul.f32 0.25, %v1723_v42  ;;  %v6078_v50 = vpop.f32.mrb[5].mxu0 }
 0x7da   : > { %v1728_v51 = vsel %vm1065_vm2, %v1727_v49, -inf }
 0x7db   : > { %1729 = vmax.xlane.f32.xlu0 %v1728_v51  ;;  %v1889_v52 = vpop.f32.mrb[6].mxu0 }
 0x7dc   : > { %v1893_v53 = vmul.f32 0.25, %v1889_v52  ;;  %v6088_v54 = vpop.f32.mrb[7].mxu0 }
 0x7de   : > { %v1894_v55 = vsel %vm1065_vm2, %v1893_v53, -inf }
 0x7df   : > { %1895 = vmax.xlane.f32.xlu0 %v1894_v55 }
 0x868   : > { %v1730_v56 = vpop.xlane.xlu0 %1729 }
 0x869   : > { %v1731_v57 = vsub.f32 %v1727_v49, %v1730_v56 }
 0x86b   : > { %v1732_v59 = vmul.f32 1.442695, %v1731_v57 }
 0x86c   : > { %v1896_v58 = vpop.xlane.xlu0 %1895 }
 0x86d   : > { %v1897_v60 = vsub.f32 %v1893_v53, %v1896_v58  ;;  %6452 = vpow2.f32 %v1732_v59  ;;  %v6304_v58 = vld [vmem:[%s6911_s12] sm:$0xff]   ;;  %v6305_v59 = vld [vmem:[%s6911_s12 + $0x8] sm:$0xff]  }
 0x86e   : > { %6115 = vmatpush3.bf16.msra.mxu0 %v6304_v58 }
 0x86f   : > { %v1898_v0 = vmul.f32 1.442695, %v1897_v60  ;;  %6116 = vmatprep.subr.bf16.mxu0 %v6643_v4  ;;  %v6306_v60 = vld [vmem:[%s6911_s12 + $0x10] sm:$0xff]  }
 0x871   : > { %6454 = vpow2.f32 %v1898_v0  ;;  %v6309_v0 = vld [vmem:[%s6911_s12 + $0x28] sm:$0xff]  }
 0x872   : > { %6117 = vmatpush3.bf16.msra.mxu0 %v6305_v59 }
 0x873   : > { %6118 = vmatprep.subr.bf16.mxu0 %v6643_v4 }
 0x876   : > { %v2055_v61 = vpop.f32.mrb[8].mxu0  ;;  %6119 = vmatpush3.bf16.msra.mxu0 %v6306_v60 }
 0x877   : > { %v6098_v62 = vpop.f32.mrb[9].mxu0  ;;  %v6453_v12 = vpop.eup %6452  ;;  %v2059_v13 = vmul.f32 0.25, %v2055_v61  ;;  %6120 = vmatprep.subr.bf16.mxu0 %v6643_v4  ;;  %v6307_v61 = vld [vmem:[%s6911_s12 + $0x18] sm:$0xff]  }
 0x878   : > { %v1734_v15 = vsel %vm1065_vm2, %v6453_v12, 0.0  ;;  %v6308_v62 = vld [vmem:[%s6911_s12 + $0x20] sm:$0xff]  }
 0x879   : > { %v2060_v16 = vsel %vm1065_vm2, %v2059_v13, -inf }
 0x87a   : > { %6121 = vmatpush3.bf16.msra.mxu0 %v6307_v61 }
 0x87b   : > { %v1479_v1 = vpop.f32.mrb[14].mxu1  ;;  %v6455_v17 = vpop.eup %6454  ;;  %6122 = vmatprep.subr.bf16.mxu0 %v6643_v4 }
 0x87c   : > { %v6063_v2 = vpop.f32.mrb[15].mxu1  ;;  %v1900_v18 = vsel %vm1065_vm2, %v6455_v17, 0.0 }
 0x87d   : > { %v2221_v5 = vpop.f32.mrb[10].mxu0 }
 0x87e   : > { %v2225_v6 = vmul.f32 0.25, %v2221_v5  ;;  %v6108_v7 = vpop.f32.mrb[11].mxu0  ;;  %6123 = vmatpush3.bf16.msra.mxu0 %v6308_v62 }
 0x87f   : > { %v1557_v8 = vpop.f32.mrb[16].mxu1  ;;  %6124 = vmatprep.subr.bf16.mxu0 %v6643_v4 }
 0x880   : > { %v1561_v9 = vmul.f32 0.25, %v1557_v8  ;;  %v6068_v10 = vpop.f32.mrb[17].mxu1  ;;  %v2226_v11 = vsel %vm1065_vm2, %v2225_v6, -inf }
 0x881   : > { %2227 = vmax.xlane.f32.xlu0 %v2226_v11 }
 0x882   : > { %v1562_v14 = vsel %vm1065_vm2, %v1561_v9, -inf  ;;  %6125 = vmatpush3.bf16.msra.mxu0 %v6309_v0 }
 0x883   : > { %1563 = vmax.xlane.f32.xlu1 %v1562_v14  ;;  %6126 = vmatprep.subr.bf16.mxu0 %v6643_v4 }
 0x885   : > { %1735 = vadd.xlane.f32.xlu0 %v1734_v15 }
 0x887   : > { %2061 = vmax.xlane.f32.xlu1 %v2060_v16 }
 0x88b   : > { %1901 = vadd.xlane.f32.xlu1 %v1900_v18 }
 0x90e   : > { %v2228_v20 = vpop.xlane.xlu0 %2227 }
 0x90f   : > { %v2229_v21 = vsub.f32 %v2225_v6, %v2228_v20  ;;  %v6311_v6 = vld [vmem:[%s6911_s12 + $0x38] sm:$0xff]  }
 0x910   : > { %v1564_v22 = vpop.xlane.xlu1 %1563 }
 0x911   : > { %v2230_v23 = vmul.f32 1.442695, %v2229_v21  ;;  %v1565_v34 = vsub.f32 %v1561_v9, %v1564_v22 }
 0x912   : > { %v1736_v39 = vpop.xlane.xlu0 %1735 }
 0x913   : > { %6456 = vpow2.f32 %v2230_v23  ;;  %v1566_v35 = vmul.f32 1.442695, %v1565_v34 }
 0x914   : > { %v2062_v24 = vpop.xlane.xlu1 %2061 }
 0x915   : > { %v2063_v25 = vsub.f32 %v2059_v13, %v2062_v24 }
 0x917   : > { %v2064_v26 = vmul.f32 1.442695, %v2063_v25 }
 0x919   : > { %6458 = vpow2.f32 %v2064_v26 }
 0x91a   : > { %6460 = vpow2.f32 %v1566_v35 }
 0x91d   : > { %v6457_v27 = vpop.eup %6456 }
 0x91e   : > { %v2232_v28 = vsel %vm1065_vm2, %v6457_v27, 0.0 }
 0x91f   : > { %2233 = vadd.xlane.f32.xlu1 %v2232_v28 }
 0x923   : > { %v6459_v29 = vpop.eup %6458 }
 0x924   : > { %v2066_v32 = vsel %vm1065_vm2, %v6459_v29, 0.0  ;;  %v6461_v36 = vpop.eup %6460 }
 0x925   : > { %2067 = vadd.xlane.f32.xlu0 %v2066_v32  ;;  %v1568_v37 = vsel %vm1065_vm2, %v6461_v36, 0.0 }
 0x930   : > { %1739 = vrot.lane.b32.xlu1 %v7027_v45, %s6648_s19 }
 0x93b   : > { %1573 = vrot.lane.b32.xlu0 %v7027_v45, %s6647_s2 }
 0x93f   : > { %2071 = vrot.lane.b32.xlu0 %v7027_v45, %s6651_s13 }
 0x943   : > { %2314 = vrot.lane.b32.xlu0 %v7073_v19, %s6650_s25  ;;  %v1902_v19 = vpop.xlane.xlu1 %1901 }
 0x954   : > { %1569 = vadd.xlane.f32.xlu1 %v1568_v37 }
 0x965   : > { %1905 = vrot.lane.b32.xlu1 %v7027_v45, %s6649_s23 }
 0x969   : > { %2237 = vrot.lane.b32.xlu1 %v7027_v45, %s6650_s25 }
 0x96d   : > { %2318 = vrot.lane.b32.xlu1 %v1479_v1, %s6651_s13  ;;  %v6310_v1 = vld [vmem:[%s6911_s12 + $0x30] sm:$0xff]   ;;  %s7726_s12 = sld [smem:[#allocation35_spill]] (!%p5762_p4) }
 0x96e   : > { %6127 = vmatpush3.bf16.msra.mxu0 %v6310_v1 }
 0x96f   : > { %6128 = vmatprep.subr.bf16.mxu0 %v6643_v4 }
 0x972   : > { %6129 = vmatpush3.bf16.msra.mxu0 %v6311_v6 }
 0x9ac   : > { %v2234_v44 = vpop.xlane.xlu1 %2233 }
 0x9b0   : > { %v1740_v46 = vpop.permute.xlu1 %1739 }
 0x9b2   : > { %v2068_v40 = vpop.xlane.xlu0 %2067 }
 0x9b6   : > { %v1574_v43 = vpop.permute.xlu0 %1573 }
 0x9b7   : > { %6070 = vmatpush3.msra.mxu1 %v1574_v43  ;;  %v2496_v43 = vld [vmem:[%s6935_s18] sm:$0xff] }
 0x9b8   : > { %6079 = vmatprep.subr.mxu1 %v6643_v4 }
 0x9ba   : > { %v2072_v53 = vpop.permute.xlu0 %2071 }
 0x9be   : > { %v2315_v15 = vpop.permute.xlu0 %2314 }
 0x9bf   : > { %v2341_v18 = vsel %vm987_vm1, %v7041_v63, %v2315_v15  ;;  %v5492_v63 = vld [vmem:[%s7718_s11] ss:$0 sm:$0xff] }
 0x9c0   : > { %v2560_v15 = vld [vmem:[%s6935_s18 + $0x200] sm:$0xff] }
 0x9e1   : > { %v1570_v47 = vpop.xlane.xlu1 %1569 }
 0x9e2   : > { %6462 = vrcp.f32 %v1570_v47 }
 0x9e3   : > { %6464 = vrcp.f32 %v1736_v39  ;;  %v6476_v39 = vld [vmem:[#allocation2] sm:$0xff] }
 0x9e4   : > { %6466 = vrcp.f32 %v1902_v19  ;;  %v2504_v19 = vld [vmem:[%s6935_s18 + $0x40] sm:$0xff] }
 0x9e5   : > { %6468 = vrcp.f32 %v2068_v40  ;;  %v1906_v50 = vpop.permute.xlu1 %1905  ;;  %v5504_v47 = vcombine.high %v2496_v43, %v2504_v19 }
 0x9e6   : > { %6470 = vrcp.f32 %v2234_v44  ;;  %v2497_v44 = vld [vmem:[%s6935_s18 + $0x8] sm:$0xff] }
 0x9e9   : > { %v2238_v56 = vpop.permute.xlu1 %2237 }
 0x9ec   : > { %v6463_v48 = vpop.eup %6462 }
 0x9ed   : > { %v1572_v38 = vmul.f32 %v6463_v48, %v6461_v36  ;;  %v6465_v42 = vpop.eup %6464  ;;  %v2505_v48 = vld [vmem:[%s6935_s18 + $0x48] sm:$0xff] }
 0x9ee   : > { %v1738_v45 = vmul.f32 %v6465_v42, %v6453_v12  ;;  %v6467_v49 = vpop.eup %6466  ;;  %v2520_v42 = vld [vmem:[%s6935_s18 + $0xc0] sm:$0xff] }
 0x9ef   : > { %6072 = vmatmul.mubr.msk.f32.vlgmr.msra.gmra.mrb[18].mxu1 %vm1065_vm2, %v1572_v38  ;;  %v1904_v51 = vmul.f32 %v6467_v49, %v6455_v17  ;;  %v6469_v52 = vpop.eup %6468  ;;  %v2512_v38 = vld [vmem:[%s6935_s18 + $0x80] sm:$0xff]  ;;  %v5506_v49 = vcombine.high %v2497_v44, %v2505_v48 }
 0x9f0   : > { %6080 = vmatpush3.msra.mxu1 %v1740_v46  ;;  %6081 = vmatprep.mubr.msk.f32.mxu1 %vm6644_vm0, %v6643_v4  ;;  %v2070_v54 = vmul.f32 %v6469_v52, %v6459_v29  ;;  %v6471_v55 = vpop.eup %6470  ;;  %v5503_v46 = vcombine.low %v2496_v43, %v2504_v19  ;;  %v2521_v52 = vld [vmem:[%s6935_s18 + $0xc8] sm:$0xff]  ;;  %v5519_v58 = vcombine.low %v2512_v38, %v2520_v42  ;;  %v2608_v19 = vld [vmem:[%s6935_s18 + $0x380] sm:$0xff] }
 0x9f1   : > { %6089 = vmatprep.subr.mxu1 %v6643_v4  ;;  %v2236_v57 = vmul.f32 %v6471_v55, %v6457_v27  ;;  %v2536_v55 = vld [vmem:[%s6935_s18 + $0x140] sm:$0xff]  ;;  %3389 = vmatprep.subr.bf16.mxu0 %v5506_v49  ;;  %v2498_v49 = vld [vmem:[%s6935_s18 + $0x10] sm:$0xff] }
 0x9f3   : > { %6082 = vmatmul.mubr.msk.f32.vlgmr.msra.gmra.mrb[20].mxu1 %vm1065_vm2, %v1738_v45  ;;  %v5505_v45 = vcombine.low %v2497_v44, %v2505_v48  ;;  %v2616_v44 = vld [vmem:[%s6935_s18 + $0x3c0] sm:$0xff]  ;;  %v2617_v48 = vld [vmem:[%s6935_s18 + $0x3c8] sm:$0xff] }
 0x9f4   : > { %6090 = vmatpush3.msra.mxu1 %v1906_v50  ;;  %6091 = vmatprep.mubr.msk.f32.mxu1 %vm6644_vm0, %v6643_v4  ;;  %v5520_v50 = vcombine.high %v2512_v38, %v2520_v42  ;;  %v5615_v38 = vcombine.low %v2608_v19, %v2616_v44 }
 0x9f5   : > { %6099 = vmatprep.subr.mxu1 %v6643_v4 }
 0x9f7   : > { %6092 = vmatmul.mubr.msk.f32.vlgmr.msra.gmra.mrb[22].mxu1 %vm1065_vm2, %v1904_v51  ;;  %v2513_v51 = vld [vmem:[%s6935_s18 + $0x88] sm:$0xff] }
 0x9f8   : > { %6100 = vmatpush3.msra.mxu1 %v2072_v53  ;;  %6101 = vmatprep.mubr.msk.f32.mxu1 %vm6644_vm0, %v6643_v4  ;;  %v2528_v53 = vld [vmem:[%s6935_s18 + $0x100] sm:$0xff]  ;;  %v5521_v59 = vcombine.low %v2513_v51, %v2521_v52 }
 0x9f9   : > { %6109 = vmatprep.subr.mxu1 %v6643_v4  ;;  %v5536_v60 = vcombine.high %v2528_v53, %v2536_v55  ;;  %v5535_v62 = vcombine.low %v2528_v53, %v2536_v55 }
 0x9fb   : > { %6102 = vmatmul.mubr.msk.f32.vlgmr.msra.gmra.mrb[24].mxu1 %vm1065_vm2, %v2070_v54  ;;  %v5522_v54 = vcombine.high %v2513_v51, %v2521_v52  ;;  %v2499_v51 = vld [vmem:[%s6935_s18 + $0x18] sm:$0xff] }
 0x9fc   : > { %6110 = vmatpush3.msra.mxu1 %v2238_v56  ;;  %6111 = vmatprep.mubr.msk.f32.mxu1 %vm6644_vm0, %v6643_v4  ;;  %v2319_v4 = vpop.permute.xlu1 %2318  ;;  %v2529_v56 = vld [vmem:[%s6935_s18 + $0x108] sm:$0xff] }
 0x9fd   : > { %v2343_v20 = vsel %vm2342_vm3, %v2341_v18, %v2319_v4  ;;  %3348 = vmatprep.subr.bf16.mxu1 %v5504_v47  ;;  %v2568_v4 = vld [vmem:[%s6935_s18 + $0x240] sm:$0xff]  ;;  %v2569_v18 = vld [vmem:[%s6935_s18 + $0x248] sm:$0xff]  ;;  %v5616_v47 = vcombine.high %v2608_v19, %v2616_v44  ;;  %v2587_v19 = vld [vmem:[%s6935_s18 + $0x2d8] sm:$0xff] }
 0x9ff   : > { %6112 = vmatmul.mubr.msk.f32.vlgmr.msra.gmra.mrb[26].mxu1 %vm1065_vm2, %v2236_v57  ;;  %v2537_v57 = vld [vmem:[%s6935_s18 + $0x148] sm:$0xff] }
 0xa00   : > { %3380 = vmatprep.mubr.bf16.mxu1 %v6642_v3  ;;  %3349 = vmatpush1.bf16.msra.mxu1 %v5503_v46  ;;  %v5538_v61 = vcombine.high %v2529_v56, %v2537_v57  ;;  %v5537_v0 = vcombine.low %v2529_v56, %v2537_v57  ;;  %v2609_v46 = vld [vmem:[%s6935_s18 + $0x388] sm:$0xff] }
 0xa01   : > { %3350 = vmatprep.subr.bf16.mxu1 %v5520_v50  ;;  %v5617_v42 = vcombine.low %v2609_v46, %v2617_v48  ;;  %v2506_v50 = vld [vmem:[%s6935_s18 + $0x50] sm:$0xff] }
 0xa02   : > { %v5507_v52 = vcombine.low %v2498_v49, %v2506_v50  ;;  %v5508_v53 = vcombine.high %v2498_v49, %v2506_v50  ;;  %v2603_v49 = vld [vmem:[%s6935_s18 + $0x358] sm:$0xff] }
 0xa04   : > { %3351 = vmatpush1.bf16.msra.mxu1 %v5519_v58 }
 0xa05   : > { %3352 = vmatprep.subr.bf16.mxu1 %v5536_v60 }
 0xa08   : > { %3353 = vmatpush1.bf16.msra.mxu1 %v5535_v62 }
 0xac2   : > { %v1645_v2 = vpop.f32.mrb[18].mxu1 }
 0xac3   : > { %2322 = vrot.lane.b32.xlu0 %v1645_v2, %s6649_s23  ;;  %v6073_v5 = vpop.f32.mrb[19].mxu1 }
 0xac6   : > { %v1811_v7 = vpop.f32.mrb[20].mxu1 }
 0xac7   : > { %2326 = vrot.lane.b32.xlu1 %v1811_v7, %s6648_s19  ;;  %v6083_v8 = vpop.f32.mrb[21].mxu1  ;;  %v2544_v7 = vld [vmem:[%s6935_s18 + $0x180] sm:$0xff] }
 0xac8   : > { %v2552_v8 = vld [vmem:[%s6935_s18 + $0x1c0] sm:$0xff] }
 0xaca   : > { %v1977_v9 = vpop.f32.mrb[22].mxu1 }
 0xacb   : > { %2330 = vrot.lane.b32.xlu0 %v1977_v9, %s6647_s2  ;;  %v6093_v10 = vpop.f32.mrb[23].mxu1  ;;  %v2545_v9 = vld [vmem:[%s6935_s18 + $0x188] sm:$0xff] }
 0xacc   : > { %v5552_v10 = vcombine.high %v2544_v7, %v2552_v8 }
 0xace   : > { %v2143_v11 = vpop.f32.mrb[24].mxu1  ;;  %3354 = vmatprep.subr.bf16.mxu1 %v5552_v10 }
 0xacf   : > { %2334 = vrot.lane.b32.xlu1 %v2143_v11, %s6646_s1  ;;  %v6103_v12 = vpop.f32.mrb[25].mxu1  ;;  %v2553_v11 = vld [vmem:[%s6935_s18 + $0x1c8] sm:$0xff] }
 0xad0   : > { %v5551_v12 = vcombine.low %v2544_v7, %v2552_v8  ;;  %v2515_v7 = vld [vmem:[%s6935_s18 + $0x98] sm:$0xff] }
 0xad1   : > { %v2523_v8 = vld [vmem:[%s6935_s18 + $0xd8] sm:$0xff] }
 0xad2   : > { %v2309_v13 = vpop.f32.mrb[26].mxu1  ;;  %3355 = vmatpush1.bf16.msra.mxu1 %v5551_v12  ;;  %v5526_v12 = vcombine.high %v2515_v7, %v2523_v8 }
 0xad3   : > { %2338 = vrot.lane.b32.xlu0 %v2309_v13, %s6645_s0  ;;  %v6113_v14 = vpop.f32.mrb[27].mxu1  ;;  %v5553_v13 = vcombine.low %v2545_v9, %v2553_v11 }
 0xad4   : > { %v5554_v14 = vcombine.high %v2545_v9, %v2553_v11 }
 0xb35   : > { %v2323_v16 = vpop.permute.xlu0 %2322 }
 0xb36   : > { %v2345_v22 = vsel %vm2344_vm4, %v2343_v20, %v2323_v16  ;;  %v2561_v16 = vld [vmem:[%s6935_s18 + $0x208] sm:$0xff]  ;;  %v5567_v20 = vcombine.low %v2560_v15, %v2568_v4 }
 0xb39   : > { %v2327_v17 = vpop.permute.xlu1 %2326 }
 0xb3a   : > { %v2347_v24 = vsel %vm2346_vm5, %v2345_v22, %v2327_v17  ;;  %v5568_v17 = vcombine.high %v2560_v15, %v2568_v4  ;;  %v5570_v22 = vcombine.high %v2561_v16, %v2569_v18  ;;  %v2539_v15 = vld [vmem:[%s6935_s18 + $0x158] sm:$0xff] }
 0xb3c   : > { %3356 = vmatprep.subr.bf16.mxu1 %v5568_v17 }
 0xb3d   : > { %v2331_v21 = vpop.permute.xlu0 %2330  ;;  %3357 = vmatpush1.bf16.msra.mxu1 %v5567_v20  ;;  %v2546_v20 = vld [vmem:[%s6935_s18 + $0x190] sm:$0xff] }
 0xb3e   : > { %v2349_v25 = vsel %vm2348_vm6, %v2347_v24, %v2331_v21  ;;  %v5569_v21 = vcombine.low %v2561_v16, %v2569_v18  ;;  %v2584_v24 = vld [vmem:[%s6935_s18 + $0x2c0] sm:$0xff]  ;;  %v5525_v16 = vcombine.low %v2515_v7, %v2523_v8 }
 0xb41   : > { %v2335_v23 = vpop.permute.xlu1 %2334 }
 0xb42   : > { %v2351_v26 = vsel %vm2350_vm7, %v2349_v25, %v2335_v23  ;;  %v2576_v23 = vld [vmem:[%s6935_s18 + $0x280] sm:$0xff]  ;;  %v2577_v25 = vld [vmem:[%s6935_s18 + $0x288] sm:$0xff] }
 0xb45   : > { %v2339_v27 = vpop.permute.xlu0 %2338 }
 0xb46   : > { %v2353_v28 = vsel %vm2352_vm8, %v2351_v26, %v2339_v27  ;;  %v5584_v26 = vcombine.high %v2576_v23, %v2584_v24  ;;  %v2585_v27 = vld [vmem:[%s6935_s18 + $0x2c8] sm:$0xff] }
 0xb47   : > { %v2354_v29 = vpack.c.bf16 %v2353_v28, %v2353_v28  ;;  %v5583_v28 = vcombine.low %v2576_v23, %v2584_v24  ;;  %v2555_v23 = vld [vmem:[%s6935_s18 + $0x1d8] sm:$0xff] }
 0xb48   : > { %3358 = vmatprep.subr.bf16.mxu1 %v5584_v26 }
 0xb49   : > { %6131 = vmatmul.mubr.bf16.vlgmr.msra.gmra.mrb[12].mxu0 %v2354_v29  ;;  %v5585_v29 = vcombine.low %v2577_v25, %v2585_v27  ;;  %3359 = vmatpush1.bf16.msra.mxu1 %v5583_v28  ;;  %v2562_v28 = vld [vmem:[%s6935_s18 + $0x210] sm:$0xff] }
 0xb4a   : > { %3421 = vmatprep.mubr.bf16.mxu0 %v6642_v3  ;;  %3390 = vmatpush1.bf16.msra.mxu0 %v5505_v45  ;;  %v5618_v45 = vcombine.high %v2609_v46, %v2617_v48 }
 0xb4b   : > { %3391 = vmatprep.subr.bf16.mxu0 %v5522_v54  ;;  %v2507_v54 = vld [vmem:[%s6935_s18 + $0x58] sm:$0xff] }
 0xb4c   : > { %v5509_v55 = vcombine.low %v2499_v51, %v2507_v54  ;;  %v5510_v56 = vcombine.high %v2499_v51, %v2507_v54  ;;  %v2610_v54 = vld [vmem:[%s6935_s18 + $0x390] sm:$0xff] }
 0xb4e   : > { %3392 = vmatpush1.bf16.msra.mxu0 %v5521_v59 }
 0xb4f   : > { %3393 = vmatprep.subr.bf16.mxu0 %v5538_v61  ;;  %v5501_v61 = vld [vmem:[%s7719_s22] ss:$0 sm:$0xff] }
 0xb52   : > { %3394 = vmatpush1.bf16.msra.mxu0 %v5537_v0  ;;  %v5502_v0 = vld [vmem:[%s7721_s8] ss:$0 sm:$0xff] }
 0xb53   : > { %3395 = vmatprep.subr.bf16.mxu0 %v5554_v14  ;;  %v2531_v14 = vld [vmem:[%s6935_s18 + $0x118] sm:$0xff] }
 0xb54   : > { %v5542_v18 = vcombine.high %v2531_v14, %v2539_v15 }
 0xb56   : > { %3396 = vmatpush1.bf16.msra.mxu0 %v5553_v13  ;;  %v2538_v13 = vld [vmem:[%s6935_s18 + $0x150] sm:$0xff] }
 0xb57   : > { %3397 = vmatprep.subr.bf16.mxu0 %v5570_v22  ;;  %v2547_v22 = vld [vmem:[%s6935_s18 + $0x198] sm:$0xff] }
 0xb5a   : > { %3398 = vmatpush1.bf16.msra.mxu0 %v5569_v21  ;;  %v2554_v21 = vld [vmem:[%s6935_s18 + $0x1d0] sm:$0xff] }
 0xb5b   : > { %v5556_v26 = vcombine.high %v2546_v20, %v2554_v21 }
 0xc1c   : > { %v2460_v32 = vpop.f32.mrb[12].mxu0 }
 0xc1d   : > { %v2461_v34 = vadd.f32 %v5492_v63, %v2460_v32  ;;  %v6132_v35 = vpop.f32.mrb[13].mxu0  ;;  %v5586_v63 = vcombine.high %v2577_v25, %v2585_v27  ;;  %v2592_v32 = vld [vmem:[%s6935_s18 + $0x300] sm:$0xff]  ;;  %v5541_v25 = vcombine.low %v2531_v14, %v2539_v15  ;;  %v5558_v27 = vcombine.high %v2547_v22, %v2555_v23  ;;  %v2525_v14 = vld [vmem:[%s6935_s18 + $0xe8] sm:$0xff] }
 0xc1e   : > { %v2463_v36 = vpop.f32.mrb[14].mxu0  ;;  %v2593_v35 = vld [vmem:[%s6935_s18 + $0x308] sm:$0xff] }
 0xc1f   : > { %v6133_v37 = vpop.f32.mrb[15].mxu0  ;;  %v2466_v40 = vadd.f32 %v6476_v39, %v2461_v34  ;;  %3399 = vmatprep.subr.bf16.mxu0 %v5586_v63  ;;  %v2600_v34 = vld [vmem:[%s6935_s18 + $0x340] sm:$0xff]  ;;  %v2563_v63 = vld [vmem:[%s6935_s18 + $0x218] sm:$0xff] }
 0xc20   : > { %3400 = vmatpush1.bf16.msra.mxu0 %v5585_v29  ;;  %v5600_v36 = vcombine.high %v2592_v32, %v2600_v34  ;;  %v2601_v37 = vld [vmem:[%s6935_s18 + $0x348] sm:$0xff]  ;;  %v5599_v39 = vcombine.low %v2592_v32, %v2600_v34  ;;  %v2570_v29 = vld [vmem:[%s6935_s18 + $0x250] sm:$0xff]  ;;  %v2571_v32 = vld [vmem:[%s6935_s18 + $0x258] sm:$0xff]  ;;  %v5555_v34 = vcombine.low %v2546_v20, %v2554_v21 }
 0xc21   : > { %2469 = vadd.xlane.f32.xlu1 %v2466_v40  ;;  %v5602_v43 = vcombine.high %v2593_v35, %v2601_v37  ;;  %v5571_v44 = vcombine.low %v2562_v28, %v2570_v29  ;;  %v5573_v46 = vcombine.low %v2563_v63, %v2571_v32  ;;  %v2540_v20 = vld [vmem:[%s6935_s18 + $0x160] sm:$0xff]  ;;  %v2533_v21 = vld [vmem:[%s6935_s18 + $0x128] sm:$0xff] }
 0xc22   : > { %3360 = vmatprep.subr.bf16.mxu1 %v5600_v36  ;;  %v5572_v36 = vcombine.high %v2562_v28, %v2570_v29  ;;  %v2556_v28 = vld [vmem:[%s6935_s18 + $0x1e0] sm:$0xff]  ;;  %v2549_v29 = vld [vmem:[%s6935_s18 + $0x1a8] sm:$0xff] }
 0xc23   : > { %3401 = vmatprep.subr.bf16.mxu0 %v5602_v43  ;;  %3361 = vmatpush1.bf16.msra.mxu1 %v5599_v39  ;;  %v2578_v39 = vld [vmem:[%s6935_s18 + $0x290] sm:$0xff]  ;;  %v2579_v43 = vld [vmem:[%s6935_s18 + $0x298] sm:$0xff] }
 0xc24   : > { %3362 = vmatprep.subr.bf16.mxu1 %v5616_v47  ;;  %v5590_v48 = vcombine.high %v2579_v43, %v2587_v19  ;;  %v5589_v51 = vcombine.low %v2579_v43, %v2587_v19  ;;  %v2573_v43 = vld [vmem:[%s6935_s18 + $0x268] sm:$0xff] }
 0xc27   : > { %3363 = vmatpush1.bf16.msra.mxu1 %v5615_v38  ;;  %v2594_v38 = vld [vmem:[%s6935_s18 + $0x310] sm:$0xff] }
 0xc28   : > { %3430 = vmatprep.subr.bf16.mxu1 %v5508_v53 }
 0xcae   : > { %v2470_v1 = vpop.xlane.xlu1 %2469 }
 0xcaf   : > { %v2472_v2 = vmul.f32 0.0078125, %v2470_v1 }
 0xcb1   : > { %v7196_v5 = vsub.f32 %v2466_v40, %v2472_v2  ;;  %v5601_v40 = vcombine.low %v2593_v35, %v2601_v37  ;;  %v2514_v2 = vld [vmem:[%s6935_s18 + $0x90] sm:$0xff]  ;;  %v5557_v35 = vcombine.low %v2547_v22, %v2555_v23  ;;  %v5574_v37 = vcombine.high %v2563_v63, %v2571_v32  ;;  %v2541_v22 = vld [vmem:[%s6935_s18 + $0x168] sm:$0xff] }
 0xcb2   : > { %v2557_v63 = vld [vmem:[%s6935_s18 + $0x1e8] sm:$0xff] }
 0xcb3   : > { %v2474_v6 = vmul.f32 %v7196_v5, %v7196_v5  ;;  %3402 = vmatpush1.bf16.msra.mxu0 %v5601_v40  ;;  %v2586_v40 = vld [vmem:[%s6935_s18 + $0x2d0] sm:$0xff] }
 0xcb4   : > { %3403 = vmatprep.subr.bf16.mxu0 %v5618_v45  ;;  %v5588_v47 = vcombine.high %v2578_v39, %v2586_v40  ;;  %v2595_v45 = vld [vmem:[%s6935_s18 + $0x318] sm:$0xff]  ;;  %v5587_v50 = vcombine.low %v2578_v39, %v2586_v40  ;;  %v2572_v39 = vld [vmem:[%s6935_s18 + $0x260] sm:$0xff]  ;;  %v2565_v40 = vld [vmem:[%s6935_s18 + $0x228] sm:$0xff] }
 0xcb5   : > { %2475 = vadd.xlane.f32.xlu0 %v2474_v6  ;;  %v2522_v6 = vld [vmem:[%s6935_s18 + $0xd0] sm:$0xff]  ;;  %v5606_v53 = vcombine.high %v2595_v45, %v2603_v49 }
 0xcb6   : > { %v5524_v11 = vcombine.high %v2514_v2, %v2522_v6  ;;  %v5523_v4 = vcombine.low %v2514_v2, %v2522_v6  ;;  %v2509_v2 = vld [vmem:[%s6935_s18 + $0x68] sm:$0xff] }
 0xcb7   : > { %3404 = vmatpush1.bf16.msra.mxu0 %v5617_v42  ;;  %v2602_v42 = vld [vmem:[%s6935_s18 + $0x350] sm:$0xff] }
 0xcb8   : > { %3471 = vmatprep.subr.bf16.mxu0 %v5510_v56  ;;  %v2611_v56 = vld [vmem:[%s6935_s18 + $0x398] sm:$0xff] }
 0xd42   : > { %v2476_v57 = vpop.xlane.xlu0 %2475 }
 0xd43   : > { %v2477_v58 = vmul.f32 0.0078125, %v2476_v57  ;;  %v2619_v57 = vld [vmem:[%s6935_s18 + $0x3d8] sm:$0xff] }
 0xd44   : > { %v5621_v7 = vcombine.low %v2611_v56, %v2619_v57 }
 0xd45   : > { %v2478_v59 = vadd.f32 1e-05, %v2477_v58  ;;  %v5603_v58 = vcombine.low %v2594_v38, %v2602_v42 }
 0xd47   : > { %6472 = vrsqrt.f32 %v2478_v59  ;;  %v5605_v59 = vcombine.low %v2595_v45, %v2603_v49  ;;  %v2589_v45 = vld [vmem:[%s6935_s18 + $0x2e8] sm:$0xff] }
 0xd51   : > { %v6473_v60 = vpop.eup %6472 }
 0xd52   : > { %v2480_v62 = vmul.f32 %v6473_v60, %v7196_v5  ;;  %v2530_v5 = vld [vmem:[%s6935_s18 + $0x110] sm:$0xff] }
 0xd53   : > { %v5540_v17 = vcombine.high %v2530_v5, %v2538_v13  ;;  %v5539_v24 = vcombine.low %v2530_v5, %v2538_v13  ;;  %v2524_v5 = vld [vmem:[%s6935_s18 + $0xe0] sm:$0xff]  ;;  %v2517_v13 = vld [vmem:[%s6935_s18 + $0xa8] sm:$0xff] }
 0xd54   : > { %v2487_v1 = vmul.f32 %v5501_v61, %v2480_v62  ;;  %v5622_v61 = vcombine.high %v2611_v56, %v2619_v57  ;;  %v2500_v62 = vld [vmem:[%s6935_s18 + $0x20] sm:$0xff]  ;;  %v2605_v56 = vld [vmem:[%s6935_s18 + $0x368] sm:$0xff] }
 0xd56   : > { %v7239_v9 = vadd.f32 %v5502_v0, %v2487_v1  ;;  %v2508_v0 = vld [vmem:[%s6935_s18 + $0x60] sm:$0xff]  ;;  %v2501_v1 = vld [vmem:[%s6935_s18 + $0x28] sm:$0xff] }
 0xd57   : > { %v5512_v8 = vcombine.high %v2500_v62, %v2508_v0  ;;  %v5511_v15 = vcombine.low %v2500_v62, %v2508_v0  ;;  %v2620_v62 = vld [vmem:[%s6935_s18 + $0x3e0] sm:$0xff]  ;;  %v2613_v0 = vld [vmem:[%s6935_s18 + $0x3a8] sm:$0xff] }
 0xd58   : > { %v7243_v10 = vpack.c.bf16 %v7239_v9, %v7239_v9 }
 0xd5a   : > { %3381 = vmatmul.mubr.bf16.vlgmr.msra.gmra.mrb[28].mxu1 %v7243_v10  ;;  %3422 = vmatmul.mubr.bf16.vlgmr.msra.gmra.mrb[16].mxu0 %v7243_v10 }
 0xd5b   : > { %3431 = vmatpush1.bf16.msra.mxu1 %v5507_v52  ;;  %3472 = vmatpush1.bf16.msra.mxu0 %v5509_v55  ;;  %v5604_v52 = vcombine.high %v2594_v38, %v2602_v42  ;;  %v2618_v55 = vld [vmem:[%s6935_s18 + $0x3d0] sm:$0xff]  ;;  %v2588_v38 = vld [vmem:[%s6935_s18 + $0x2e0] sm:$0xff]  ;;  %v2581_v42 = vld [vmem:[%s6935_s18 + $0x2a8] sm:$0xff] }
 0xd5c   : > { %3432 = vmatprep.subr.bf16.mxu1 %v5524_v11  ;;  %3473 = vmatprep.subr.bf16.mxu0 %v5526_v12  ;;  %v5620_v60 = vcombine.high %v2610_v54, %v2618_v55  ;;  %v5619_v6 = vcombine.low %v2610_v54, %v2618_v55  ;;  %v5514_v11 = vcombine.high %v2501_v1, %v2509_v2  ;;  %v2516_v12 = vld [vmem:[%s6935_s18 + $0xa0] sm:$0xff]  ;;  %v2597_v55 = vld [vmem:[%s6935_s18 + $0x328] sm:$0xff] }
 0xd5d   : > { %3462 = vmatprep.mubr.bf16.mxu1 %v6642_v3  ;;  %3503 = vmatprep.mubr.bf16.mxu0 %v6642_v3  ;;  %v5527_v23 = vcombine.low %v2516_v12, %v2524_v5  ;;  %v2604_v54 = vld [vmem:[%s6935_s18 + $0x360] sm:$0xff] }
 0xd5f   : > { %3433 = vmatpush1.bf16.msra.mxu1 %v5523_v4  ;;  %3474 = vmatpush1.bf16.msra.mxu0 %v5525_v16  ;;  %v5513_v4 = vcombine.low %v2501_v1, %v2509_v2  ;;  %v5528_v16 = vcombine.high %v2516_v12, %v2524_v5  ;;  %v2621_v1 = vld [vmem:[%s6935_s18 + $0x3e8] sm:$0xff]  ;;  %v2510_v12 = vld [vmem:[%s6935_s18 + $0x70] sm:$0xff]  ;;  %v2503_v5 = vld [vmem:[%s6935_s18 + $0x38] sm:$0xff] }
 0xd60   : > { %3434 = vmatprep.subr.bf16.mxu1 %v5540_v17  ;;  %3475 = vmatprep.subr.bf16.mxu0 %v5542_v18  ;;  %v5530_v17 = vcombine.high %v2517_v13, %v2525_v14  ;;  %v2532_v18 = vld [vmem:[%s6935_s18 + $0x120] sm:$0xff] }
 0xd61   : > { %v5543_v32 = vcombine.low %v2532_v18, %v2540_v20 }
 0xd63   : > { %3435 = vmatpush1.bf16.msra.mxu1 %v5539_v24  ;;  %3476 = vmatpush1.bf16.msra.mxu0 %v5541_v25  ;;  %v5529_v24 = vcombine.low %v2517_v13, %v2525_v14  ;;  %v5544_v25 = vcombine.high %v2532_v18, %v2540_v20  ;;  %v2511_v13 = vld [vmem:[%s6935_s18 + $0x78] sm:$0xff]  ;;  %v2526_v18 = vld [vmem:[%s6935_s18 + $0xf0] sm:$0xff] }
 0xd64   : > { %3436 = vmatprep.subr.bf16.mxu1 %v5556_v26  ;;  %3477 = vmatprep.subr.bf16.mxu0 %v5558_v27  ;;  %v5546_v26 = vcombine.high %v2533_v21, %v2541_v22  ;;  %v2548_v27 = vld [vmem:[%s6935_s18 + $0x1a0] sm:$0xff]  ;;  %v2519_v20 = vld [vmem:[%s6935_s18 + $0xb8] sm:$0xff] }
 0xd65   : > { %v5559_v19 = vcombine.low %v2548_v27, %v2556_v28 }
 0xd67   : > { %3437 = vmatpush1.bf16.msra.mxu1 %v5555_v34  ;;  %3478 = vmatpush1.bf16.msra.mxu0 %v5557_v35  ;;  %v5545_v34 = vcombine.low %v2533_v21, %v2541_v22  ;;  %v5560_v35 = vcombine.high %v2548_v27, %v2556_v28  ;;  %v2527_v21 = vld [vmem:[%s6935_s18 + $0xf8] sm:$0xff]  ;;  %v2542_v27 = vld [vmem:[%s6935_s18 + $0x170] sm:$0xff] }
 0xd68   : > { %3438 = vmatprep.subr.bf16.mxu1 %v5572_v36  ;;  %3479 = vmatprep.subr.bf16.mxu0 %v5574_v37  ;;  %v5562_v36 = vcombine.high %v2549_v29, %v2557_v63  ;;  %v2564_v37 = vld [vmem:[%s6935_s18 + $0x220] sm:$0xff]  ;;  %v2535_v28 = vld [vmem:[%s6935_s18 + $0x138] sm:$0xff] }
 0xd69   : > { %v5575_v49 = vcombine.low %v2564_v37, %v2572_v39 }
 0xd6b   : > { %3439 = vmatpush1.bf16.msra.mxu1 %v5571_v44  ;;  %3480 = vmatpush1.bf16.msra.mxu0 %v5573_v46  ;;  %v5561_v44 = vcombine.low %v2549_v29, %v2557_v63  ;;  %v5576_v46 = vcombine.high %v2564_v37, %v2572_v39  ;;  %v2543_v29 = vld [vmem:[%s6935_s18 + $0x178] sm:$0xff]  ;;  %v2558_v37 = vld [vmem:[%s6935_s18 + $0x1f0] sm:$0xff] }
 0xd6c   : > { %3440 = vmatprep.subr.bf16.mxu1 %v5588_v47  ;;  %3481 = vmatprep.subr.bf16.mxu0 %v5590_v48  ;;  %v5578_v47 = vcombine.high %v2565_v40, %v2573_v43  ;;  %v2580_v48 = vld [vmem:[%s6935_s18 + $0x2a0] sm:$0xff]  ;;  %v2551_v39 = vld [vmem:[%s6935_s18 + $0x1b8] sm:$0xff] }
 0xd6d   : > { %v5591_v57 = vcombine.low %v2580_v48, %v2588_v38 }
 0xd6f   : > { %3441 = vmatpush1.bf16.msra.mxu1 %v5587_v50  ;;  %3482 = vmatpush1.bf16.msra.mxu0 %v5589_v51  ;;  %v5577_v50 = vcombine.low %v2565_v40, %v2573_v43  ;;  %v5592_v51 = vcombine.high %v2580_v48, %v2588_v38  ;;  %v2559_v40 = vld [vmem:[%s6935_s18 + $0x1f8] sm:$0xff]  ;;  %v2574_v48 = vld [vmem:[%s6935_s18 + $0x270] sm:$0xff] }
 0xd70   : > { %3442 = vmatprep.subr.bf16.mxu1 %v5604_v52  ;;  %3483 = vmatprep.subr.bf16.mxu0 %v5606_v53  ;;  %v5594_v52 = vcombine.high %v2581_v42, %v2589_v45  ;;  %v2596_v53 = vld [vmem:[%s6935_s18 + $0x320] sm:$0xff]  ;;  %v2567_v38 = vld [vmem:[%s6935_s18 + $0x238] sm:$0xff] }
 0xd71   : > { %v5607_v2 = vcombine.low %v2596_v53, %v2604_v54 }
 0xd73   : > { %3443 = vmatpush1.bf16.msra.mxu1 %v5603_v58  ;;  %3484 = vmatpush1.bf16.msra.mxu0 %v5605_v59  ;;  %v5593_v58 = vcombine.low %v2581_v42, %v2589_v45  ;;  %v5608_v59 = vcombine.high %v2596_v53, %v2604_v54  ;;  %v2575_v42 = vld [vmem:[%s6935_s18 + $0x278] sm:$0xff] }
 0xd74   : > { %3444 = vmatprep.subr.bf16.mxu1 %v5620_v60  ;;  %3485 = vmatprep.subr.bf16.mxu0 %v5622_v61  ;;  %v5610_v60 = vcombine.high %v2597_v55, %v2605_v56  ;;  %v2612_v61 = vld [vmem:[%s6935_s18 + $0x3a0] sm:$0xff]  ;;  %v2583_v53 = vld [vmem:[%s6935_s18 + $0x2b8] sm:$0xff] }
 0xd75   : > { %v5623_v14 = vcombine.low %v2612_v61, %v2620_v62  ;;  %v2591_v54 = vld [vmem:[%s6935_s18 + $0x2f8] sm:$0xff] }
 0xd77   : > { %3445 = vmatpush1.bf16.msra.mxu1 %v5619_v6  ;;  %3486 = vmatpush1.bf16.msra.mxu0 %v5621_v7  ;;  %v5609_v6 = vcombine.low %v2597_v55, %v2605_v56  ;;  %v5624_v7 = vcombine.high %v2612_v61, %v2620_v62  ;;  %v5581_v56 = vcombine.low %v2567_v38, %v2575_v42  ;;  %v2599_v61 = vld [vmem:[%s6935_s18 + $0x338] sm:$0xff] }
 0xd78   : > { %3512 = vmatprep.subr.bf16.mxu1 %v5512_v8  ;;  %3553 = vmatprep.subr.bf16.mxu0 %v5514_v11  ;;  %v5626_v8 = vcombine.high %v2613_v0, %v2621_v1  ;;  %v2502_v11 = vld [vmem:[%s6935_s18 + $0x30] sm:$0xff]  ;;  %v2607_v62 = vld [vmem:[%s6935_s18 + $0x378] sm:$0xff] }
 0xd79   : > { %v5515_v22 = vcombine.low %v2502_v11, %v2510_v12 }
 0xd7a   : > { %3463 = vmatmul.mubr.bf16.vlgmr.msra.gmra.mrb[32].mxu1 %v7243_v10  ;;  %3504 = vmatmul.mubr.bf16.vlgmr.msra.gmra.mrb[20].mxu0 %v7243_v10 }
 0xd7b   : > { %3513 = vmatpush1.bf16.msra.mxu1 %v5511_v15  ;;  %3554 = vmatpush1.bf16.msra.mxu0 %v5513_v4  ;;  %v5625_v15 = vcombine.low %v2613_v0, %v2621_v1  ;;  %v5516_v4 = vcombine.high %v2502_v11, %v2510_v12  ;;  %v5597_v1 = vcombine.low %v2583_v53, %v2591_v54  ;;  %v2615_v11 = vld [vmem:[%s6935_s18 + $0x3b8] sm:$0xff] }
 0xd7c   : > { %3514 = vmatprep.subr.bf16.mxu1 %v5528_v16  ;;  %3555 = vmatprep.subr.bf16.mxu0 %v5530_v17  ;;  %v5518_v16 = vcombine.high %v2503_v5, %v2511_v13  ;;  %v2518_v17 = vld [vmem:[%s6935_s18 + $0xb0] sm:$0xff]  ;;  %v2623_v12 = vld [vmem:[%s6935_s18 + $0x3f8] sm:$0xff] }
 0xd7d   : > { %3544 = vmatprep.mubr.bf16.mxu1 %v6642_v3  ;;  %3585 = vmatprep.mubr.bf16.mxu0 %v6642_v3  ;;  %v5531_v63 = vcombine.low %v2518_v17, %v2526_v18 }
 0xd7f   : > { %3515 = vmatpush1.bf16.msra.mxu1 %v5527_v23  ;;  %3556 = vmatpush1.bf16.msra.mxu0 %v5529_v24  ;;  %v5517_v23 = vcombine.low %v2503_v5, %v2511_v13  ;;  %v5532_v24 = vcombine.high %v2518_v17, %v2526_v18  ;;  %v5613_v13 = vcombine.low %v2599_v61, %v2607_v62  ;;  %v6312_v17 = vld [vmem:[%s7722_s28 + $0x40] sm:$0xff]  }
 0xd80   : > { %3516 = vmatprep.subr.bf16.mxu1 %v5544_v25  ;;  %3557 = vmatprep.subr.bf16.mxu0 %v5546_v26  ;;  %v5534_v25 = vcombine.high %v2519_v20, %v2527_v21  ;;  %v2534_v26 = vld [vmem:[%s6935_s18 + $0x130] sm:$0xff]  ;;  %v6313_v18 = vld [vmem:[%s7722_s28 + $0xc0] sm:$0xff]  }
 0xd81   : > { %v5547_v43 = vcombine.low %v2534_v26, %v2542_v27 }
 0xd83   : > { %3517 = vmatpush1.bf16.msra.mxu1 %v5543_v32  ;;  %3558 = vmatpush1.bf16.msra.mxu0 %v5545_v34  ;;  %v5533_v32 = vcombine.low %v2519_v20, %v2527_v21  ;;  %v5548_v34 = vcombine.high %v2534_v26, %v2542_v27  ;;  %v6314_v20 = vld [vmem:[%s7722_s28] sm:$0xff]   ;;  %v6320_v26 = vld [vmem:[%s7722_s28 + $0x50] sm:$0xff]  }
 0xd84   : > { %3518 = vmatprep.subr.bf16.mxu1 %v5560_v35  ;;  %3559 = vmatprep.subr.bf16.mxu0 %v5562_v36  ;;  %v5550_v35 = vcombine.high %v2535_v28, %v2543_v29  ;;  %v2550_v36 = vld [vmem:[%s6935_s18 + $0x1b0] sm:$0xff]  ;;  %v6315_v21 = vld [vmem:[%s7722_s28 + $0x80] sm:$0xff]  }
 0xd85   : > { %v5563_v45 = vcombine.low %v2550_v36, %v2558_v37  ;;  %v6321_v27 = vld [vmem:[%s7722_s28 + $0xd0] sm:$0xff]  }
 0xd87   : > { %3519 = vmatpush1.bf16.msra.mxu1 %v5559_v19  ;;  %3560 = vmatpush1.bf16.msra.mxu0 %v5561_v44  ;;  %v5549_v19 = vcombine.low %v2535_v28, %v2543_v29  ;;  %v5564_v44 = vcombine.high %v2550_v36, %v2558_v37  ;;  %v6322_v28 = vld [vmem:[%s7722_s28 + $0x10] sm:$0xff]   ;;  %v6329_v36 = vld [vmem:[%s7722_s28 + $0xe0] sm:$0xff]  }
 0xd88   : > { %3520 = vmatprep.subr.bf16.mxu1 %v5576_v46  ;;  %3561 = vmatprep.subr.bf16.mxu0 %v5578_v47  ;;  %v5566_v46 = vcombine.high %v2551_v39, %v2559_v40  ;;  %v2566_v47 = vld [vmem:[%s6935_s18 + $0x230] sm:$0xff]  ;;  %v6330_v37 = vld [vmem:[%s7722_s28 + $0x20] sm:$0xff]  }
 0xd89   : > { %v5579_v55 = vcombine.low %v2566_v47, %v2574_v48  ;;  %v6323_v29 = vld [vmem:[%s7722_s28 + $0x90] sm:$0xff]  }
 0xd8b   : > { %3521 = vmatpush1.bf16.msra.mxu1 %v5575_v49  ;;  %3562 = vmatpush1.bf16.msra.mxu0 %v5577_v50  ;;  %v5580_v49 = vcombine.high %v2566_v47, %v2574_v48  ;;  %v5582_v50 = vcombine.high %v2567_v38, %v2575_v42  ;;  %v6337_v47 = vld [vmem:[%s7722_s28 + $0xf0] sm:$0xff]   ;;  %v6340_v42 = vld [vmem:[%s7722_s28 + $0x78] sm:$0xff]  }
 0xd8c   : > { %3522 = vmatprep.subr.bf16.mxu1 %v5592_v51  ;;  %3563 = vmatprep.subr.bf16.mxu0 %v5594_v52  ;;  %v2582_v51 = vld [vmem:[%s6935_s18 + $0x2b0] sm:$0xff] }
 0xd8d   : > { %v2590_v52 = vld [vmem:[%s6935_s18 + $0x2f0] sm:$0xff] }
 0xd8e   : > { %v5595_v0 = vcombine.low %v2582_v51, %v2590_v52  ;;  %v6338_v48 = vld [vmem:[%s7722_s28 + $0x30] sm:$0xff]  }
 0xd8f   : > { %3523 = vmatpush1.bf16.msra.mxu1 %v5591_v57  ;;  %3564 = vmatpush1.bf16.msra.mxu0 %v5593_v58  ;;  %v5596_v57 = vcombine.high %v2582_v51, %v2590_v52  ;;  %v5598_v58 = vcombine.high %v2583_v53, %v2591_v54  ;;  %v6339_v38 = vld [vmem:[%s7722_s28 + $0xb0] sm:$0xff]   ;;  %v6345_v51 = vld [vmem:[%s7722_s28 + $0x1c0] sm:$0xff]   ;;  %v2642_v53 = vsub.s32 3, %v6997_v30 }
 0xd90   : > { %3524 = vmatprep.subr.bf16.mxu1 %v5608_v59  ;;  %3565 = vmatprep.subr.bf16.mxu0 %v5610_v60  ;;  %v2598_v59 = vld [vmem:[%s6935_s18 + $0x330] sm:$0xff]  ;;  %v7382_v52 = vld [vmem:[%s6940_s16] sm:$0xff] }
 0xd91   : > { %v2606_v60 = vld [vmem:[%s6935_s18 + $0x370] sm:$0xff]  ;;  %v2631_v54 = vrot.slane %v7382_v52, %v7004_v33 }
 0xd92   : > { %v5611_v5 = vcombine.low %v2598_v59, %v2606_v60 }
 0xd93   : > { %3525 = vmatpush1.bf16.msra.mxu1 %v5607_v2  ;;  %3566 = vmatpush1.bf16.msra.mxu0 %v5609_v6  ;;  %v5612_v2 = vcombine.high %v2598_v59, %v2606_v60  ;;  %v5614_v6 = vcombine.high %v2599_v61, %v2607_v62 }
 0xd94   : > { %3526 = vmatprep.subr.bf16.mxu1 %v5624_v7  ;;  %3567 = vmatprep.subr.bf16.mxu0 %v5626_v8  ;;  %v2614_v7 = vld [vmem:[%s6935_s18 + $0x3b0] sm:$0xff] }
 0xd95   : > { %v2622_v8 = vld [vmem:[%s6935_s18 + $0x3f0] sm:$0xff] }
 0xd97   : > { %3527 = vmatpush1.bf16.msra.mxu1 %v5623_v14  ;;  %3568 = vmatpush1.bf16.msra.mxu0 %v5625_v15  ;;  %v5628_v14 = vcombine.high %v2614_v7, %v2622_v8  ;;  %v5630_v15 = vcombine.high %v2615_v11, %v2623_v12 }
 0xd98   : > { %3594 = vmatprep.subr.bf16.mxu1 %v5516_v4  ;;  %3635 = vmatprep.subr.bf16.mxu0 %v5518_v16  ;;  %v5627_v4 = vcombine.low %v2614_v7, %v2622_v8  ;;  %v5629_v16 = vcombine.low %v2615_v11, %v2623_v12 }
 0xd9a   : > { %3545 = vmatmul.mubr.bf16.vlgmr.msra.gmra.mrb[36].mxu1 %v7243_v10  ;;  %3586 = vmatmul.mubr.bf16.vlgmr.msra.gmra.mrb[24].mxu0 %v7243_v10 }
 0xd9b   : > { %3595 = vmatpush1.bf16.msra.mxu1 %v5515_v22  ;;  %3636 = vmatpush1.bf16.msra.mxu0 %v5517_v23  ;;  %v6316_v22 = vld [vmem:[%s7722_s28 + $0x48] sm:$0xff]  }
 0xd9c   : > { %3596 = vmatprep.subr.bf16.mxu1 %v5532_v24  ;;  %3637 = vmatprep.subr.bf16.mxu0 %v5534_v25  ;;  %v6317_v23 = vld [vmem:[%s7722_s28 + $0xc8] sm:$0xff]  }
 0xd9d   : > { %3626 = vmatprep.mubr.bf16.mxu1 %v6642_v3  ;;  %3667 = vmatprep.mubr.bf16.mxu0 %v6642_v3  ;;  %v5565_v3 = vcombine.low %v2551_v39, %v2559_v40  ;;  %v6318_v24 = vld [vmem:[%s7722_s28 + $0x8] sm:$0xff]   ;;  %v6331_v39 = vld [vmem:[%s7722_s28 + $0xa0] sm:$0xff]  }
 0xd9e   : > { %v6319_v25 = vld [vmem:[%s7722_s28 + $0x88] sm:$0xff]  }
 0xd9f   : > { %3597 = vmatpush1.bf16.msra.mxu1 %v5531_v63  ;;  %3638 = vmatpush1.bf16.msra.mxu0 %v5533_v32  ;;  %v6325_v63 = vld [vmem:[%s7722_s28 + $0xd8] sm:$0xff]   ;;  %v6332_v40 = vld [vmem:[%s7722_s28 + $0x68] sm:$0xff]  }
 0xda0   : > { %3598 = vmatprep.subr.bf16.mxu1 %v5548_v34  ;;  %3639 = vmatprep.subr.bf16.mxu0 %v5550_v35  ;;  %v6326_v32 = vld [vmem:[%s7722_s28 + $0x18] sm:$0xff]   ;;  %v6328_v35 = vld [vmem:[%s7722_s28 + $0x60] sm:$0xff]  }
 0xda1   : > { %v6327_v34 = vld [vmem:[%s7722_s28 + $0x98] sm:$0xff]  }
 0xda3   : > { %3599 = vmatpush1.bf16.msra.mxu1 %v5547_v43  ;;  %3640 = vmatpush1.bf16.msra.mxu0 %v5549_v19  ;;  %v6333_v43 = vld [vmem:[%s7722_s28 + $0xe8] sm:$0xff]  }
 0xda4   : > { %3600 = vmatprep.subr.bf16.mxu1 %v5564_v44  ;;  %3641 = vmatprep.subr.bf16.mxu0 %v5566_v46  ;;  %v6334_v19 = vld [vmem:[%s7722_s28 + $0x28] sm:$0xff]   ;;  %v6336_v46 = vld [vmem:[%s7722_s28 + $0x70] sm:$0xff]  }
 0xda5   : > { %v6335_v44 = vld [vmem:[%s7722_s28 + $0xa8] sm:$0xff]  }
 0xda7   : > { %3601 = vmatpush1.bf16.msra.mxu1 %v5563_v45  ;;  %3642 = vmatpush1.bf16.msra.mxu0 %v5565_v3  ;;  %v6341_v45 = vld [vmem:[%s7722_s28 + $0xf8] sm:$0xff]  }
 0xda8   : > { %3602 = vmatprep.subr.bf16.mxu1 %v5580_v49  ;;  %3643 = vmatprep.subr.bf16.mxu0 %v5582_v50  ;;  %v6342_v3 = vld [vmem:[%s7722_s28 + $0x38] sm:$0xff]   ;;  %v6344_v50 = vld [vmem:[%s7722_s28 + $0x140] sm:$0xff]  }
 0xda9   : > { %v6343_v49 = vld [vmem:[%s7722_s28 + $0xb8] sm:$0xff]  }
 0xdab   : > { %3603 = vmatpush1.bf16.msra.mxu1 %v5579_v55  ;;  %3644 = vmatpush1.bf16.msra.mxu0 %v5581_v56  ;;  %v2639_v55 = vrot.slane %v7382_v52, %v7011_v41  ;;  %v2635_v56 = vrot.slane %v7382_v52, %v7000_v31 }
 0xdac   : > { %3604 = vmatprep.subr.bf16.mxu1 %v5596_v57  ;;  %3645 = vmatprep.subr.bf16.mxu0 %v5598_v58  ;;  %v2643_v57 = vrot.slane %v7382_v52, %v2642_v53 }
 0xdaf   : > { %3605 = vmatpush1.bf16.msra.mxu1 %v5595_v0  ;;  %3646 = vmatpush1.bf16.msra.mxu0 %v5597_v1 }
 0xdb0   : > { %3606 = vmatprep.subr.bf16.mxu1 %v5612_v2  ;;  %3647 = vmatprep.subr.bf16.mxu0 %v5614_v6 }
 0xdb3   : > { %3607 = vmatpush1.bf16.msra.mxu1 %v5611_v5  ;;  %3648 = vmatpush1.bf16.msra.mxu0 %v5613_v13 }
 0xdb4   : > { %3608 = vmatprep.subr.bf16.mxu1 %v5628_v14  ;;  %3649 = vmatprep.subr.bf16.mxu0 %v5630_v15 }
 0xdb7   : > { %3609 = vmatpush1.bf16.msra.mxu1 %v5627_v4  ;;  %3650 = vmatpush1.bf16.msra.mxu0 %v5629_v16  ;;  %v6346_v16 = vld [vmem:[%s7722_s28 + $0x100] sm:$0xff]  }
 0xdb8   : > { %5829 = vmatprep.subr.bf16.mxu1 %v6312_v17  ;;  %5851 = vmatprep.subr.bf16.mxu0 %v6313_v18  ;;  %v6347_v17 = vld [vmem:[%s7722_s28 + $0x180] sm:$0xff]  }
 0xdba   : > { %3627 = vmatmul.mubr.bf16.vlgmr.msra.gmra.mrb[40].mxu1 %v7243_v10  ;;  %3668 = vmatmul.mubr.bf16.vlgmr.msra.gmra.mrb[28].mxu0 %v7243_v10  ;;  %v6324_v10 = vld [vmem:[%s7722_s28 + $0x58] sm:$0xff]  }
 0xdbb   : > { %5830 = vmatpush3.bf16.msra.mxu1 %v6314_v20  ;;  %5852 = vmatpush3.bf16.msra.mxu0 %v6315_v21  ;;  %v6348_v21 = vld [vmem:[%s7722_s28 + $0x148] sm:$0xff]  }
 0xdbc   : > { %5831 = vmatprep.subr.bf16.mxu1 %v6316_v22  ;;  %5853 = vmatprep.subr.bf16.mxu0 %v6317_v23  ;;  %v6349_v22 = vld [vmem:[%s7722_s28 + $0x1c8] sm:$0xff]  }
 0xdbd   : > { %v6350_v23 = vld [vmem:[%s7722_s28 + $0x108] sm:$0xff]  }
 0xdbf   : > { %5832 = vmatpush3.bf16.msra.mxu1 %v6318_v24  ;;  %5854 = vmatpush3.bf16.msra.mxu0 %v6319_v25  ;;  %v6351_v24 = vld [vmem:[%s7722_s28 + $0x188] sm:$0xff]   ;;  %v6352_v25 = vld [vmem:[%s7722_s28 + $0x150] sm:$0xff]  }
 0xdc0   : > { %5833 = vmatprep.subr.bf16.mxu1 %v6320_v26  ;;  %5855 = vmatprep.subr.bf16.mxu0 %v6321_v27  ;;  %v6353_v26 = vld [vmem:[%s7722_s28 + $0x1d0] sm:$0xff]  }
 0xdc1   : > { %v6354_v27 = vld [vmem:[%s7722_s28 + $0x110] sm:$0xff]  }
 0xdc3   : > { %5834 = vmatpush3.bf16.msra.mxu1 %v6322_v28  ;;  %5856 = vmatpush3.bf16.msra.mxu0 %v6323_v29  ;;  %v6355_v28 = vld [vmem:[%s7722_s28 + $0x190] sm:$0xff]   ;;  %v6356_v29 = vld [vmem:[%s7722_s28 + $0x158] sm:$0xff]  }
 0xdc4   : > { %5835 = vmatprep.subr.bf16.mxu1 %v6324_v10  ;;  %5857 = vmatprep.subr.bf16.mxu0 %v6325_v63  ;;  %v6357_v10 = vld [vmem:[%s7722_s28 + $0x1d8] sm:$0xff]  }
 0xdc5   : > { %v6358_v63 = vld [vmem:[%s7722_s28 + $0x118] sm:$0xff]  }
 0xdc7   : > { %5836 = vmatpush3.bf16.msra.mxu1 %v6326_v32  ;;  %5858 = vmatpush3.bf16.msra.mxu0 %v6327_v34  ;;  %v6359_v32 = vld [vmem:[%s7722_s28 + $0x198] sm:$0xff]   ;;  %v6360_v34 = vld [vmem:[%s7722_s28 + $0x160] sm:$0xff]  }
 0xdc8   : > { %5837 = vmatprep.subr.bf16.mxu1 %v6328_v35  ;;  %5859 = vmatprep.subr.bf16.mxu0 %v6329_v36  ;;  %v6361_v35 = vld [vmem:[%s7722_s28 + $0x1e0] sm:$0xff]  }
 0xdc9   : > { %v6362_v36 = vld [vmem:[%s7722_s28 + $0x120] sm:$0xff]  }
 0xdcb   : > { %5838 = vmatpush3.bf16.msra.mxu1 %v6330_v37  ;;  %5860 = vmatpush3.bf16.msra.mxu0 %v6331_v39  ;;  %v6363_v37 = vld [vmem:[%s7722_s28 + $0x1a0] sm:$0xff]   ;;  %v6364_v39 = vld [vmem:[%s7722_s28 + $0x168] sm:$0xff]  }
 0xdcc   : > { %5839 = vmatprep.subr.bf16.mxu1 %v6332_v40  ;;  %5861 = vmatprep.subr.bf16.mxu0 %v6333_v43  ;;  %v6365_v40 = vld [vmem:[%s7722_s28 + $0x1e8] sm:$0xff]   ;;  %v2646_v43 = vsub.s32 4, %v6997_v30 }
 0xdcf   : > { %5840 = vmatpush3.bf16.msra.mxu1 %v6334_v19  ;;  %5862 = vmatpush3.bf16.msra.mxu0 %v6335_v44  ;;  %v2654_v19 = vsub.s32 6, %v6997_v30  ;;  %v6366_v44 = vld [vmem:[%s7722_s28 + $0x128] sm:$0xff]  }
 0xdd0   : > { %5841 = vmatprep.subr.bf16.mxu1 %v6336_v46  ;;  %5863 = vmatprep.subr.bf16.mxu0 %v6337_v47  ;;  %v6367_v46 = vld [vmem:[%s7722_s28 + $0x1a8] sm:$0xff]   ;;  %v2650_v47 = vsub.s32 5, %v6997_v30 }
 0xdd3   : > { %5842 = vmatpush3.bf16.msra.mxu1 %v6338_v48  ;;  %5864 = vmatpush3.bf16.msra.mxu0 %v6339_v38  ;;  %v2658_v48 = vsub.s32 7, %v6997_v30  ;;  %v6368_v38 = vld [vmem:[%s7722_s28 + $0x170] sm:$0xff]  }
 0xdd4   : > { %5843 = vmatprep.subr.bf16.mxu1 %v6340_v42  ;;  %5865 = vmatprep.subr.bf16.mxu0 %v6341_v45  ;;  %v6369_v42 = vld [vmem:[%s7722_s28 + $0x1f0] sm:$0xff]   ;;  %v2647_v45 = vrot.slane %v7382_v52, %v2646_v43 }
 0xdd7   : > { %5844 = vmatpush3.bf16.msra.mxu1 %v6342_v3  ;;  %5866 = vmatpush3.bf16.msra.mxu0 %v6343_v49  ;;  %v2655_v3 = vrot.slane %v7382_v52, %v2654_v19  ;;  %v2651_v49 = vrot.slane %v7382_v52, %v2650_v47 }
 0xdd8   : > { %5873 = vmatprep.subr.bf16.mxu1 %v6344_v50  ;;  %5895 = vmatprep.subr.bf16.mxu0 %v6345_v51  ;;  %v2659_v50 = vrot.slane %v7382_v52, %v2658_v48  ;;  %v6370_v51 = vld [vmem:[%s7722_s28 + $0x130] sm:$0xff]  }
 0xe2d   : > { %v3382_v58 = vpop.f32.mrb[28].mxu1  ;;  %v3423_v59 = vpop.f32.mrb[16].mxu0 }
 0xe2e   : > { %v3383_v60 = vadd.f32 %v3382_v58, %v2631_v54  ;;  %v3424_v61 = vadd.f32 %v3423_v59, %v2639_v55  ;;  %v3384_v62 = vpop.f32.mrb[29].mxu1  ;;  %v3425_v0 = vpop.f32.mrb[17].mxu0  ;;  %v6371_v54 = vld [vmem:[%s7722_s28 + $0x1b0] sm:$0xff]   ;;  %v6372_v55 = vld [vmem:[%s7722_s28 + $0x178] sm:$0xff]  }
 0xe2f   : > { %v3385_v1 = vadd.f32 %v3384_v62, %v2635_v56  ;;  %v3426_v2 = vadd.f32 %v3425_v0, %v2643_v57  ;;  %v3386_v6 = vpop.f32.mrb[30].mxu1  ;;  %v3427_v7 = vpop.f32.mrb[18].mxu0  ;;  %v6373_v56 = vld [vmem:[%s7722_s28 + $0x1f8] sm:$0xff]  }
 0xe30   : > { %v3676_v8 = vmax.f32 %v3383_v60, 0.0  ;;  %v3678_v11 = vmax.f32 %v3424_v61, 0.0  ;;  %v3387_v12 = vpop.f32.mrb[31].mxu1  ;;  %v3428_v5 = vpop.f32.mrb[19].mxu0  ;;  %v6374_v6 = vld [vmem:[%s7722_s28 + $0x138] sm:$0xff]  }
 0xe31   : > { %v3677_v13 = vmax.f32 %v3385_v1, 0.0  ;;  %v3679_v14 = vmax.f32 %v3426_v2, 0.0  ;;  %v6375_v7 = vld [vmem:[%s7722_s28 + $0x1b8] sm:$0xff]  }
 0xe32   : > { %v3692_v18 = vpack.c.bf16 %v3676_v8, %v3676_v8  ;;  %v3694_v20 = vpack.c.bf16 %v3678_v11, %v3678_v11 }
 0xe33   : > { %v3693_v15 = vpack.c.bf16 %v3677_v13, %v3677_v13  ;;  %v3695_v4 = vpack.c.bf16 %v3679_v14, %v3679_v14  ;;  %v6376_v13 = vld [vmem:[%s7722_s28 + $0x240] sm:$0xff]  }
 0xe34   : > { %v6377_v14 = vld [vmem:[%s7722_s28 + $0x2c0] sm:$0xff]  }
 0xe35   : > { %4771 = vmatprep.mubr.bf16.mxu1 %v3693_v15  ;;  %4811 = vmatprep.mubr.bf16.mxu0 %v3695_v4 }
 0xe36   : > { %4772 = vmatmul.mubr.bf16.vlgmr.msra.gmra.mrb[44].mxu1 %v3692_v18  ;;  %4812 = vmatmul.mubr.bf16.vlgmr.msra.gmra.mrb[32].mxu0 %v3694_v20  ;;  %v6378_v18 = vld [vmem:[%s7722_s28 + $0x200] sm:$0xff]  }
 0xe37   : > { %5874 = vmatpush3.bf16.msra.mxu1 %v6346_v16  ;;  %5896 = vmatpush3.bf16.msra.mxu0 %v6347_v17  ;;  %v6379_v20 = vld [vmem:[%s7722_s28 + $0x280] sm:$0xff]  }
 0xe38   : > { %5875 = vmatprep.subr.bf16.mxu1 %v6348_v21  ;;  %5897 = vmatprep.subr.bf16.mxu0 %v6349_v22 }
 0xe3b   : > { %5876 = vmatpush3.bf16.msra.mxu1 %v6350_v23  ;;  %5898 = vmatpush3.bf16.msra.mxu0 %v6351_v24  ;;  %v6380_v23 = vld [vmem:[%s7722_s28 + $0x248] sm:$0xff]  }
 0xe3c   : > { %5877 = vmatprep.subr.bf16.mxu1 %v6352_v25  ;;  %5899 = vmatprep.subr.bf16.mxu0 %v6353_v26  ;;  %v6381_v24 = vld [vmem:[%s7722_s28 + $0x2c8] sm:$0xff]  }
 0xe3d   : > { %v6382_v25 = vld [vmem:[%s7722_s28 + $0x208] sm:$0xff]  }
 0xe3e   : > { %v6383_v26 = vld [vmem:[%s7722_s28 + $0x288] sm:$0xff]  }
 0xe3f   : > { %5878 = vmatpush3.bf16.msra.mxu1 %v6354_v27  ;;  %5900 = vmatpush3.bf16.msra.mxu0 %v6355_v28  ;;  %v6384_v27 = vld [vmem:[%s7722_s28 + $0x250] sm:$0xff]  }
 0xe40   : > { %5879 = vmatprep.subr.bf16.mxu1 %v6356_v29  ;;  %5901 = vmatprep.subr.bf16.mxu0 %v6357_v10  ;;  %v6385_v28 = vld [vmem:[%s7722_s28 + $0x2d0] sm:$0xff]  }
 0xe41   : > { %v6386_v29 = vld [vmem:[%s7722_s28 + $0x210] sm:$0xff]  }
 0xe42   : > { %v6387_v10 = vld [vmem:[%s7722_s28 + $0x290] sm:$0xff]  }
 0xe43   : > { %5880 = vmatpush3.bf16.msra.mxu1 %v6358_v63  ;;  %5902 = vmatpush3.bf16.msra.mxu0 %v6359_v32  ;;  %v6388_v63 = vld [vmem:[%s7722_s28 + $0x258] sm:$0xff]  }
 0xe44   : > { %5881 = vmatprep.subr.bf16.mxu1 %v6360_v34  ;;  %5903 = vmatprep.subr.bf16.mxu0 %v6361_v35  ;;  %v6389_v32 = vld [vmem:[%s7722_s28 + $0x2d8] sm:$0xff]  }
 0xe45   : > { %v6390_v34 = vld [vmem:[%s7722_s28 + $0x218] sm:$0xff]  }
 0xe46   : > { %v6391_v35 = vld [vmem:[%s7722_s28 + $0x298] sm:$0xff]  }
 0xe47   : > { %5882 = vmatpush3.bf16.msra.mxu1 %v6362_v36  ;;  %5904 = vmatpush3.bf16.msra.mxu0 %v6363_v37  ;;  %v6392_v36 = vld [vmem:[%s7722_s28 + $0x260] sm:$0xff]  }
 0xe48   : > { %5883 = vmatprep.subr.bf16.mxu1 %v6364_v39  ;;  %5905 = vmatprep.subr.bf16.mxu0 %v6365_v40  ;;  %v6393_v37 = vld [vmem:[%s7722_s28 + $0x2e0] sm:$0xff]  }
 0xe49   : > { %v6394_v39 = vld [vmem:[%s7722_s28 + $0x220] sm:$0xff]  }
 0xe4a   : > { %v6395_v40 = vld [vmem:[%s7722_s28 + $0x2a0] sm:$0xff]  }
 0xe4b   : > { %5884 = vmatpush3.bf16.msra.mxu1 %v6366_v44  ;;  %5906 = vmatpush3.bf16.msra.mxu0 %v6367_v46  ;;  %v6396_v44 = vld [vmem:[%s7722_s28 + $0x268] sm:$0xff]  }
 0xe4c   : > { %5885 = vmatprep.subr.bf16.mxu1 %v6368_v38  ;;  %5907 = vmatprep.subr.bf16.mxu0 %v6369_v42  ;;  %v6397_v46 = vld [vmem:[%s7722_s28 + $0x2e8] sm:$0xff]  }
 0xe4d   : > { %v3464_v57 = vpop.f32.mrb[32].mxu1  ;;  %v3505_v58 = vpop.f32.mrb[20].mxu0  ;;  %v6398_v38 = vld [vmem:[%s7722_s28 + $0x228] sm:$0xff]  }
 0xe4e   : > { %v3465_v59 = vadd.f32 %v3464_v57, %v2647_v45  ;;  %v3506_v60 = vadd.f32 %v3505_v58, %v2655_v3  ;;  %v3466_v61 = vpop.f32.mrb[33].mxu1  ;;  %v3507_v62 = vpop.f32.mrb[21].mxu0  ;;  %v6399_v42 = vld [vmem:[%s7722_s28 + $0x2a8] sm:$0xff]   ;;  %v6400_v3 = vld [vmem:[%s7722_s28 + $0x270] sm:$0xff]   ;;  %v6404_v58 = vld [vmem:[%s7722_s28 + $0x278] sm:$0xff]  }
 0xe4f   : > { %v3467_v0 = vadd.f32 %v3466_v61, %v2651_v49  ;;  %v3508_v1 = vadd.f32 %v3507_v62, %v2659_v50  ;;  %v3468_v2 = vpop.f32.mrb[34].mxu1  ;;  %v3509_v52 = vpop.f32.mrb[22].mxu0  ;;  %5886 = vmatpush3.bf16.msra.mxu1 %v6370_v51  ;;  %5908 = vmatpush3.bf16.msra.mxu0 %v6371_v54  ;;  %v7465_v45 = vld [vmem:[%s6940_s16 + $0x8] sm:$0xff]  ;;  %v6401_v49 = vld [vmem:[%s7722_s28 + $0x2f0] sm:$0xff]  }
 0xe50   : > { %v3680_v8 = vmax.f32 %v3465_v59, 0.0  ;;  %v3682_v11 = vmax.f32 %v3506_v60, 0.0  ;;  %v3469_v12 = vpop.f32.mrb[35].mxu1  ;;  %v3510_v5 = vpop.f32.mrb[23].mxu0  ;;  %5887 = vmatprep.subr.bf16.mxu1 %v6372_v55  ;;  %5909 = vmatprep.subr.bf16.mxu0 %v6373_v56  ;;  %v2663_v50 = vrot.slane %v7465_v45, %v7004_v33  ;;  %v2671_v51 = vrot.slane %v7465_v45, %v7011_v41  ;;  %v6402_v56 = vld [vmem:[%s7722_s28 + $0x230] sm:$0xff]   ;;  %v6405_v33 = vld [vmem:[%s7722_s28 + $0x2f8] sm:$0xff]  }
 0xe51   : > { %v3681_v15 = vmax.f32 %v3467_v0, 0.0  ;;  %v3683_v4 = vmax.f32 %v3508_v1, 0.0  ;;  %v2667_v54 = vrot.slane %v7465_v45, %v7000_v31  ;;  %v2675_v55 = vrot.slane %v7465_v45, %v2642_v53  ;;  %v6403_v57 = vld [vmem:[%s7722_s28 + $0x2b0] sm:$0xff]   ;;  %v6406_v52 = vld [vmem:[%s7722_s28 + $0x238] sm:$0xff]   ;;  %v6408_v5 = vld [vmem:[%s7722_s28 + $0x340] sm:$0xff]  }
 0xe52   : > { %v3696_v21 = vpack.c.bf16 %v3680_v8, %v3680_v8  ;;  %v3698_v22 = vpack.c.bf16 %v3682_v11, %v3682_v11 }
 0xe53   : > { %v3697_v16 = vpack.c.bf16 %v3681_v15, %v3681_v15  ;;  %v3699_v17 = vpack.c.bf16 %v3683_v4, %v3683_v4  ;;  %5888 = vmatpush3.bf16.msra.mxu1 %v6374_v6  ;;  %5910 = vmatpush3.bf16.msra.mxu0 %v6375_v7  ;;  %v6407_v6 = vld [vmem:[%s7722_s28 + $0x2b8] sm:$0xff]  }
 0xe54   : > { %5917 = vmatprep.subr.bf16.mxu1 %v6376_v13  ;;  %5939 = vmatprep.subr.bf16.mxu0 %v6377_v14  ;;  %v6409_v13 = vld [vmem:[%s7722_s28 + $0x3c0] sm:$0xff]  }
 0xe55   : > { %4851 = vmatprep.mubr.bf16.mxu1 %v3697_v16  ;;  %4891 = vmatprep.mubr.bf16.mxu0 %v3699_v17  ;;  %v6410_v17 = vld [vmem:[%s7722_s28 + $0x300] sm:$0xff]  }
 0xe56   : > { %4852 = vmatmul.mubr.bf16.vlgmr.msra.gmra.mrb[48].mxu1 %v3696_v21  ;;  %4892 = vmatmul.mubr.bf16.vlgmr.msra.gmra.mrb[36].mxu0 %v3698_v22  ;;  %v6412_v22 = vld [vmem:[%s7722_s28 + $0x348] sm:$0xff]  }
 0xe57   : > { %5918 = vmatpush3.bf16.msra.mxu1 %v6378_v18  ;;  %5940 = vmatpush3.bf16.msra.mxu0 %v6379_v20  ;;  %v6411_v18 = vld [vmem:[%s7722_s28 + $0x380] sm:$0xff]  }
 0xe58   : > { %5919 = vmatprep.subr.bf16.mxu1 %v6380_v23  ;;  %5941 = vmatprep.subr.bf16.mxu0 %v6381_v24  ;;  %v6413_v23 = vld [vmem:[%s7722_s28 + $0x3c8] sm:$0xff]  }
 0xe59   : > { %v6414_v24 = vld [vmem:[%s7722_s28 + $0x308] sm:$0xff]  }
 0xe5b   : > { %5920 = vmatpush3.bf16.msra.mxu1 %v6382_v25  ;;  %5942 = vmatpush3.bf16.msra.mxu0 %v6383_v26  ;;  %v6415_v25 = vld [vmem:[%s7722_s28 + $0x388] sm:$0xff]   ;;  %v6416_v26 = vld [vmem:[%s7722_s28 + $0x350] sm:$0xff]  }
 0xe5c   : > { %5921 = vmatprep.subr.bf16.mxu1 %v6384_v27  ;;  %5943 = vmatprep.subr.bf16.mxu0 %v6385_v28  ;;  %v6417_v27 = vld [vmem:[%s7722_s28 + $0x3d0] sm:$0xff]  }
 0xe5d   : > { %v6418_v28 = vld [vmem:[%s7722_s28 + $0x310] sm:$0xff]  }
 0xe5f   : > { %5922 = vmatpush3.bf16.msra.mxu1 %v6386_v29  ;;  %5944 = vmatpush3.bf16.msra.mxu0 %v6387_v10  ;;  %v6419_v29 = vld [vmem:[%s7722_s28 + $0x390] sm:$0xff]   ;;  %v6420_v10 = vld [vmem:[%s7722_s28 + $0x358] sm:$0xff]  }
 0xe60   : > { %5923 = vmatprep.subr.bf16.mxu1 %v6388_v63  ;;  %5945 = vmatprep.subr.bf16.mxu0 %v6389_v32  ;;  %v6421_v63 = vld [vmem:[%s7722_s28 + $0x3d8] sm:$0xff]  }
 0xe61   : > { %v6422_v32 = vld [vmem:[%s7722_s28 + $0x318] sm:$0xff]  }
 0xe63   : > { %5924 = vmatpush3.bf16.msra.mxu1 %v6390_v34  ;;  %5946 = vmatpush3.bf16.msra.mxu0 %v6391_v35  ;;  %v6423_v34 = vld [vmem:[%s7722_s28 + $0x398] sm:$0xff]   ;;  %v6424_v35 = vld [vmem:[%s7722_s28 + $0x360] sm:$0xff]  }
 0xe64   : > { %5925 = vmatprep.subr.bf16.mxu1 %v6392_v36  ;;  %5947 = vmatprep.subr.bf16.mxu0 %v6393_v37  ;;  %v6425_v36 = vld [vmem:[%s7722_s28 + $0x3e0] sm:$0xff]  }
 0xe65   : > { %v6426_v37 = vld [vmem:[%s7722_s28 + $0x320] sm:$0xff]  }
 0xe67   : > { %5926 = vmatpush3.bf16.msra.mxu1 %v6394_v39  ;;  %5948 = vmatpush3.bf16.msra.mxu0 %v6395_v40  ;;  %v6427_v39 = vld [vmem:[%s7722_s28 + $0x3a0] sm:$0xff]   ;;  %v6428_v40 = vld [vmem:[%s7722_s28 + $0x368] sm:$0xff]  }
 0xe68   : > { %5927 = vmatprep.subr.bf16.mxu1 %v6396_v44  ;;  %5949 = vmatprep.subr.bf16.mxu0 %v6397_v46  ;;  %v6429_v44 = vld [vmem:[%s7722_s28 + $0x3e8] sm:$0xff]  }
 0xe69   : > { %v6430_v46 = vld [vmem:[%s7722_s28 + $0x328] sm:$0xff]  }
 0xe6b   : > { %5928 = vmatpush3.bf16.msra.mxu1 %v6398_v38  ;;  %5950 = vmatpush3.bf16.msra.mxu0 %v6399_v42  ;;  %v6431_v38 = vld [vmem:[%s7722_s28 + $0x3a8] sm:$0xff]   ;;  %v6432_v42 = vld [vmem:[%s7722_s28 + $0x370] sm:$0xff]  }
 0xe6c   : > { %5929 = vmatprep.subr.bf16.mxu1 %v6400_v3  ;;  %5951 = vmatprep.subr.bf16.mxu0 %v6401_v49  ;;  %v6433_v3 = vld [vmem:[%s7722_s28 + $0x3f0] sm:$0xff]   ;;  %v2679_v49 = vrot.slane %v7465_v45, %v2646_v43  ;;  %v6436_v43 = vld [vmem:[%s7722_s28 + $0x378] sm:$0xff]  }
 0xe6d   : > { %v3546_v59 = vpop.f32.mrb[36].mxu1  ;;  %v3587_v60 = vpop.f32.mrb[24].mxu0 }
 0xe6e   : > { %v3547_v41 = vadd.f32 %v3546_v59, %v2663_v50  ;;  %v3588_v61 = vadd.f32 %v3587_v60, %v2671_v51  ;;  %v3548_v62 = vpop.f32.mrb[37].mxu1  ;;  %v3589_v0 = vpop.f32.mrb[25].mxu0  ;;  %v2687_v50 = vrot.slane %v7465_v45, %v2654_v19  ;;  %v2683_v51 = vrot.slane %v7465_v45, %v2650_v47 }
 0xe6f   : > { %v3549_v31 = vadd.f32 %v3548_v62, %v2667_v54  ;;  %v3590_v1 = vadd.f32 %v3589_v0, %v2675_v55  ;;  %v3550_v2 = vpop.f32.mrb[38].mxu1  ;;  %v3591_v53 = vpop.f32.mrb[26].mxu0  ;;  %5930 = vmatpush3.bf16.msra.mxu1 %v6402_v56  ;;  %5952 = vmatpush3.bf16.msra.mxu0 %v6403_v57  ;;  %v2691_v54 = vrot.slane %v7465_v45, %v2658_v48  ;;  %v6434_v55 = vld [vmem:[%s7722_s28 + $0x330] sm:$0xff]   ;;  %v6437_v57 = vld [vmem:[%s7722_s28 + $0x3f8] sm:$0xff]  }
 0xe70   : > { %v3684_v7 = vmax.f32 %v3547_v41, 0.0  ;;  %v3686_v8 = vmax.f32 %v3588_v61, 0.0  ;;  %v3551_v11 = vpop.f32.mrb[39].mxu1  ;;  %v3592_v12 = vpop.f32.mrb[27].mxu0  ;;  %5931 = vmatprep.subr.bf16.mxu1 %v6404_v58  ;;  %5953 = vmatprep.subr.bf16.mxu0 %v6405_v33  ;;  %v6435_v56 = vld [vmem:[%s7722_s28 + $0x3b0] sm:$0xff]   ;;  %v6438_v48 = vld [vmem:[%s7722_s28 + $0x338] sm:$0xff]  }
 0xe71   : > { %v3685_v14 = vmax.f32 %v3549_v31, 0.0  ;;  %v3687_v15 = vmax.f32 %v3590_v1, 0.0  ;;  %v6439_v45 = vld [vmem:[%s7722_s28 + $0x3b8] sm:$0xff]  }
 0xe72   : > { %v3700_v20 = vpack.c.bf16 %v3684_v7, %v3684_v7  ;;  %v3702_v21 = vpack.c.bf16 %v3686_v8, %v3686_v8 }
 0xe73   : > { %v3701_v4 = vpack.c.bf16 %v3685_v14, %v3685_v14  ;;  %v3703_v16 = vpack.c.bf16 %v3687_v15, %v3687_v15  ;;  %5932 = vmatpush3.bf16.msra.mxu1 %v6406_v52  ;;  %5954 = vmatpush3.bf16.msra.mxu0 %v6407_v6 }
 0xe74   : > { %5961 = vmatprep.subr.bf16.mxu1 %v6408_v5  ;;  %5983 = vmatprep.subr.bf16.mxu0 %v6409_v13  ;;  %v5631_v13 = vld [vmem:[%s713_s21] ss:$0 sm:$0xff] }
 0xe75   : > { %4931 = vmatprep.mubr.bf16.mxu1 %v3701_v4  ;;  %4971 = vmatprep.mubr.bf16.mxu0 %v3703_v16 }
 0xe76   : > { %4932 = vmatmul.mubr.bf16.vlgmr.msra.gmra.mrb[52].mxu1 %v3700_v20  ;;  %4972 = vmatmul.mubr.bf16.vlgmr.msra.gmra.mrb[40].mxu0 %v3702_v21 }
 0xe77   : > { %5962 = vmatpush3.bf16.msra.mxu1 %v6410_v17  ;;  %5984 = vmatpush3.bf16.msra.mxu0 %v6411_v18 }
 0xe78   : > { %5963 = vmatprep.subr.bf16.mxu1 %v6412_v22  ;;  %5985 = vmatprep.subr.bf16.mxu0 %v6413_v23 }
 0xe7b   : > { %5964 = vmatpush3.bf16.msra.mxu1 %v6414_v24  ;;  %5986 = vmatpush3.bf16.msra.mxu0 %v6415_v25 }
 0xe7c   : > { %5965 = vmatprep.subr.bf16.mxu1 %v6416_v26  ;;  %5987 = vmatprep.subr.bf16.mxu0 %v6417_v27 }
 0xe7f   : > { %5966 = vmatpush3.bf16.msra.mxu1 %v6418_v28  ;;  %5988 = vmatpush3.bf16.msra.mxu0 %v6419_v29 }
 0xe80   : > { %5967 = vmatprep.subr.bf16.mxu1 %v6420_v10  ;;  %5989 = vmatprep.subr.bf16.mxu0 %v6421_v63 }
 0xe83   : > { %5968 = vmatpush3.bf16.msra.mxu1 %v6422_v32  ;;  %5990 = vmatpush3.bf16.msra.mxu0 %v6423_v34 }
 0xe84   : > { %5969 = vmatprep.subr.bf16.mxu1 %v6424_v35  ;;  %5991 = vmatprep.subr.bf16.mxu0 %v6425_v36 }
 0xe87   : > { %5970 = vmatpush3.bf16.msra.mxu1 %v6426_v37  ;;  %5992 = vmatpush3.bf16.msra.mxu0 %v6427_v39 }
 0xe88   : > { %5971 = vmatprep.subr.bf16.mxu1 %v6428_v40  ;;  %5993 = vmatprep.subr.bf16.mxu0 %v6429_v44 }
 0xe8b   : > { %5972 = vmatpush3.bf16.msra.mxu1 %v6430_v46  ;;  %5994 = vmatpush3.bf16.msra.mxu0 %v6431_v38 }
 0xe8c   : > { %5973 = vmatprep.subr.bf16.mxu1 %v6432_v42  ;;  %5995 = vmatprep.subr.bf16.mxu0 %v6433_v3 }
 0xe8d   : > { %v3628_v58 = vpop.f32.mrb[40].mxu1  ;;  %v3669_v19 = vpop.f32.mrb[28].mxu0 }
 0xe8e   : > { %v3629_v33 = vadd.f32 %v3628_v58, %v2679_v49  ;;  %v3670_v59 = vadd.f32 %v3669_v19, %v2687_v50  ;;  %v3630_v60 = vpop.f32.mrb[41].mxu1  ;;  %v3671_v41 = vpop.f32.mrb[29].mxu0 }
 0xe8f   : > { %v3631_v61 = vadd.f32 %v3630_v60, %v2683_v51  ;;  %v3672_v47 = vadd.f32 %v3671_v41, %v2691_v54  ;;  %v3632_v62 = vpop.f32.mrb[42].mxu1  ;;  %v3673_v30 = vpop.f32.mrb[30].mxu0  ;;  %5974 = vmatpush3.bf16.msra.mxu1 %v6434_v55  ;;  %5996 = vmatpush3.bf16.msra.mxu0 %v6435_v56 }
 0xe90   : > { %v3688_v0 = vmax.f32 %v3629_v33, 0.0  ;;  %v3690_v31 = vmax.f32 %v3670_v59, 0.0  ;;  %v3633_v1 = vpop.f32.mrb[43].mxu1  ;;  %v3674_v2 = vpop.f32.mrb[31].mxu0  ;;  %5975 = vmatprep.subr.bf16.mxu1 %v6436_v43  ;;  %5997 = vmatprep.subr.bf16.mxu0 %v6437_v57 }
 0xe91   : > { %v3689_v53 = vmax.f32 %v3631_v61, 0.0  ;;  %v3691_v52 = vmax.f32 %v3672_v47, 0.0 }
 0xe92   : > { %v3704_v8 = vpack.c.bf16 %v3688_v0, %v3688_v0  ;;  %v3706_v11 = vpack.c.bf16 %v3690_v31, %v3690_v31 }
 0xe93   : > { %v3705_v6 = vpack.c.bf16 %v3689_v53, %v3689_v53  ;;  %v3707_v7 = vpack.c.bf16 %v3691_v52, %v3691_v52  ;;  %5976 = vmatpush3.bf16.msra.mxu1 %v6438_v48  ;;  %5998 = vmatpush3.bf16.msra.mxu0 %v6439_v45  ;;  %v5760_v52 = vld [vmem:[%s716_s10] ss:$0 sm:$0xff] }
 0xe95   : > { %5011 = vmatprep.mubr.bf16.mxu1 %v3705_v6  ;;  %5051 = vmatprep.mubr.bf16.mxu0 %v3707_v7 }
 0xe96   : > { %5012 = vmatmul.mubr.bf16.vlgmr.msra.gmra.mrb[56].mxu1 %v3704_v8  ;;  %5052 = vmatmul.mubr.bf16.vlgmr.msra.gmra.mrb[44].mxu0 %v3706_v11  ;;  %v6477_v11 = vld [vmem:[%s7726_s12] sm:$0xff] (!%p5762_p4)  }
 0xf09   : > { %v5845_v12 = vpop.f32.mrb[44].mxu1  ;;  %v5867_v5 = vpop.f32.mrb[32].mxu0 }
 0xf0a   : > { %v5846_v14 = vpop.f32.mrb[45].mxu1  ;;  %v5868_v15 = vpop.f32.mrb[33].mxu0 }
 0xf0b   : > { %v5847_v4 = vadd.f32 %v5846_v14, %v5845_v12  ;;  %v5869_v16 = vadd.f32 %v5868_v15, %v5867_v5  ;;  %v5848_v17 = vpop.f32.mrb[46].mxu1  ;;  %v5870_v18 = vpop.f32.mrb[34].mxu0  ;;  %v6652_v12 = vmov (!%p5762_p4), 0.0   ;;  %v6478_v5 = vld [vmem:[%s7726_s12 + $0x8] sm:$0xff] (!%p5762_p4)   ;;  %v6480_v14 = vld [vmem:[%s7726_s12 + $0x18] sm:$0xff] (!%p5762_p4)   ;;  %v6481_v15 = vld [vmem:[%s7726_s12 + $0x20] sm:$0xff] (!%p5762_p4)  }
 0xf0c   : > { %v5849_v20 = vpop.f32.mrb[47].mxu1  ;;  %v5871_v21 = vpop.f32.mrb[35].mxu0  ;;  %6134 = vmatprep.subr.bf16.mxu0 (!%p5762_p4), %v6652_v12  ;;  %6150 = vmatprep.mubr.msk.bf16.mxu0 (!%p5762_p4), %vm6653_vm9, %v6652_v12  ;;  %v6484_v17 = vld [vmem:[%s7726_s12 + $0x38] sm:$0xff] (!%p5762_p4)  }
 0xf0d   : > { %v4774_v22 = vadd.f32 %v5847_v4, %v5631_v13  ;;  %6135 = vmatpush3.bf16.msra.mxu0 (!%p5762_p4), %v6477_v11  ;;  %v6479_v13 = vld [vmem:[%s7726_s12 + $0x10] sm:$0xff] (!%p5762_p4)   ;;  %v6482_v4 = vld [vmem:[%s7726_s12 + $0x28] sm:$0xff] (!%p5762_p4)   ;;  %v5763_v20 = vld [vmem:[%s7727_s26] ss:$0 sm:$0xff] (!%p5762_p4) }
 0xf0e   : > { %6136 = vmatprep.subr.bf16.mxu0 (!%p5762_p4), %v6652_v12 }
 0xf0f   : > { %v4814_v23 = vadd.f32 %v5869_v16, %v4774_v22  ;;  %v6483_v16 = vld [vmem:[%s7726_s12 + $0x30] sm:$0xff] (!%p5762_p4)  }
 0xf11   : > { %6137 = vmatpush3.bf16.msra.mxu0 (!%p5762_p4), %v6478_v5 }
 0xf12   : > { %6138 = vmatprep.subr.bf16.mxu0 (!%p5762_p4), %v6652_v12 }
 0xf15   : > { %6139 = vmatpush3.bf16.msra.mxu0 (!%p5762_p4), %v6479_v13 }
 0xf16   : > { %6140 = vmatprep.subr.bf16.mxu0 (!%p5762_p4), %v6652_v12 }
 0xf19   : > { %6141 = vmatpush3.bf16.msra.mxu0 (!%p5762_p4), %v6480_v14 }
 0xf1a   : > { %6142 = vmatprep.subr.bf16.mxu0 (!%p5762_p4), %v6652_v12 }
 0xf1d   : > { %6143 = vmatpush3.bf16.msra.mxu0 (!%p5762_p4), %v6481_v15 }
 0xf1e   : > { %6144 = vmatprep.subr.bf16.mxu0 (!%p5762_p4), %v6652_v12 }
 0xf21   : > { %6145 = vmatpush3.bf16.msra.mxu0 (!%p5762_p4), %v6482_v4 }
 0xf22   : > { %6146 = vmatprep.subr.bf16.mxu0 (!%p5762_p4), %v6652_v12 }
 0xf25   : > { %6147 = vmatpush3.bf16.msra.mxu0 (!%p5762_p4), %v6483_v16 }
 0xf26   : > { %6148 = vmatprep.subr.bf16.mxu0 (!%p5762_p4), %v6652_v12 }
 0xf29   : > { %v5889_v24 = vpop.f32.mrb[48].mxu1  ;;  %v5911_v25 = vpop.f32.mrb[36].mxu0  ;;  %6149 = vmatpush3.bf16.msra.mxu0 (!%p5762_p4), %v6484_v17 }
 0xf2a   : > { %v5890_v26 = vpop.f32.mrb[49].mxu1  ;;  %v5912_v27 = vpop.f32.mrb[37].mxu0 }
 0xf2b   : > { %v5891_v28 = vadd.f32 %v5890_v26, %v5889_v24  ;;  %v5913_v29 = vadd.f32 %v5912_v27, %v5911_v25  ;;  %v5892_v10 = vpop.f32.mrb[50].mxu1  ;;  %v5914_v63 = vpop.f32.mrb[38].mxu0 }
 0xf2c   : > { %v5893_v32 = vpop.f32.mrb[51].mxu1  ;;  %v5915_v34 = vpop.f32.mrb[39].mxu0 }
 0xf2d   : > { %v4854_v35 = vadd.f32 %v5891_v28, %v4814_v23 }
 0xf2f   : > { %v4894_v36 = vadd.f32 %v5913_v29, %v4854_v35 }
 0xf49   : > { %v5933_v37 = vpop.f32.mrb[52].mxu1  ;;  %v5955_v39 = vpop.f32.mrb[40].mxu0 }
 0xf4a   : > { %v5934_v40 = vpop.f32.mrb[53].mxu1  ;;  %v5956_v44 = vpop.f32.mrb[41].mxu0 }
 0xf4b   : > { %v5935_v46 = vadd.f32 %v5934_v40, %v5933_v37  ;;  %v5957_v38 = vadd.f32 %v5956_v44, %v5955_v39  ;;  %v5936_v42 = vpop.f32.mrb[54].mxu1  ;;  %v5958_v3 = vpop.f32.mrb[42].mxu0 }
 0xf4c   : > { %v5937_v49 = vpop.f32.mrb[55].mxu1  ;;  %v5959_v50 = vpop.f32.mrb[43].mxu0 }
 0xf4d   : > { %v4934_v51 = vadd.f32 %v5935_v46, %v4894_v36 }
 0xf4f   : > { %v4974_v54 = vadd.f32 %v5957_v38, %v4934_v51 }
 0xf69   : > { %v5977_v55 = vpop.f32.mrb[56].mxu1  ;;  %v5999_v56 = vpop.f32.mrb[44].mxu0 }
 0xf6a   : > { %v5978_v43 = vpop.f32.mrb[57].mxu1  ;;  %v6000_v57 = vpop.f32.mrb[45].mxu0 }
 0xf6b   : > { %v5979_v58 = vadd.f32 %v5978_v43, %v5977_v55  ;;  %v6001_v19 = vadd.f32 %v6000_v57, %v5999_v56  ;;  %v5980_v33 = vpop.f32.mrb[58].mxu1  ;;  %v6002_v59 = vpop.f32.mrb[46].mxu0 }
 0xf6c   : > { %v5981_v60 = vpop.f32.mrb[59].mxu1  ;;  %v6003_v41 = vpop.f32.mrb[47].mxu0 }
 0xf6d   : > { %v5014_v61 = vadd.f32 %v5979_v58, %v4974_v54 }
 0xf6f   : > { %v5054_v47 = vadd.f32 %v6001_v19, %v5014_v61 }
 0xf71   : > { %v5059_v62 = vadd.f32 %v5054_v47, %v7239_v9  ;;  %v5761_v9 = vld [vmem:[%s719_s6] ss:$0 sm:$0xff] }
 0xf73   : > { %5062 = vadd.xlane.f32.xlu0 %v5059_v62 }
0x1000   : > { %v5063_v30 = vpop.xlane.xlu0 %5062 }
0x1001   : > { %v5064_v48 = vmul.f32 0.0078125, %v5063_v30 }
0x1003   : > { %v5065_v45 = vsub.f32 %v5059_v62, %v5064_v48 }
0x1005   : > { %v5066_v0 = vmul.f32 %v5065_v45, %v5065_v45 }
0x1007   : > { %5067 = vadd.xlane.f32.xlu1 %v5066_v0 }
0x1094   : > { %v5068_v31 = vpop.xlane.xlu1 %5067 }
0x1095   : > { %v5069_v1 = vmul.f32 0.0078125, %v5068_v31 }
0x1097   : > { %v5070_v2 = vadd.f32 1e-05, %v5069_v1 }
0x1099   : > { %6474 = vrsqrt.f32 %v5070_v2 }
0x10a3   : > { %v6475_v53 = vpop.eup %6474 }
0x10a4   : > { %v5072_v6 = vmul.f32 %v6475_v53, %v5065_v45  ;;  %5091 = sbr.rel (%p5762_p4) target bundleno = 4483 (0x1183), region = 92 }
0x10a6   : > { %v5079_v7 = vmul.f32 %v5760_v52, %v5072_v6 }
0x10a8   : > { %v5086_v8 = vadd.f32 %v5761_v9, %v5079_v7 }
0x10aa   : > { %5087 = vst [vmem:[#allocation2] sm:$0xff] %v5086_v8  ;;  %v5092_v18 = vpack.c.bf16 (!%p5762_p4), %v5086_v8, %v5086_v8 }
0x10ac   : > { %6151 = vmatmul.mubr.bf16.vlgmr.msra.gmra.mrb[0].mxu0 %v5092_v18 }
0x117f   : > { %v5198_v21 = vpop.f32.mrb[0].mxu0 }
0x1180   : > { %v5199_v22 = vadd.f32 %v5763_v20, %v5198_v21  ;;  %v6152_v23 = vpop.f32.mrb[1].mxu0 }
0x1181   : > { %v5201_v24 = vpop.f32.mrb[2].mxu0 }
0x1182   : > { %5204 = vst [vmem:[%s674_s3] sm:$0xff] %v5199_v22  ;;  %v6153_v25 = vpop.f32.mrb[3].mxu0 }
0x1183 PF: > { %s7728_s21 = sld [smem:[#allocation14_spill]]  ;;  %s7729_s0 = sld [smem:[#allocation10_spill]] }
0x1184   : > { %s7730_s1 = sld [smem:[#allocation22_spill]]  ;;  %s7731_s25 = sld [smem:[#allocation37_spill]] }
0x1185   : > { %s5219_s17 = sshll.u32 %s674_s3, 4  ;;  %s6654_s11 = smov [#allocation6]   ;;  %s5220_s17 = int_to_ptr.vmem [resolvable:$true] %s5219_s17 }
0x1186   : > { %s6515_s24 = scalar_lea.vmem %s5220_s17, 128  ;;  %s6519_s9 = sshll.u32 %s6654_s11, 4  ;;  %s6520_s9 = int_to_ptr.vmem [resolvable:$false] %s6519_s9 }
0x1187   : > { %p6516_p0 = scmp.ne.s32.totalorder %s5220_s17, %s6515_s24  ;;  %s6521_s20 = scalar_lea.vmem %s6520_s9, 256 }
0x1188   : > { %p6522_p3 = scmp.lt.s32.totalorder %s5220_s17, %s6520_s9  ;;  %p6523_p10 = scmp.lt.s32.totalorder %s6521_s20, %s6515_s24 }
0x1189   : > { %s5773_s2 = sshll.u32 %s7728_s21, 7  ;;  %s7733_s6 = sand.u32 1, %s7729_s0  }
0x118a   : > { %s7732_s13 = smov %s7731_s25  ;;  %s7578_s10 = scalar_lea.hbm %s7731_s25, %s5773_s2 }
0x118b   : > { %s5206_s30 = scalar_lea.sflag [#allocation5], %s7733_s6  ;;  %p7734_p1 = scmp.ne.s32.totalorder %s7730_s1, 0 }
0x118c   : > { %p6524_p11 = por %p6523_p10, %p6522_p3 }
0x118d   : > { %p6517_p5 = pnand %p6516_p0, %p7734_p1 }
0x118f   : > { %p6518_p7 = pneg %p6517_p5 }
0x1191   : > { %p6525_p6 = pnand %p6524_p11, %p6518_p7 }
0x1193   : > { %6528 = shalt.err (!%p6525_p6)
}
0x1194   : > { %s6529_s14 = scalar_lea.hbm %s7578_s10, 128  ;;  %s6533_s27 = scalar_lea.hbm %s7732_s13, 256 }
0x1195   : > { %p6530_p9 = scmp.ne.s32.totalorder %s7578_s10, %s6529_s14  ;;  %p6534_p2 = scmp.lt.u32.totalorder %s7578_s10, %s7732_s13 }
0x1196   : > { %p6535_p8 = scmp.lt.u32.totalorder %s6533_s27, %s6529_s14  ;;  %p6537_p0 = scmp.lt.u32.totalorder %s6529_s14, %s7578_s10 }
0x1197   : > { %p6531_p13 = pnand %p6530_p9, %p7734_p1 }
0x1198   : > { %p6536_p4 = por %p6535_p8, %p6534_p2 }
0x1199   : > { %p6532_p12 = pneg %p6531_p13 }
0x119a   : > { %p6538_p5 = por %p6537_p0, %p6536_p4 }
0x119c   : > { %p6539_p7 = pnand %p6538_p5, %p6532_p12 }
0x119e   : > { %6542 = shalt.err (!%p6539_p7)
}
0x119f   : > { %6158 = dma.vmem_to_hbm [thread:$0]  (%p7734_p1), %s5220_s17, 128, %s7578_s10, %s5206_s30  }
0x11a0 PF: > { %s7735_s8 = sld [smem:[#allocation17_spill]]  ;;  %s7736_s28 = sld [smem:[#allocation9_spill]] }
0x11a1   : > { %s7737_s18 = sld [smem:[#allocation23_spill]] }
0x11a6   : > { %p6169_p3 = scmp.ge.s32.totalorder %s7735_s8, 2  ;;  %s5231_s16 = sand.u32 1, %s7736_s28  }
0x11a7   : > { %p7738_p10 = scmp.ne.s32.totalorder %s7737_s18, 0  ;;  %s5232_s26 = scalar_lea.sflag [#allocation5], %s5231_s16 }
0x11a9   : > { %p6165_p11 = pnand %p6169_p3, %p7738_p10 }
0x11ab   : > { %6592 = dma.done.wait (!%p6165_p11), %s5232_s26, 128  }
0x11ac   : > { %6594 = vsyncadd (!%p6165_p11), %s5232_s26, 4294967168  ;;  %s31_s28 = sadd.s32 1, %s7735_s8   ;;  %s7739_s18 = sld [smem:[#allocation10_spill]] }
0x11ad   : > { %p28_p6 = scmp.ge.s32.totalorder %s31_s28, 10   ;;  %s7740_s19 = sld [smem:[#allocation11_spill]] }
0x11ae   : > { %s7741_s20 = sld [smem:[#allocation21_spill]]  ;;  %s7742_s21 = sld [smem:[#allocation12_spill]] }
0x11af   : > { %s7743_s22 = sld [smem:[#allocation13_spill]]  ;;  %s7744_s23 = sld [smem:[#allocation20_spill]] }
0x11b0   : > { %s7745_s24 = sld [smem:[#allocation15_spill]]  ;;  %s7746_s25 = sld [smem:[#allocation16_spill]] }
0x11b1   : > { %s7747_s26 = sld [smem:[#allocation18_spill]]  ;;  %s7748_s27 = sld [smem:[#allocation19_spill]] }
0x11b2   :  { %30 = sbr.rel (!%p28_p6) target bundleno = 23 (0x17), region = 169 }
0x11b9   :  { %5237 = vsyncpa [#allocation4], 1 }
0x11ba   :  { %5239 = vsyncpa [#allocation4 + $0x1], 1 }
0x11bb   :  { %5240 = vsyncpa [#allocation5], 1 }
0x11bc   :  { %5242 = vsyncpa [#allocation5 + $0x1], 1 }

// kernel: forward.4
= control target key start
LH: loop header
LB: loop body
LE: loop exit
PB: predicated region body
PF: predicated region fallthrough
CT: control target
= control target key end

     0   :  { %14 = vsyncpa [#allocation5], 0  ;;  %s10025_s0 = inlined_call_operand.vmem [shape: bf16[2,18,16,128], index: 0, kind: input, shape index: {}]   ;;  %s10026_s1 = inlined_call_operand.hbm [shape: bf16[1152,128], index: 1, kind: input, shape index: {}]   ;;  %s10027_s2 = inlined_call_operand.hbm [shape: f32[1,128], index: 2, kind: input, shape index: {}]   ;;  %s10028_s3 = inlined_call_operand.hbm [shape: bf16[128,128], index: 3, kind: input, shape index: {}]   ;;  %s10029_s4 = inlined_call_operand.hbm [shape: f32[1,128], index: 4, kind: input, shape index: {}]   ;;  %s10030_s5 = inlined_call_operand.hbm [shape: bf16[1152,128], index: 5, kind: input, shape index: {}]   ;;  %s10031_s6 = inlined_call_operand.hbm [shape: f32[1,128], index: 6, kind: input, shape index: {}]   ;;  %s10032_s7 = inlined_call_operand.vmem [shape: f32[8,256], index: 7, kind: input, shape index: {}]   ;;  %s10033_s8 = inlined_call_operand.hbm [shape: f32[8,128], index: 8, kind: input, shape index: {}]   ;;  %s10034_s9 = inlined_call_operand.vmem [shape: f32[2,8,128], index: 9, kind: output, shape index: {}]  }
   0x1   :  { %15 = vsyncpa [#allocation7], 0 }
   0x2   :  { %16 = vsyncpa [#allocation10], 0 }
   0x3   :  { %17 = vsyncpa [#allocation13], 0  ;;  %s7764_s30 = smov 0  }
   0x4 LB: > { %s7702_s10 = smov [#allocation6]   ;;  %s7770_s12 = sadd.s32 4294967295, %s7700_s30   ;;  %s7700_s30 = sphi %s7764_s30, %s23_s30  }
   0x5   : > { %s274_s11 = sshll.u32 %s7702_s10, 4  ;;  %p5180_p0 = scmp.ge.s32.totalorder %s7700_s30, 1  ;;  %s7775_s11 = int_to_ptr.vmem [resolvable:$true] %s274_s11 }
   0x6   : > { %p248_p1 = scmp.lt.s32.totalorder %s7700_s30, 3  ;;  %p10035_p2 = scmp.eq.s32.totalorder %s7770_s12, 0 }
   0x7   : > { %s7703_s14 = smov [#allocation9]   ;;  %s7704_s16 = smov [#allocation12]  }
   0x8   : > { %p7777_p3 = pnand %p5180_p0, %p248_p1  ;;  %s298_s15 = sshll.u32 %s7703_s14, 4  ;;  %s7783_s15 = int_to_ptr.vmem [resolvable:$true] %s298_s15 }
   0x9   : > { %s322_s17 = sshll.u32 %s7704_s16, 4  ;;  %s7705_s19 = smov [#allocation4]   ;;  %s7791_s17 = int_to_ptr.vmem [resolvable:$true] %s322_s17 }
   0xa   : > { %s10047_s13 = scalar_select %p7777_p3, 1, 0 }
   0xb   : > { %p7222_p4 = pneg %p7777_p3  ;;  %s260_s20 = sshll.u32 %s7705_s19, 4  ;;  %s7793_s20 = int_to_ptr.vmem [resolvable:$true] %s260_s20 }
   0xc   : > { %s7482_s23 = scalar_lea.hbm %s10027_s2, 16 }
   0xd   : > { %p7787_p5 = pnand %p10035_p2, %p7222_p4  ;;  %p7483_p6 = scmp.ne.s32.totalorder %s10027_s2, %s7482_s23 }
   0xe   : > { %p7489_p10 = scmp.lt.u32.totalorder %s7482_s23, %s10027_s2 }
   0xf   : > { %p7803_p7 = pneg %p7787_p5 }
  0x11   : > { %p7485_p8 = pnand %p7803_p7, %p7483_p6 }
  0x13   : > { %p7486_p9 = pneg %p7485_p8 }
  0x15   : > { %p7491_p11 = pnand %p7489_p10, %p7486_p9 }
  0x17   : > { %7494 = shalt.err (!%p7491_p11)
}
  0x18   : > { %s7495_s29 = scalar_lea.vmem %s7775_s11, 16  ;;  %s7502_s10 = scalar_lea.vmem %s7775_s11, 32 }
  0x19   : > { %p7496_p12 = scmp.ne.s32.totalorder %s7775_s11, %s7495_s29  ;;  %p7503_p1 = scmp.lt.s32.totalorder %s7775_s11, %s7775_s11 }
  0x1a   : > { %p7504_p4 = scmp.lt.s32.totalorder %s7502_s10, %s7495_s29 }
  0x1b   : > { %p7498_p13 = pnand %p7496_p12, %p7803_p7 }
  0x1c   : > { %p7505_p6 = por %p7504_p4, %p7503_p1 }
  0x1d   : > { %p7499_p0 = pneg %p7498_p13 }
  0x1f   : > { %p7506_p8 = pnand %p7505_p6, %p7499_p0 }
  0x21   : > { %7509 = shalt.err (!%p7506_p8)
}
  0x22   : > { %7228 = dma.hbm_to_vmem [thread:$0]  (!%p7787_p5), %s10027_s2, 16, %s7775_s11, [#allocation7]  }
  0x23   : > { %s7510_s22 = scalar_lea.hbm %s10029_s4, 16 }
  0x24   : > { %p7511_p9 = scmp.ne.s32.totalorder %s10029_s4, %s7510_s22  ;;  %p7517_p12 = scmp.lt.u32.totalorder %s7510_s22, %s10029_s4 }
  0x26   : > { %p7513_p10 = pnand %p7511_p9, %p7803_p7 }
  0x28   : > { %p7514_p11 = pneg %p7513_p10 }
  0x2a   : > { %p7519_p13 = pnand %p7517_p12, %p7514_p11 }
  0x2c   : > { %7522 = shalt.err (!%p7519_p13)
}
  0x2d   : > { %s7523_s11 = scalar_lea.vmem %s7783_s15, 16  ;;  %s7530_s28 = scalar_lea.vmem %s7783_s15, 32 }
  0x2e   : > { %p7524_p0 = scmp.ne.s32.totalorder %s7783_s15, %s7523_s11  ;;  %p7531_p6 = scmp.lt.s32.totalorder %s7783_s15, %s7783_s15 }
  0x2f   : > { %p7532_p8 = scmp.lt.s32.totalorder %s7530_s28, %s7523_s11 }
  0x30   : > { %p7526_p1 = pnand %p7524_p0, %p7803_p7 }
  0x31   : > { %p7533_p9 = por %p7532_p8, %p7531_p6 }
  0x32   : > { %p7527_p4 = pneg %p7526_p1 }
  0x34   : > { %p7534_p10 = pnand %p7533_p9, %p7527_p4 }
  0x36   : > { %7537 = shalt.err (!%p7534_p10)
}
  0x37   : > { %7234 = dma.hbm_to_vmem [thread:$0]  (!%p7787_p5), %s10029_s4, 16, %s7783_s15, [#allocation10]  }
  0x38   : > { %s7538_s19 = scalar_lea.hbm %s10031_s6, 16 }
  0x39   : > { %p7539_p11 = scmp.ne.s32.totalorder %s10031_s6, %s7538_s19  ;;  %p7545_p0 = scmp.lt.u32.totalorder %s7538_s19, %s10031_s6 }
  0x3b   : > { %p7541_p12 = pnand %p7539_p11, %p7803_p7 }
  0x3d   : > { %p7542_p13 = pneg %p7541_p12 }
  0x3f   : > { %p7547_p1 = pnand %p7545_p0, %p7542_p13 }
  0x41   : > { %7550 = shalt.err (!%p7547_p1)
}
  0x42   : > { %s7551_s15 = scalar_lea.vmem %s7791_s17, 16  ;;  %s7558_s25 = scalar_lea.vmem %s7791_s17, 32 }
  0x43   : > { %p7552_p4 = scmp.ne.s32.totalorder %s7791_s17, %s7551_s15  ;;  %p7559_p9 = scmp.lt.s32.totalorder %s7791_s17, %s7791_s17 }
  0x44   : > { %p7560_p10 = scmp.lt.s32.totalorder %s7558_s25, %s7551_s15 }
  0x45   : > { %p7554_p6 = pnand %p7552_p4, %p7803_p7 }
  0x46   : > { %p7561_p11 = por %p7560_p10, %p7559_p9 }
  0x47   : > { %p7555_p8 = pneg %p7554_p6 }
  0x49   : > { %p7562_p12 = pnand %p7561_p11, %p7555_p8 }
  0x4b   : > { %7565 = shalt.err (!%p7562_p12)
}
  0x4c   : > { %7240 = dma.hbm_to_vmem [thread:$0]  (!%p7787_p5), %s10031_s6, 16, %s7791_s17, [#allocation13]  }
  0x4d   : > { %s7566_s10 = scalar_lea.hbm %s10026_s1, 9216 }
  0x4e   : > { %p7567_p13 = scmp.ne.s32.totalorder %s10026_s1, %s7566_s10  ;;  %p7573_p4 = scmp.lt.u32.totalorder %s7566_s10, %s10026_s1 }
  0x50   : > { %p7569_p0 = pnand %p7567_p13, %p7803_p7 }
  0x52   : > { %p7570_p1 = pneg %p7569_p0 }
  0x54   : > { %p7575_p6 = pnand %p7573_p4, %p7570_p1 }
  0x56   : > { %7578 = shalt.err (!%p7575_p6)
}
  0x57   : > { %s7579_s17 = scalar_lea.vmem %s7793_s20, 9216  ;;  %p7587_p11 = scmp.lt.s32.totalorder %s7793_s20, %s7793_s20 }
  0x58   : > { %p7580_p8 = scmp.ne.s32.totalorder %s7793_s20, %s7579_s17  ;;  %p7588_p12 = scmp.lt.s32.totalorder %s7579_s17, %s7579_s17 }
  0x5a   : > { %p7582_p9 = pnand %p7580_p8, %p7803_p7  ;;  %p7589_p13 = por %p7588_p12, %p7587_p11 }
  0x5c   : > { %p7583_p10 = pneg %p7582_p9 }
  0x5e   : > { %p7590_p0 = pnand %p7589_p13, %p7583_p10 }
  0x60   : > { %7593 = shalt.err (!%p7590_p0)
}
  0x61   : > { %s7706_s22 = smov 64   ;;  %s7707_s23 = smov 4  }
  0x62   : > { %7225 = dma.hbm_to_vmem [thread:$0]  (!%p7787_p5), %s10026_s1, 9216, %s7793_s20, [#allocation5], %s7706_s22, %s7706_s22, %s7707_s23  }
  0x63   : > { %s7708_s25 = smov [#allocation8]   ;;  %s7709_s11 = smov [#allocation11]  }
  0x64   : > { %s284_s27 = sshll.u32 %s7708_s25, 4  ;;  %s308_s28 = sshll.u32 %s7709_s11, 4  ;;  %s285_s27 = int_to_ptr.vmem [resolvable:$true] %s284_s27  ;;  %s309_s28 = int_to_ptr.vmem [resolvable:$true] %s308_s28 }
  0x65   : > { %s7594_s14 = scalar_lea.hbm %s10028_s3, 1024 }
  0x66   : > { %p7595_p1 = scmp.ne.s32.totalorder %s10028_s3, %s7594_s14  ;;  %p7601_p8 = scmp.lt.u32.totalorder %s7594_s14, %s10028_s3 }
  0x68   : > { %p7597_p4 = pnand %p7595_p1, %p7803_p7 }
  0x6a   : > { %p7598_p6 = pneg %p7597_p4 }
  0x6c   : > { %p7603_p9 = pnand %p7601_p8, %p7598_p6 }
  0x6e   : > { %7606 = shalt.err (!%p7603_p9)
}
  0x6f   : > { %s7607_s20 = scalar_lea.vmem %s285_s27, 1024  ;;  %p7615_p13 = scmp.lt.s32.totalorder %s285_s27, %s285_s27 }
  0x70   : > { %p7608_p10 = scmp.ne.s32.totalorder %s285_s27, %s7607_s20  ;;  %p7616_p0 = scmp.lt.s32.totalorder %s7607_s20, %s7607_s20 }
  0x72   : > { %p7610_p11 = pnand %p7608_p10, %p7803_p7  ;;  %p7617_p2 = por %p7616_p0, %p7615_p13 }
  0x74   : > { %p7611_p12 = pneg %p7610_p11 }
  0x76   : > { %p7618_p3 = pnand %p7617_p2, %p7611_p12 }
  0x78   : > { %7621 = shalt.err (!%p7618_p3)
}
  0x79   : > { %7231 = dma.hbm_to_vmem [thread:$0]  (!%p7787_p5), %s10028_s3, 1024, %s285_s27, [#allocation7], %s7706_s22, %s7706_s22, %s7707_s23  }
  0x7a   : > { %s7622_s29 = scalar_lea.hbm %s10030_s5, 9216 }
  0x7b   : > { %p7623_p2 = scmp.ne.s32.totalorder %s10030_s5, %s7622_s29  ;;  %p7629_p4 = scmp.lt.u32.totalorder %s7622_s29, %s10030_s5 }
  0x7d   : > { %p7625_p3 = pnand %p7623_p2, %p7803_p7 }
  0x7f   : > { %p7626_p1 = pneg %p7625_p3 }
  0x81   : > { %p7631_p6 = pnand %p7629_p4, %p7626_p1 }
  0x83   : > { %7634 = shalt.err (!%p7631_p6)
}
  0x84   : > { %s7635_s21 = scalar_lea.vmem %s309_s28, 9216  ;;  %p7643_p11 = scmp.lt.s32.totalorder %s309_s28, %s309_s28 }
  0x85   : > { %p7636_p8 = scmp.ne.s32.totalorder %s309_s28, %s7635_s21  ;;  %p7644_p12 = scmp.lt.s32.totalorder %s7635_s21, %s7635_s21 }
  0x87   : > { %p7638_p9 = pnand %p7636_p8, %p7803_p7  ;;  %p7645_p13 = por %p7644_p12, %p7643_p11 }
  0x89   : > { %p7639_p10 = pneg %p7638_p9 }
  0x8b   : > { %p7646_p0 = pnand %p7645_p13, %p7639_p10 }
  0x8d   : > { %7649 = shalt.err (!%p7646_p0)
}
  0x8e   : > { %7237 = dma.hbm_to_vmem [thread:$0]  (!%p7787_p5), %s10030_s5, 9216, %s309_s28, [#allocation10], %s7706_s22, %s7706_s22, %s7707_s23  }
  0x8f   : > { %s7710_s20 = smov [#allocation14]   ;;  %s7650_s11 = scalar_lea.hbm %s10033_s8, 128 }
  0x90   : > { %s336_s24 = sshll.u32 %s7710_s20, 4  ;;  %p7651_p2 = scmp.ne.s32.totalorder %s10033_s8, %s7650_s11  ;;  %s337_s24 = int_to_ptr.vmem [resolvable:$true] %s336_s24 }
  0x91   : > { %p7657_p4 = scmp.lt.u32.totalorder %s7650_s11, %s10033_s8 }
  0x92   : > { %p7653_p3 = pnand %p7651_p2, %p7803_p7 }
  0x94   : > { %p7654_p1 = pneg %p7653_p3 }
  0x96   : > { %p7659_p6 = pnand %p7657_p4, %p7654_p1 }
  0x98   : > { %7662 = shalt.err (!%p7659_p6)
}
  0x99   : > { %s7663_s22 = scalar_lea.vmem %s337_s24, 128  ;;  %p7671_p11 = scmp.lt.s32.totalorder %s337_s24, %s337_s24 }
  0x9a   : > { %p7664_p8 = scmp.ne.s32.totalorder %s337_s24, %s7663_s22  ;;  %p7672_p12 = scmp.lt.s32.totalorder %s7663_s22, %s7663_s22 }
  0x9c   : > { %p7666_p9 = pnand %p7664_p8, %p7803_p7  ;;  %p7673_p13 = por %p7672_p12, %p7671_p11 }
  0x9e   : > { %p7667_p10 = pneg %p7666_p9 }
  0xa0   : > { %p7674_p0 = pnand %p7673_p13, %p7667_p10 }
  0xa2   : > { %7677 = shalt.err (!%p7674_p0)
}
  0xa3   : > { %7243 = dma.hbm_to_vmem [thread:$0]  (!%p7787_p5), %s10033_s8, 128, %s337_s24, [#allocation13]  }
  0xa4   : > { %p10050_p2 = scmp.ne.s32.totalorder %s10047_s13, 0 }
  0xa6   : > { %357 = sbr.rel (%p10050_p2) target bundleno = 1484 (0x5cc), region = 56 }
  0xad   : > { %p10051_p3 = scmp.eq.s32.totalorder %s7770_s12, 0 }
  0xaf   : > { %7683 = dma.done.wait (%p10051_p3), [#allocation5], 9216   ;;  %p10052_p7 = pmov %p10051_p3 }
  0xb0   : > { %p10053_p1 = pmov %p10051_p3 }
  0xb1   : > { %7685 = vsyncadd (%p10052_p7), [#allocation5], 4294958080 }
  0xb2   : > { %7687 = dma.done.wait (%p10053_p1), [#allocation7], 1040   ;;  %p10054_p4 = pmov %p10053_p1 }
  0xb3   : > { %p10055_p6 = pmov %p10053_p1 }
  0xb4   : > { %7689 = vsyncadd (%p10054_p4), [#allocation7], 4294966256 }
  0xb5   : > { %7691 = dma.done.wait (%p10055_p6), [#allocation10], 9232   ;;  %p10056_p5 = pmov %p10053_p1 }
  0xb6   : > { %p10057_p8 = pmov %p10053_p1 }
  0xb7   : > { %7693 = vsyncadd (%p10056_p5), [#allocation10], 4294958064 }
  0xb8   : > { %7695 = dma.done.wait (%p10057_p8), [#allocation13], 144   ;;  %p10058_p9 = pmov %p10053_p1 }
  0xb9   : > { %v7278_v0 = vld [vmem:[#allocation4 + $0x40] sm:$0xff]   ;;  %v7282_v4 = vld [vmem:[#allocation4 + $0x48] sm:$0xff]   ;;  %v7286_v8 = vld [vmem:[#allocation4 + $0x50] sm:$0xff]   ;;  %v426_v17 = vlaneseq  ;;  %p416_p10 = scmp.lt.s32.totalorder %s7770_s12, 1  ;;  %vm7711_vm4 = vmmov 1  }
  0xba   : > { %7697 = vsyncadd (%p10058_p9), [#allocation13], 4294967152  ;;  %v7279_v1 = vld [vmem:[#allocation4 + $0xc0] sm:$0xff]   ;;  %5998 = vmatprep.subr.bf16.mxu0 %v7278_v0  ;;  %v7283_v5 = vld [vmem:[#allocation4 + $0xc8] sm:$0xff]  }
  0xbb   : > { %v7280_v2 = vld [vmem:[#allocation4] sm:$0xff]   ;;  %6110 = vmatprep.subr.bf16.mxu1 %v7279_v1  ;;  %v7284_v6 = vld [vmem:[#allocation4 + $0x8] sm:$0xff]   ;;  %v7287_v9 = vld [vmem:[#allocation4 + $0xd0] sm:$0xff]   ;;  %v7978_v22 = vshrl.u32 %v426_v17, 7  ;;  %s10089_s12 = smov (!%p416_p10, %s7770_s12), 1 }
  0xbc   : > { %v7281_v3 = vld [vmem:[#allocation4 + $0x80] sm:$0xff]   ;;  %5999 = vmatpush3.bf16.msra.mxu0 %v7280_v2  ;;  %v7285_v7 = vld [vmem:[#allocation4 + $0x88] sm:$0xff]   ;;  %v7288_v10 = vld [vmem:[#allocation4 + $0x10] sm:$0xff]   ;;  %s7193_s13 = smul.u32 144, %s10089_s12  ;;  %s5198_s24 = sshll.u32 %s10089_s12, 3 }
  0xbd   : > { %6111 = vmatpush3.bf16.msra.mxu1 %v7281_v3  ;;  %6000 = vmatprep.subr.bf16.mxu0 %v7282_v4  ;;  %v7289_v11 = vld [vmem:[#allocation4 + $0x90] sm:$0xff]   ;;  %v7290_v12 = vld [vmem:[#allocation4 + $0x58] sm:$0xff]   ;;  %v7294_v16 = vld [vmem:[#allocation4 + $0x60] sm:$0xff]   ;;  %v428_v27 = vadd.s32 8, %v7978_v22  ;;  %v574_v31 = vadd.s32 4294967295, %v7978_v22  ;;  %vm537_vm0 = vcmp.lt.s32.totalorder %v7978_v22, 1  ;;  %s424_s11 = scalar_lea.vmem %s10034_s9, %s5198_s24 }
  0xbe   : > { %6112 = vmatprep.subr.bf16.mxu1 %v7283_v5  ;;  %v7291_v13 = vld [vmem:[#allocation4 + $0xd8] sm:$0xff]   ;;  %v7295_v18 = vld [vmem:[#allocation4 + $0xe0] sm:$0xff]   ;;  %v7298_v21 = vld [vmem:[#allocation4 + $0x68] sm:$0xff]   ;;  %s7989_s19 = scalar_lea.vmem %s10025_s0, %s7193_s13  ;;  %vm790_vm3 = vcmp.lt.s32.totalorder %v7978_v22, 7 }
  0xbf   : > { %v7292_v14 = vld [vmem:[#allocation4 + $0x18] sm:$0xff]   ;;  %v7296_v19 = vld [vmem:[#allocation4 + $0x20] sm:$0xff]   ;;  %v7299_v23 = vld [vmem:[#allocation4 + $0xe8] sm:$0xff]   ;;  %v828_v33 = vadd.s32 1, %v428_v27  ;;  %vm576_vm1 = vcmp.ge.s32.totalorder %v574_v31, 0 }
  0xc0   : > { %6001 = vmatpush3.bf16.msra.mxu0 %v7284_v6  ;;  %v7293_v15 = vld [vmem:[#allocation4 + $0x98] sm:$0xff]   ;;  %v7297_v20 = vld [vmem:[#allocation4 + $0xa0] sm:$0xff]   ;;  %v7300_v24 = vld [vmem:[#allocation4 + $0x28] sm:$0xff]  }
  0xc1   : > { %6113 = vmatpush3.bf16.msra.mxu1 %v7285_v7  ;;  %6002 = vmatprep.subr.bf16.mxu0 %v7286_v8  ;;  %v7301_v25 = vld [vmem:[#allocation4 + $0xa8] sm:$0xff]   ;;  %v7302_v26 = vld [vmem:[#allocation4 + $0x70] sm:$0xff]   ;;  %v7306_v32 = vld [vmem:[#allocation4 + $0x78] sm:$0xff]   ;;  %vm832_vm2 = vcmp.lt.s32.totalorder %v828_v33, 16 }
  0xc2   : > { %6114 = vmatprep.subr.bf16.mxu1 %v7287_v9  ;;  %v7303_v28 = vld [vmem:[#allocation4 + $0xf0] sm:$0xff]   ;;  %v7307_v34 = vld [vmem:[#allocation4 + $0xf8] sm:$0xff]   ;;  %v429_v37 = vld [vmem:[%s7989_s19] sm:$0xff]  }
  0xc3   : > { %v7304_v29 = vld [vmem:[#allocation4 + $0x30] sm:$0xff]   ;;  %v7308_v35 = vld [vmem:[#allocation4 + $0x38] sm:$0xff]   ;;  %v7993_v38 = vld [vmem:[%s7989_s19 + $0x8] sm:$0xff]   ;;  %v465_v39 = vunpack.c.l.bf16 %v429_v37  ;;  %v466_v40 = vunpack.c.h.bf16 %v429_v37  ;;  %1700 = vmatprep.mubr.bf16.mxu0 %v429_v37 }
  0xc4   : > { %6003 = vmatpush3.bf16.msra.mxu0 %v7288_v10  ;;  %v7305_v30 = vld [vmem:[#allocation4 + $0xb0] sm:$0xff]   ;;  %v7309_v36 = vld [vmem:[#allocation4 + $0xb8] sm:$0xff]   ;;  %v467_v41 = vunpack.c.l.bf16 %v7993_v38  ;;  %v468_v43 = vunpack.c.h.bf16 %v7993_v38  ;;  %vm8005_vm5 = vmpackc.low %vm7711_vm4, %vm576_vm1 }
  0xc5   : > { %6115 = vmatpush3.bf16.msra.mxu1 %v7289_v11  ;;  %6004 = vmatprep.subr.bf16.mxu0 %v7290_v12  ;;  %v7999_v42 = vld [vmem:[%s7989_s19 + $0x10] sm:$0xff]   ;;  %v501_v46 = vrot.slane %v465_v39, 7  ;;  %v519_v47 = vrot.slane %v466_v40, 7  ;;  %v754_v48 = vrot.slane %v465_v39, 1  ;;  %v772_v49 = vrot.slane %v466_v40, 1  ;;  %v8018_v59 = vld [vmem:[%s7989_s19 + $0x18] sm:$0xff]   ;;  %vm8028_vm6 = vmpackc.low %vm832_vm2, %vm7711_vm4 }
  0xc6   : > { %6116 = vmatprep.subr.bf16.mxu1 %v7291_v13  ;;  %v469_v44 = vunpack.c.l.bf16 %v7999_v42  ;;  %v470_v45 = vunpack.c.h.bf16 %v7999_v42  ;;  %v502_v50 = vrot.slane %v467_v41, 7  ;;  %v520_v51 = vrot.slane %v468_v43, 7  ;;  %v8025_v0 = vld [vmem:[%s7989_s19 + $0x20] sm:$0xff]   ;;  %v7335_v40 = vld [vmem:[#allocation4 + $0x190] sm:$0xff]  }
  0xc7   : > { %v755_v52 = vrot.slane %v467_v41, 1  ;;  %v773_v53 = vrot.slane %v468_v43, 1  ;;  %v538_v55 = vsel %vm537_vm0, %v501_v46, %v519_v47  ;;  %v556_v56 = vsel %vm537_vm0, %v519_v47, %v501_v46  ;;  %v7323_v1 = vld [vmem:[#allocation4 + $0x140] sm:$0xff]   ;;  %v7336_v41 = vld [vmem:[#allocation4 + $0x158] sm:$0xff]  }
  0xc8   : > { %6005 = vmatpush3.bf16.msra.mxu0 %v7292_v14  ;;  %v791_v57 = vsel %vm790_vm3, %v754_v48, %v772_v49  ;;  %v809_v58 = vsel %vm790_vm3, %v772_v49, %v754_v48  ;;  %v539_v60 = vsel %vm537_vm0, %v502_v50, %v520_v51  ;;  %v557_v61 = vsel %vm537_vm0, %v520_v51, %v502_v50  ;;  %v7324_v8 = vld [vmem:[#allocation4 + $0x1c0] sm:$0xff]   ;;  %v7337_v47 = vld [vmem:[#allocation4 + $0x1d8] sm:$0xff]  }
  0xc9   : > { %6117 = vmatpush3.bf16.msra.mxu1 %v7293_v15  ;;  %6006 = vmatprep.subr.bf16.mxu0 %v7294_v16  ;;  %v5423_v62 = vpack.c.bf16 %v538_v55, %v556_v56  ;;  %v5474_v63 = vpack.c.bf16 %v809_v58, %v791_v57  ;;  %v5426_v2 = vpack.c.bf16 %v539_v60, %v557_v61  ;;  %v503_v4 = vrot.slane %v469_v44, 7  ;;  %v7325_v11 = vld [vmem:[#allocation4 + $0x100] sm:$0xff]   ;;  %v7338_v49 = vld [vmem:[#allocation4 + $0x118] sm:$0xff]  }
  0xca   : > { %6118 = vmatprep.subr.bf16.mxu1 %v7295_v18  ;;  %v521_v5 = vrot.slane %v470_v45, 7  ;;  %v471_v6 = vunpack.c.l.bf16 %v8018_v59  ;;  %v472_v7 = vunpack.c.h.bf16 %v8018_v59  ;;  %v7326_v15 = vld [vmem:[#allocation4 + $0x180] sm:$0xff]   ;;  %v792_v16 = vsel %vm790_vm3, %v755_v52, %v773_v53  ;;  %v7339_v55 = vld [vmem:[#allocation4 + $0x198] sm:$0xff]  }
  0xcb   : > { %5472 = vmatprep.mubr.msk.bf16.mxu1 %vm8005_vm5, %v5426_v2  ;;  %v810_v17 = vsel %vm790_vm3, %v773_v53, %v755_v52  ;;  %v473_v18 = vunpack.c.l.bf16 %v8025_v0  ;;  %v8099_v53 = vld [vmem:[%s7989_s19 + $0x30] sm:$0xff]   ;;  %v8105_v58 = vld [vmem:[%s7989_s19 + $0x38] sm:$0xff]   ;;  %v7341_v60 = vld [vmem:[#allocation4 + $0x160] sm:$0xff]  }
  0xcc   : > { %6007 = vmatpush3.bf16.msra.mxu0 %v7296_v19  ;;  %v540_v9 = vsel %vm537_vm0, %v503_v4, %v521_v5  ;;  %v558_v10 = vsel %vm537_vm0, %v521_v5, %v503_v4  ;;  %v504_v13 = vrot.slane %v471_v6, 7  ;;  %v522_v14 = vrot.slane %v472_v7, 7  ;;  %v7327_v19 = vld [vmem:[#allocation4 + $0x148] sm:$0xff]   ;;  %10063 = vst [vmem:[#allocation19_spill] sm:$0xff] %v8099_v53  ;;  %v7344_v5 = vld [vmem:[#allocation4 + $0x1a0] sm:$0xff]  }
  0xcd   : > { %6119 = vmatpush3.bf16.msra.mxu1 %v7297_v20  ;;  %6008 = vmatprep.subr.bf16.mxu0 %v7298_v21  ;;  %v8045_v12 = vpack.c.bf16 %v540_v9, %v558_v10  ;;  %v8062_v27 = vpack.c.bf16 %v810_v17, %v792_v16  ;;  %v505_v31 = vrot.slane %v473_v18, 7  ;;  %v757_v51 = vrot.slane %v471_v6, 1  ;;  %v8127_v9 = vld [vmem:[%s7989_s19 + $0x40] sm:$0xff]   ;;  %v7346_v17 = vld [vmem:[#allocation4 + $0x1e8] sm:$0xff]  }
  0xce   : > { %6120 = vmatprep.subr.bf16.mxu1 %v7299_v23  ;;  %v541_v20 = vsel %vm537_vm0, %v504_v13, %v522_v14  ;;  %v559_v21 = vsel %vm537_vm0, %v522_v14, %v504_v13  ;;  %v474_v23 = vunpack.c.h.bf16 %v8025_v0  ;;  %v775_v52 = vrot.slane %v472_v7, 1  ;;  %v7345_v13 = vld [vmem:[#allocation4 + $0x168] sm:$0xff]  }
  0xcf   : > { %v477_v61 = vunpack.c.l.bf16 %v8099_v53  ;;  %v478_v4 = vunpack.c.h.bf16 %v8099_v53  ;;  %v480_v16 = vunpack.c.h.bf16 %v8105_v58 }
  0xd0   : > { %6009 = vmatpush3.bf16.msra.mxu0 %v7300_v24  ;;  %v7328_v24 = vld [vmem:[#allocation4 + $0x1c8] sm:$0xff]   ;;  %v523_v33 = vrot.slane %v474_v23, 7  ;;  %v776_v10 = vrot.slane %v474_v23, 1 }
  0xd1   : > { %6121 = vmatpush3.bf16.msra.mxu1 %v7301_v25  ;;  %6010 = vmatprep.subr.bf16.mxu0 %v7302_v26  ;;  %v7329_v25 = vld [vmem:[#allocation4 + $0x108] sm:$0xff]  }
  0xd2   : > { %6122 = vmatprep.subr.bf16.mxu1 %v7303_v28  ;;  %v7330_v26 = vld [vmem:[#allocation4 + $0x188] sm:$0xff]   ;;  %v756_v28 = vrot.slane %v469_v44, 1  ;;  %v542_v43 = vsel %vm537_vm0, %v505_v31, %v523_v33  ;;  %v560_v44 = vsel %vm537_vm0, %v523_v33, %v505_v31  ;;  %v8152_v31 = vrot.slane %v477_v61, 1  ;;  %v8155_v33 = vld [vmem:[%s7989_s19 + $0x50] sm:$0xff]  }
  0xd3   : > { %v8094_v50 = vpack.c.bf16 %v542_v43, %v560_v44  ;;  %v8174_v43 = vrot.slane %v478_v4, 1 }
  0xd4   : > { %6011 = vmatpush3.bf16.msra.mxu0 %v7304_v29  ;;  %v8064_v29 = vpack.c.bf16 %v541_v20, %v559_v21  ;;  %v7347_v20 = vld [vmem:[#allocation4 + $0x128] sm:$0xff]  }
  0xd5   : > { %6123 = vmatpush3.bf16.msra.mxu1 %v7305_v30  ;;  %6012 = vmatprep.subr.bf16.mxu0 %v7306_v32  ;;  %v774_v30 = vrot.slane %v470_v45, 1  ;;  %v8069_v32 = vld [vmem:[%s7989_s19 + $0x28] sm:$0xff]  }
  0xd6   : > { %6124 = vmatprep.subr.bf16.mxu1 %v7307_v34  ;;  %v7332_v34 = vld [vmem:[#allocation4 + $0x150] sm:$0xff]   ;;  %v475_v45 = vunpack.c.l.bf16 %v8069_v32  ;;  %v476_v46 = vunpack.c.h.bf16 %v8069_v32 }
  0xd7   : > { %v793_v37 = vsel %vm790_vm3, %v756_v28, %v774_v30  ;;  %v811_v39 = vsel %vm790_vm3, %v774_v30, %v756_v28  ;;  %v7348_v28 = vld [vmem:[#allocation4 + $0x1a8] sm:$0xff]  }
  0xd8   : > { %6013 = vmatpush3.bf16.msra.mxu0 %v7308_v35  ;;  %v7333_v35 = vld [vmem:[#allocation4 + $0x1d0] sm:$0xff]   ;;  %v8092_v48 = vpack.c.bf16 %v811_v39, %v793_v37  ;;  %v506_v56 = vrot.slane %v475_v45, 7  ;;  %v524_v57 = vrot.slane %v476_v46, 7  ;;  %v8140_v21 = vrot.slane %v475_v45, 1  ;;  %v8165_v37 = vld [vmem:[%s7989_s19 + $0x58] sm:$0xff]  }
  0xd9   : > { %6125 = vmatpush3.bf16.msra.mxu1 %v7309_v36  ;;  %6222 = vmatprep.subr.bf16.mxu0 %v7323_v1  ;;  %v7334_v36 = vld [vmem:[#allocation4 + $0x110] sm:$0xff]   ;;  %v794_v1 = vsel %vm790_vm3, %v757_v51, %v775_v52  ;;  %v8142_v23 = vrot.slane %v476_v46, 1 }
  0xda   : > { %6334 = vmatprep.subr.bf16.mxu1 %v7324_v8  ;;  %v543_v6 = vsel %vm537_vm0, %v506_v56, %v524_v57  ;;  %v561_v7 = vsel %vm537_vm0, %v524_v57, %v506_v56  ;;  %v758_v8 = vrot.slane %v473_v18, 1  ;;  %v525_v18 = vrot.slane %v478_v4, 7  ;;  %v7350_v39 = vld [vmem:[#allocation4 + $0x170] sm:$0xff]   ;;  %v8187_v56 = vld [vmem:[%s7989_s19 + $0x60] sm:$0xff]  }
  0xdb   : > { %5424 = vmatmul.mubr.msk.bf16.vlgmr.msra.gmra.mrb[0].mxu0 %vm8005_vm5, %v5423_v62  ;;  %v7342_v62 = vld [vmem:[#allocation4 + $0x1e0] sm:$0xff]   ;;  %v7351_v45 = vld [vmem:[#allocation4 + $0x1f0] sm:$0xff]  }
  0xdc   : > { %1708 = vmatprep.mubr.bf16.mxu0 %v7993_v38  ;;  %5475 = vmatmul.mubr.msk.bf16.vlgmr.msra.gmra.mrb[0].mxu1 %vm8028_vm6, %v5474_v63  ;;  %v7343_v63 = vld [vmem:[#allocation4 + $0x120] sm:$0xff]   ;;  %v7353_v57 = vld [vmem:[#allocation4 + $0x1b0] sm:$0xff]  }
  0xdd   : > { %6223 = vmatpush3.bf16.msra.mxu0 %v7325_v11  ;;  %5478 = vmatprep.mubr.msk.bf16.mxu1 %vm8005_vm5, %v8045_v12  ;;  %v479_v11 = vunpack.c.l.bf16 %v8105_v58 }
  0xde   : > { %6335 = vmatpush3.bf16.msra.mxu1 %v7326_v15  ;;  %6224 = vmatprep.subr.bf16.mxu0 %v7327_v19  ;;  %v507_v15 = vrot.slane %v477_v61, 7  ;;  %v8135_v19 = vpack.c.bf16 %v543_v6, %v561_v7  ;;  %v487_v6 = vunpack.c.l.bf16 %v8165_v37  ;;  %v7355_v7 = vld [vmem:[#allocation4 + $0x1f8] sm:$0xff]  }
  0xdf   : > { %6336 = vmatprep.subr.bf16.mxu1 %v7328_v24  ;;  %v481_v24 = vunpack.c.l.bf16 %v8127_v9  ;;  %v8150_v30 = vrot.slane %v479_v11, 7 }
  0xe0   : > { %10064 = vst [vmem:[#allocation20_spill] sm:$0xff] %v8135_v19 }
  0xe1   : > { %6225 = vmatpush3.bf16.msra.mxu0 %v7329_v25  ;;  %v482_v25 = vunpack.c.h.bf16 %v8127_v9  ;;  %v8177_v46 = vrot.slane %v481_v24, 7  ;;  %v8191_v61 = vrot.slane %v481_v24, 1  ;;  %v489_v24 = vunpack.c.l.bf16 %v8187_v56 }
  0xe2   : > { %6337 = vmatpush3.bf16.msra.mxu1 %v7330_v26  ;;  %6226 = vmatprep.subr.bf16.mxu0 %v7332_v34  ;;  %v8147_v26 = vld [vmem:[%s7989_s19 + $0x48] sm:$0xff]   ;;  %v795_v34 = vsel %vm790_vm3, %v758_v8, %v776_v10 }
  0xe3   : > { %5427 = vmatmul.mubr.msk.bf16.gmra.mrb[4].mxu0 %vm8005_vm5, %v5426_v2  ;;  %6338 = vmatprep.subr.bf16.mxu1 %v7333_v35  ;;  %v812_v2 = vsel %vm790_vm3, %v775_v52, %v757_v51  ;;  %v813_v35 = vsel %vm790_vm3, %v776_v10, %v758_v8  ;;  %v483_v44 = vunpack.c.l.bf16 %v8147_v26  ;;  %v484_v51 = vunpack.c.h.bf16 %v8147_v26  ;;  %v7352_v52 = vld [vmem:[#allocation4 + $0x130] sm:$0xff]   ;;  %v7356_v8 = vld [vmem:[#allocation4 + $0x138] sm:$0xff]  }
  0xe4   : > { %1716 = vmatprep.mubr.bf16.mxu0 %v7999_v42  ;;  %5481 = vmatmul.mubr.msk.bf16.gmra.mrb[4].mxu1 %vm8028_vm6, %v8062_v27  ;;  %v8132_v14 = vpack.c.bf16 %v812_v2, %v794_v1  ;;  %v7354_v1 = vld [vmem:[#allocation4 + $0x178] sm:$0xff]  }
  0xe5   : > { %5484 = vmatprep.mubr.msk.bf16.mxu1 %vm8005_vm5, %v8064_v29  ;;  %6227 = vmatpush3.bf16.msra.mxu0 %v7334_v36  ;;  %v526_v36 = vrot.slane %v480_v16, 7  ;;  %v8197_v4 = vrot.slane %v483_v44, 7  ;;  %v8205_v10 = vrot.slane %v484_v51, 7 }
  0xe6   : > { %6339 = vmatpush3.bf16.msra.mxu1 %v7335_v40  ;;  %6228 = vmatprep.subr.bf16.mxu0 %v7336_v41  ;;  %v544_v40 = vsel %vm537_vm0, %v507_v15, %v525_v18  ;;  %v562_v41 = vsel %vm537_vm0, %v525_v18, %v507_v15  ;;  %v8211_v15 = vrot.slane %v483_v44, 1  ;;  %v490_v44 = vunpack.c.h.bf16 %v8187_v56 }
  0xe7   : > { %6340 = vmatprep.subr.bf16.mxu1 %v7337_v47  ;;  %v8179_v47 = vrot.slane %v482_v25, 7  ;;  %v8195_v2 = vpack.c.bf16 %v544_v40, %v562_v41  ;;  %v545_v40 = vsel %vm537_vm0, %v8150_v30, %v526_v36  ;;  %v563_v41 = vsel %vm537_vm0, %v526_v36, %v8150_v30 }
  0xe8   : > { %v531_v30 = vrot.slane %v490_v44, 7 }
  0xe9   : > { %6229 = vmatpush3.bf16.msra.mxu0 %v7338_v49  ;;  %v8181_v49 = vrot.slane %v479_v11, 1  ;;  %v8208_v11 = vld [vmem:[%s7989_s19 + $0x68] sm:$0xff]  }
  0xea   : > { %6341 = vmatpush3.bf16.msra.mxu1 %v7339_v55  ;;  %6230 = vmatprep.subr.bf16.mxu0 %v7341_v60  ;;  %v8184_v55 = vrot.slane %v480_v16, 1  ;;  %v8189_v60 = vpack.c.bf16 %v813_v35, %v795_v34  ;;  %v8213_v16 = vrot.slane %v484_v51, 1  ;;  %v8233_v34 = vrot.slane %v487_v6, 7 }
  0xeb   : > { %5430 = vmatmul.mubr.msk.bf16.gmra.mrb[8].mxu0 %vm8005_vm5, %v8045_v12  ;;  %6342 = vmatprep.subr.bf16.mxu1 %v7342_v62  ;;  %v485_v62 = vunpack.c.l.bf16 %v8155_v33 }
  0xec   : > { %1724 = vmatprep.mubr.bf16.mxu0 %v8018_v59  ;;  %5487 = vmatmul.mubr.msk.bf16.gmra.mrb[8].mxu1 %vm8028_vm6, %v8092_v48 }
  0xed   : > { %5490 = vmatprep.mubr.msk.bf16.mxu1 %vm8005_vm5, %v8094_v50  ;;  %6231 = vmatpush3.bf16.msra.mxu0 %v7343_v63  ;;  %v486_v63 = vunpack.c.h.bf16 %v8155_v33  ;;  %v8219_v18 = vrot.slane %v485_v62, 7  ;;  %v8235_v35 = vrot.slane %v485_v62, 1  ;;  %v492_v62 = vunpack.c.h.bf16 %v8208_v11 }
  0xee   : > { %6343 = vmatpush3.bf16.msra.mxu1 %v7344_v5  ;;  %6232 = vmatprep.subr.bf16.mxu0 %v7345_v13  ;;  %v8199_v5 = vrot.slane %v482_v25, 1  ;;  %v7357_v13 = vld [vmem:[#allocation4 + $0x1b8] sm:$0xff]   ;;  %v796_v25 = vsel %vm790_vm3, %v8140_v21, %v8142_v23 }
  0xef   : > { %6344 = vmatprep.subr.bf16.mxu1 %v7346_v17  ;;  %v488_v17 = vunpack.c.h.bf16 %v8165_v37  ;;  %v8247_v51 = vrot.slane %v486_v63, 1 }
  0xf1   : > { %6233 = vmatpush3.bf16.msra.mxu0 %v7347_v20  ;;  %v529_v20 = vrot.slane %v486_v63, 7  ;;  %v8262_v36 = vrot.slane %v488_v17, 1 }
  0xf2   : > { %6345 = vmatpush3.bf16.msra.mxu1 %v7348_v28  ;;  %6234 = vmatprep.subr.bf16.mxu0 %v7350_v39  ;;  %v814_v28 = vsel %vm790_vm3, %v8142_v23, %v8140_v21  ;;  %v8238_v39 = vld [vmem:[%s7989_s19 + $0x70] sm:$0xff]   ;;  %v491_v21 = vunpack.c.l.bf16 %v8208_v11 }
  0xf3   : > { %5433 = vmatmul.mubr.msk.bf16.gmra.mrb[12].mxu0 %vm8005_vm5, %v8064_v29  ;;  %6346 = vmatprep.subr.bf16.mxu1 %v7351_v45  ;;  %v530_v45 = vrot.slane %v488_v17, 7  ;;  %v8250_v23 = vpack.c.bf16 %v814_v28, %v796_v25  ;;  %v493_v63 = vunpack.c.l.bf16 %v8238_v39  ;;  %v8276_v25 = vrot.slane %v492_v62, 7 }
  0xf4   : > { %1732 = vmatprep.mubr.bf16.mxu0 %v8025_v0  ;;  %5493 = vmatmul.mubr.msk.bf16.gmra.mrb[12].mxu1 %vm8028_vm6, %v8132_v14  ;;  %v8278_v17 = vrot.slane %v491_v21, 1  ;;  %v815_v28 = vsel %vm790_vm3, %v8174_v43, %v8152_v31 }
  0xf5   : > { %5496 = vmatprep.mubr.msk.bf16.mxu1 %vm8005_vm5, %v8135_v19  ;;  %6235 = vmatpush3.bf16.msra.mxu0 %v7352_v52  ;;  %v8252_v52 = vrot.slane %v489_v24, 7 }
  0xf6   : > { %6347 = vmatpush3.bf16.msra.mxu1 %v7353_v57  ;;  %6236 = vmatprep.subr.bf16.mxu0 %v7354_v1  ;;  %v8254_v57 = vrot.slane %v487_v6, 1  ;;  %v8257_v1 = vpack.c.bf16 %v545_v40, %v563_v41  ;;  %v8270_v6 = vrot.slane %v490_v44, 1  ;;  %v546_v40 = vsel %vm537_vm0, %v8177_v46, %v8179_v47 }
  0xf7   : > { %6348 = vmatprep.subr.bf16.mxu1 %v7355_v7  ;;  %v8266_v7 = vrot.slane %v491_v21, 7  ;;  %v564_v41 = vsel %vm537_vm0, %v8179_v47, %v8177_v46  ;;  %v8299_v44 = vrot.slane %v493_v63, 7  ;;  %v8301_v21 = vrot.slane %v492_v62, 1 }
  0xf8   : > { %v798_v46 = vsel %vm790_vm3, %v8181_v49, %v8184_v55  ;;  %v816_v47 = vsel %vm790_vm3, %v8184_v55, %v8181_v49  ;;  %v547_v62 = vsel %vm537_vm0, %v8197_v4, %v8205_v10  ;;  %v799_v49 = vsel %vm790_vm3, %v8191_v61, %v8199_v5 }
  0xf9   : > { %6237 = vmatpush3.bf16.msra.mxu0 %v7356_v8  ;;  %v8268_v8 = vrot.slane %v489_v24, 1  ;;  %v797_v24 = vsel %vm790_vm3, %v8152_v31, %v8174_v43  ;;  %v8311_v43 = vpack.c.bf16 %v546_v40, %v564_v41  ;;  %v817_v55 = vsel %vm790_vm3, %v8199_v5, %v8191_v61 }
  0xfa   : > { %6349 = vmatpush3.bf16.msra.mxu1 %v7357_v13  ;;  %v494_v13 = vunpack.c.h.bf16 %v8238_v39  ;;  %v8309_v31 = vpack.c.bf16 %v815_v28, %v797_v24  ;;  %v8339_v24 = vpack.c.bf16 %v816_v47, %v798_v46  ;;  %v8367_v40 = vpack.c.bf16 %v817_v55, %v799_v49 }
  0xfb   : > { %5436 = vmatmul.mubr.msk.bf16.gmra.mrb[16].mxu0 %vm8005_vm5, %v8094_v50  ;;  %v800_v61 = vsel %vm790_vm3, %v8211_v15, %v8213_v16  ;;  %v818_v5 = vsel %vm790_vm3, %v8213_v16, %v8211_v15  ;;  %v801_v15 = vsel %vm790_vm3, %v8235_v35, %v8247_v51  ;;  %v819_v16 = vsel %vm790_vm3, %v8247_v51, %v8235_v35 }
  0xfc   : > { %1740 = vmatprep.mubr.bf16.mxu0 %v8069_v32  ;;  %5499 = vmatmul.mubr.msk.bf16.gmra.mrb[16].mxu1 %vm8028_vm6, %v8189_v60  ;;  %v8395_v46 = vpack.c.bf16 %v818_v5, %v800_v61  ;;  %v551_v55 = vsel %vm537_vm0, %v8266_v7, %v8276_v25 }
  0xfd   : > { %5502 = vmatprep.mubr.msk.bf16.mxu1 %vm8005_vm5, %v8195_v2 }
 0x103   : > { %5439 = vmatmul.mubr.msk.bf16.gmra.mrb[20].mxu0 %vm8005_vm5, %v8135_v19  ;;  %v8307_v19 = vrot.slane %v493_v63, 1  ;;  %v565_v63 = vsel %vm537_vm0, %v8205_v10, %v8197_v4  ;;  %v548_v4 = vsel %vm537_vm0, %v8219_v18, %v529_v20  ;;  %v566_v10 = vsel %vm537_vm0, %v529_v20, %v8219_v18 }
 0x104   : > { %1748 = vmatprep.mubr.bf16.mxu0 %v8099_v53  ;;  %5505 = vmatmul.mubr.msk.bf16.gmra.mrb[20].mxu1 %vm8028_vm6, %v8250_v23  ;;  %v8305_v53 = vrot.slane %v494_v13, 7  ;;  %v8341_v28 = vpack.c.bf16 %v547_v62, %v565_v63  ;;  %v8369_v41 = vpack.c.bf16 %v548_v4, %v566_v10  ;;  %v549_v18 = vsel %vm537_vm0, %v8233_v34, %v530_v45  ;;  %v8424_v62 = vld [vmem:[%s7989_s19 + $0x78] sm:$0xff]  }
 0x105   : > { %5508 = vmatprep.mubr.msk.bf16.mxu1 %vm8005_vm5, %v8257_v1  ;;  %v567_v20 = vsel %vm537_vm0, %v530_v45, %v8233_v34  ;;  %v550_v34 = vsel %vm537_vm0, %v8252_v52, %v531_v30  ;;  %v568_v45 = vsel %vm537_vm0, %v531_v30, %v8252_v52  ;;  %v8426_v63 = vpack.c.bf16 %v819_v16, %v801_v15  ;;  %v8493_v16 = vld [vmem:[%s7989_s19 + $0x80] sm:$0xff]  }
 0x106   : > { %v8397_v47 = vpack.c.bf16 %v549_v18, %v567_v20  ;;  %v8428_v49 = vpack.c.bf16 %v550_v34, %v568_v45  ;;  %v495_v35 = vunpack.c.l.bf16 %v8424_v62  ;;  %v496_v51 = vunpack.c.h.bf16 %v8424_v62 }
 0x107   : > { %v802_v52 = vsel %vm790_vm3, %v8254_v57, %v8262_v36  ;;  %v820_v30 = vsel %vm790_vm3, %v8262_v36, %v8254_v57  ;;  %v569_v4 = vsel %vm537_vm0, %v8276_v25, %v8266_v7  ;;  %v803_v57 = vsel %vm790_vm3, %v8268_v8, %v8270_v6 }
 0x108   : > { %v516_v10 = vrot.slane %v495_v35, 7  ;;  %v534_v61 = vrot.slane %v496_v51, 7  ;;  %v8458_v5 = vpack.c.bf16 %v820_v30, %v802_v52  ;;  %v8460_v18 = vpack.c.bf16 %v551_v55, %v569_v4 }
 0x109   : > { %v821_v36 = vsel %vm790_vm3, %v8270_v6, %v8268_v8  ;;  %v552_v7 = vsel %vm537_vm0, %v8299_v44, %v8305_v53  ;;  %v570_v25 = vsel %vm537_vm0, %v8305_v53, %v8299_v44  ;;  %v786_v8 = vrot.slane %v494_v13, 1  ;;  %v7358_v6 = vld [vmem:[#allocation4 + $0x200] sm:$0xff]  }
 0x10a   : > { %v8488_v20 = vpack.c.bf16 %v821_v36, %v803_v57  ;;  %v8490_v15 = vpack.c.bf16 %v552_v7, %v570_v25  ;;  %7001 = vmatprep.subr.bf16.mxu0 %v7358_v6  ;;  %v804_v53 = vsel %vm790_vm3, %v8278_v17, %v8301_v21  ;;  %v822_v13 = vsel %vm790_vm3, %v8301_v21, %v8278_v17 }
 0x10b   : > { %5442 = vmatmul.mubr.msk.bf16.gmra.mrb[24].mxu0 %vm8005_vm5, %v8195_v2  ;;  %7177 = vmatprep.subr.bf16.mxu1 %v7358_v6  ;;  %v553_v44 = vsel %vm537_vm0, %v516_v10, %v534_v61  ;;  %v571_v34 = vsel %vm537_vm0, %v534_v61, %v516_v10  ;;  %v497_v45 = vunpack.c.l.bf16 %v8493_v16  ;;  %v498_v52 = vunpack.c.h.bf16 %v8493_v16 }
 0x10c   : > { %1756 = vmatprep.mubr.bf16.mxu0 %v8105_v58  ;;  %5511 = vmatmul.mubr.msk.bf16.gmra.mrb[24].mxu1 %vm8028_vm6, %v8309_v31  ;;  %v8521_v30 = vpack.c.bf16 %v822_v13, %v804_v53  ;;  %v8523_v55 = vpack.c.bf16 %v553_v44, %v571_v34  ;;  %v805_v4 = vsel %vm790_vm3, %v8307_v19, %v786_v8  ;;  %v769_v25 = vrot.slane %v495_v35, 1  ;;  %v7361_v13 = vld [vmem:[#allocation4 + $0x218] sm:$0xff]  }
 0x10d   : > { %5514 = vmatprep.mubr.msk.bf16.mxu1 %vm8005_vm5, %v8311_v43  ;;  %v517_v17 = vrot.slane %v497_v45, 7  ;;  %v535_v21 = vrot.slane %v498_v52, 7  ;;  %v823_v10 = vsel %vm790_vm3, %v786_v8, %v8307_v19  ;;  %v787_v53 = vrot.slane %v496_v51, 1  ;;  %v7359_v8 = vld [vmem:[#allocation4 + $0x208] sm:$0xff]  }
 0x10e   : > { %v8549_v36 = vpack.c.bf16 %v823_v10, %v805_v4 }
 0x10f   : > { %v554_v61 = vsel %vm537_vm0, %v517_v17, %v535_v21  ;;  %v572_v57 = vsel %vm537_vm0, %v535_v21, %v517_v17  ;;  %v806_v19 = vsel %vm790_vm3, %v769_v25, %v787_v53  ;;  %v824_v35 = vsel %vm790_vm3, %v787_v53, %v769_v25 }
 0x110   : > { %v8551_v7 = vpack.c.bf16 %v554_v61, %v572_v57  ;;  %v8567_v51 = vpack.c.bf16 %v824_v35, %v806_v19 }
 0x113   : > { %5445 = vmatmul.mubr.msk.bf16.gmra.mrb[28].mxu0 %vm8005_vm5, %v8257_v1 }
 0x114   : > { %1764 = vmatprep.mubr.bf16.mxu0 %v8127_v9  ;;  %5517 = vmatmul.mubr.msk.bf16.gmra.mrb[28].mxu1 %vm8028_vm6, %v8339_v24 }
 0x115   : > { %5520 = vmatprep.mubr.msk.bf16.mxu1 %vm8005_vm5, %v8341_v28 }
 0x11b   : > { %5448 = vmatmul.mubr.msk.bf16.gmra.mrb[32].mxu0 %vm8005_vm5, %v8311_v43 }
 0x11c   : > { %1772 = vmatprep.mubr.bf16.mxu0 %v8147_v26  ;;  %5523 = vmatmul.mubr.msk.bf16.gmra.mrb[32].mxu1 %vm8028_vm6, %v8367_v40 }
 0x11d   : > { %5526 = vmatprep.mubr.msk.bf16.mxu1 %vm8005_vm5, %v8369_v41 }
 0x123   : > { %5451 = vmatmul.mubr.msk.bf16.gmra.mrb[36].mxu0 %vm8005_vm5, %v8341_v28 }
 0x124   : > { %1780 = vmatprep.mubr.bf16.mxu0 %v8155_v33  ;;  %5529 = vmatmul.mubr.msk.bf16.gmra.mrb[36].mxu1 %vm8028_vm6, %v8395_v46 }
 0x125   : > { %5532 = vmatprep.mubr.msk.bf16.mxu1 %vm8005_vm5, %v8397_v47 }
 0x12b   : > { %5454 = vmatmul.mubr.msk.bf16.gmra.mrb[40].mxu0 %vm8005_vm5, %v8369_v41 }
 0x12c   : > { %1788 = vmatprep.mubr.bf16.mxu0 %v8165_v37  ;;  %5535 = vmatmul.mubr.msk.bf16.gmra.mrb[40].mxu1 %vm8028_vm6, %v8426_v63 }
 0x12d   : > { %5538 = vmatprep.mubr.msk.bf16.mxu1 %vm8005_vm5, %v8428_v49 }
 0x133   : > { %5457 = vmatmul.mubr.msk.bf16.gmra.mrb[44].mxu0 %vm8005_vm5, %v8397_v47 }
 0x134   : > { %1796 = vmatprep.mubr.bf16.mxu0 %v8187_v56  ;;  %5541 = vmatmul.mubr.msk.bf16.gmra.mrb[44].mxu1 %vm8028_vm6, %v8458_v5 }
 0x135   : > { %5544 = vmatprep.mubr.msk.bf16.mxu1 %vm8005_vm5, %v8460_v18 }
 0x13b   : > { %5460 = vmatmul.mubr.msk.bf16.gmra.mrb[48].mxu0 %vm8005_vm5, %v8428_v49 }
 0x13c   : > { %1804 = vmatprep.mubr.bf16.mxu0 %v8208_v11  ;;  %5547 = vmatmul.mubr.msk.bf16.gmra.mrb[48].mxu1 %vm8028_vm6, %v8488_v20 }
 0x13d   : > { %5550 = vmatprep.mubr.msk.bf16.mxu1 %vm8005_vm5, %v8490_v15 }
 0x143   : > { %5463 = vmatmul.mubr.msk.bf16.gmra.mrb[52].mxu0 %vm8005_vm5, %v8460_v18 }
 0x144   : > { %1812 = vmatprep.mubr.bf16.mxu0 %v8238_v39  ;;  %5553 = vmatmul.mubr.msk.bf16.gmra.mrb[52].mxu1 %vm8028_vm6, %v8521_v30 }
 0x145   : > { %5556 = vmatprep.mubr.msk.bf16.mxu1 %vm8005_vm5, %v8523_v55 }
 0x14b   : > { %5466 = vmatmul.mubr.msk.bf16.gmra.mrb[56].mxu0 %vm8005_vm5, %v8490_v15 }
 0x14c   : > { %1820 = vmatprep.mubr.bf16.mxu0 %v8424_v62  ;;  %5559 = vmatmul.mubr.msk.bf16.gmra.mrb[56].mxu1 %vm8028_vm6, %v8549_v36 }
 0x14d   : > { %5562 = vmatprep.mubr.msk.bf16.mxu1 %vm8005_vm5, %v8551_v7 }
 0x153   : > { %5469 = vmatmul.mubr.msk.bf16.gmra.mrb[60].mxu0 %vm8005_vm5, %v8523_v55 }
 0x154   : > { %5568 = vmatprep.mubr.msk.bf16.mxu0 %vm8028_vm6, %v8062_v27  ;;  %5565 = vmatmul.mubr.msk.bf16.gmra.mrb[60].mxu1 %vm8028_vm6, %v8567_v51  ;;  %v7360_v27 = vld [vmem:[#allocation4 + $0x210] sm:$0xff]  }
 0x155   : > { %2183 = vmatprep.mubr.bf16.mxu1 %v7999_v42 }
 0x15b   : > { %2023 = vmatmul.mubr.bf16.vlgmr.msra.gmra.mrb[64].mxu0 %v7993_v38  ;;  %v7363_v38 = vld [vmem:[#allocation4 + $0x220] sm:$0xff]  }
 0x15c   : > { %5571 = vmatprep.mubr.msk.bf16.mxu0 %vm8028_vm6, %v8092_v48  ;;  %7002 = vmatpush3.bf16.msra.mxu0 %v7358_v6 }
 0x15d   : > { %5616 = vmatmul.mubr.msk.bf16.vlgmr.msra.gmra.mrb[64].mxu1 %vm8005_vm5, %v8045_v12  ;;  %7003 = vmatprep.subr.bf16.mxu0 %v7359_v8  ;;  %v7364_v12 = vld [vmem:[#allocation4 + $0x228] sm:$0xff]  }
 0x15e   : > { %2191 = vmatprep.mubr.bf16.mxu1 %v8018_v59  ;;  %7185 = vmatpush3.bf16.msra.mxu1 %v7358_v6  ;;  %v8611_v6 = vld [vmem:[#allocation8] sm:$0xff]  }
 0x15f   : > { %7178 = vmatprep.subr.bf16.mxu1 %v7359_v8 }
 0x160   : > { %7004 = vmatpush3.bf16.msra.mxu0 %v7359_v8 }
 0x161   : > { %7005 = vmatprep.subr.bf16.mxu0 %v7360_v27 }
 0x162   : > { %7186 = vmatpush3.bf16.msra.mxu1 %v7359_v8 }
 0x163   : > { %2031 = vmatmul.mubr.bf16.gmra.mrb[68].mxu0 %v7999_v42  ;;  %7179 = vmatprep.subr.bf16.mxu1 %v7360_v27  ;;  %v7366_v42 = vld [vmem:[#allocation4 + $0x230] sm:$0xff]  }
 0x164   : > { %5574 = vmatprep.mubr.msk.bf16.mxu0 %vm8028_vm6, %v8132_v14  ;;  %7006 = vmatpush3.bf16.msra.mxu0 %v7360_v27 }
 0x165   : > { %5619 = vmatmul.mubr.msk.bf16.gmra.mrb[68].mxu1 %vm8005_vm5, %v8064_v29  ;;  %7007 = vmatprep.subr.bf16.mxu0 %v7361_v13  ;;  %v7367_v29 = vld [vmem:[#allocation4 + $0x238] sm:$0xff]  }
 0x166   : > { %2199 = vmatprep.mubr.bf16.mxu1 %v8025_v0  ;;  %7187 = vmatpush3.bf16.msra.mxu1 %v7360_v27 }
 0x167   : > { %7180 = vmatprep.subr.bf16.mxu1 %v7361_v13 }
 0x168   : > { %7008 = vmatpush3.bf16.msra.mxu0 %v7361_v13 }
 0x169   : > { %7009 = vmatprep.subr.bf16.mxu0 %v7363_v38 }
 0x16a   : > { %7188 = vmatpush3.bf16.msra.mxu1 %v7361_v13 }
 0x16b   : > { %2039 = vmatmul.mubr.bf16.gmra.mrb[72].mxu0 %v8018_v59  ;;  %7181 = vmatprep.subr.bf16.mxu1 %v7363_v38  ;;  %v10065_v59 = vld [vmem:[#allocation20_spill] sm:$0xff] }
 0x16c   : > { %5577 = vmatprep.mubr.msk.bf16.mxu0 %vm8028_vm6, %v8189_v60  ;;  %7010 = vmatpush3.bf16.msra.mxu0 %v7363_v38 }
 0x16d   : > { %5622 = vmatmul.mubr.msk.bf16.gmra.mrb[72].mxu1 %vm8005_vm5, %v8094_v50  ;;  %7011 = vmatprep.subr.bf16.mxu0 %v7364_v12  ;;  %v10066_v50 = vld [vmem:[#allocation19_spill] sm:$0xff] }
 0x16e   : > { %2207 = vmatprep.mubr.bf16.mxu1 %v8069_v32  ;;  %7189 = vmatpush3.bf16.msra.mxu1 %v7363_v38 }
 0x16f   : > { %7182 = vmatprep.subr.bf16.mxu1 %v7364_v12 }
 0x170   : > { %7012 = vmatpush3.bf16.msra.mxu0 %v7364_v12 }
 0x171   : > { %7013 = vmatprep.subr.bf16.mxu0 %v7366_v42 }
 0x172   : > { %7190 = vmatpush3.bf16.msra.mxu1 %v7364_v12 }
 0x173   : > { %2047 = vmatmul.mubr.bf16.gmra.mrb[76].mxu0 %v8025_v0  ;;  %7183 = vmatprep.subr.bf16.mxu1 %v7366_v42 }
 0x174   : > { %5580 = vmatprep.mubr.msk.bf16.mxu0 %vm8028_vm6, %v8250_v23  ;;  %7014 = vmatpush3.bf16.msra.mxu0 %v7366_v42 }
 0x175   : > { %5625 = vmatmul.mubr.msk.bf16.gmra.mrb[76].mxu1 %vm8005_vm5, %v10065_v59  ;;  %7015 = vmatprep.subr.bf16.mxu0 %v7367_v29 }
 0x176   : > { %2215 = vmatprep.mubr.bf16.mxu1 %v10066_v50  ;;  %7191 = vmatpush3.bf16.msra.mxu1 %v7366_v42 }
 0x177   : > { %7184 = vmatprep.subr.bf16.mxu1 %v7367_v29 }
 0x178   : > { %7016 = vmatpush3.bf16.msra.mxu0 %v7367_v29 }
 0x17a   : > { %7192 = vmatpush3.bf16.msra.mxu1 %v7367_v29 }
 0x17b   : > { %2055 = vmatmul.mubr.bf16.gmra.mrb[80].mxu0 %v8069_v32  ;;  %7049 = vmatprep.subr.bf16.mxu1 %v8611_v6  ;;  %v8670_v32 = vld [vmem:[#allocation6] ss:$0 sm:$0xff] }
 0x17c   : > { %5583 = vmatprep.mubr.msk.bf16.mxu0 %vm8028_vm6, %v8309_v31 }
 0x17d   : > { %5628 = vmatmul.mubr.msk.bf16.gmra.mrb[80].mxu1 %vm8005_vm5, %v8195_v2 }
 0x17e   : > { %2223 = vmatprep.mubr.bf16.mxu1 %v8105_v58 }
 0x183   : > { %2063 = vmatmul.mubr.bf16.gmra.mrb[84].mxu0 %v10066_v50 }
 0x184   : > { %5586 = vmatprep.mubr.msk.bf16.mxu0 %vm8028_vm6, %v8339_v24 }
 0x185   : > { %5631 = vmatmul.mubr.msk.bf16.gmra.mrb[84].mxu1 %vm8005_vm5, %v8257_v1 }
 0x186   : > { %2231 = vmatprep.mubr.bf16.mxu1 %v8127_v9 }
 0x18b   : > { %2071 = vmatmul.mubr.bf16.gmra.mrb[88].mxu0 %v8105_v58 }
 0x18c   : > { %5589 = vmatprep.mubr.msk.bf16.mxu0 %vm8028_vm6, %v8367_v40 }
 0x18d   : > { %5634 = vmatmul.mubr.msk.bf16.gmra.mrb[88].mxu1 %vm8005_vm5, %v8311_v43 }
 0x18e   : > { %2239 = vmatprep.mubr.bf16.mxu1 %v8147_v26 }
 0x193   : > { %2079 = vmatmul.mubr.bf16.gmra.mrb[92].mxu0 %v8127_v9 }
 0x194   : > { %5592 = vmatprep.mubr.msk.bf16.mxu0 %vm8028_vm6, %v8395_v46 }
 0x195   : > { %5637 = vmatmul.mubr.msk.bf16.gmra.mrb[92].mxu1 %vm8005_vm5, %v8341_v28 }
 0x196   : > { %2247 = vmatprep.mubr.bf16.mxu1 %v8155_v33 }
 0x19b   : > { %2087 = vmatmul.mubr.bf16.gmra.mrb[96].mxu0 %v8147_v26 }
 0x19c   : > { %5595 = vmatprep.mubr.msk.bf16.mxu0 %vm8028_vm6, %v8426_v63 }
 0x19d   : > { %5640 = vmatmul.mubr.msk.bf16.gmra.mrb[96].mxu1 %vm8005_vm5, %v8369_v41 }
 0x19e   : > { %2255 = vmatprep.mubr.bf16.mxu1 %v8165_v37 }
 0x1a3   : > { %2095 = vmatmul.mubr.bf16.gmra.mrb[100].mxu0 %v8155_v33 }
 0x1a4   : > { %5598 = vmatprep.mubr.msk.bf16.mxu0 %vm8028_vm6, %v8458_v5 }
 0x1a5   : > { %5643 = vmatmul.mubr.msk.bf16.gmra.mrb[100].mxu1 %vm8005_vm5, %v8397_v47 }
 0x1a6   : > { %2263 = vmatprep.mubr.bf16.mxu1 %v8187_v56 }
 0x1ab   : > { %2103 = vmatmul.mubr.bf16.gmra.mrb[104].mxu0 %v8165_v37 }
 0x1ac   : > { %5601 = vmatprep.mubr.msk.bf16.mxu0 %vm8028_vm6, %v8488_v20 }
 0x1ad   : > { %5646 = vmatmul.mubr.msk.bf16.gmra.mrb[104].mxu1 %vm8005_vm5, %v8428_v49 }
 0x1ae   : > { %v6014_v0 = vpop.f32.mrb[0].mxu0  ;;  %2271 = vmatprep.mubr.bf16.mxu1 %v8208_v11 }
 0x1af   : > { %v6015_v58 = vpop.f32.mrb[1].mxu0  ;;  %v6126_v9 = vpop.f32.mrb[0].mxu1 }
 0x1b0   : > { %v6016_v26 = vadd.f32 %v6015_v58, %v6014_v0  ;;  %v6017_v33 = vpop.f32.mrb[2].mxu0  ;;  %v6127_v2 = vpop.f32.mrb[1].mxu1 }
 0x1b1   : > { %v6018_v1 = vpop.f32.mrb[3].mxu0  ;;  %v6128_v43 = vadd.f32 %v6127_v2, %v6126_v9  ;;  %v6129_v28 = vpop.f32.mrb[2].mxu1  ;;  %v770_v9 = vrot.slane %v497_v45, 1 }
 0x1b2   : > { %v1703_v37 = vadd.f32 %v6016_v26, %v8670_v32  ;;  %v6019_v41 = vadd.f32 %v6018_v1, %v6017_v33  ;;  %v6130_v47 = vpop.f32.mrb[3].mxu1  ;;  %v788_v26 = vrot.slane %v498_v52, 1 }
 0x1b3   : > { %2111 = vmatmul.mubr.bf16.gmra.mrb[108].mxu0 %v8187_v56  ;;  %v6131_v44 = vadd.f32 %v6130_v47, %v6129_v28 }
 0x1b4   : > { %v1706_v49 = vadd.f32 %v6019_v41, %v8670_v32  ;;  %5604 = vmatprep.mubr.msk.bf16.mxu0 %vm8028_vm6, %v8521_v30  ;;  %v8678_v34 = vadd.f32 %v6128_v43, %v1703_v37  ;;  %v8706_v37 = vld [vmem:[%s7989_s19 + $0x88] sm:$0xff]   ;;  %v807_v52 = vsel %vm790_vm3, %v770_v9, %v788_v26  ;;  %v825_v47 = vsel %vm790_vm3, %v788_v26, %v770_v9 }
 0x1b5   : > { %5649 = vmatmul.mubr.msk.bf16.gmra.mrb[108].mxu1 %vm8005_vm5, %v8460_v18 }
 0x1b6   : > { %v6020_v17 = vpop.f32.mrb[4].mxu0  ;;  %2279 = vmatprep.mubr.bf16.mxu1 %v8238_v39  ;;  %v8684_v21 = vadd.f32 %v6131_v44, %v1706_v49  ;;  %v500_v49 = vunpack.c.h.bf16 %v8706_v37 }
 0x1b7   : > { %v6021_v4 = vpop.f32.mrb[5].mxu0  ;;  %v6132_v56 = vpop.f32.mrb[4].mxu1 }
 0x1b8   : > { %v6022_v10 = vadd.f32 %v6021_v4, %v6020_v17  ;;  %v6023_v61 = vpop.f32.mrb[6].mxu0  ;;  %v6133_v57 = vpop.f32.mrb[5].mxu1 }
 0x1b9   : > { %v6024_v25 = vpop.f32.mrb[7].mxu0  ;;  %v6134_v19 = vadd.f32 %v6133_v57, %v6132_v56  ;;  %v6135_v35 = vpop.f32.mrb[6].mxu1 }
 0x1ba   : > { %v1711_v53 = vadd.f32 %v6022_v10, %v8670_v32  ;;  %v6025_v8 = vadd.f32 %v6024_v25, %v6023_v61  ;;  %v6136_v27 = vpop.f32.mrb[7].mxu1 }
 0x1bb   : > { %2119 = vmatmul.mubr.bf16.gmra.mrb[112].mxu0 %v8208_v11  ;;  %v6137_v13 = vadd.f32 %v6136_v27, %v6135_v35 }
 0x1bc   : > { %v1714_v18 = vadd.f32 %v6025_v8, %v8670_v32  ;;  %5607 = vmatprep.mubr.msk.bf16.mxu0 %vm8028_vm6, %v8549_v36  ;;  %v8692_v38 = vadd.f32 %v6134_v19, %v1711_v53  ;;  %v536_v19 = vrot.slane %v500_v49, 7 }
 0x1bd   : > { %5652 = vmatmul.mubr.msk.bf16.gmra.mrb[112].mxu1 %vm8005_vm5, %v8490_v15 }
 0x1be   : > { %v6026_v12 = vpop.f32.mrb[8].mxu0  ;;  %2287 = vmatprep.mubr.bf16.mxu1 %v8424_v62  ;;  %v8698_v42 = vadd.f32 %v6137_v13, %v1714_v18 }
 0x1bf   : > { %v6027_v11 = vpop.f32.mrb[9].mxu0  ;;  %v6138_v29 = vpop.f32.mrb[8].mxu1 }
 0x1c0   : > { %v6028_v59 = vadd.f32 %v6027_v11, %v6026_v12  ;;  %v6029_v50 = vpop.f32.mrb[10].mxu0  ;;  %v6139_v0 = vpop.f32.mrb[9].mxu1 }
 0x1c1   : > { %v6030_v58 = vpop.f32.mrb[11].mxu0  ;;  %v6140_v33 = vadd.f32 %v6139_v0, %v6138_v29  ;;  %v6141_v2 = vpop.f32.mrb[10].mxu1 }
 0x1c2   : > { %v1719_v15 = vadd.f32 %v6028_v59, %v8670_v32  ;;  %v6031_v1 = vadd.f32 %v6030_v58, %v6029_v50  ;;  %v6142_v43 = vpop.f32.mrb[11].mxu1 }
 0x1c3   : > { %2127 = vmatmul.mubr.bf16.gmra.mrb[116].mxu0 %v8238_v39  ;;  %v6143_v41 = vadd.f32 %v6142_v43, %v6141_v2  ;;  %v499_v39 = vunpack.c.l.bf16 %v8706_v37 }
 0x1c4   : > { %v1722_v28 = vadd.f32 %v6031_v1, %v8670_v32  ;;  %5610 = vmatprep.mubr.msk.bf16.mxu0 %vm8028_vm6, %v8567_v51  ;;  %v8713_v45 = vadd.f32 %v6140_v33, %v1719_v15 }
 0x1c5   : > { %5655 = vmatmul.mubr.msk.bf16.gmra.mrb[116].mxu1 %vm8005_vm5, %v8523_v55  ;;  %v8727_v55 = vpack.c.bf16 %v825_v47, %v807_v52  ;;  %v518_v53 = vrot.slane %v499_v39, 7 }
 0x1c6   : > { %v6032_v44 = vpop.f32.mrb[12].mxu0  ;;  %2295 = vmatprep.mubr.bf16.mxu1 %v8493_v16  ;;  %v8725_v17 = vadd.f32 %v6143_v41, %v1722_v28 }
 0x1c7   : > { %v6033_v4 = vpop.f32.mrb[13].mxu0  ;;  %v6144_v56 = vpop.f32.mrb[12].mxu1  ;;  %v555_v50 = vsel %vm537_vm0, %v518_v53, %v536_v19 }
 0x1c8   : > { %v6034_v10 = vadd.f32 %v6033_v4, %v6032_v44  ;;  %v6035_v61 = vpop.f32.mrb[14].mxu0  ;;  %v6145_v57 = vpop.f32.mrb[13].mxu1 }
 0x1c9   : > { %v6036_v25 = vpop.f32.mrb[15].mxu0  ;;  %v6146_v8 = vadd.f32 %v6145_v57, %v6144_v56  ;;  %v6147_v27 = vpop.f32.mrb[14].mxu1 }
 0x1ca   : > { %v1727_v35 = vadd.f32 %v6034_v10, %v8670_v32  ;;  %v6037_v18 = vadd.f32 %v6036_v25, %v6035_v61  ;;  %v6148_v13 = vpop.f32.mrb[15].mxu1 }
 0x1cb   : > { %2135 = vmatmul.mubr.bf16.gmra.mrb[120].mxu0 %v8424_v62  ;;  %v6149_v11 = vadd.f32 %v6148_v13, %v6147_v27  ;;  %v573_v62 = vsel %vm537_vm0, %v536_v19, %v518_v53  ;;  %v7369_v13 = vld [vmem:[#allocation8 + $0x8] sm:$0xff]  }
 0x1cc   : > { %v1730_v12 = vadd.f32 %v6037_v18, %v8670_v32  ;;  %5613 = vmatprep.mubr.msk.bf16.mxu0 %vm8028_vm6, %v8727_v55  ;;  %v8739_v29 = vadd.f32 %v6146_v8, %v1727_v35  ;;  %v5660_v1 = vpack.c.bf16 %v555_v50, %v573_v62  ;;  %v7370_v62 = vld [vmem:[#allocation8 + $0x10] sm:$0xff]  }
 0x1cd   : > { %5658 = vmatmul.mubr.msk.bf16.gmra.mrb[120].mxu1 %vm8005_vm5, %v8551_v7 }
 0x1ce   : > { %v6038_v59 = vpop.f32.mrb[16].mxu0  ;;  %2303 = vmatprep.mubr.bf16.mxu1 %v8706_v37  ;;  %v8749_v0 = vadd.f32 %v6149_v11, %v1730_v12 }
 0x1cf   : > { %v6039_v58 = vpop.f32.mrb[17].mxu0  ;;  %v6150_v9 = vpop.f32.mrb[16].mxu1 }
 0x1d0   : > { %v6040_v26 = vadd.f32 %v6039_v58, %v6038_v59  ;;  %v6041_v15 = vpop.f32.mrb[18].mxu0  ;;  %v6151_v33 = vpop.f32.mrb[17].mxu1 }
 0x1d1   : > { %v6042_v2 = vpop.f32.mrb[19].mxu0  ;;  %v6152_v43 = vadd.f32 %v6151_v33, %v6150_v9  ;;  %v6153_v28 = vpop.f32.mrb[18].mxu1 }
 0x1d2   : > { %v1735_v7 = vadd.f32 %v6040_v26, %v8670_v32  ;;  %v6043_v41 = vadd.f32 %v6042_v2, %v6041_v15  ;;  %v6154_v52 = vpop.f32.mrb[19].mxu1 }
 0x1d3   : > { %2143 = vmatmul.mubr.bf16.gmra.mrb[124].mxu0 %v8493_v16  ;;  %v6155_v44 = vadd.f32 %v6154_v52, %v6153_v28 }
 0x1d4   : > { %v1738_v47 = vadd.f32 %v6043_v41, %v8670_v32  ;;  %7017 = vmatprep.mubr.msk.bf16.mxu0 %vm8028_vm6, %v8092_v48  ;;  %v8757_v4 = vadd.f32 %v6152_v43, %v1735_v7 }
 0x1d5   : > { %5661 = vmatmul.mubr.msk.bf16.gmra.mrb[124].mxu1 %vm8005_vm5, %v5660_v1 }
 0x1d6   : > { %v6044_v56 = vpop.f32.mrb[20].mxu0  ;;  %7033 = vmatprep.mubr.msk.bf16.mxu1 %vm8028_vm6, %v8426_v63  ;;  %v8764_v10 = vadd.f32 %v6155_v44, %v1738_v47  ;;  %v7372_v47 = vld [vmem:[#allocation8 + $0x20] sm:$0xff]  }
 0x1d7   : > { %v6045_v16 = vpop.f32.mrb[21].mxu0  ;;  %v6156_v61 = vpop.f32.mrb[20].mxu1 }
 0x1d8   : > { %v6046_v57 = vadd.f32 %v6045_v16, %v6044_v56  ;;  %v6047_v25 = vpop.f32.mrb[22].mxu0  ;;  %v6157_v53 = vpop.f32.mrb[21].mxu1  ;;  %v771_v16 = vrot.slane %v499_v39, 1 }
 0x1d9   : > { %v6048_v19 = vpop.f32.mrb[23].mxu0  ;;  %v6158_v35 = vadd.f32 %v6157_v53, %v6156_v61  ;;  %v6159_v8 = vpop.f32.mrb[22].mxu1 }
 0x1da   : > { %v1743_v48 = vadd.f32 %v6046_v57, %v8670_v32  ;;  %v6049_v27 = vadd.f32 %v6048_v19, %v6047_v25  ;;  %v6160_v18 = vpop.f32.mrb[23].mxu1 }
 0x1db   : > { %7018 = vmatmul.mubr.msk.bf16.vlgmr.msra.gmra.mrb[128].mxu0 %vm8028_vm6, %v8132_v14  ;;  %v6161_v12 = vadd.f32 %v6160_v18, %v6159_v8 }
 0x1dc   : > { %v1746_v63 = vadd.f32 %v6049_v27, %v8670_v32  ;;  %7021 = vmatprep.mubr.msk.bf16.mxu0 %vm8028_vm6, %v8189_v60  ;;  %v8774_v11 = vadd.f32 %v6158_v35, %v1743_v48  ;;  %v7373_v35 = vld [vmem:[#allocation8 + $0x28] sm:$0xff]  }
 0x1dd   : > { %7034 = vmatmul.mubr.msk.bf16.vlgmr.msra.gmra.mrb[128].mxu1 %vm8028_vm6, %v8458_v5 }
 0x1de   : > { %7050 = vmatpush3.bf16.msra.mxu1 %v8611_v6  ;;  %v6050_v59 = vpop.f32.mrb[24].mxu0  ;;  %7037 = vmatprep.mubr.msk.bf16.mxu1 %vm8028_vm6, %v8488_v20  ;;  %v8783_v14 = vadd.f32 %v6161_v12, %v1746_v63  ;;  %v7371_v20 = vld [vmem:[#allocation8 + $0x18] sm:$0xff]  }
 0x1df   : > { %v6051_v50 = vpop.f32.mrb[25].mxu0  ;;  %7051 = vmatprep.subr.bf16.mxu1 %v7369_v13  ;;  %v6162_v58 = vpop.f32.mrb[24].mxu1 }
 0x1e0   : > { %v6052_v60 = vadd.f32 %v6051_v50, %v6050_v59  ;;  %v6053_v9 = vpop.f32.mrb[26].mxu0  ;;  %v6163_v26 = vpop.f32.mrb[25].mxu1 }
 0x1e1   : > { %v6054_v15 = vpop.f32.mrb[27].mxu0  ;;  %v6164_v5 = vadd.f32 %v6163_v26, %v6162_v58  ;;  %v6165_v2 = vpop.f32.mrb[26].mxu1  ;;  %v7376_v26 = vld [vmem:[%s7989_s19 + $0x8] sm:$0xff]  }
 0x1e2   : > { %v1751_v33 = vadd.f32 %v6052_v60, %v8670_v32  ;;  %7052 = vmatpush3.bf16.msra.mxu1 %v7369_v13  ;;  %v6055_v6 = vadd.f32 %v6054_v15, %v6053_v9  ;;  %v6166_v1 = vpop.f32.mrb[27].mxu1  ;;  %v7374_v13 = vld [vmem:[#allocation8 + $0x30] sm:$0xff]  }
 0x1e3   : > { %7022 = vmatmul.mubr.msk.bf16.gmra.mrb[132].mxu0 %vm8028_vm6, %v8250_v23  ;;  %7053 = vmatprep.subr.bf16.mxu1 %v7370_v62  ;;  %v6167_v43 = vadd.f32 %v6166_v1, %v6165_v2 }
 0x1e4   : > { %v1754_v7 = vadd.f32 %v6055_v6, %v8670_v32  ;;  %7025 = vmatprep.mubr.msk.bf16.mxu0 %vm8028_vm6, %v8309_v31  ;;  %v8793_v28 = vadd.f32 %v6164_v5, %v1751_v33  ;;  %v7375_v33 = vld [vmem:[#allocation8 + $0x38] sm:$0xff]  }
 0x1e5   : > { %7038 = vmatmul.mubr.msk.bf16.gmra.mrb[132].mxu1 %vm8028_vm6, %v8521_v30  ;;  %v789_v30 = vrot.slane %v500_v49, 1 }
 0x1e6   : > { %7054 = vmatpush3.bf16.msra.mxu1 %v7370_v62  ;;  %v6056_v41 = vpop.f32.mrb[28].mxu0  ;;  %7041 = vmatprep.mubr.msk.bf16.mxu1 %vm8028_vm6, %v8549_v36  ;;  %v8801_v23 = vadd.f32 %v6167_v43, %v1754_v7 }
 0x1e7   : > { %v6057_v52 = vpop.f32.mrb[29].mxu0  ;;  %7055 = vmatprep.subr.bf16.mxu1 %v7371_v20  ;;  %v6168_v44 = vpop.f32.mrb[28].mxu1  ;;  %v826_v27 = vsel %vm790_vm3, %v789_v30, %v771_v16 }
 0x1e8   : > { %v6058_v56 = vadd.f32 %v6057_v52, %v6056_v41  ;;  %v6059_v31 = vpop.f32.mrb[30].mxu0  ;;  %v6169_v61 = vpop.f32.mrb[29].mxu1 }
 0x1e9   : > { %v6060_v57 = vpop.f32.mrb[31].mxu0  ;;  %v6170_v53 = vadd.f32 %v6169_v61, %v6168_v44  ;;  %v6171_v36 = vpop.f32.mrb[30].mxu1  ;;  %v7377_v44 = vld [vmem:[%s7989_s19 + $0x10] sm:$0xff]  }
 0x1ea   : > { %v1759_v25 = vadd.f32 %v6058_v56, %v8670_v32  ;;  %7056 = vmatpush3.bf16.msra.mxu1 %v7371_v20  ;;  %v6061_v19 = vadd.f32 %v6060_v57, %v6059_v31  ;;  %v6172_v48 = vpop.f32.mrb[31].mxu1  ;;  %v7378_v57 = vld [vmem:[%s7989_s19 + $0x18] sm:$0xff]  }
 0x1eb   : > { %7026 = vmatmul.mubr.msk.bf16.gmra.mrb[136].mxu0 %vm8028_vm6, %v8339_v24  ;;  %7057 = vmatprep.subr.bf16.mxu1 %v7372_v47  ;;  %v6173_v8 = vadd.f32 %v6172_v48, %v6171_v36  ;;  %v808_v24 = vsel %vm790_vm3, %v771_v16, %v789_v30 }
 0x1ec   : > { %v1762_v39 = vadd.f32 %v6061_v19, %v8670_v32  ;;  %7029 = vmatprep.mubr.msk.bf16.mxu0 %vm8028_vm6, %v8367_v40  ;;  %v8815_v37 = vadd.f32 %v6170_v53, %v1759_v25  ;;  %v5708_v62 = vpack.c.bf16 %v826_v27, %v808_v24 }
 0x1ed   : > { %7042 = vmatmul.mubr.msk.bf16.gmra.mrb[136].mxu1 %vm8028_vm6, %v8567_v51 }
 0x1ee   : > { %7058 = vmatpush3.bf16.msra.mxu1 %v7372_v47  ;;  %v6062_v49 = vpop.f32.mrb[32].mxu0  ;;  %7045 = vmatprep.mubr.msk.bf16.mxu1 %vm8028_vm6, %v8727_v55  ;;  %v8827_v40 = vadd.f32 %v6173_v8, %v1762_v39 }
 0x1ef   : > { %v6063_v18 = vpop.f32.mrb[33].mxu0  ;;  %7059 = vmatprep.subr.bf16.mxu1 %v7373_v35  ;;  %v6174_v63 = vpop.f32.mrb[32].mxu1 }
 0x1f0   : > { %v6064_v51 = vadd.f32 %v6063_v18, %v6062_v49  ;;  %v6065_v12 = vpop.f32.mrb[34].mxu0  ;;  %v6175_v59 = vpop.f32.mrb[33].mxu1  ;;  %v7379_v18 = vld [vmem:[%s7989_s19 + $0x20] sm:$0xff]  }
 0x1f1   : > { %v6066_v50 = vpop.f32.mrb[35].mxu0  ;;  %v6176_v58 = vadd.f32 %v6175_v59, %v6174_v63  ;;  %v6177_v60 = vpop.f32.mrb[34].mxu1  ;;  %v7380_v59 = vld [vmem:[%s7989_s19 + $0x28] sm:$0xff]  }
 0x1f2   : > { %v1767_v55 = vadd.f32 %v6064_v51, %v8670_v32  ;;  %7060 = vmatpush3.bf16.msra.mxu1 %v7373_v35  ;;  %v6067_v9 = vadd.f32 %v6066_v50, %v6065_v12  ;;  %v6178_v15 = vpop.f32.mrb[35].mxu1 }
 0x1f3   : > { %7030 = vmatmul.mubr.msk.bf16.gmra.mrb[140].mxu0 %vm8028_vm6, %v8395_v46  ;;  %7061 = vmatprep.subr.bf16.mxu1 %v7374_v13  ;;  %v6179_v2 = vadd.f32 %v6178_v15, %v6177_v60 }
 0x1f4   : > { %v1770_v5 = vadd.f32 %v6067_v9, %v8670_v32  ;;  %v8835_v6 = vadd.f32 %v6176_v58, %v1767_v55 }
 0x1f5   : > { %7046 = vmatmul.mubr.msk.bf16.gmra.mrb[140].mxu1 %vm8028_vm6, %v5708_v62 }
 0x1f6   : > { %7062 = vmatpush3.bf16.msra.mxu1 %v7374_v13  ;;  %v6068_v1 = vpop.f32.mrb[36].mxu0  ;;  %7065 = vmatprep.mubr.bf16.mxu1 %v7376_v26  ;;  %v8839_v20 = vadd.f32 %v6179_v2, %v1770_v5 }
 0x1f7   : > { %v6069_v7 = vpop.f32.mrb[37].mxu0  ;;  %7063 = vmatprep.subr.bf16.mxu1 %v7375_v33  ;;  %v6180_v46 = vpop.f32.mrb[36].mxu1 }
 0x1f8   : > { %v6070_v43 = vadd.f32 %v6069_v7, %v6068_v1  ;;  %v6071_v41 = vpop.f32.mrb[38].mxu0  ;;  %v6181_v52 = vpop.f32.mrb[37].mxu1  ;;  %v7381_v7 = vld [vmem:[%s7989_s19 + $0x30] sm:$0xff]  }
 0x1f9   : > { %v6072_v47 = vpop.f32.mrb[39].mxu0  ;;  %v6182_v31 = vadd.f32 %v6181_v52, %v6180_v46  ;;  %v6183_v16 = vpop.f32.mrb[38].mxu1 }
 0x1fa   : > { %v1775_v56 = vadd.f32 %v6070_v43, %v8670_v32  ;;  %7064 = vmatpush3.bf16.msra.mxu1 %v7375_v33  ;;  %v6073_v61 = vadd.f32 %v6072_v47, %v6071_v41  ;;  %v6184_v30 = vpop.f32.mrb[39].mxu1  ;;  %v7382_v47 = vld [vmem:[%s7989_s19 + $0x38] sm:$0xff]  }
 0x1fb   : > { %v6185_v53 = vadd.f32 %v6184_v30, %v6183_v16 }
 0x1fc   : > { %v1778_v25 = vadd.f32 %v6073_v61, %v8670_v32  ;;  %v8845_v36 = vadd.f32 %v6182_v31, %v1775_v56 }
 0x1fd   : > { %7066 = vmatmul.mubr.bf16.vlgmr.msra.gmra.mrb[144].mxu1 %v7377_v44 }
 0x1fe   : > { %v6074_v19 = vpop.f32.mrb[40].mxu0  ;;  %7069 = vmatprep.mubr.bf16.mxu1 %v7378_v57  ;;  %v8847_v48 = vadd.f32 %v6185_v53, %v1778_v25 }
 0x1ff   : > { %v6075_v35 = vpop.f32.mrb[41].mxu0  ;;  %v6186_v39 = vpop.f32.mrb[40].mxu1 }
 0x200   : > { %v6076_v8 = vadd.f32 %v6075_v35, %v6074_v19  ;;  %v6077_v49 = vpop.f32.mrb[42].mxu0  ;;  %v6187_v24 = vpop.f32.mrb[41].mxu1 }
 0x201   : > { %v6078_v27 = vpop.f32.mrb[43].mxu0  ;;  %v6188_v63 = vadd.f32 %v6187_v24, %v6186_v39  ;;  %v6189_v51 = vpop.f32.mrb[42].mxu1 }
 0x202   : > { %v1783_v13 = vadd.f32 %v6076_v8, %v8670_v32  ;;  %v6079_v12 = vadd.f32 %v6078_v27, %v6077_v49  ;;  %v6190_v50 = vpop.f32.mrb[43].mxu1  ;;  %v7383_v8 = vld [vmem:[%s7989_s19 + $0x40] sm:$0xff]  }
 0x203   : > { %v6191_v55 = vadd.f32 %v6190_v50, %v6189_v51 }
 0x204   : > { %v1786_v62 = vadd.f32 %v6079_v12, %v8670_v32  ;;  %v8853_v58 = vadd.f32 %v6188_v63, %v1783_v13  ;;  %v7384_v13 = vld [vmem:[%s7989_s19 + $0x48] sm:$0xff]  }
 0x205   : > { %7070 = vmatmul.mubr.bf16.gmra.mrb[148].mxu1 %v7379_v18 }
 0x206   : > { %v6080_v60 = vpop.f32.mrb[44].mxu0  ;;  %7073 = vmatprep.mubr.bf16.mxu1 %v7380_v59  ;;  %v8855_v9 = vadd.f32 %v6191_v55, %v1786_v62 }
 0x207   : > { %v6081_v26 = vpop.f32.mrb[45].mxu0  ;;  %v6192_v15 = vpop.f32.mrb[44].mxu1 }
 0x208   : > { %v6082_v33 = vadd.f32 %v6081_v26, %v6080_v60  ;;  %v6083_v5 = vpop.f32.mrb[46].mxu0  ;;  %v6193_v2 = vpop.f32.mrb[45].mxu1 }
 0x209   : > { %v6084_v1 = vpop.f32.mrb[47].mxu0  ;;  %v6194_v43 = vadd.f32 %v6193_v2, %v6192_v15  ;;  %v6195_v41 = vpop.f32.mrb[46].mxu1  ;;  %v7385_v2 = vld [vmem:[%s7989_s19 + $0x50] sm:$0xff]  }
 0x20a   : > { %v1791_v46 = vadd.f32 %v6082_v33, %v8670_v32  ;;  %v6085_v52 = vadd.f32 %v6084_v1, %v6083_v5  ;;  %v6196_v44 = vpop.f32.mrb[47].mxu1 }
 0x20b   : > { %v6197_v31 = vadd.f32 %v6196_v44, %v6195_v41  ;;  %v7386_v41 = vld [vmem:[%s7989_s19 + $0x58] sm:$0xff]  }
 0x20c   : > { %v1794_v56 = vadd.f32 %v6085_v52, %v8670_v32  ;;  %v8861_v16 = vadd.f32 %v6194_v43, %v1791_v46 }
 0x20d   : > { %7074 = vmatmul.mubr.bf16.gmra.mrb[152].mxu1 %v7381_v7 }
 0x20e   : > { %v6086_v61 = vpop.f32.mrb[48].mxu0  ;;  %7077 = vmatprep.mubr.bf16.mxu1 %v7382_v47  ;;  %v8863_v57 = vadd.f32 %v6197_v31, %v1794_v56 }
 0x20f   : > { %v6087_v30 = vpop.f32.mrb[49].mxu0  ;;  %v6198_v25 = vpop.f32.mrb[48].mxu1 }
 0x210   : > { %v6088_v53 = vadd.f32 %v6087_v30, %v6086_v61  ;;  %v6089_v19 = vpop.f32.mrb[50].mxu0  ;;  %v6199_v35 = vpop.f32.mrb[49].mxu1 }
 0x211   : > { %v6090_v39 = vpop.f32.mrb[51].mxu0  ;;  %v6200_v24 = vadd.f32 %v6199_v35, %v6198_v25  ;;  %v6201_v27 = vpop.f32.mrb[50].mxu1 }
 0x212   : > { %v1799_v49 = vadd.f32 %v6088_v53, %v8670_v32  ;;  %v6091_v18 = vadd.f32 %v6090_v39, %v6089_v19  ;;  %v6202_v63 = vpop.f32.mrb[51].mxu1 }
 0x213   : > { %v6203_v12 = vadd.f32 %v6202_v63, %v6201_v27 }
 0x214   : > { %v1802_v51 = vadd.f32 %v6091_v18, %v8670_v32  ;;  %v8869_v59 = vadd.f32 %v6200_v24, %v1799_v49 }
 0x215   : > { %7078 = vmatmul.mubr.bf16.gmra.mrb[156].mxu1 %v7383_v8  ;;  %v7387_v8 = vld [vmem:[%s7989_s19 + $0x60] sm:$0xff]  }
 0x216   : > { %v8871_v50 = vadd.f32 %v6203_v12, %v1802_v51  ;;  %v6092_v62 = vpop.f32.mrb[52].mxu0  ;;  %7081 = vmatprep.mubr.bf16.mxu1 %v7384_v13  ;;  %v7388_v13 = vld [vmem:[%s7989_s19 + $0x68] sm:$0xff]  }
 0x217   : > { %v6093_v55 = vpop.f32.mrb[53].mxu0  ;;  %v6204_v60 = vpop.f32.mrb[52].mxu1 }
 0x218   : > { %v6094_v26 = vadd.f32 %v6093_v55, %v6092_v62  ;;  %v6095_v15 = vpop.f32.mrb[54].mxu0  ;;  %v6205_v33 = vpop.f32.mrb[53].mxu1 }
 0x219   : > { %v6096_v5 = vpop.f32.mrb[55].mxu0  ;;  %v6206_v7 = vadd.f32 %v6205_v33, %v6204_v60  ;;  %v6207_v46 = vpop.f32.mrb[54].mxu1 }
 0x21a   : > { %v1807_v1 = vadd.f32 %v6094_v26, %v8670_v32  ;;  %v6097_v43 = vadd.f32 %v6096_v5, %v6095_v15  ;;  %v6208_v52 = vpop.f32.mrb[55].mxu1 }
 0x21b   : > { %v6209_v56 = vadd.f32 %v6208_v52, %v6207_v46 }
 0x21c   : > { %v8876_v47 = vadd.f32 %v6206_v7, %v1807_v1  ;;  %v1810_v44 = vadd.f32 %v6097_v43, %v8670_v32  ;;  %v7389_v7 = vld [vmem:[%s7989_s19 + $0x70] sm:$0xff]  }
 0x21d   : > { %7082 = vmatmul.mubr.bf16.gmra.mrb[160].mxu1 %v7385_v2 }
 0x21e   : > { %v8879_v31 = vadd.f32 %v6209_v56, %v1810_v44  ;;  %v6098_v61 = vpop.f32.mrb[56].mxu0  ;;  %7085 = vmatprep.mubr.bf16.mxu1 %v7386_v41  ;;  %v7390_v44 = vld [vmem:[%s7989_s19 + $0x78] sm:$0xff]  }
 0x21f   : > { %v6099_v30 = vpop.f32.mrb[57].mxu0  ;;  %v6210_v25 = vpop.f32.mrb[56].mxu1 }
 0x220   : > { %v6100_v53 = vadd.f32 %v6099_v30, %v6098_v61  ;;  %v6101_v19 = vpop.f32.mrb[58].mxu0  ;;  %v6211_v35 = vpop.f32.mrb[57].mxu1 }
 0x221   : > { %v6102_v39 = vpop.f32.mrb[59].mxu0  ;;  %v6212_v24 = vadd.f32 %v6211_v35, %v6210_v25  ;;  %v6213_v27 = vpop.f32.mrb[58].mxu1 }
 0x222   : > { %v1815_v49 = vadd.f32 %v6100_v53, %v8670_v32  ;;  %v6103_v18 = vadd.f32 %v6102_v39, %v6101_v19  ;;  %v6214_v63 = vpop.f32.mrb[59].mxu1 }
 0x223   : > { %v6215_v62 = vadd.f32 %v6214_v63, %v6213_v27  ;;  %v7393_v63 = vld [vmem:[#allocation11] sm:$0xff]  }
 0x224   : > { %v8884_v51 = vadd.f32 %v6212_v24, %v1815_v49  ;;  %v1818_v12 = vadd.f32 %v6103_v18, %v8670_v32  ;;  %v7392_v24 = vld [vmem:[#allocation11 + $0x40] sm:$0xff]  }
 0x225   : > { %7086 = vmatmul.mubr.bf16.gmra.mrb[164].mxu1 %v7387_v8  ;;  %6494 = vmatprep.subr.bf16.mxu0 %v7392_v24 }
 0x226   : > { %v8887_v55 = vadd.f32 %v6215_v62, %v1818_v12  ;;  %v6104_v60 = vpop.f32.mrb[60].mxu0  ;;  %7089 = vmatprep.mubr.bf16.mxu1 %v7388_v13  ;;  %v7391_v13 = vld [vmem:[%s7989_s19 + $0x80] sm:$0xff]   ;;  %6495 = vmatpush3.bf16.msra.mxu0 %v7393_v63 }
 0x227   : > { %v6105_v26 = vpop.f32.mrb[61].mxu0  ;;  %v6216_v15 = vpop.f32.mrb[60].mxu1  ;;  %v7400_v63 = vld [vmem:[#allocation11 + $0x18] sm:$0xff]  }
 0x228   : > { %v6106_v33 = vadd.f32 %v6105_v26, %v6104_v60  ;;  %v6107_v5 = vpop.f32.mrb[62].mxu0  ;;  %v6217_v2 = vpop.f32.mrb[61].mxu1 }
 0x229   : > { %v6108_v1 = vpop.f32.mrb[63].mxu0  ;;  %v6218_v43 = vadd.f32 %v6217_v2, %v6216_v15  ;;  %v6219_v41 = vpop.f32.mrb[62].mxu1  ;;  %v7394_v2 = vld [vmem:[#allocation11 + $0x48] sm:$0xff]  }
 0x22a   : > { %v1823_v46 = vadd.f32 %v6106_v33, %v8670_v32  ;;  %v6109_v52 = vadd.f32 %v6108_v1, %v6107_v5  ;;  %v6220_v56 = vpop.f32.mrb[63].mxu1  ;;  %v7395_v1 = vld [vmem:[#allocation11 + $0x8] sm:$0xff]   ;;  %6496 = vmatprep.subr.bf16.mxu0 %v7394_v2 }
 0x22b   : > { %v6221_v25 = vadd.f32 %v6220_v56, %v6219_v41  ;;  %6497 = vmatpush3.bf16.msra.mxu0 %v7395_v1 }
 0x22c   : > { %v8892_v61 = vadd.f32 %v6218_v43, %v1823_v46  ;;  %v1826_v30 = vadd.f32 %v6109_v52, %v8670_v32 }
 0x22d   : > { %7090 = vmatmul.mubr.bf16.gmra.mrb[168].mxu1 %v7389_v7 }
 0x22e   : > { %v8895_v53 = vadd.f32 %v6221_v25, %v1826_v30  ;;  %v6238_v19 = vpop.f32.mrb[64].mxu0  ;;  %7093 = vmatprep.mubr.bf16.mxu1 %v7390_v44  ;;  %v7396_v44 = vld [vmem:[#allocation11 + $0x50] sm:$0xff]  }
 0x22f   : > { %v6239_v35 = vpop.f32.mrb[65].mxu0  ;;  %v7397_v25 = vld [vmem:[#allocation11 + $0x10] sm:$0xff]   ;;  %6498 = vmatprep.subr.bf16.mxu0 %v7396_v44 }
 0x230   : > { %v6350_v39 = vpop.f32.mrb[64].mxu1  ;;  %v6240_v8 = vadd.f32 %v6239_v35, %v6238_v19  ;;  %v6241_v49 = vpop.f32.mrb[66].mxu0  ;;  %6499 = vmatpush3.bf16.msra.mxu0 %v7397_v25 }
 0x231   : > { %v6351_v27 = vpop.f32.mrb[65].mxu1  ;;  %v6242_v18 = vpop.f32.mrb[67].mxu0 }
 0x232   : > { %v2025_v12 = vadd.f32 %v6240_v8, %v8678_v34  ;;  %v6352_v62 = vadd.f32 %v6351_v27, %v6350_v39  ;;  %v6353_v60 = vpop.f32.mrb[66].mxu1  ;;  %v6243_v32 = vadd.f32 %v6242_v18, %v6241_v49  ;;  %v7398_v18 = vld [vmem:[#allocation11 + $0x58] sm:$0xff]  }
 0x233   : > { %v6354_v26 = vpop.f32.mrb[67].mxu1  ;;  %6500 = vmatprep.subr.bf16.mxu0 %v7398_v18 }
 0x234   : > { %v2028_v15 = vadd.f32 %v6243_v32, %v8684_v21  ;;  %v6355_v33 = vadd.f32 %v6354_v26, %v6353_v60  ;;  %v8900_v5 = vadd.f32 %v6352_v62, %v2025_v12  ;;  %v7401_v12 = vld [vmem:[#allocation11 + $0x80] sm:$0xff]   ;;  %6501 = vmatpush3.bf16.msra.mxu0 %v7400_v63 }
 0x235   : > { %7094 = vmatmul.mubr.bf16.gmra.mrb[172].mxu1 %v7391_v13  ;;  %v7399_v13 = vld [vmem:[#allocation11 + $0xc0] sm:$0xff]  }
 0x236   : > { %v6244_v7 = vpop.f32.mrb[68].mxu0  ;;  %v8902_v46 = vadd.f32 %v6355_v33, %v2028_v15  ;;  %6606 = vmatprep.subr.bf16.mxu1 %v7399_v13  ;;  %v7402_v33 = vld [vmem:[#allocation11 + $0x60] sm:$0xff]  }
 0x237   : > { %v6245_v43 = vpop.f32.mrb[69].mxu0  ;;  %6607 = vmatpush3.bf16.msra.mxu1 %v7401_v12  ;;  %6502 = vmatprep.subr.bf16.mxu0 %v7402_v33  ;;  %v7410_v12 = vld [vmem:[#allocation11 + $0x70] sm:$0xff]  }
 0x238   : > { %v6356_v34 = vpop.f32.mrb[68].mxu1  ;;  %v6246_v41 = vadd.f32 %v6245_v43, %v6244_v7  ;;  %v6247_v52 = vpop.f32.mrb[70].mxu0  ;;  %v7404_v7 = vld [vmem:[#allocation11 + $0x20] sm:$0xff]   ;;  %v7405_v43 = vld [vmem:[#allocation11 + $0x88] sm:$0xff]  }
 0x239   : > { %v6357_v56 = vpop.f32.mrb[69].mxu1  ;;  %v6248_v30 = vpop.f32.mrb[71].mxu0  ;;  %6503 = vmatpush3.bf16.msra.mxu0 %v7404_v7 }
 0x23a   : > { %v2033_v21 = vadd.f32 %v6246_v41, %v8692_v38  ;;  %v6358_v19 = vadd.f32 %v6357_v56, %v6356_v34  ;;  %v6359_v35 = vpop.f32.mrb[70].mxu1  ;;  %v6249_v39 = vadd.f32 %v6248_v30, %v6247_v52 }
 0x23b   : > { %v6360_v8 = vpop.f32.mrb[71].mxu1 }
 0x23c   : > { %v2036_v49 = vadd.f32 %v6249_v39, %v8698_v42  ;;  %v6361_v24 = vadd.f32 %v6360_v8, %v6359_v35  ;;  %v8906_v27 = vadd.f32 %v6358_v19, %v2033_v21  ;;  %v7403_v42 = vld [vmem:[#allocation11 + $0xc8] sm:$0xff]   ;;  %v7407_v35 = vld [vmem:[#allocation11 + $0xd0] sm:$0xff]  }
 0x23d   : > { %6608 = vmatprep.subr.bf16.mxu1 %v7403_v42  ;;  %v7406_v19 = vld [vmem:[#allocation11 + $0x68] sm:$0xff]   ;;  %v7409_v8 = vld [vmem:[#allocation11 + $0x90] sm:$0xff]  }
 0x23e   : > { %v6250_v62 = vpop.f32.mrb[72].mxu0  ;;  %v8908_v60 = vadd.f32 %v6361_v24, %v2036_v49  ;;  %6609 = vmatpush3.bf16.msra.mxu1 %v7405_v43  ;;  %v7408_v39 = vld [vmem:[#allocation11 + $0x28] sm:$0xff]   ;;  %6504 = vmatprep.subr.bf16.mxu0 %v7406_v19 }
 0x23f   : > { %v6251_v38 = vpop.f32.mrb[73].mxu0  ;;  %6610 = vmatprep.subr.bf16.mxu1 %v7407_v35  ;;  %6505 = vmatpush3.bf16.msra.mxu0 %v7408_v39 }
 0x240   : > { %v6362_v32 = vpop.f32.mrb[72].mxu1  ;;  %v6252_v26 = vadd.f32 %v6251_v38, %v6250_v62  ;;  %v6253_v15 = vpop.f32.mrb[74].mxu0  ;;  %6506 = vmatprep.subr.bf16.mxu0 %v7410_v12  ;;  %v7419_v12 = vld [vmem:[#allocation11 + $0xa8] sm:$0xff]  }
 0x241   : > { %v6363_v2 = vpop.f32.mrb[73].mxu1  ;;  %v6254_v1 = vpop.f32.mrb[75].mxu0 }
 0x242   : > { %v2041_v34 = vadd.f32 %v6252_v26, %v8713_v45  ;;  %v6364_v41 = vadd.f32 %v6363_v2, %v6362_v32  ;;  %v6365_v52 = vpop.f32.mrb[74].mxu1  ;;  %v6255_v44 = vadd.f32 %v6254_v1, %v6253_v15  ;;  %6611 = vmatpush3.bf16.msra.mxu1 %v7409_v8  ;;  %v7412_v32 = vld [vmem:[#allocation11 + $0x30] sm:$0xff]   ;;  %v7413_v26 = vld [vmem:[#allocation11 + $0x98] sm:$0xff]  }
 0x243   : > { %v6366_v56 = vpop.f32.mrb[75].mxu1  ;;  %6507 = vmatpush3.bf16.msra.mxu0 %v7412_v32 }
 0x244   : > { %v2044_v30 = vadd.f32 %v6255_v44, %v8725_v17  ;;  %v6367_v25 = vadd.f32 %v6366_v56, %v6365_v52  ;;  %v8912_v21 = vadd.f32 %v6364_v41, %v2041_v34  ;;  %v7411_v17 = vld [vmem:[#allocation11 + $0xd8] sm:$0xff]   ;;  %v7415_v52 = vld [vmem:[#allocation11 + $0xe0] sm:$0xff]  }
 0x245   : > { %6612 = vmatprep.subr.bf16.mxu1 %v7411_v17  ;;  %v7414_v41 = vld [vmem:[#allocation11 + $0x78] sm:$0xff]   ;;  %v7417_v56 = vld [vmem:[#allocation11 + $0xa0] sm:$0xff]  }
 0x246   : > { %v6256_v49 = vpop.f32.mrb[76].mxu0  ;;  %v8914_v24 = vadd.f32 %v6367_v25, %v2044_v30  ;;  %6613 = vmatpush3.bf16.msra.mxu1 %v7413_v26  ;;  %v7416_v44 = vld [vmem:[#allocation11 + $0x38] sm:$0xff]   ;;  %6508 = vmatprep.subr.bf16.mxu0 %v7414_v41 }
 0x247   : > { %v6257_v45 = vpop.f32.mrb[77].mxu0  ;;  %6614 = vmatprep.subr.bf16.mxu1 %v7415_v52  ;;  %6509 = vmatpush3.bf16.msra.mxu0 %v7416_v44 }
 0x248   : > { %v6368_v18 = vpop.f32.mrb[76].mxu1  ;;  %v6258_v13 = vadd.f32 %v6257_v45, %v6256_v49  ;;  %v6259_v63 = vpop.f32.mrb[78].mxu0  ;;  %v7418_v45 = vld [vmem:[#allocation11 + $0xe8] sm:$0xff]  }
 0x249   : > { %v6369_v62 = vpop.f32.mrb[77].mxu1  ;;  %v6260_v38 = vpop.f32.mrb[79].mxu0 }
 0x24a   : > { %v2049_v15 = vadd.f32 %v6258_v13, %v8739_v29  ;;  %v6370_v33 = vadd.f32 %v6369_v62, %v6368_v18  ;;  %v6371_v42 = vpop.f32.mrb[78].mxu1  ;;  %v6261_v2 = vadd.f32 %v6260_v38, %v6259_v63  ;;  %v7712_v29 = vmov 0.0   ;;  %6615 = vmatpush3.bf16.msra.mxu1 %v7417_v56  ;;  %v7422_v56 = vld [vmem:[#allocation11 + $0xf8] sm:$0xff]  }
 0x24b   : > { %v6372_v1 = vpop.f32.mrb[79].mxu1  ;;  %v3004_v19 = vrot.slane %v7712_v29, 7  ;;  %v10040_v63 = vmov 0.0|0.0   ;;  %6616 = vmatprep.subr.bf16.mxu1 %v7418_v45 }
 0x24c   : > { %v2052_v7 = vadd.f32 %v6261_v2, %v8749_v0  ;;  %v6373_v43 = vadd.f32 %v6372_v1, %v6371_v42  ;;  %v8918_v34 = vadd.f32 %v6370_v33, %v2049_v15  ;;  %4177 = vmatprep.mubr.bf16.mxu0 %v10040_v63  ;;  %v7420_v2 = vld [vmem:[#allocation11 + $0xf0] sm:$0xff]  }
 0x24d   : > { %v8923_v49 = vpack.c.bf16 %v3004_v19, %v3004_v19  ;;  %v7421_v1 = vld [vmem:[#allocation11 + $0xb0] sm:$0xff]  }
 0x24e   : > { %v6262_v30 = vpop.f32.mrb[80].mxu0  ;;  %v8920_v25 = vadd.f32 %v6373_v43, %v2052_v7  ;;  %6617 = vmatpush3.bf16.msra.mxu1 %v7419_v12 }
 0x24f   : > { %v6263_v35 = vpop.f32.mrb[81].mxu0  ;;  %10067 = vst [vmem:[#allocation20_spill] sm:$0xff] %v8923_v49  ;;  %5712 = vmatmul.mubr.msk.bf16.vlgmr.msra.gmra.mrb[144].mxu0 %vm8005_vm5, %v8923_v49  ;;  %6618 = vmatprep.subr.bf16.mxu1 %v7420_v2 }
 0x250   : > { %v6374_v39 = vpop.f32.mrb[80].mxu1  ;;  %v6264_v0 = vadd.f32 %v6263_v35, %v6262_v30  ;;  %v6265_v8 = vpop.f32.mrb[82].mxu0  ;;  %v7423_v35 = vld [vmem:[#allocation11 + $0xb8] sm:$0xff]  }
 0x251   : > { %v6375_v18 = vpop.f32.mrb[81].mxu1  ;;  %v6266_v13 = vpop.f32.mrb[83].mxu0 }
 0x252   : > { %v2057_v17 = vadd.f32 %v6264_v0, %v8757_v4  ;;  %v6376_v62 = vadd.f32 %v6375_v18, %v6374_v39  ;;  %v6377_v38 = vpop.f32.mrb[82].mxu1  ;;  %v6267_v32 = vadd.f32 %v6266_v13, %v6265_v8  ;;  %6619 = vmatpush3.bf16.msra.mxu1 %v7421_v1 }
 0x253   : > { %v6378_v26 = vpop.f32.mrb[83].mxu1  ;;  %6620 = vmatprep.subr.bf16.mxu1 %v7422_v56 }
 0x254   : > { %v2060_v15 = vadd.f32 %v6267_v32, %v8764_v10  ;;  %v6379_v33 = vadd.f32 %v6378_v26, %v6377_v38  ;;  %v8931_v42 = vadd.f32 %v6376_v62, %v2057_v17 }
 0x256   : > { %v6268_v7 = vpop.f32.mrb[84].mxu0  ;;  %v8933_v43 = vadd.f32 %v6379_v33, %v2060_v15  ;;  %6621 = vmatpush3.bf16.msra.mxu1 %v7423_v35 }
 0x257   : > { %v6269_v4 = vpop.f32.mrb[85].mxu0 }
 0x258   : > { %v6380_v41 = vpop.f32.mrb[84].mxu1  ;;  %v6270_v52 = vadd.f32 %v6269_v4, %v6268_v7  ;;  %v6271_v44 = vpop.f32.mrb[86].mxu0 }
 0x259   : > { %v6381_v30 = vpop.f32.mrb[85].mxu1  ;;  %v6272_v19 = vpop.f32.mrb[87].mxu0 }
 0x25a   : > { %v2065_v10 = vadd.f32 %v6270_v52, %v8774_v11  ;;  %v6382_v39 = vadd.f32 %v6381_v30, %v6380_v41  ;;  %v6383_v0 = vpop.f32.mrb[86].mxu1  ;;  %v6273_v8 = vadd.f32 %v6272_v19, %v6271_v44 }
 0x25b   : > { %v6384_v45 = vpop.f32.mrb[87].mxu1 }
 0x25c   : > { %v2068_v18 = vadd.f32 %v6273_v8, %v8783_v14  ;;  %v6385_v13 = vadd.f32 %v6384_v45, %v6383_v0  ;;  %v8937_v12 = vadd.f32 %v6382_v39, %v2065_v10 }
 0x25e   : > { %v6274_v17 = vpop.f32.mrb[88].mxu0  ;;  %v8939_v62 = vadd.f32 %v6385_v13, %v2068_v18 }
 0x25f   : > { %v6275_v38 = vpop.f32.mrb[89].mxu0 }
 0x260   : > { %v6386_v32 = vpop.f32.mrb[88].mxu1  ;;  %v6276_v26 = vadd.f32 %v6275_v38, %v6274_v17  ;;  %v6277_v15 = vpop.f32.mrb[90].mxu0 }
 0x261   : > { %v6387_v33 = vpop.f32.mrb[89].mxu1  ;;  %v6278_v11 = vpop.f32.mrb[91].mxu0 }
 0x262   : > { %v2073_v2 = vadd.f32 %v6276_v26, %v8793_v28  ;;  %v6388_v1 = vadd.f32 %v6387_v33, %v6386_v32  ;;  %v6389_v7 = vpop.f32.mrb[90].mxu1  ;;  %v6279_v4 = vadd.f32 %v6278_v11, %v6277_v15 }
 0x263   : > { %v6390_v41 = vpop.f32.mrb[91].mxu1 }
 0x264   : > { %v2076_v14 = vadd.f32 %v6279_v4, %v8801_v23  ;;  %v6391_v52 = vadd.f32 %v6390_v41, %v6389_v7  ;;  %v8943_v44 = vadd.f32 %v6388_v1, %v2073_v2 }
 0x266   : > { %v6280_v56 = vpop.f32.mrb[92].mxu0  ;;  %v8945_v30 = vadd.f32 %v6391_v52, %v2076_v14 }
 0x267   : > { %v6281_v19 = vpop.f32.mrb[93].mxu0 }
 0x268   : > { %v6392_v35 = vpop.f32.mrb[92].mxu1  ;;  %v6282_v10 = vadd.f32 %v6281_v19, %v6280_v56  ;;  %v6283_v39 = vpop.f32.mrb[94].mxu0 }
 0x269   : > { %v6393_v0 = vpop.f32.mrb[93].mxu1  ;;  %v6284_v8 = vpop.f32.mrb[95].mxu0 }
 0x26a   : > { %v2081_v28 = vadd.f32 %v6282_v10, %v8815_v37  ;;  %v6394_v45 = vadd.f32 %v6393_v0, %v6392_v35  ;;  %v6395_v18 = vpop.f32.mrb[94].mxu1  ;;  %v6285_v13 = vadd.f32 %v6284_v8, %v6283_v39 }
 0x26b   : > { %v6396_v17 = vpop.f32.mrb[95].mxu1 }
 0x26c   : > { %v2084_v23 = vadd.f32 %v6285_v13, %v8827_v40  ;;  %v6397_v38 = vadd.f32 %v6396_v17, %v6395_v18  ;;  %v8949_v32 = vadd.f32 %v6394_v45, %v2081_v28 }
 0x26e   : > { %v6286_v26 = vpop.f32.mrb[96].mxu0  ;;  %v8951_v15 = vadd.f32 %v6397_v38, %v2084_v23 }
 0x26f   : > { %v6287_v33 = vpop.f32.mrb[97].mxu0 }
 0x270   : > { %v6398_v11 = vpop.f32.mrb[96].mxu1  ;;  %v6288_v2 = vadd.f32 %v6287_v33, %v6286_v26  ;;  %v6289_v1 = vpop.f32.mrb[98].mxu0 }
 0x271   : > { %v6399_v7 = vpop.f32.mrb[97].mxu1  ;;  %v6290_v4 = vpop.f32.mrb[99].mxu0 }
 0x272   : > { %v2089_v37 = vadd.f32 %v6288_v2, %v8835_v6  ;;  %v6400_v41 = vadd.f32 %v6399_v7, %v6398_v11  ;;  %v6401_v14 = vpop.f32.mrb[98].mxu1  ;;  %v6291_v52 = vadd.f32 %v6290_v4, %v6289_v1 }
 0x273   : > { %v6402_v56 = vpop.f32.mrb[99].mxu1 }
 0x274   : > { %v2092_v40 = vadd.f32 %v6291_v52, %v8839_v20  ;;  %v6403_v19 = vadd.f32 %v6402_v56, %v6401_v14  ;;  %v8955_v35 = vadd.f32 %v6400_v41, %v2089_v37 }
 0x276   : > { %v6292_v10 = vpop.f32.mrb[100].mxu0  ;;  %v8957_v39 = vadd.f32 %v6403_v19, %v2092_v40 }
 0x277   : > { %v6293_v0 = vpop.f32.mrb[101].mxu0 }
 0x278   : > { %v6404_v8 = vpop.f32.mrb[100].mxu1  ;;  %v6294_v28 = vadd.f32 %v6293_v0, %v6292_v10  ;;  %v6295_v45 = vpop.f32.mrb[102].mxu0 }
 0x279   : > { %v6405_v18 = vpop.f32.mrb[101].mxu1  ;;  %v6296_v13 = vpop.f32.mrb[103].mxu0 }
 0x27a   : > { %v2097_v6 = vadd.f32 %v6294_v28, %v8845_v36  ;;  %v6406_v17 = vadd.f32 %v6405_v18, %v6404_v8  ;;  %v6407_v23 = vpop.f32.mrb[102].mxu1  ;;  %v6297_v38 = vadd.f32 %v6296_v13, %v6295_v45 }
 0x27b   : > { %v6408_v26 = vpop.f32.mrb[103].mxu1 }
 0x27c   : > { %v2100_v20 = vadd.f32 %v6297_v38, %v8847_v48  ;;  %v6409_v33 = vadd.f32 %v6408_v26, %v6407_v23  ;;  %v8961_v11 = vadd.f32 %v6406_v17, %v2097_v6 }
 0x27e   : > { %v6298_v2 = vpop.f32.mrb[104].mxu0  ;;  %v8963_v1 = vadd.f32 %v6409_v33, %v2100_v20 }
 0x27f   : > { %v6299_v7 = vpop.f32.mrb[105].mxu0 }
 0x280   : > { %v6410_v4 = vpop.f32.mrb[104].mxu1  ;;  %v6300_v37 = vadd.f32 %v6299_v7, %v6298_v2  ;;  %v6301_v41 = vpop.f32.mrb[106].mxu0 }
 0x281   : > { %v6411_v14 = vpop.f32.mrb[105].mxu1  ;;  %v6302_v52 = vpop.f32.mrb[107].mxu0 }
 0x282   : > { %v2105_v36 = vadd.f32 %v6300_v37, %v8853_v58  ;;  %v6412_v56 = vadd.f32 %v6411_v14, %v6410_v4  ;;  %v6413_v40 = vpop.f32.mrb[106].mxu1  ;;  %v6303_v19 = vadd.f32 %v6302_v52, %v6301_v41 }
 0x283   : > { %v6414_v10 = vpop.f32.mrb[107].mxu1 }
 0x284   : > { %v2108_v48 = vadd.f32 %v6303_v19, %v8855_v9  ;;  %v6415_v0 = vadd.f32 %v6414_v10, %v6413_v40  ;;  %v8967_v8 = vadd.f32 %v6412_v56, %v2105_v36 }
 0x286   : > { %v6304_v28 = vpop.f32.mrb[108].mxu0  ;;  %v8969_v45 = vadd.f32 %v6415_v0, %v2108_v48 }
 0x287   : > { %v6305_v18 = vpop.f32.mrb[109].mxu0 }
 0x288   : > { %v6416_v13 = vpop.f32.mrb[108].mxu1  ;;  %v6306_v6 = vadd.f32 %v6305_v18, %v6304_v28  ;;  %v6307_v17 = vpop.f32.mrb[110].mxu0 }
 0x289   : > { %v6417_v23 = vpop.f32.mrb[109].mxu1  ;;  %v6308_v38 = vpop.f32.mrb[111].mxu0 }
 0x28a   : > { %v2113_v58 = vadd.f32 %v6306_v6, %v8861_v16  ;;  %v6418_v26 = vadd.f32 %v6417_v23, %v6416_v13  ;;  %v6419_v20 = vpop.f32.mrb[110].mxu1  ;;  %v6309_v33 = vadd.f32 %v6308_v38, %v6307_v17 }
 0x28b   : > { %v6420_v2 = vpop.f32.mrb[111].mxu1 }
 0x28c   : > { %v2116_v9 = vadd.f32 %v6309_v33, %v8863_v57  ;;  %v6421_v7 = vadd.f32 %v6420_v2, %v6419_v20  ;;  %v8973_v4 = vadd.f32 %v6418_v26, %v2113_v58 }
 0x28e   : > { %v6310_v37 = vpop.f32.mrb[112].mxu0  ;;  %v8975_v41 = vadd.f32 %v6421_v7, %v2116_v9 }
 0x28f   : > { %v6311_v14 = vpop.f32.mrb[113].mxu0 }
 0x290   : > { %v6422_v52 = vpop.f32.mrb[112].mxu1  ;;  %v6312_v36 = vadd.f32 %v6311_v14, %v6310_v37  ;;  %v6313_v56 = vpop.f32.mrb[114].mxu0 }
 0x291   : > { %v6423_v40 = vpop.f32.mrb[113].mxu1  ;;  %v6314_v19 = vpop.f32.mrb[115].mxu0 }
 0x292   : > { %v2121_v16 = vadd.f32 %v6312_v36, %v8869_v59  ;;  %v6424_v10 = vadd.f32 %v6423_v40, %v6422_v52  ;;  %v6425_v48 = vpop.f32.mrb[114].mxu1  ;;  %v6315_v0 = vadd.f32 %v6314_v19, %v6313_v56 }
 0x293   : > { %v6426_v28 = vpop.f32.mrb[115].mxu1 }
 0x294   : > { %v2124_v57 = vadd.f32 %v6315_v0, %v8871_v50  ;;  %v6427_v18 = vadd.f32 %v6426_v28, %v6425_v48  ;;  %v8979_v13 = vadd.f32 %v6424_v10, %v2121_v16 }
 0x296   : > { %v6316_v6 = vpop.f32.mrb[116].mxu0  ;;  %v8981_v17 = vadd.f32 %v6427_v18, %v2124_v57 }
 0x297   : > { %v6317_v23 = vpop.f32.mrb[117].mxu0 }
 0x298   : > { %v6428_v38 = vpop.f32.mrb[116].mxu1  ;;  %v6318_v58 = vadd.f32 %v6317_v23, %v6316_v6  ;;  %v6319_v26 = vpop.f32.mrb[118].mxu0 }
 0x299   : > { %v6429_v20 = vpop.f32.mrb[117].mxu1  ;;  %v6320_v33 = vpop.f32.mrb[119].mxu0 }
 0x29a   : > { %v2129_v59 = vadd.f32 %v6318_v58, %v8876_v47  ;;  %v6430_v2 = vadd.f32 %v6429_v20, %v6428_v38  ;;  %v6431_v9 = vpop.f32.mrb[118].mxu1  ;;  %v6321_v7 = vadd.f32 %v6320_v33, %v6319_v26 }
 0x29b   : > { %v6432_v37 = vpop.f32.mrb[119].mxu1 }
 0x29c   : > { %v2132_v50 = vadd.f32 %v6321_v7, %v8879_v31  ;;  %v6433_v14 = vadd.f32 %v6432_v37, %v6431_v9  ;;  %v8985_v52 = vadd.f32 %v6430_v2, %v2129_v59 }
 0x29e   : > { %v6322_v36 = vpop.f32.mrb[120].mxu0  ;;  %v8987_v56 = vadd.f32 %v6433_v14, %v2132_v50 }
 0x29f   : > { %v6323_v40 = vpop.f32.mrb[121].mxu0 }
 0x2a0   : > { %v6434_v19 = vpop.f32.mrb[120].mxu1  ;;  %v6324_v16 = vadd.f32 %v6323_v40, %v6322_v36  ;;  %v6325_v10 = vpop.f32.mrb[122].mxu0 }
 0x2a1   : > { %v6435_v48 = vpop.f32.mrb[121].mxu1  ;;  %v6326_v0 = vpop.f32.mrb[123].mxu0 }
 0x2a2   : > { %v2137_v47 = vadd.f32 %v6324_v16, %v8884_v51  ;;  %v6436_v28 = vadd.f32 %v6435_v48, %v6434_v19  ;;  %v6437_v57 = vpop.f32.mrb[122].mxu1  ;;  %v6327_v18 = vadd.f32 %v6326_v0, %v6325_v10 }
 0x2a3   : > { %v6438_v6 = vpop.f32.mrb[123].mxu1 }
 0x2a4   : > { %v2140_v31 = vadd.f32 %v6327_v18, %v8887_v55  ;;  %v6439_v23 = vadd.f32 %v6438_v6, %v6437_v57  ;;  %v8991_v38 = vadd.f32 %v6436_v28, %v2137_v47 }
 0x2a6   : > { %v6328_v58 = vpop.f32.mrb[124].mxu0  ;;  %v8993_v26 = vadd.f32 %v6439_v23, %v2140_v31 }
 0x2a7   : > { %v6329_v20 = vpop.f32.mrb[125].mxu0 }
 0x2a8   : > { %v6440_v33 = vpop.f32.mrb[124].mxu1  ;;  %v6330_v59 = vadd.f32 %v6329_v20, %v6328_v58  ;;  %v6331_v2 = vpop.f32.mrb[126].mxu0 }
 0x2a9   : > { %v6441_v9 = vpop.f32.mrb[125].mxu1  ;;  %v6332_v7 = vpop.f32.mrb[127].mxu0 }
 0x2aa   : > { %v2145_v51 = vadd.f32 %v6330_v59, %v8892_v61  ;;  %v6442_v37 = vadd.f32 %v6441_v9, %v6440_v33  ;;  %v6443_v50 = vpop.f32.mrb[126].mxu1  ;;  %v6333_v14 = vadd.f32 %v6332_v7, %v6331_v2  ;;  %v7425_v59 = vld [vmem:[#allocation11 + $0x100] sm:$0xff]  }
 0x2ab   : > { %v6444_v36 = vpop.f32.mrb[127].mxu1 }
 0x2ac   : > { %v2148_v55 = vadd.f32 %v6333_v14, %v8895_v53  ;;  %v6445_v40 = vadd.f32 %v6444_v36, %v6443_v50  ;;  %v8997_v19 = vadd.f32 %v6442_v37, %v2145_v51 }
 0x2ae   : > { %v7019_v16 = vpop.f32.mrb[128].mxu0  ;;  %v8999_v10 = vadd.f32 %v6445_v40, %v2148_v55  ;;  %v7428_v40 = vld [vmem:[#allocation11 + $0x150] sm:$0xff]  }
 0x2af   : > { %v9002_v48 = vadd.f32 %v7019_v16, %v8906_v27  ;;  %v2346_v0 = vpop.f32.mrb[129].mxu0  ;;  %v7429_v16 = vld [vmem:[#allocation11 + $0x110] sm:$0xff]  }
 0x2b0   : > { %v7035_v47 = vpop.f32.mrb[128].mxu1  ;;  %v9005_v28 = vadd.f32 %v2346_v0, %v8900_v5  ;;  %v7020_v61 = vpop.f32.mrb[130].mxu0  ;;  %v7430_v0 = vld [vmem:[#allocation11 + $0x1c0] sm:$0xff]  }
 0x2b1   : > { %v9008_v57 = vadd.f32 %v7035_v47, %v8961_v11  ;;  %v2410_v18 = vpop.f32.mrb[129].mxu1  ;;  %v9011_v53 = vadd.f32 %v7020_v61, %v8908_v60  ;;  %v2349_v6 = vpop.f32.mrb[131].mxu0  ;;  %v7424_v11 = vld [vmem:[#allocation11 + $0x140] sm:$0xff]   ;;  %v7432_v61 = vld [vmem:[#allocation11 + $0x158] sm:$0xff]   ;;  %6830 = vmatprep.subr.bf16.mxu1 %v7430_v0 }
 0x2b2   : > { %v9014_v31 = vadd.f32 %v2410_v18, %v8955_v35  ;;  %v7036_v23 = vpop.f32.mrb[130].mxu1  ;;  %v9017_v27 = vadd.f32 %v2349_v6, %v8902_v46  ;;  %6718 = vmatprep.subr.bf16.mxu0 %v7424_v11  ;;  %v7426_v35 = vld [vmem:[#allocation11 + $0x148] sm:$0xff]  }
 0x2b3   : > { %v9020_v58 = vadd.f32 %v7036_v23, %v8963_v1  ;;  %v2413_v5 = vpop.f32.mrb[131].mxu1  ;;  %6719 = vmatpush3.bf16.msra.mxu0 %v7425_v59  ;;  %v7427_v1 = vld [vmem:[#allocation11 + $0x108] sm:$0xff]  }
 0x2b4   : > { %v9023_v20 = vadd.f32 %v2413_v5, %v8957_v39  ;;  %6720 = vmatprep.subr.bf16.mxu0 %v7426_v35  ;;  %v7436_v35 = vld [vmem:[#allocation11 + $0x160] sm:$0xff]  }
 0x2b6   : > { %v7023_v33 = vpop.f32.mrb[132].mxu0 }
 0x2b7   : > { %v9026_v60 = vadd.f32 %v7023_v33, %v8918_v34  ;;  %v2362_v2 = vpop.f32.mrb[133].mxu0  ;;  %6721 = vmatpush3.bf16.msra.mxu0 %v7427_v1  ;;  %v7440_v1 = vld [vmem:[#allocation11 + $0x168] sm:$0xff]  }
 0x2b8   : > { %v7039_v9 = vpop.f32.mrb[132].mxu1  ;;  %v9029_v46 = vadd.f32 %v2362_v2, %v8912_v21  ;;  %v7024_v7 = vpop.f32.mrb[134].mxu0  ;;  %6722 = vmatprep.subr.bf16.mxu0 %v7428_v40 }
 0x2b9   : > { %v9032_v51 = vadd.f32 %v7039_v9, %v8973_v4  ;;  %v2426_v39 = vpop.f32.mrb[133].mxu1  ;;  %v9035_v37 = vadd.f32 %v7024_v7, %v8920_v25  ;;  %v2365_v50 = vpop.f32.mrb[135].mxu0  ;;  %v7437_v9 = vld [vmem:[#allocation11 + $0x120] sm:$0xff]  }
 0x2ba   : > { %v9038_v34 = vadd.f32 %v2426_v39, %v8967_v8  ;;  %v7040_v14 = vpop.f32.mrb[134].mxu1  ;;  %v9041_v36 = vadd.f32 %v2365_v50, %v8914_v24  ;;  %v7441_v50 = vld [vmem:[#allocation11 + $0x128] sm:$0xff]  }
 0x2bb   : > { %v9044_v21 = vadd.f32 %v7040_v14, %v8975_v41  ;;  %v2429_v55 = vpop.f32.mrb[135].mxu1  ;;  %6723 = vmatpush3.bf16.msra.mxu0 %v7429_v16 }
 0x2bc   : > { %v9047_v4 = vadd.f32 %v2429_v55, %v8969_v45  ;;  %v7433_v45 = vld [vmem:[#allocation11 + $0x118] sm:$0xff]   ;;  %6724 = vmatprep.subr.bf16.mxu0 %v7432_v61  ;;  %v7445_v61 = vld [vmem:[#allocation11 + $0x130] sm:$0xff]  }
 0x2be   : > { %v7027_v25 = vpop.f32.mrb[136].mxu0 }
 0x2bf   : > { %v9050_v47 = vadd.f32 %v7027_v25, %v8937_v12  ;;  %v2378_v8 = vpop.f32.mrb[137].mxu0  ;;  %6725 = vmatpush3.bf16.msra.mxu0 %v7433_v45  ;;  %v2491_v45 = vmax.f32 %v9008_v57, 0.0 }
 0x2c0   : > { %v7043_v24 = vpop.f32.mrb[136].mxu1  ;;  %v9053_v18 = vadd.f32 %v2378_v8, %v8931_v42  ;;  %v7028_v41 = vpop.f32.mrb[138].mxu0  ;;  %6726 = vmatprep.subr.bf16.mxu0 %v7436_v35 }
 0x2c1   : > { %v9056_v6 = vadd.f32 %v7043_v24, %v8985_v52  ;;  %v2442_v23 = vpop.f32.mrb[137].mxu1  ;;  %v9059_v5 = vadd.f32 %v7028_v41, %v8939_v62  ;;  %v2381_v12 = vpop.f32.mrb[139].mxu0  ;;  %v2475_v24 = vmax.f32 %v9002_v48, 0.0  ;;  %v9100_v41 = vld [vmem:[#allocation9] ss:$0 sm:$0xff] }
 0x2c2   : > { %v9062_v11 = vadd.f32 %v2442_v23, %v8979_v13  ;;  %v7044_v33 = vpop.f32.mrb[138].mxu1  ;;  %v9065_v42 = vadd.f32 %v2381_v12, %v8933_v43  ;;  %v2474_v23 = vmax.f32 %v9017_v27, 0.0 }
 0x2c3   : > { %v9068_v59 = vadd.f32 %v7044_v33, %v8987_v56  ;;  %v2445_v2 = vpop.f32.mrb[139].mxu1  ;;  %6727 = vmatpush3.bf16.msra.mxu0 %v7437_v9  ;;  %v7449_v33 = vld [vmem:[#allocation11 + $0x138] sm:$0xff]  }
 0x2c4   : > { %v9071_v52 = vadd.f32 %v2445_v2, %v8981_v17  ;;  %6728 = vmatprep.subr.bf16.mxu0 %v7440_v1  ;;  %v2479_v2 = vmax.f32 %v9026_v60, 0.0 }
 0x2c6   : > { %v7031_v62 = vpop.f32.mrb[140].mxu0 }
 0x2c7   : > { %v9074_v7 = vadd.f32 %v7031_v62, %v8949_v32  ;;  %v2394_v13 = vpop.f32.mrb[141].mxu0  ;;  %6729 = vmatpush3.bf16.msra.mxu0 %v7441_v50 }
 0x2c8   : > { %v7047_v39 = vpop.f32.mrb[140].mxu1  ;;  %v9077_v43 = vadd.f32 %v2394_v13, %v8943_v44  ;;  %v7032_v56 = vpop.f32.mrb[142].mxu0  ;;  %v2477_v13 = vmax.f32 %v9029_v46, 0.0  ;;  %v2483_v46 = vmax.f32 %v9050_v47, 0.0 }
 0x2c9   : > { %v9080_v17 = vadd.f32 %v7047_v39, %v8997_v19  ;;  %v2458_v14 = vpop.f32.mrb[141].mxu1  ;;  %v9083_v55 = vadd.f32 %v7032_v56, %v8951_v15  ;;  %v2397_v40 = vpop.f32.mrb[143].mxu0  ;;  %v3244_v19 = vrot.slane %v7712_v29, 1  ;;  %v7444_v15 = vld [vmem:[#allocation11 + $0x170] sm:$0xff]   ;;  %v2478_v56 = vmax.f32 %v9041_v36, 0.0 }
 0x2ca   : > { %v9086_v32 = vadd.f32 %v2458_v14, %v8991_v38  ;;  %v7048_v25 = vpop.f32.mrb[142].mxu1  ;;  %v9089_v16 = vadd.f32 %v2397_v40, %v8945_v30  ;;  %v2473_v38 = vmax.f32 %v9005_v28, 0.0  ;;  %6730 = vmatprep.subr.bf16.mxu0 %v7444_v15  ;;  %v2484_v15 = vmax.f32 %v9059_v5, 0.0 }
 0x2cb   : > { %v9092_v44 = vadd.f32 %v7048_v25, %v8999_v10  ;;  %v2461_v0 = vpop.f32.mrb[143].mxu1  ;;  %v9102_v30 = vpack.c.bf16 %v3244_v19, %v3244_v19  ;;  %v7448_v10 = vld [vmem:[#allocation11 + $0x178] sm:$0xff]   ;;  %6731 = vmatpush3.bf16.msra.mxu0 %v7445_v61  ;;  %v2482_v61 = vmax.f32 %v9065_v42, 0.0 }
 0x2cc   : > { %v9096_v8 = vadd.f32 %v2461_v0, %v8993_v26  ;;  %v2476_v26 = vmax.f32 %v9011_v53, 0.0  ;;  %6732 = vmatprep.subr.bf16.mxu0 %v7448_v10  ;;  %v2480_v53 = vmax.f32 %v9035_v37, 0.0  ;;  %v2481_v37 = vmax.f32 %v9053_v18, 0.0 }
 0x2cd   : > { %10068 = vst [vmem:[#allocation19_spill] sm:$0xff] %v9102_v30 }
 0x2cf   : > { %6733 = vmatpush3.bf16.msra.mxu0 %v7449_v33 }
 0x2d0   : > { %v7067_v12 = vpop.f32.mrb[144].mxu1 }
 0x2d1   : > { %v2861_v35 = vadd.f32 %v7067_v12, %v2475_v24  ;;  %v2732_v62 = vpop.f32.mrb[145].mxu1 }
 0x2d2   : > { %v2859_v1 = vadd.f32 %v2732_v62, %v2473_v38  ;;  %v7068_v27 = vpop.f32.mrb[146].mxu1 }
 0x2d3   : > { %v2900_v50 = vadd.f32 %v9100_v41, %v2861_v35  ;;  %v2862_v14 = vadd.f32 %v7068_v27, %v2476_v26  ;;  %v2735_v40 = vpop.f32.mrb[147].mxu1 }
 0x2d4   : > { %v2898_v0 = vadd.f32 %v9100_v41, %v2859_v1  ;;  %v2860_v19 = vadd.f32 %v2735_v40, %v2474_v23 }
 0x2d5   : > { %v2901_v36 = vadd.f32 %v9100_v41, %v2862_v14  ;;  %v3006_v24 = vrot.slane %v2900_v50, 7  ;;  %v3246_v38 = vrot.slane %v2900_v50, 1 }
 0x2d6   : > { %v2899_v10 = vadd.f32 %v9100_v41, %v2860_v19  ;;  %v3005_v26 = vrot.slane %v2898_v0, 7  ;;  %v3245_v23 = vrot.slane %v2898_v0, 1 }
 0x2d7   : > { %v3024_v12 = vrot.slane %v2901_v36, 7  ;;  %v3264_v35 = vrot.slane %v2901_v36, 1  ;;  %v9126_v62 = vpack.c.bf16 %v2901_v36, %v2900_v50 }
 0x2d8   : > { %v3023_v33 = vrot.slane %v2899_v10, 7  ;;  %v3263_v1 = vrot.slane %v2899_v10, 1  ;;  %v7071_v27 = vpop.f32.mrb[148].mxu1  ;;  %v9128_v40 = vpack.c.bf16 %v2899_v10, %v2898_v0 }
 0x2d9   : > { %v2865_v63 = vadd.f32 %v7071_v27, %v2479_v2  ;;  %v2748_v25 = vpop.f32.mrb[149].mxu1  ;;  %v3042_v14 = vsel %vm537_vm0, %v3006_v24, %v3024_v12  ;;  %v3060_v60 = vsel %vm537_vm0, %v3024_v12, %v3006_v24  ;;  %v3282_v19 = vsel %vm790_vm3, %v3246_v38, %v3264_v35 }
 0x2da   : > { %v2863_v39 = vadd.f32 %v2748_v25, %v2477_v13  ;;  %v7072_v50 = vpop.f32.mrb[150].mxu1  ;;  %4185 = vmatprep.mubr.bf16.mxu0 %v9128_v40  ;;  %v3041_v36 = vsel %vm537_vm0, %v3005_v26, %v3023_v33  ;;  %v3059_v2 = vsel %vm537_vm0, %v3023_v33, %v3005_v26  ;;  %v9141_v0 = vpack.c.bf16 %v3042_v14, %v3060_v60  ;;  %v7431_v13 = vld [vmem:[#allocation11 + $0x180] sm:$0xff]   ;;  %v7434_v60 = vld [vmem:[#allocation11 + $0x1c8] sm:$0xff]  }
 0x2db   : > { %v2904_v10 = vadd.f32 %v9100_v41, %v2865_v63  ;;  %v2866_v27 = vadd.f32 %v7072_v50, %v2480_v53  ;;  %v2751_v9 = vpop.f32.mrb[151].mxu1  ;;  %v5714_v24 = vpack.c.bf16 %v3041_v36, %v3059_v2  ;;  %v3281_v12 = vsel %vm790_vm3, %v3245_v23, %v3263_v1  ;;  %v7435_v50 = vld [vmem:[#allocation11 + $0x188] sm:$0xff]  }
 0x2dc   : > { %v2902_v25 = vadd.f32 %v9100_v41, %v2863_v39  ;;  %v2864_v28 = vadd.f32 %v2751_v9, %v2478_v56  ;;  %v3299_v48 = vsel %vm790_vm3, %v3263_v1, %v3245_v23  ;;  %v3300_v26 = vsel %vm790_vm3, %v3264_v35, %v3246_v38 }
 0x2dd   : > { %v2487_v33 = vmax.f32 %v9074_v7, 0.0  ;;  %v2485_v63 = vmax.f32 %v9077_v43, 0.0  ;;  %v2905_v53 = vadd.f32 %v9100_v41, %v2866_v27  ;;  %5715 = vmatmul.mubr.msk.bf16.gmra.mrb[148].mxu0 %vm8005_vm5, %v5714_v24  ;;  %5760 = vmatprep.mubr.msk.bf16.mxu1 %vm8005_vm5, %v5714_v24  ;;  %v9158_v9 = vpack.c.bf16 %v3299_v48, %v3281_v12  ;;  %v7447_v43 = vld [vmem:[#allocation11 + $0x1a0] sm:$0xff]  }
 0x2de   : > { %v3008_v39 = vrot.slane %v2904_v10, 7  ;;  %v3248_v56 = vrot.slane %v2904_v10, 1  ;;  %v2903_v23 = vadd.f32 %v9100_v41, %v2864_v28  ;;  %4193 = vmatprep.mubr.bf16.mxu0 %v9126_v62  ;;  %5763 = vmatmul.mubr.msk.bf16.vlgmr.msra.gmra.mrb[176].mxu1 %vm8028_vm6, %v9102_v30  ;;  %v9165_v38 = vpack.c.bf16 %v3300_v26, %v3282_v19  ;;  %v7438_v19 = vld [vmem:[#allocation11 + $0x1d0] sm:$0xff]  }
 0x2df   : > { %v3007_v35 = vrot.slane %v2902_v25, 7  ;;  %v3026_v1 = vrot.slane %v2905_v53, 7  ;;  %v3266_v14 = vrot.slane %v2905_v53, 1  ;;  %5766 = vmatprep.mubr.msk.bf16.mxu1 %vm8005_vm5, %v9141_v0  ;;  %v9170_v48 = vpack.c.bf16 %v2905_v53, %v2904_v10  ;;  %6831 = vmatpush3.bf16.msra.mxu1 %v7431_v13 }
 0x2e0   : > { %v3247_v28 = vrot.slane %v2902_v25, 1  ;;  %v3025_v36 = vrot.slane %v2903_v23, 7  ;;  %v3265_v2 = vrot.slane %v2903_v23, 1  ;;  %v7075_v27 = vpop.f32.mrb[152].mxu1  ;;  %v9172_v24 = vpack.c.bf16 %v2903_v23, %v2902_v25  ;;  %6832 = vmatprep.subr.bf16.mxu1 %v7434_v60 }
 0x2e1   : > { %v2869_v12 = vadd.f32 %v7075_v27, %v2483_v46  ;;  %v2764_v26 = vpop.f32.mrb[153].mxu1  ;;  %v3044_v29 = vsel %vm537_vm0, %v3008_v39, %v3026_v1  ;;  %v3062_v10 = vsel %vm537_vm0, %v3026_v1, %v3008_v39  ;;  %v3284_v13 = vsel %vm790_vm3, %v3248_v56, %v3266_v14 }
 0x2e2   : > { %v2867_v53 = vadd.f32 %v2764_v26, %v2481_v37  ;;  %v7076_v25 = vpop.f32.mrb[154].mxu1  ;;  %v3043_v60 = vsel %vm537_vm0, %v3007_v35, %v3025_v36  ;;  %v3061_v47 = vsel %vm537_vm0, %v3025_v36, %v3007_v35  ;;  %v9188_v46 = vpack.c.bf16 %v3044_v29, %v3062_v10  ;;  %v7439_v37 = vld [vmem:[#allocation11 + $0x190] sm:$0xff]  }
 0x2e3   : > { %v2908_v23 = vadd.f32 %v9100_v41, %v2869_v12  ;;  %v2870_v39 = vadd.f32 %v7076_v25, %v2484_v15  ;;  %v2767_v1 = vpop.f32.mrb[155].mxu1  ;;  %v9193_v27 = vpack.c.bf16 %v3043_v60, %v3061_v47  ;;  %v3283_v18 = vsel %vm790_vm3, %v3247_v28, %v3265_v2  ;;  %6833 = vmatpush3.bf16.msra.mxu1 %v7435_v50  ;;  %v7442_v15 = vld [vmem:[#allocation11 + $0x1d8] sm:$0xff]  }
 0x2e4   : > { %v2906_v26 = vadd.f32 %v9100_v41, %v2867_v53  ;;  %v2868_v35 = vadd.f32 %v2767_v1, %v2482_v61  ;;  %v3301_v29 = vsel %vm790_vm3, %v3265_v2, %v3247_v28  ;;  %v3302_v5 = vsel %vm790_vm3, %v3266_v14, %v3248_v56  ;;  %6834 = vmatprep.subr.bf16.mxu1 %v7438_v19  ;;  %v7443_v19 = vld [vmem:[#allocation11 + $0x198] sm:$0xff]  }
 0x2e5   : > { %v2488_v36 = vmax.f32 %v9083_v55, 0.0  ;;  %v2486_v12 = vmax.f32 %v9089_v16, 0.0  ;;  %v2909_v50 = vadd.f32 %v9100_v41, %v2870_v39  ;;  %5718 = vmatmul.mubr.msk.bf16.gmra.mrb[152].mxu0 %vm8005_vm5, %v9141_v0  ;;  %v9210_v42 = vpack.c.bf16 %v3301_v29, %v3283_v18 }
 0x2e6   : > { %v3010_v61 = vrot.slane %v2908_v23, 7  ;;  %v3250_v10 = vrot.slane %v2908_v23, 1  ;;  %v2907_v28 = vadd.f32 %v9100_v41, %v2868_v35  ;;  %4201 = vmatprep.mubr.bf16.mxu0 %v9172_v24  ;;  %5769 = vmatmul.mubr.msk.bf16.gmra.mrb[180].mxu1 %vm8028_vm6, %v9158_v9  ;;  %v9217_v55 = vpack.c.bf16 %v3302_v5, %v3284_v13  ;;  %v7446_v13 = vld [vmem:[#allocation11 + $0x1e0] sm:$0xff]  }
 0x2e7   : > { %v3009_v16 = vrot.slane %v2906_v26, 7  ;;  %v3028_v56 = vrot.slane %v2909_v50, 7  ;;  %v3268_v14 = vrot.slane %v2909_v50, 1  ;;  %5772 = vmatprep.mubr.msk.bf16.mxu1 %vm8005_vm5, %v9193_v27  ;;  %v9222_v2 = vpack.c.bf16 %v2909_v50, %v2908_v23  ;;  %6835 = vmatpush3.bf16.msra.mxu1 %v7439_v37 }
 0x2e8   : > { %v3249_v53 = vrot.slane %v2906_v26, 1  ;;  %v3027_v25 = vrot.slane %v2907_v28, 7  ;;  %v3267_v60 = vrot.slane %v2907_v28, 1  ;;  %v7079_v47 = vpop.f32.mrb[156].mxu1  ;;  %v9224_v39 = vpack.c.bf16 %v2907_v28, %v2906_v26  ;;  %6836 = vmatprep.subr.bf16.mxu1 %v7442_v15 }
 0x2e9   : > { %10069 = vst [vmem:[#allocation21_spill] sm:$0xff] %v9222_v2  ;;  %v2873_v1 = vadd.f32 %v7079_v47, %v2487_v33  ;;  %v2780_v18 = vpop.f32.mrb[157].mxu1  ;;  %v3046_v35 = vsel %vm537_vm0, %v3010_v61, %v3028_v56  ;;  %v3064_v23 = vsel %vm537_vm0, %v3028_v56, %v3010_v61  ;;  %v3286_v37 = vsel %vm790_vm3, %v3250_v10, %v3268_v14 }
 0x2ea   : > { %v2871_v29 = vadd.f32 %v2780_v18, %v2485_v63  ;;  %v7080_v26 = vpop.f32.mrb[158].mxu1  ;;  %v3045_v5 = vsel %vm537_vm0, %v3009_v16, %v3027_v25  ;;  %v3063_v7 = vsel %vm537_vm0, %v3027_v25, %v3009_v16  ;;  %v9240_v33 = vpack.c.bf16 %v3046_v35, %v3064_v23  ;;  %v7450_v25 = vld [vmem:[#allocation11 + $0x1e8] sm:$0xff]  }
 0x2eb   : > { %v2912_v15 = vadd.f32 %v9100_v41, %v2873_v1  ;;  %v2874_v50 = vadd.f32 %v7080_v26, %v2488_v36  ;;  %v2783_v28 = vpop.f32.mrb[159].mxu1  ;;  %v9243_v61 = vpack.c.bf16 %v3045_v5, %v3063_v7  ;;  %v3285_v56 = vsel %vm790_vm3, %v3249_v53, %v3267_v60  ;;  %6837 = vmatpush3.bf16.msra.mxu1 %v7443_v19  ;;  %v7451_v26 = vld [vmem:[#allocation11 + $0x1a8] sm:$0xff]  }
 0x2ec   : > { %v2910_v63 = vadd.f32 %v9100_v41, %v2871_v29  ;;  %v2872_v47 = vadd.f32 %v2783_v28, %v2486_v12  ;;  %v3303_v18 = vsel %vm790_vm3, %v3267_v60, %v3249_v53  ;;  %v3304_v16 = vsel %vm790_vm3, %v3268_v14, %v3250_v10  ;;  %6838 = vmatprep.subr.bf16.mxu1 %v7446_v13 }
 0x2ed   : > { %v2913_v35 = vadd.f32 %v9100_v41, %v2874_v50  ;;  %5721 = vmatmul.mubr.msk.bf16.gmra.mrb[156].mxu0 %vm8005_vm5, %v9193_v27  ;;  %v9258_v19 = vpack.c.bf16 %v3303_v18, %v3285_v56  ;;  %v3012_v12 = vrot.slane %v2912_v15, 7  ;;  %v3252_v23 = vrot.slane %v2912_v15, 1 }
 0x2ee   : > { %v2911_v53 = vadd.f32 %v9100_v41, %v2872_v47  ;;  %4209 = vmatprep.mubr.bf16.mxu0 %v9170_v48  ;;  %5775 = vmatmul.mubr.msk.bf16.gmra.mrb[184].mxu1 %vm8028_vm6, %v9165_v38  ;;  %v9265_v10 = vpack.c.bf16 %v3304_v16, %v3286_v37  ;;  %v3011_v14 = vrot.slane %v2910_v63, 7  ;;  %v3251_v5 = vrot.slane %v2910_v63, 1  ;;  %v7452_v37 = vld [vmem:[#allocation11 + $0x1f0] sm:$0xff]  }
 0x2ef   : > { %v3030_v60 = vrot.slane %v2913_v35, 7  ;;  %v3270_v13 = vrot.slane %v2913_v35, 1  ;;  %5778 = vmatprep.mubr.msk.bf16.mxu1 %vm8005_vm5, %v9188_v46  ;;  %v9270_v29 = vpack.c.bf16 %v2913_v35, %v2912_v15  ;;  %6839 = vmatpush3.bf16.msra.mxu1 %v7447_v43  ;;  %v10071_v35 = vmax.f32 %v9014_v31, 0.0 }
 0x2f0   : > { %v3029_v7 = vrot.slane %v2911_v53, 7  ;;  %v3269_v50 = vrot.slane %v2911_v53, 1  ;;  %v7083_v28 = vpop.f32.mrb[160].mxu1  ;;  %v9272_v56 = vpack.c.bf16 %v2911_v53, %v2910_v63  ;;  %6840 = vmatprep.subr.bf16.mxu1 %v7450_v25  ;;  %v10073_v30 = vmax.f32 %v9023_v20, 0.0 }
 0x2f1   : > { %v2877_v47 = vadd.f32 %v7083_v28, %v2491_v45  ;;  %v2796_v18 = vpop.f32.mrb[161].mxu1  ;;  %v3048_v16 = vsel %vm537_vm0, %v3012_v12, %v3030_v60  ;;  %v3066_v15 = vsel %vm537_vm0, %v3030_v60, %v3012_v12  ;;  %v3288_v43 = vsel %vm790_vm3, %v3252_v23, %v3270_v13 }
 0x2f2   : > { %10070 = vst [vmem:[#allocation22_spill] sm:$0xff] %v9272_v56  ;;  %v2875_v1 = vadd.f32 %v2796_v18, %v10071_v35  ;;  %v7084_v63 = vpop.f32.mrb[162].mxu1  ;;  %v3047_v25 = vsel %vm537_vm0, %v3011_v14, %v3029_v7  ;;  %v3065_v57 = vsel %vm537_vm0, %v3029_v7, %v3011_v14  ;;  %v9288_v45 = vpack.c.bf16 %v3048_v16, %v3066_v15  ;;  %v7453_v18 = vld [vmem:[#allocation11 + $0x1b0] sm:$0xff]  }
 0x2f3   : > { %v2916_v53 = vadd.f32 %v9100_v41, %v2877_v47  ;;  %v10072_v28 = vmax.f32 %v9020_v58, 0.0  ;;  %v2799_v60 = vpop.f32.mrb[163].mxu1  ;;  %v9293_v36 = vpack.c.bf16 %v3047_v25, %v3065_v57  ;;  %v3287_v31 = vsel %vm790_vm3, %v3251_v5, %v3269_v50  ;;  %6841 = vmatpush3.bf16.msra.mxu1 %v7451_v26  ;;  %v7454_v47 = vld [vmem:[#allocation11 + $0x1f8] sm:$0xff]  }
 0x2f4   : > { %v2914_v35 = vadd.f32 %v9100_v41, %v2875_v1  ;;  %v2876_v14 = vadd.f32 %v2799_v60, %v10073_v30  ;;  %v3305_v7 = vsel %vm790_vm3, %v3269_v50, %v3251_v5  ;;  %v3306_v58 = vsel %vm790_vm3, %v3270_v13, %v3252_v23  ;;  %6842 = vmatprep.subr.bf16.mxu1 %v7452_v37  ;;  %v7455_v25 = vld [vmem:[#allocation11 + $0x1b8] sm:$0xff]  }
 0x2f5   : > { %v2878_v12 = vadd.f32 %v7084_v63, %v10072_v28  ;;  %5724 = vmatmul.mubr.msk.bf16.gmra.mrb[160].mxu0 %vm8005_vm5, %v9188_v46  ;;  %v9310_v20 = vpack.c.bf16 %v3305_v7, %v3287_v31  ;;  %v3014_v30 = vrot.slane %v2916_v53, 7  ;;  %v3254_v1 = vrot.slane %v2916_v53, 1 }
 0x2f6   : > { %v2915_v5 = vadd.f32 %v9100_v41, %v2876_v14  ;;  %4217 = vmatprep.mubr.bf16.mxu0 %v9224_v39  ;;  %5781 = vmatmul.mubr.msk.bf16.gmra.mrb[188].mxu1 %vm8028_vm6, %v9210_v42  ;;  %v9317_v23 = vpack.c.bf16 %v3306_v58, %v3288_v43  ;;  %v3013_v13 = vrot.slane %v2914_v35, 7  ;;  %v3253_v57 = vrot.slane %v2914_v35, 1 }
 0x2f7   : > { %v2917_v26 = vadd.f32 %v9100_v41, %v2878_v12  ;;  %5784 = vmatprep.mubr.msk.bf16.mxu1 %vm8005_vm5, %v9243_v61  ;;  %6843 = vmatpush3.bf16.msra.mxu1 %v7453_v18  ;;  %v10074_v43 = vmax.f32 %v9032_v51, 0.0 }
 0x2f8   : > { %v3031_v28 = vrot.slane %v2915_v5, 7  ;;  %v3271_v12 = vrot.slane %v2915_v5, 1  ;;  %v7087_v60 = vpop.f32.mrb[164].mxu1  ;;  %v9324_v31 = vpack.c.bf16 %v2915_v5, %v2914_v35  ;;  %6844 = vmatprep.subr.bf16.mxu1 %v7454_v47 }
 0x2f9   : > { %v3032_v50 = vrot.slane %v2917_v26, 7  ;;  %v3272_v37 = vrot.slane %v2917_v26, 1  ;;  %v9322_v63 = vpack.c.bf16 %v2917_v26, %v2916_v53  ;;  %v2881_v14 = vadd.f32 %v7087_v60, %v10074_v43  ;;  %v2812_v7 = vpop.f32.mrb[165].mxu1 }
 0x2fa   : > { %v10075_v26 = vmax.f32 %v9038_v34, 0.0  ;;  %v7088_v16 = vpop.f32.mrb[166].mxu1  ;;  %v3049_v35 = vsel %vm537_vm0, %v3013_v13, %v3031_v28  ;;  %v3067_v51 = vsel %vm537_vm0, %v3031_v28, %v3013_v13  ;;  %v10076_v60 = vmax.f32 %v9044_v21, 0.0 }
 0x2fb   : > { %v3050_v58 = vsel %vm537_vm0, %v3014_v30, %v3032_v50  ;;  %v3068_v53 = vsel %vm537_vm0, %v3032_v50, %v3014_v30  ;;  %v3290_v18 = vsel %vm790_vm3, %v3254_v1, %v3272_v37  ;;  %v2920_v5 = vadd.f32 %v9100_v41, %v2881_v14  ;;  %v2815_v50 = vpop.f32.mrb[167].mxu1  ;;  %6845 = vmatpush3.bf16.msra.mxu1 %v7455_v25 }
 0x2fc   : > { %v2879_v15 = vadd.f32 %v2812_v7, %v10075_v26  ;;  %v9340_v47 = vpack.c.bf16 %v3050_v58, %v3068_v53  ;;  %v2882_v30 = vadd.f32 %v7088_v16, %v10076_v60  ;;  %v9345_v43 = vpack.c.bf16 %v3049_v35, %v3067_v51 }
 0x2fd   : > { %v3289_v34 = vsel %vm790_vm3, %v3253_v57, %v3271_v12  ;;  %v10077_v26 = vmax.f32 %v9047_v4, 0.0  ;;  %v3307_v13 = vsel %vm790_vm3, %v3271_v12, %v3253_v57  ;;  %v3308_v28 = vsel %vm790_vm3, %v3272_v37, %v3254_v1  ;;  %5727 = vmatmul.mubr.msk.bf16.gmra.mrb[164].mxu0 %vm8005_vm5, %v9243_v61 }
 0x2fe   : > { %v2918_v7 = vadd.f32 %v9100_v41, %v2879_v15  ;;  %v2503_v21 = vmax.f32 %v9080_v17, 0.0  ;;  %v2921_v14 = vadd.f32 %v9100_v41, %v2882_v30  ;;  %v9362_v15 = vpack.c.bf16 %v3307_v13, %v3289_v34  ;;  %4225 = vmatprep.mubr.bf16.mxu0 %v9222_v2  ;;  %5787 = vmatmul.mubr.msk.bf16.gmra.mrb[192].mxu1 %vm8028_vm6, %v9217_v55 }
 0x2ff   : > { %v2880_v49 = vadd.f32 %v2815_v50, %v10077_v26  ;;  %v3016_v4 = vrot.slane %v2920_v5, 7  ;;  %v3256_v25 = vrot.slane %v2920_v5, 1  ;;  %v9369_v17 = vpack.c.bf16 %v3308_v28, %v3290_v18  ;;  %5790 = vmatprep.mubr.msk.bf16.mxu1 %vm8005_vm5, %v9240_v33 }
 0x300   : > { %v3015_v1 = vrot.slane %v2918_v7, 7  ;;  %v3034_v37 = vrot.slane %v2921_v14, 7  ;;  %v3274_v57 = vrot.slane %v2921_v14, 1  ;;  %v9374_v12 = vpack.c.bf16 %v2921_v14, %v2920_v5  ;;  %v7091_v51 = vpop.f32.mrb[168].mxu1 }
 0x301   : > { %v2919_v58 = vadd.f32 %v9100_v41, %v2880_v49  ;;  %v3255_v53 = vrot.slane %v2918_v7, 1  ;;  %v10078_v30 = vmax.f32 %v9056_v6, 0.0  ;;  %v2828_v18 = vpop.f32.mrb[169].mxu1  ;;  %v10079_v13 = vmax.f32 %v9062_v11, 0.0 }
 0x302   : > { %v3052_v34 = vsel %vm537_vm0, %v3016_v4, %v3034_v37  ;;  %v3070_v26 = vsel %vm537_vm0, %v3034_v37, %v3016_v4  ;;  %v3292_v5 = vsel %vm790_vm3, %v3256_v25, %v3274_v57  ;;  %v7092_v14 = vpop.f32.mrb[170].mxu1 }
 0x303   : > { %v3033_v35 = vrot.slane %v2919_v58, 7  ;;  %v3273_v49 = vrot.slane %v2919_v58, 1  ;;  %v9376_v60 = vpack.c.bf16 %v2919_v58, %v2918_v7  ;;  %v2885_v50 = vadd.f32 %v7091_v51, %v10078_v30  ;;  %v2831_v37 = vpop.f32.mrb[171].mxu1 }
 0x304   : > { %v2883_v28 = vadd.f32 %v2828_v18, %v10079_v13  ;;  %v9392_v58 = vpack.c.bf16 %v3052_v34, %v3070_v26  ;;  %v10080_v30 = vmax.f32 %v9068_v59, 0.0  ;;  %v10081_v13 = vmax.f32 %v9071_v52, 0.0 }
 0x305   : > { %v3051_v7 = vsel %vm537_vm0, %v3015_v1, %v3033_v35  ;;  %v3069_v6 = vsel %vm537_vm0, %v3033_v35, %v3015_v1  ;;  %v2924_v51 = vadd.f32 %v9100_v41, %v2885_v50  ;;  %v3291_v11 = vsel %vm790_vm3, %v3255_v53, %v3273_v49  ;;  %5730 = vmatmul.mubr.msk.bf16.gmra.mrb[168].mxu0 %vm8005_vm5, %v9240_v33 }
 0x306   : > { %v2886_v4 = vadd.f32 %v7092_v14, %v10080_v30  ;;  %v9397_v16 = vpack.c.bf16 %v3051_v7, %v3069_v6  ;;  %v2922_v18 = vadd.f32 %v9100_v41, %v2883_v28  ;;  %v2884_v2 = vadd.f32 %v2831_v37, %v10081_v13  ;;  %4233 = vmatprep.mubr.bf16.mxu0 %v9272_v56 }
 0x307   : > { %v3309_v1 = vsel %vm790_vm3, %v3273_v49, %v3255_v53  ;;  %v3310_v35 = vsel %vm790_vm3, %v3274_v57, %v3256_v25  ;;  %v2504_v59 = vmax.f32 %v9092_v44, 0.0  ;;  %v2502_v50 = vmax.f32 %v9096_v8, 0.0  ;;  %5793 = vmatmul.mubr.msk.bf16.gmra.mrb[196].mxu1 %vm8028_vm6, %v9258_v19 }
 0x308   : > { %v2925_v34 = vadd.f32 %v9100_v41, %v2886_v4  ;;  %v9414_v26 = vpack.c.bf16 %v3309_v1, %v3291_v11  ;;  %v3018_v52 = vrot.slane %v2924_v51, 7  ;;  %v3258_v28 = vrot.slane %v2924_v51, 1  ;;  %5796 = vmatprep.mubr.msk.bf16.mxu1 %vm8005_vm5, %v9293_v36  ;;  %v7095_v6 = vpop.f32.mrb[172].mxu1 }
 0x309   : > { %v2923_v14 = vadd.f32 %v9100_v41, %v2884_v2  ;;  %v9421_v44 = vpack.c.bf16 %v3310_v35, %v3292_v5  ;;  %v3017_v8 = vrot.slane %v2922_v18, 7  ;;  %v3257_v49 = vrot.slane %v2922_v18, 1  ;;  %v2844_v37 = vpop.f32.mrb[173].mxu1 }
 0x30a   : > { %v3036_v25 = vrot.slane %v2925_v34, 7  ;;  %v3276_v57 = vrot.slane %v2925_v34, 1  ;;  %v9426_v53 = vpack.c.bf16 %v2925_v34, %v2924_v51  ;;  %v2889_v4 = vadd.f32 %v7095_v6, %v2503_v21  ;;  %v7096_v35 = vpop.f32.mrb[174].mxu1 }
 0x30b   : > { %v3035_v7 = vrot.slane %v2923_v14, 7  ;;  %v3275_v2 = vrot.slane %v2923_v14, 1  ;;  %v9428_v30 = vpack.c.bf16 %v2923_v14, %v2922_v18  ;;  %v10082_v51 = vmax.f32 %v9086_v32, 0.0  ;;  %v2847_v56 = vpop.f32.mrb[175].mxu1 }
 0x30c   : > { %v3054_v5 = vsel %vm537_vm0, %v3018_v52, %v3036_v25  ;;  %v3072_v11 = vsel %vm537_vm0, %v3036_v25, %v3018_v52  ;;  %v3294_v13 = vsel %vm790_vm3, %v3258_v28, %v3276_v57  ;;  %v2928_v14 = vadd.f32 %v9100_v41, %v2889_v4 }
 0x30d   : > { %v2887_v1 = vadd.f32 %v2844_v37, %v10082_v51  ;;  %v3053_v34 = vsel %vm537_vm0, %v3017_v8, %v3035_v7  ;;  %v3071_v21 = vsel %vm537_vm0, %v3035_v7, %v3017_v8  ;;  %v9442_v18 = vpack.c.bf16 %v3054_v5, %v3072_v11  ;;  %5733 = vmatmul.mubr.msk.bf16.gmra.mrb[172].mxu0 %vm8005_vm5, %v9293_v36 }
 0x30e   : > { %v2890_v6 = vadd.f32 %v7096_v35, %v2504_v59  ;;  %v9445_v52 = vpack.c.bf16 %v3053_v34, %v3071_v21  ;;  %v3293_v25 = vsel %vm790_vm3, %v3257_v49, %v3275_v2  ;;  %v2888_v37 = vadd.f32 %v2847_v56, %v2502_v50  ;;  %4241 = vmatprep.mubr.bf16.mxu0 %v9270_v29 }
 0x30f   : > { %v2926_v32 = vadd.f32 %v9100_v41, %v2887_v1  ;;  %v3311_v51 = vsel %vm790_vm3, %v3275_v2, %v3257_v49  ;;  %v3312_v8 = vsel %vm790_vm3, %v3276_v57, %v3258_v28  ;;  %v3020_v4 = vrot.slane %v2928_v14, 7  ;;  %5799 = vmatmul.mubr.msk.bf16.gmra.mrb[200].mxu1 %vm8028_vm6, %v9265_v10 }
 0x310   : > { %v2929_v7 = vadd.f32 %v9100_v41, %v2890_v6  ;;  %v9458_v59 = vpack.c.bf16 %v3311_v51, %v3293_v25  ;;  %v3260_v5 = vrot.slane %v2928_v14, 1  ;;  %v2927_v11 = vadd.f32 %v9100_v41, %v2888_v37  ;;  %5802 = vmatprep.mubr.msk.bf16.mxu1 %vm8005_vm5, %v9288_v45 }
 0x311   : > { %v9465_v56 = vpack.c.bf16 %v3312_v8, %v3294_v13  ;;  %v3019_v50 = vrot.slane %v2926_v32, 7  ;;  %v3259_v2 = vrot.slane %v2926_v32, 1 }
 0x312   : > { %v3038_v28 = vrot.slane %v2929_v7, 7  ;;  %v3278_v57 = vrot.slane %v2929_v7, 1  ;;  %v9470_v49 = vpack.c.bf16 %v2929_v7, %v2928_v14  ;;  %v3037_v1 = vrot.slane %v2927_v11, 7 }
 0x313   : > { %v3277_v41 = vrot.slane %v2927_v11, 1  ;;  %v9472_v35 = vpack.c.bf16 %v2927_v11, %v2926_v32 }
 0x314   : > { %v3056_v34 = vsel %vm537_vm0, %v3020_v4, %v3038_v28  ;;  %v3074_v13 = vsel %vm537_vm0, %v3038_v28, %v3020_v4  ;;  %v3296_v21 = vsel %vm790_vm3, %v3260_v5, %v3278_v57  ;;  %v3314_v6 = vsel %vm790_vm3, %v3278_v57, %v3260_v5 }
 0x315   : > { %v3055_v14 = vsel %vm537_vm0, %v3019_v50, %v3037_v1  ;;  %v3073_v25 = vsel %vm537_vm0, %v3037_v1, %v3019_v50  ;;  %v9486_v32 = vpack.c.bf16 %v3056_v34, %v3074_v13  ;;  %v3295_v37 = vsel %vm790_vm3, %v3259_v2, %v3277_v41  ;;  %5736 = vmatmul.mubr.msk.bf16.gmra.mrb[176].mxu0 %vm8005_vm5, %v9288_v45  ;;  %v7457_v1 = vld [vmem:[#allocation11 + $0x208] sm:$0xff]  }
 0x316   : > { %v9490_v51 = vpack.c.bf16 %v3055_v14, %v3073_v25  ;;  %v3313_v8 = vsel %vm790_vm3, %v3277_v41, %v3259_v2  ;;  %v9494_v7 = vpack.c.bf16 %v3314_v6, %v3296_v21  ;;  %4249 = vmatprep.mubr.bf16.mxu0 %v9324_v31  ;;  %v7456_v2 = vld [vmem:[#allocation11 + $0x200] sm:$0xff]   ;;  %v7459_v41 = vld [vmem:[#allocation11 + $0x218] sm:$0xff]   ;;  %v7461_v34 = vld [vmem:[#allocation11 + $0x228] sm:$0xff]  }
 0x317   : > { %v9496_v4 = vpack.c.bf16 %v3313_v8, %v3295_v37  ;;  %5805 = vmatmul.mubr.msk.bf16.gmra.mrb[204].mxu1 %vm8028_vm6, %v9310_v20  ;;  %7097 = vmatprep.subr.bf16.mxu0 %v7456_v2 }
 0x318   : > { %5808 = vmatprep.mubr.msk.bf16.mxu1 %vm8005_vm5, %v9345_v43 }
 0x31d   : > { %5739 = vmatmul.mubr.msk.bf16.gmra.mrb[180].mxu0 %vm8005_vm5, %v9345_v43 }
 0x31e   : > { %4257 = vmatprep.mubr.bf16.mxu0 %v9322_v63 }
 0x31f   : > { %5811 = vmatmul.mubr.msk.bf16.gmra.mrb[208].mxu1 %vm8028_vm6, %v9317_v23 }
 0x320   : > { %5814 = vmatprep.mubr.msk.bf16.mxu1 %vm8005_vm5, %v9340_v47 }
 0x322   : > { %v6510_v22 = vpop.f32.mrb[144].mxu0 }
 0x323   : > { %v6511_v5 = vpop.f32.mrb[145].mxu0 }
 0x324   : > { %v9528_v11 = vadd.f32 %v6511_v5, %v6510_v22  ;;  %v6513_v50 = vpop.f32.mrb[146].mxu0 }
 0x325   : > { %5742 = vmatmul.mubr.msk.bf16.gmra.mrb[184].mxu0 %vm8005_vm5, %v9340_v47  ;;  %v6514_v28 = vpop.f32.mrb[147].mxu0 }
 0x326   : > { %4265 = vmatprep.mubr.bf16.mxu0 %v9376_v60  ;;  %v9530_v57 = vadd.f32 %v6514_v28, %v6513_v50 }
 0x327   : > { %5817 = vmatmul.mubr.msk.bf16.gmra.mrb[212].mxu1 %vm8028_vm6, %v9362_v15 }
 0x328   : > { %5820 = vmatprep.mubr.msk.bf16.mxu1 %vm8005_vm5, %v9397_v16 }
 0x32d   : > { %5745 = vmatmul.mubr.msk.bf16.gmra.mrb[188].mxu0 %vm8005_vm5, %v9397_v16 }
 0x32e   : > { %4273 = vmatprep.mubr.bf16.mxu0 %v9374_v12 }
 0x32f   : > { %5823 = vmatmul.mubr.msk.bf16.gmra.mrb[216].mxu1 %vm8028_vm6, %v9369_v17 }
 0x330   : > { %5826 = vmatprep.mubr.msk.bf16.mxu1 %vm8005_vm5, %v9392_v58 }
 0x335   : > { %5748 = vmatmul.mubr.msk.bf16.gmra.mrb[192].mxu0 %vm8005_vm5, %v9392_v58 }
 0x336   : > { %4281 = vmatprep.mubr.bf16.mxu0 %v9428_v30 }
 0x337   : > { %5829 = vmatmul.mubr.msk.bf16.gmra.mrb[220].mxu1 %vm8028_vm6, %v9414_v26 }
 0x338   : > { %5832 = vmatprep.mubr.msk.bf16.mxu1 %vm8005_vm5, %v9445_v52 }
 0x33d   : > { %5751 = vmatmul.mubr.msk.bf16.gmra.mrb[196].mxu0 %vm8005_vm5, %v9445_v52 }
 0x33e   : > { %4289 = vmatprep.mubr.bf16.mxu0 %v9426_v53 }
 0x33f   : > { %5835 = vmatmul.mubr.msk.bf16.gmra.mrb[224].mxu1 %vm8028_vm6, %v9421_v44 }
 0x340   : > { %5838 = vmatprep.mubr.msk.bf16.mxu1 %vm8005_vm5, %v9442_v18 }
 0x345   : > { %5754 = vmatmul.mubr.msk.bf16.gmra.mrb[200].mxu0 %vm8005_vm5, %v9442_v18 }
 0x346   : > { %4297 = vmatprep.mubr.bf16.mxu0 %v9472_v35 }
 0x347   : > { %5841 = vmatmul.mubr.msk.bf16.gmra.mrb[228].mxu1 %vm8028_vm6, %v9458_v59 }
 0x348   : > { %5844 = vmatprep.mubr.msk.bf16.mxu1 %vm8005_vm5, %v9490_v51 }
 0x34d   : > { %5757 = vmatmul.mubr.msk.bf16.gmra.mrb[204].mxu0 %vm8005_vm5, %v9490_v51 }
 0x34e   : > { %5856 = vmatprep.mubr.msk.bf16.mxu0 %vm8028_vm6, %v9158_v9  ;;  %v7458_v9 = vld [vmem:[#allocation11 + $0x210] sm:$0xff]  }
 0x34f   : > { %5847 = vmatmul.mubr.msk.bf16.gmra.mrb[232].mxu1 %vm8028_vm6, %v9465_v56 }
 0x350   : > { %5850 = vmatprep.mubr.msk.bf16.mxu1 %vm8005_vm5, %v9486_v32 }
 0x355   : > { %4500 = vmatmul.mubr.bf16.vlgmr.msra.gmra.mrb[208].mxu0 %v9128_v40  ;;  %v7460_v40 = vld [vmem:[#allocation11 + $0x220] sm:$0xff]  }
 0x356   : > { %5859 = vmatprep.mubr.msk.bf16.mxu0 %vm8028_vm6, %v9165_v38  ;;  %7098 = vmatpush3.bf16.msra.mxu0 %v7456_v2 }
 0x357   : > { %5853 = vmatmul.mubr.msk.bf16.gmra.mrb[236].mxu1 %vm8028_vm6, %v9496_v4  ;;  %7099 = vmatprep.subr.bf16.mxu0 %v7457_v1 }
 0x358   : > { %4660 = vmatprep.mubr.bf16.mxu1 %v9126_v62 }
 0x35a   : > { %7100 = vmatpush3.bf16.msra.mxu0 %v7457_v1 }
 0x35b   : > { %7101 = vmatprep.subr.bf16.mxu0 %v7458_v9 }
 0x35d   : > { %4508 = vmatmul.mubr.bf16.gmra.mrb[212].mxu0 %v9126_v62  ;;  %v7462_v62 = vld [vmem:[#allocation11 + $0x230] sm:$0xff]  }
 0x35e   : > { %5862 = vmatprep.mubr.msk.bf16.mxu0 %vm8028_vm6, %v9210_v42  ;;  %7102 = vmatpush3.bf16.msra.mxu0 %v7458_v9 }
 0x35f   : > { %5904 = vmatmul.mubr.msk.bf16.vlgmr.msra.gmra.mrb[240].mxu1 %vm8005_vm5, %v9141_v0  ;;  %7103 = vmatprep.subr.bf16.mxu0 %v7459_v41  ;;  %v7463_v0 = vld [vmem:[#allocation11 + $0x238] sm:$0xff]  }
 0x360   : > { %4668 = vmatprep.mubr.bf16.mxu1 %v9172_v24 }
 0x362   : > { %7104 = vmatpush3.bf16.msra.mxu0 %v7459_v41 }
 0x363   : > { %7105 = vmatprep.subr.bf16.mxu0 %v7460_v40 }
 0x365   : > { %4516 = vmatmul.mubr.bf16.gmra.mrb[216].mxu0 %v9172_v24  ;;  %v10084_v24 = vld [vmem:[#allocation22_spill] sm:$0xff] }
 0x366   : > { %5865 = vmatprep.mubr.msk.bf16.mxu0 %vm8028_vm6, %v9217_v55  ;;  %7106 = vmatpush3.bf16.msra.mxu0 %v7460_v40 }
 0x367   : > { %5907 = vmatmul.mubr.msk.bf16.gmra.mrb[244].mxu1 %vm8005_vm5, %v9193_v27  ;;  %7107 = vmatprep.subr.bf16.mxu0 %v7461_v34 }
 0x368   : > { %4676 = vmatprep.mubr.bf16.mxu1 %v9170_v48 }
 0x36a   : > { %7108 = vmatpush3.bf16.msra.mxu0 %v7461_v34 }
 0x36b   : > { %7109 = vmatprep.subr.bf16.mxu0 %v7462_v62 }
 0x36d   : > { %4524 = vmatmul.mubr.bf16.gmra.mrb[220].mxu0 %v9170_v48  ;;  %v10083_v48 = vld [vmem:[#allocation21_spill] sm:$0xff] }
 0x36e   : > { %5868 = vmatprep.mubr.msk.bf16.mxu0 %vm8028_vm6, %v9258_v19  ;;  %7110 = vmatpush3.bf16.msra.mxu0 %v7462_v62 }
 0x36f   : > { %5910 = vmatmul.mubr.msk.bf16.gmra.mrb[248].mxu1 %vm8005_vm5, %v9188_v46  ;;  %7111 = vmatprep.subr.bf16.mxu0 %v7463_v0  ;;  %v9680_v46 = vld [vmem:[#allocation12] ss:$0 sm:$0xff] }
 0x370   : > { %4684 = vmatprep.mubr.bf16.mxu1 %v9224_v39 }
 0x372   : > { %7112 = vmatpush3.bf16.msra.mxu0 %v7463_v0 }
 0x375   : > { %4532 = vmatmul.mubr.bf16.gmra.mrb[224].mxu0 %v9224_v39 }
 0x376   : > { %5871 = vmatprep.mubr.msk.bf16.mxu0 %vm8028_vm6, %v9265_v10 }
 0x377   : > { %5913 = vmatmul.mubr.msk.bf16.gmra.mrb[252].mxu1 %vm8005_vm5, %v9243_v61 }
 0x378   : > { %4692 = vmatprep.mubr.bf16.mxu1 %v10083_v48 }
 0x37d   : > { %4540 = vmatmul.mubr.bf16.gmra.mrb[228].mxu0 %v10083_v48 }
 0x37e   : > { %5874 = vmatprep.mubr.msk.bf16.mxu0 %vm8028_vm6, %v9310_v20 }
 0x37f   : > { %5916 = vmatmul.mubr.msk.bf16.gmra.mrb[0].mxu1 %vm8005_vm5, %v9240_v33 }
 0x380   : > { %4700 = vmatprep.mubr.bf16.mxu1 %v10084_v24 }
 0x385   : > { %4548 = vmatmul.mubr.bf16.gmra.mrb[232].mxu0 %v10084_v24 }
 0x386   : > { %5877 = vmatprep.mubr.msk.bf16.mxu0 %vm8028_vm6, %v9317_v23 }
 0x387   : > { %5919 = vmatmul.mubr.msk.bf16.gmra.mrb[4].mxu1 %vm8005_vm5, %v9293_v36 }
 0x388   : > { %4708 = vmatprep.mubr.bf16.mxu1 %v9270_v29 }
 0x38d   : > { %4556 = vmatmul.mubr.bf16.gmra.mrb[236].mxu0 %v9270_v29 }
 0x38e   : > { %5880 = vmatprep.mubr.msk.bf16.mxu0 %vm8028_vm6, %v9362_v15 }
 0x38f   : > { %5922 = vmatmul.mubr.msk.bf16.gmra.mrb[8].mxu1 %vm8005_vm5, %v9288_v45  ;;  %v4180_v45 = vadd.f32 %v9528_v11, %v9680_v46 }
 0x390   : > { %4716 = vmatprep.mubr.bf16.mxu1 %v9324_v31 }
 0x395   : > { %4564 = vmatmul.mubr.bf16.gmra.mrb[240].mxu0 %v9324_v31 }
 0x396   : > { %5883 = vmatprep.mubr.msk.bf16.mxu0 %vm8028_vm6, %v9369_v17 }
 0x397   : > { %5925 = vmatmul.mubr.msk.bf16.gmra.mrb[12].mxu1 %vm8005_vm5, %v9345_v43 }
 0x398   : > { %4724 = vmatprep.mubr.bf16.mxu1 %v9322_v63 }
 0x39d   : > { %4572 = vmatmul.mubr.bf16.gmra.mrb[244].mxu0 %v9322_v63 }
 0x39e   : > { %5886 = vmatprep.mubr.msk.bf16.mxu0 %vm8028_vm6, %v9414_v26 }
 0x39f   : > { %5928 = vmatmul.mubr.msk.bf16.gmra.mrb[16].mxu1 %vm8005_vm5, %v9340_v47 }
 0x3a0   : > { %4732 = vmatprep.mubr.bf16.mxu1 %v9376_v60 }
 0x3a5   : > { %4580 = vmatmul.mubr.bf16.gmra.mrb[248].mxu0 %v9376_v60 }
 0x3a6   : > { %5889 = vmatprep.mubr.msk.bf16.mxu0 %vm8028_vm6, %v9421_v44 }
 0x3a7   : > { %5931 = vmatmul.mubr.msk.bf16.gmra.mrb[20].mxu1 %vm8005_vm5, %v9397_v16 }
 0x3a8   : > { %4740 = vmatprep.mubr.bf16.mxu1 %v9374_v12 }
 0x3ad   : > { %4588 = vmatmul.mubr.bf16.gmra.mrb[252].mxu0 %v9374_v12  ;;  %v4183_v12 = vadd.f32 %v9530_v57, %v9680_v46 }
 0x3ae   : > { %5892 = vmatprep.mubr.msk.bf16.mxu0 %vm8028_vm6, %v9458_v59 }
 0x3af   : > { %5934 = vmatmul.mubr.msk.bf16.gmra.mrb[24].mxu1 %vm8005_vm5, %v9392_v58 }
 0x3b0   : > { %4748 = vmatprep.mubr.bf16.mxu1 %v9428_v30  ;;  %v6516_v27 = vpop.f32.mrb[148].mxu0 }
 0x3b1   : > { %v6517_v39 = vpop.f32.mrb[149].mxu0  ;;  %v6622_v33 = vpop.f32.mrb[176].mxu1 }
 0x3b2   : > { %v6518_v61 = vadd.f32 %v6517_v39, %v6516_v27  ;;  %v6519_v36 = vpop.f32.mrb[150].mxu0  ;;  %v6623_v29 = vpop.f32.mrb[177].mxu1 }
 0x3b3   : > { %v6624_v63 = vadd.f32 %v6623_v29, %v6622_v33  ;;  %v6520_v31 = vpop.f32.mrb[151].mxu0  ;;  %v6625_v47 = vpop.f32.mrb[178].mxu1 }
 0x3b4   : > { %v6521_v43 = vadd.f32 %v6520_v31, %v6519_v36  ;;  %v6626_v16 = vpop.f32.mrb[179].mxu1 }
 0x3b5   : > { %v9686_v60 = vadd.f32 %v6624_v63, %v4180_v45  ;;  %v6627_v58 = vadd.f32 %v6626_v16, %v6625_v47  ;;  %4596 = vmatmul.mubr.bf16.gmra.mrb[0].mxu0 %v9428_v30  ;;  %v4188_v30 = vadd.f32 %v6518_v61, %v9680_v46 }
 0x3b6   : > { %5895 = vmatprep.mubr.msk.bf16.mxu0 %vm8028_vm6, %v9465_v56  ;;  %v4191_v57 = vadd.f32 %v6521_v43, %v9680_v46 }
 0x3b7   : > { %5937 = vmatmul.mubr.msk.bf16.gmra.mrb[28].mxu1 %vm8005_vm5, %v9445_v52  ;;  %v9695_v13 = vadd.f32 %v6627_v58, %v4183_v12 }
 0x3b8   : > { %4756 = vmatprep.mubr.bf16.mxu1 %v9426_v53  ;;  %v6522_v21 = vpop.f32.mrb[152].mxu0 }
 0x3b9   : > { %v6523_v6 = vpop.f32.mrb[153].mxu0  ;;  %v6628_v14 = vpop.f32.mrb[180].mxu1 }
 0x3ba   : > { %v6524_v25 = vadd.f32 %v6523_v6, %v6522_v21  ;;  %v6525_v37 = vpop.f32.mrb[154].mxu0  ;;  %v6629_v8 = vpop.f32.mrb[181].mxu1 }
 0x3bb   : > { %v6630_v22 = vadd.f32 %v6629_v8, %v6628_v14  ;;  %v6526_v5 = vpop.f32.mrb[155].mxu0  ;;  %v6631_v11 = vpop.f32.mrb[182].mxu1 }
 0x3bc   : > { %v6527_v50 = vadd.f32 %v6526_v5, %v6525_v37  ;;  %v6632_v28 = vpop.f32.mrb[183].mxu1 }
 0x3bd   : > { %v9700_v52 = vadd.f32 %v6630_v22, %v4188_v30  ;;  %v6633_v2 = vadd.f32 %v6632_v28, %v6631_v11  ;;  %4604 = vmatmul.mubr.bf16.gmra.mrb[4].mxu0 %v9426_v53  ;;  %v4196_v53 = vadd.f32 %v6524_v25, %v9680_v46  ;;  %v10085_v30 = vmov 0.0|0.0  }
 0x3be   : > { %5898 = vmatprep.mubr.msk.bf16.mxu0 %vm8028_vm6, %v9496_v4  ;;  %v4199_v61 = vadd.f32 %v6527_v50, %v9680_v46 }
 0x3bf   : > { %5940 = vmatmul.mubr.msk.bf16.gmra.mrb[32].mxu1 %vm8005_vm5, %v9442_v18  ;;  %v9709_v1 = vadd.f32 %v6633_v2, %v4191_v57 }
 0x3c0   : > { %4764 = vmatprep.mubr.bf16.mxu1 %v9472_v35  ;;  %v6528_v9 = vpop.f32.mrb[156].mxu0 }
 0x3c1   : > { %v6529_v41 = vpop.f32.mrb[157].mxu0  ;;  %v6634_v40 = vpop.f32.mrb[184].mxu1 }
 0x3c2   : > { %v6530_v34 = vadd.f32 %v6529_v41, %v6528_v9  ;;  %v6531_v62 = vpop.f32.mrb[158].mxu0  ;;  %v6635_v0 = vpop.f32.mrb[185].mxu1 }
 0x3c3   : > { %v6636_v48 = vadd.f32 %v6635_v0, %v6634_v40  ;;  %v6532_v24 = vpop.f32.mrb[159].mxu0  ;;  %v6637_v27 = vpop.f32.mrb[186].mxu1  ;;  %v10086_v0 = vld [vmem:[#allocation20_spill] sm:$0xff] }
 0x3c4   : > { %v6533_v39 = vadd.f32 %v6532_v24, %v6531_v62  ;;  %v6638_v33 = vpop.f32.mrb[187].mxu1 }
 0x3c5   : > { %v9714_v18 = vadd.f32 %v6636_v48, %v4196_v53  ;;  %v6639_v36 = vadd.f32 %v6638_v33, %v6637_v27  ;;  %4612 = vmatmul.mubr.bf16.gmra.mrb[8].mxu0 %v9472_v35  ;;  %v4204_v35 = vadd.f32 %v6530_v34, %v9680_v46 }
 0x3c6   : > { %5901 = vmatprep.mubr.msk.bf16.mxu0 %vm8028_vm6, %v9494_v7  ;;  %v4207_v25 = vadd.f32 %v6533_v39, %v9680_v46 }
 0x3c7   : > { %5943 = vmatmul.mubr.msk.bf16.gmra.mrb[36].mxu1 %vm8005_vm5, %v9490_v51  ;;  %v9723_v29 = vadd.f32 %v6639_v36, %v4199_v61 }
 0x3c8   : > { %4772 = vmatprep.mubr.bf16.mxu1 %v9470_v49  ;;  %v6534_v45 = vpop.f32.mrb[160].mxu0 }
 0x3c9   : > { %v6535_v63 = vpop.f32.mrb[161].mxu0  ;;  %v6640_v31 = vpop.f32.mrb[188].mxu1 }
 0x3ca   : > { %v6536_v47 = vadd.f32 %v6535_v63, %v6534_v45  ;;  %v6537_v43 = vpop.f32.mrb[162].mxu0  ;;  %v6641_v16 = vpop.f32.mrb[189].mxu1 }
 0x3cb   : > { %v6642_v12 = vadd.f32 %v6641_v16, %v6640_v31  ;;  %v6538_v58 = vpop.f32.mrb[163].mxu0  ;;  %v6643_v21 = vpop.f32.mrb[190].mxu1 }
 0x3cc   : > { %v6539_v6 = vadd.f32 %v6538_v58, %v6537_v43  ;;  %v6644_v14 = vpop.f32.mrb[191].mxu1 }
 0x3cd   : > { %v9728_v51 = vadd.f32 %v6642_v12, %v4204_v35  ;;  %v6645_v37 = vadd.f32 %v6644_v14, %v6643_v21  ;;  %4620 = vmatmul.mubr.bf16.gmra.mrb[12].mxu0 %v9470_v49  ;;  %v4212_v49 = vadd.f32 %v6536_v47, %v9680_v46 }
 0x3ce   : > { %7113 = vmatprep.mubr.msk.bf16.mxu0 %vm8028_vm6, %v9165_v38  ;;  %v4215_v34 = vadd.f32 %v6539_v6, %v9680_v46 }
 0x3cf   : > { %5946 = vmatmul.mubr.msk.bf16.gmra.mrb[40].mxu1 %vm8005_vm5, %v9486_v32  ;;  %v9737_v8 = vadd.f32 %v6645_v37, %v4207_v25 }
 0x3d0   : > { %4780 = vmatprep.mubr.bf16.mxu1 %v10085_v30  ;;  %v6540_v22 = vpop.f32.mrb[164].mxu0 }
 0x3d1   : > { %v6541_v5 = vpop.f32.mrb[165].mxu0  ;;  %v6646_v11 = vpop.f32.mrb[192].mxu1 }
 0x3d2   : > { %v6542_v50 = vadd.f32 %v6541_v5, %v6540_v22  ;;  %v6543_v28 = vpop.f32.mrb[166].mxu0  ;;  %v6647_v57 = vpop.f32.mrb[193].mxu1 }
 0x3d3   : > { %v6648_v2 = vadd.f32 %v6647_v57, %v6646_v11  ;;  %v6544_v9 = vpop.f32.mrb[167].mxu0  ;;  %v6649_v41 = vpop.f32.mrb[194].mxu1 }
 0x3d4   : > { %v6545_v32 = vadd.f32 %v6544_v9, %v6543_v28  ;;  %v6650_v40 = vpop.f32.mrb[195].mxu1  ;;  %v4220_v36 = vadd.f32 %v6542_v50, %v9680_v46 }
 0x3d5   : > { %v9742_v38 = vadd.f32 %v6648_v2, %v4212_v49  ;;  %v6651_v62 = vadd.f32 %v6650_v40, %v6649_v41  ;;  %7114 = vmatmul.mubr.msk.bf16.vlgmr.msra.gmra.mrb[16].mxu0 %vm8028_vm6, %v9210_v42 }
 0x3d6   : > { %7117 = vmatprep.mubr.msk.bf16.mxu0 %vm8028_vm6, %v9217_v55  ;;  %v4223_v47 = vadd.f32 %v6545_v32, %v9680_v46 }
 0x3d7   : > { %5949 = vmatmul.mubr.msk.bf16.gmra.mrb[44].mxu1 %vm8005_vm5, %v10086_v0  ;;  %v9753_v53 = vadd.f32 %v6651_v62, %v4215_v34 }
 0x3d8   : > { %v6546_v48 = vpop.f32.mrb[168].mxu0 }
 0x3d9   : > { %v6547_v24 = vpop.f32.mrb[169].mxu0 }
 0x3da   : > { %v6652_v27 = vpop.f32.mrb[196].mxu1  ;;  %v6548_v39 = vadd.f32 %v6547_v24, %v6546_v48  ;;  %v6549_v33 = vpop.f32.mrb[170].mxu0 }
 0x3db   : > { %v6653_v61 = vpop.f32.mrb[197].mxu1  ;;  %v6550_v42 = vpop.f32.mrb[171].mxu0 }
 0x3dc   : > { %v6654_v45 = vadd.f32 %v6653_v61, %v6652_v27  ;;  %v6655_v63 = vpop.f32.mrb[198].mxu1  ;;  %v6551_v31 = vadd.f32 %v6550_v42, %v6549_v33  ;;  %v4228_v25 = vadd.f32 %v6548_v39, %v9680_v46 }
 0x3dd   : > { %v6656_v54 = vpop.f32.mrb[199].mxu1  ;;  %7118 = vmatmul.mubr.msk.bf16.gmra.mrb[20].mxu0 %vm8028_vm6, %v9258_v19 }
 0x3de   : > { %v9757_v43 = vadd.f32 %v6654_v45, %v4220_v36  ;;  %v6657_v55 = vadd.f32 %v6656_v54, %v6655_v63  ;;  %7121 = vmatprep.mubr.msk.bf16.mxu0 %vm8028_vm6, %v9265_v10  ;;  %v4231_v19 = vadd.f32 %v6551_v31, %v9680_v46 }
 0x3e0   : > { %v9765_v16 = vadd.f32 %v6657_v55, %v4223_v47  ;;  %v6552_v35 = vpop.f32.mrb[172].mxu0 }
 0x3e1   : > { %v6553_v12 = vpop.f32.mrb[173].mxu0 }
 0x3e2   : > { %v6658_v58 = vpop.f32.mrb[200].mxu1  ;;  %v6554_v21 = vadd.f32 %v6553_v12, %v6552_v35  ;;  %v6555_v6 = vpop.f32.mrb[174].mxu0 }
 0x3e3   : > { %v6659_v14 = vpop.f32.mrb[201].mxu1  ;;  %v6556_v30 = vpop.f32.mrb[175].mxu0 }
 0x3e4   : > { %v6660_v37 = vadd.f32 %v6659_v14, %v6658_v58  ;;  %v6661_v22 = vpop.f32.mrb[202].mxu1  ;;  %v6557_v5 = vadd.f32 %v6556_v30, %v6555_v6  ;;  %v4236_v40 = vadd.f32 %v6554_v21, %v9680_v46 }
 0x3e5   : > { %v6662_v11 = vpop.f32.mrb[203].mxu1  ;;  %7122 = vmatmul.mubr.msk.bf16.gmra.mrb[24].mxu0 %vm8028_vm6, %v9310_v20 }
 0x3e6   : > { %v9769_v50 = vadd.f32 %v6660_v37, %v4228_v25  ;;  %v6663_v10 = vadd.f32 %v6662_v11, %v6661_v22  ;;  %7125 = vmatprep.mubr.msk.bf16.mxu0 %vm8028_vm6, %v9317_v23  ;;  %v4239_v20 = vadd.f32 %v6557_v5, %v9680_v46 }
 0x3e8   : > { %v9777_v28 = vadd.f32 %v6663_v10, %v4231_v19  ;;  %v6558_v57 = vpop.f32.mrb[176].mxu0 }
 0x3e9   : > { %v6559_v49 = vpop.f32.mrb[177].mxu0 }
 0x3ea   : > { %v6664_v2 = vpop.f32.mrb[204].mxu1  ;;  %v6560_v9 = vadd.f32 %v6559_v49, %v6558_v57  ;;  %v6561_v41 = vpop.f32.mrb[178].mxu0 }
 0x3eb   : > { %v6665_v32 = vpop.f32.mrb[205].mxu1  ;;  %v6562_v62 = vpop.f32.mrb[179].mxu0 }
 0x3ec   : > { %v6666_v34 = vadd.f32 %v6665_v32, %v6664_v2  ;;  %v6667_v0 = vpop.f32.mrb[206].mxu1  ;;  %v6563_v48 = vadd.f32 %v6562_v62, %v6561_v41  ;;  %v4244_v31 = vadd.f32 %v6560_v9, %v9680_v46 }
 0x3ed   : > { %v6668_v24 = vpop.f32.mrb[207].mxu1  ;;  %7126 = vmatmul.mubr.msk.bf16.gmra.mrb[28].mxu0 %vm8028_vm6, %v9362_v15 }
 0x3ee   : > { %v9781_v27 = vadd.f32 %v6666_v34, %v4236_v40  ;;  %v6669_v23 = vadd.f32 %v6668_v24, %v6667_v0  ;;  %7129 = vmatprep.mubr.msk.bf16.mxu0 %vm8028_vm6, %v9369_v17  ;;  %v4247_v15 = vadd.f32 %v6563_v48, %v9680_v46 }
 0x3f0   : > { %v9789_v39 = vadd.f32 %v6669_v23, %v4239_v20  ;;  %v6564_v33 = vpop.f32.mrb[180].mxu0 }
 0x3f1   : > { %v6565_v61 = vpop.f32.mrb[181].mxu0 }
 0x3f2   : > { %v6670_v36 = vpop.f32.mrb[208].mxu1  ;;  %v6566_v45 = vadd.f32 %v6565_v61, %v6564_v33  ;;  %v6567_v42 = vpop.f32.mrb[182].mxu0 }
 0x3f3   : > { %v6671_v63 = vpop.f32.mrb[209].mxu1  ;;  %v6568_v47 = vpop.f32.mrb[183].mxu0 }
 0x3f4   : > { %v6672_v54 = vadd.f32 %v6671_v63, %v6670_v36  ;;  %v6673_v55 = vpop.f32.mrb[210].mxu1  ;;  %v6569_v35 = vadd.f32 %v6568_v47, %v6567_v42  ;;  %v4252_v5 = vadd.f32 %v6566_v45, %v9680_v46 }
 0x3f5   : > { %v6674_v12 = vpop.f32.mrb[211].mxu1  ;;  %7130 = vmatmul.mubr.msk.bf16.gmra.mrb[32].mxu0 %vm8028_vm6, %v9414_v26 }
 0x3f6   : > { %v9793_v58 = vadd.f32 %v6672_v54, %v4244_v31  ;;  %v6675_v17 = vadd.f32 %v6674_v12, %v6673_v55  ;;  %7133 = vmatprep.mubr.msk.bf16.mxu0 %vm8028_vm6, %v9421_v44  ;;  %v4255_v26 = vadd.f32 %v6569_v35, %v9680_v46 }
 0x3f8   : > { %v9801_v21 = vadd.f32 %v6675_v17, %v4247_v15  ;;  %v6570_v6 = vpop.f32.mrb[184].mxu0 }
 0x3f9   : > { %v6571_v14 = vpop.f32.mrb[185].mxu0 }
 0x3fa   : > { %v6676_v25 = vpop.f32.mrb[212].mxu1  ;;  %v6572_v37 = vadd.f32 %v6571_v14, %v6570_v6  ;;  %v6573_v30 = vpop.f32.mrb[186].mxu0 }
 0x3fb   : > { %v6677_v22 = vpop.f32.mrb[213].mxu1  ;;  %v6574_v19 = vpop.f32.mrb[187].mxu0 }
 0x3fc   : > { %v6678_v11 = vadd.f32 %v6677_v22, %v6676_v25  ;;  %v6679_v10 = vpop.f32.mrb[214].mxu1  ;;  %v6575_v57 = vadd.f32 %v6574_v19, %v6573_v30  ;;  %v4260_v48 = vadd.f32 %v6572_v37, %v9680_v46  ;;  %v10087_v37 = vld [vmem:[#allocation19_spill] sm:$0xff] }
 0x3fd   : > { %v6680_v49 = vpop.f32.mrb[215].mxu1  ;;  %7134 = vmatmul.mubr.msk.bf16.gmra.mrb[36].mxu0 %vm8028_vm6, %v9458_v59 }
 0x3fe   : > { %v9805_v2 = vadd.f32 %v6678_v11, %v4252_v5  ;;  %v6681_v44 = vadd.f32 %v6680_v49, %v6679_v10  ;;  %7137 = vmatprep.mubr.msk.bf16.mxu0 %vm8028_vm6, %v9465_v56  ;;  %v4263_v59 = vadd.f32 %v6575_v57, %v9680_v46 }
 0x400   : > { %v9813_v9 = vadd.f32 %v6681_v44, %v4255_v26  ;;  %v6576_v41 = vpop.f32.mrb[188].mxu0 }
 0x401   : > { %v6577_v32 = vpop.f32.mrb[189].mxu0 }
 0x402   : > { %v6682_v40 = vpop.f32.mrb[216].mxu1  ;;  %v6578_v34 = vadd.f32 %v6577_v32, %v6576_v41  ;;  %v6579_v62 = vpop.f32.mrb[190].mxu0 }
 0x403   : > { %v6683_v0 = vpop.f32.mrb[217].mxu1  ;;  %v6580_v20 = vpop.f32.mrb[191].mxu0 }
 0x404   : > { %v6684_v24 = vadd.f32 %v6683_v0, %v6682_v40  ;;  %v6685_v23 = vpop.f32.mrb[218].mxu1  ;;  %v6581_v33 = vadd.f32 %v6580_v20, %v6579_v62  ;;  %v4268_v35 = vadd.f32 %v6578_v34, %v9680_v46 }
 0x405   : > { %v6686_v61 = vpop.f32.mrb[219].mxu1  ;;  %7138 = vmatmul.mubr.msk.bf16.gmra.mrb[40].mxu0 %vm8028_vm6, %v9496_v4 }
 0x406   : > { %v9817_v36 = vadd.f32 %v6684_v24, %v4260_v48  ;;  %v6687_v56 = vadd.f32 %v6686_v61, %v6685_v23  ;;  %7141 = vmatprep.mubr.msk.bf16.mxu0 %vm8028_vm6, %v9494_v7  ;;  %v4271_v4 = vadd.f32 %v6581_v33, %v9680_v46 }
 0x408   : > { %v9825_v45 = vadd.f32 %v6687_v56, %v4263_v59  ;;  %v6582_v42 = vpop.f32.mrb[192].mxu0 }
 0x409   : > { %v6583_v63 = vpop.f32.mrb[193].mxu0 }
 0x40a   : > { %v6688_v31 = vpop.f32.mrb[220].mxu1  ;;  %v6584_v54 = vadd.f32 %v6583_v63, %v6582_v42  ;;  %v6585_v47 = vpop.f32.mrb[194].mxu0 }
 0x40b   : > { %v6689_v55 = vpop.f32.mrb[221].mxu1  ;;  %v6586_v15 = vpop.f32.mrb[195].mxu0 }
 0x40c   : > { %v6690_v12 = vadd.f32 %v6689_v55, %v6688_v31  ;;  %v6691_v17 = vpop.f32.mrb[222].mxu1  ;;  %v6587_v6 = vadd.f32 %v6586_v15, %v6585_v47  ;;  %v4276_v49 = vadd.f32 %v6584_v54, %v9680_v46 }
 0x40d   : > { %v6692_v14 = vpop.f32.mrb[223].mxu1  ;;  %7142 = vmatmul.mubr.msk.bf16.gmra.mrb[44].mxu0 %vm8028_vm6, %v10087_v37 }
 0x40e   : > { %v9829_v25 = vadd.f32 %v6690_v12, %v4268_v35  ;;  %v6693_v7 = vadd.f32 %v6692_v14, %v6691_v17  ;;  %v4279_v34 = vadd.f32 %v6587_v6, %v9680_v46 }
 0x410   : > { %v9834_v30 = vadd.f32 %v6693_v7, %v4271_v4  ;;  %v6588_v22 = vpop.f32.mrb[196].mxu0 }
 0x411   : > { %v6589_v5 = vpop.f32.mrb[197].mxu0 }
 0x412   : > { %v6694_v11 = vpop.f32.mrb[224].mxu1  ;;  %v6590_v19 = vadd.f32 %v6589_v5, %v6588_v22  ;;  %v6591_v10 = vpop.f32.mrb[198].mxu0 }
 0x413   : > { %v6695_v57 = vpop.f32.mrb[225].mxu1  ;;  %v6592_v44 = vpop.f32.mrb[199].mxu0 }
 0x414   : > { %v6696_v26 = vadd.f32 %v6695_v57, %v6694_v11  ;;  %v6697_v41 = vpop.f32.mrb[226].mxu1  ;;  %v6593_v32 = vadd.f32 %v6592_v44, %v6591_v10  ;;  %v4284_v59 = vadd.f32 %v6590_v19, %v9680_v46 }
 0x415   : > { %v6698_v40 = vpop.f32.mrb[227].mxu1 }
 0x416   : > { %v9838_v62 = vadd.f32 %v6696_v26, %v4276_v49  ;;  %v6699_v3 = vadd.f32 %v6698_v40, %v6697_v41  ;;  %v4287_v47 = vadd.f32 %v6593_v32, %v9680_v46 }
 0x418   : > { %v9840_v0 = vadd.f32 %v6699_v3, %v4279_v34  ;;  %v6594_v48 = vpop.f32.mrb[200].mxu0 }
 0x419   : > { %v6595_v24 = vpop.f32.mrb[201].mxu0 }
 0x41a   : > { %v6700_v20 = vpop.f32.mrb[228].mxu1  ;;  %v6596_v23 = vadd.f32 %v6595_v24, %v6594_v48  ;;  %v6597_v33 = vpop.f32.mrb[202].mxu0 }
 0x41b   : > { %v6701_v61 = vpop.f32.mrb[229].mxu1  ;;  %v6598_v42 = vpop.f32.mrb[203].mxu0 }
 0x41c   : > { %v6702_v56 = vadd.f32 %v6701_v61, %v6700_v20  ;;  %v6703_v63 = vpop.f32.mrb[230].mxu1  ;;  %v6599_v31 = vadd.f32 %v6598_v42, %v6597_v33  ;;  %v4292_v37 = vadd.f32 %v6596_v23, %v9680_v46 }
 0x41d   : > { %v6704_v54 = vpop.f32.mrb[231].mxu1 }
 0x41e   : > { %v9844_v55 = vadd.f32 %v6702_v56, %v4284_v59  ;;  %v6705_v35 = vadd.f32 %v6704_v54, %v6703_v63  ;;  %v4295_v57 = vadd.f32 %v6599_v31, %v9680_v46 }
 0x420   : > { %v9846_v12 = vadd.f32 %v6705_v35, %v4287_v47  ;;  %v6600_v15 = vpop.f32.mrb[204].mxu0 }
 0x421   : > { %v6601_v17 = vpop.f32.mrb[205].mxu0 }
 0x422   : > { %v6706_v6 = vpop.f32.mrb[232].mxu1  ;;  %v6602_v14 = vadd.f32 %v6601_v17, %v6600_v15  ;;  %v6603_v4 = vpop.f32.mrb[206].mxu0 }
 0x423   : > { %v6707_v7 = vpop.f32.mrb[233].mxu1  ;;  %v6604_v5 = vpop.f32.mrb[207].mxu0 }
 0x424   : > { %v6708_v22 = vadd.f32 %v6707_v7, %v6706_v6  ;;  %v6709_v11 = vpop.f32.mrb[234].mxu1  ;;  %v6605_v19 = vadd.f32 %v6604_v5, %v6603_v4  ;;  %v4300_v24 = vadd.f32 %v6602_v14, %v9680_v46 }
 0x425   : > { %v6710_v10 = vpop.f32.mrb[235].mxu1 }
 0x426   : > { %v9850_v49 = vadd.f32 %v6708_v22, %v4292_v37  ;;  %v6711_v26 = vadd.f32 %v6710_v10, %v6709_v11  ;;  %v4303_v42 = vadd.f32 %v6605_v19, %v9680_v46 }
 0x428   : > { %v9852_v44 = vadd.f32 %v6711_v26, %v4295_v57  ;;  %v6734_v41 = vpop.f32.mrb[208].mxu0 }
 0x429   : > { %v6735_v40 = vpop.f32.mrb[209].mxu0 }
 0x42a   : > { %v6712_v32 = vpop.f32.mrb[236].mxu1  ;;  %v6736_v34 = vadd.f32 %v6735_v40, %v6734_v41  ;;  %v6737_v48 = vpop.f32.mrb[210].mxu0 }
 0x42b   : > { %v6713_v3 = vpop.f32.mrb[237].mxu1  ;;  %v6738_v33 = vpop.f32.mrb[211].mxu0 }
 0x42c   : > { %v6714_v20 = vadd.f32 %v6713_v3, %v6712_v32  ;;  %v6715_v23 = vpop.f32.mrb[238].mxu1  ;;  %v4502_v61 = vadd.f32 %v6736_v34, %v9686_v60  ;;  %v6739_v59 = vadd.f32 %v6738_v33, %v6737_v48 }
 0x42d   : > { %v6716_v56 = vpop.f32.mrb[239].mxu1 }
 0x42e   : > { %v9857_v63 = vadd.f32 %v6714_v20, %v4300_v24  ;;  %v6717_v31 = vadd.f32 %v6716_v56, %v6715_v23  ;;  %v4505_v54 = vadd.f32 %v6739_v59, %v9695_v13 }
 0x430   : > { %v9860_v47 = vadd.f32 %v6717_v31, %v4303_v42  ;;  %v6740_v35 = vpop.f32.mrb[212].mxu0 }
 0x431   : > { %v6741_v15 = vpop.f32.mrb[213].mxu0 }
 0x432   : > { %v6846_v17 = vpop.f32.mrb[240].mxu1  ;;  %v6742_v6 = vadd.f32 %v6741_v15, %v6740_v35  ;;  %v6743_v14 = vpop.f32.mrb[214].mxu0 }
 0x433   : > { %v6847_v4 = vpop.f32.mrb[241].mxu1  ;;  %v6744_v37 = vpop.f32.mrb[215].mxu0 }
 0x434   : > { %v6848_v7 = vadd.f32 %v6847_v4, %v6846_v17  ;;  %v6849_v60 = vpop.f32.mrb[242].mxu1  ;;  %v4510_v22 = vadd.f32 %v6742_v6, %v9700_v52  ;;  %v6745_v5 = vadd.f32 %v6744_v37, %v6743_v14 }
 0x435   : > { %v6850_v46 = vpop.f32.mrb[243].mxu1 }
 0x436   : > { %v6851_v11 = vadd.f32 %v6850_v46, %v6849_v60  ;;  %v9863_v19 = vadd.f32 %v6848_v7, %v4502_v61  ;;  %v4513_v13 = vadd.f32 %v6745_v5, %v9709_v1 }
 0x438   : > { %v9866_v10 = vadd.f32 %v6851_v11, %v4505_v54  ;;  %v6746_v57 = vpop.f32.mrb[216].mxu0 }
 0x439   : > { %v6747_v26 = vpop.f32.mrb[217].mxu0 }
 0x43a   : > { %v6852_v41 = vpop.f32.mrb[244].mxu1  ;;  %v6748_v32 = vadd.f32 %v6747_v26, %v6746_v57  ;;  %v6749_v40 = vpop.f32.mrb[218].mxu0 }
 0x43b   : > { %v6853_v34 = vpop.f32.mrb[245].mxu1  ;;  %v6750_v48 = vpop.f32.mrb[219].mxu0 }
 0x43c   : > { %v6854_v3 = vadd.f32 %v6853_v34, %v6852_v41  ;;  %v6855_v24 = vpop.f32.mrb[246].mxu1  ;;  %v4518_v52 = vadd.f32 %v6748_v32, %v9714_v18  ;;  %v6751_v20 = vadd.f32 %v6750_v48, %v6749_v40 }
 0x43d   : > { %v6856_v23 = vpop.f32.mrb[247].mxu1 }
 0x43e   : > { %v6857_v33 = vadd.f32 %v6856_v23, %v6855_v24  ;;  %v9869_v61 = vadd.f32 %v6854_v3, %v4510_v22  ;;  %v4521_v1 = vadd.f32 %v6751_v20, %v9723_v29 }
 0x440   : > { %v9872_v59 = vadd.f32 %v6857_v33, %v4513_v13  ;;  %v6752_v56 = vpop.f32.mrb[220].mxu0 }
 0x441   : > { %v6753_v42 = vpop.f32.mrb[221].mxu0 }
 0x442   : > { %v6858_v31 = vpop.f32.mrb[248].mxu1  ;;  %v6754_v54 = vadd.f32 %v6753_v42, %v6752_v56  ;;  %v6755_v35 = vpop.f32.mrb[222].mxu0 }
 0x443   : > { %v6859_v15 = vpop.f32.mrb[249].mxu1  ;;  %v6756_v6 = vpop.f32.mrb[223].mxu0 }
 0x444   : > { %v6860_v17 = vadd.f32 %v6859_v15, %v6858_v31  ;;  %v6861_v14 = vpop.f32.mrb[250].mxu1  ;;  %v4526_v18 = vadd.f32 %v6754_v54, %v9728_v51  ;;  %v6757_v4 = vadd.f32 %v6756_v6, %v6755_v35 }
 0x445   : > { %v6862_v7 = vpop.f32.mrb[251].mxu1 }
 0x446   : > { %v6863_v37 = vadd.f32 %v6862_v7, %v6861_v14  ;;  %v9875_v60 = vadd.f32 %v6860_v17, %v4518_v52  ;;  %v4529_v29 = vadd.f32 %v6757_v4, %v9737_v8 }
 0x448   : > { %v9878_v22 = vadd.f32 %v6863_v37, %v4521_v1  ;;  %v6758_v5 = vpop.f32.mrb[224].mxu0 }
 0x449   : > { %v6759_v46 = vpop.f32.mrb[225].mxu0 }
 0x44a   : > { %v6864_v11 = vpop.f32.mrb[252].mxu1  ;;  %v6760_v13 = vadd.f32 %v6759_v46, %v6758_v5  ;;  %v6761_v57 = vpop.f32.mrb[226].mxu0 }
 0x44b   : > { %v6865_v26 = vpop.f32.mrb[253].mxu1  ;;  %v6762_v32 = vpop.f32.mrb[227].mxu0 }
 0x44c   : > { %v6866_v41 = vadd.f32 %v6865_v26, %v6864_v11  ;;  %v6867_v40 = vpop.f32.mrb[254].mxu1  ;;  %v4534_v51 = vadd.f32 %v6760_v13, %v9742_v38  ;;  %v6763_v34 = vadd.f32 %v6762_v32, %v6761_v57 }
 0x44d   : > { %v6868_v3 = vpop.f32.mrb[255].mxu1 }
 0x44e   : > { %v6869_v48 = vadd.f32 %v6868_v3, %v6867_v40  ;;  %v9881_v24 = vadd.f32 %v6866_v41, %v4526_v18  ;;  %v4537_v8 = vadd.f32 %v6763_v34, %v9753_v53 }
 0x450   : > { %v9884_v52 = vadd.f32 %v6869_v48, %v4529_v29  ;;  %v6764_v20 = vpop.f32.mrb[228].mxu0 }
 0x451   : > { %v6765_v23 = vpop.f32.mrb[229].mxu0 }
 0x452   : > { %v6870_v33 = vpop.f32.mrb[0].mxu1  ;;  %v6766_v1 = vadd.f32 %v6765_v23, %v6764_v20  ;;  %v6767_v56 = vpop.f32.mrb[230].mxu0 }
 0x453   : > { %v6871_v42 = vpop.f32.mrb[1].mxu1  ;;  %v6768_v54 = vpop.f32.mrb[231].mxu0 }
 0x454   : > { %v6872_v31 = vadd.f32 %v6871_v42, %v6870_v33  ;;  %v6873_v35 = vpop.f32.mrb[2].mxu1  ;;  %v4542_v38 = vadd.f32 %v6766_v1, %v9757_v43  ;;  %v6769_v15 = vadd.f32 %v6768_v54, %v6767_v56 }
 0x455   : > { %v6874_v17 = vpop.f32.mrb[3].mxu1 }
 0x456   : > { %v6875_v6 = vadd.f32 %v6874_v17, %v6873_v35  ;;  %v9887_v14 = vadd.f32 %v6872_v31, %v4534_v51  ;;  %v4545_v53 = vadd.f32 %v6769_v15, %v9765_v16 }
 0x458   : > { %v9890_v18 = vadd.f32 %v6875_v6, %v4537_v8  ;;  %v6770_v4 = vpop.f32.mrb[232].mxu0 }
 0x459   : > { %v6771_v7 = vpop.f32.mrb[233].mxu0 }
 0x45a   : > { %v6876_v37 = vpop.f32.mrb[4].mxu1  ;;  %v6772_v29 = vadd.f32 %v6771_v7, %v6770_v4  ;;  %v6773_v5 = vpop.f32.mrb[234].mxu0 }
 0x45b   : > { %v6877_v46 = vpop.f32.mrb[5].mxu1  ;;  %v6774_v13 = vpop.f32.mrb[235].mxu0 }
 0x45c   : > { %v6878_v11 = vadd.f32 %v6877_v46, %v6876_v37  ;;  %v6879_v57 = vpop.f32.mrb[6].mxu1  ;;  %v4550_v43 = vadd.f32 %v6772_v29, %v9769_v50  ;;  %v6775_v26 = vadd.f32 %v6774_v13, %v6773_v5 }
 0x45d   : > { %v6880_v41 = vpop.f32.mrb[7].mxu1 }
 0x45e   : > { %v6881_v32 = vadd.f32 %v6880_v41, %v6879_v57  ;;  %v9893_v40 = vadd.f32 %v6878_v11, %v4542_v38  ;;  %v4553_v16 = vadd.f32 %v6775_v26, %v9777_v28  ;;  %v4983_v26 = vld [vmem:[%s10032_s7 + $0x8] sm:$0xff] }
 0x45f   : > { %5049 = vmatprep.mubr.f32.mxu1 %v4983_v26 }
 0x460   : > { %v9896_v51 = vadd.f32 %v6881_v32, %v4545_v53  ;;  %v6776_v34 = vpop.f32.mrb[236].mxu0 }
 0x461   : > { %v6777_v3 = vpop.f32.mrb[237].mxu0 }
 0x462   : > { %v6882_v48 = vpop.f32.mrb[8].mxu1  ;;  %v6778_v8 = vadd.f32 %v6777_v3, %v6776_v34  ;;  %v6779_v20 = vpop.f32.mrb[238].mxu0 }
 0x463   : > { %v6883_v23 = vpop.f32.mrb[9].mxu1  ;;  %v6780_v1 = vpop.f32.mrb[239].mxu0 }
 0x464   : > { %v6884_v33 = vadd.f32 %v6883_v23, %v6882_v48  ;;  %v6885_v56 = vpop.f32.mrb[10].mxu1  ;;  %v4558_v50 = vadd.f32 %v6778_v8, %v9781_v27  ;;  %v6781_v42 = vadd.f32 %v6780_v1, %v6779_v20 }
 0x465   : > { %v6886_v31 = vpop.f32.mrb[11].mxu1 }
 0x466   : > { %v6887_v54 = vadd.f32 %v6886_v31, %v6885_v56  ;;  %v9899_v35 = vadd.f32 %v6884_v33, %v4550_v43  ;;  %v4561_v28 = vadd.f32 %v6781_v42, %v9789_v39 }
 0x468   : > { %v9902_v38 = vadd.f32 %v6887_v54, %v4553_v16  ;;  %v6782_v15 = vpop.f32.mrb[240].mxu0 }
 0x469   : > { %v6783_v17 = vpop.f32.mrb[241].mxu0 }
 0x46a   : > { %v6888_v6 = vpop.f32.mrb[12].mxu1  ;;  %v6784_v53 = vadd.f32 %v6783_v17, %v6782_v15  ;;  %v6785_v4 = vpop.f32.mrb[242].mxu0 }
 0x46b   : > { %v6889_v7 = vpop.f32.mrb[13].mxu1  ;;  %v6786_v29 = vpop.f32.mrb[243].mxu0 }
 0x46c   : > { %v6890_v37 = vadd.f32 %v6889_v7, %v6888_v6  ;;  %v6891_v5 = vpop.f32.mrb[14].mxu1  ;;  %v4566_v27 = vadd.f32 %v6784_v53, %v9793_v58  ;;  %v6787_v46 = vadd.f32 %v6786_v29, %v6785_v4 }
 0x46d   : > { %v6892_v11 = vpop.f32.mrb[15].mxu1 }
 0x46e   : > { %v6893_v13 = vadd.f32 %v6892_v11, %v6891_v5  ;;  %v9905_v57 = vadd.f32 %v6890_v37, %v4558_v50  ;;  %v4569_v39 = vadd.f32 %v6787_v46, %v9801_v21 }
 0x470   : > { %v9908_v43 = vadd.f32 %v6893_v13, %v4561_v28  ;;  %v6788_v41 = vpop.f32.mrb[244].mxu0 }
 0x471   : > { %v6789_v32 = vpop.f32.mrb[245].mxu0 }
 0x472   : > { %v6894_v16 = vpop.f32.mrb[16].mxu1  ;;  %v6790_v34 = vadd.f32 %v6789_v32, %v6788_v41  ;;  %v6791_v3 = vpop.f32.mrb[246].mxu0 }
 0x473   : > { %v6895_v58 = vpop.f32.mrb[17].mxu1  ;;  %v6792_v8 = vpop.f32.mrb[247].mxu0 }
 0x474   : > { %v6896_v48 = vadd.f32 %v6895_v58, %v6894_v16  ;;  %v6897_v20 = vpop.f32.mrb[18].mxu1  ;;  %v4574_v23 = vadd.f32 %v6790_v34, %v9805_v2  ;;  %v6793_v33 = vadd.f32 %v6792_v8, %v6791_v3 }
 0x475   : > { %v6898_v21 = vpop.f32.mrb[19].mxu1 }
 0x476   : > { %v6899_v1 = vadd.f32 %v6898_v21, %v6897_v20  ;;  %v9914_v56 = vadd.f32 %v6896_v48, %v4566_v27  ;;  %v4577_v50 = vadd.f32 %v6793_v33, %v9813_v9 }
 0x478   : > { %v9917_v42 = vadd.f32 %v6899_v1, %v4569_v39  ;;  %v6794_v31 = vpop.f32.mrb[248].mxu0 }
 0x479   : > { %v6795_v54 = vpop.f32.mrb[249].mxu0 }
 0x47a   : > { %v6900_v28 = vpop.f32.mrb[20].mxu1  ;;  %v6796_v15 = vadd.f32 %v6795_v54, %v6794_v31  ;;  %v6797_v17 = vpop.f32.mrb[250].mxu0 }
 0x47b   : > { %v6901_v6 = vpop.f32.mrb[21].mxu1  ;;  %v6798_v4 = vpop.f32.mrb[251].mxu0 }
 0x47c   : > { %v6902_v53 = vadd.f32 %v6901_v6, %v6900_v28  ;;  %v6903_v7 = vpop.f32.mrb[22].mxu1  ;;  %v4582_v2 = vadd.f32 %v6796_v15, %v9817_v36  ;;  %v6799_v37 = vadd.f32 %v6798_v4, %v6797_v17 }
 0x47d   : > { %v6904_v29 = vpop.f32.mrb[23].mxu1 }
 0x47e   : > { %v6905_v5 = vadd.f32 %v6904_v29, %v6903_v7  ;;  %v9920_v27 = vadd.f32 %v6902_v53, %v4574_v23  ;;  %v4585_v9 = vadd.f32 %v6799_v37, %v9825_v45 }
 0x480   : > { %v9923_v46 = vadd.f32 %v6905_v5, %v4577_v50  ;;  %v6800_v11 = vpop.f32.mrb[252].mxu0 }
 0x481   : > { %v6801_v13 = vpop.f32.mrb[253].mxu0 }
 0x482   : > { %v6906_v39 = vpop.f32.mrb[24].mxu1  ;;  %v6802_v26 = vadd.f32 %v6801_v13, %v6800_v11  ;;  %v6803_v41 = vpop.f32.mrb[254].mxu0 }
 0x483   : > { %v6907_v32 = vpop.f32.mrb[25].mxu1  ;;  %v6804_v34 = vpop.f32.mrb[255].mxu0 }
 0x484   : > { %v6908_v16 = vadd.f32 %v6907_v32, %v6906_v39  ;;  %v6909_v3 = vpop.f32.mrb[26].mxu1  ;;  %v4590_v36 = vadd.f32 %v6802_v26, %v9829_v25  ;;  %v6805_v58 = vadd.f32 %v6804_v34, %v6803_v41 }
 0x485   : > { %v6910_v48 = vpop.f32.mrb[27].mxu1 }
 0x486   : > { %v6911_v8 = vadd.f32 %v6910_v48, %v6909_v3  ;;  %v9926_v20 = vadd.f32 %v6908_v16, %v4582_v2  ;;  %v4593_v45 = vadd.f32 %v6805_v58, %v9834_v30 }
 0x488   : > { %v9929_v23 = vadd.f32 %v6911_v8, %v4585_v9  ;;  %v6806_v33 = vpop.f32.mrb[0].mxu0 }
 0x489   : > { %v6807_v21 = vpop.f32.mrb[1].mxu0 }
 0x48a   : > { %v6912_v1 = vpop.f32.mrb[28].mxu1  ;;  %v6808_v50 = vadd.f32 %v6807_v21, %v6806_v33  ;;  %v6809_v31 = vpop.f32.mrb[2].mxu0 }
 0x48b   : > { %v6913_v54 = vpop.f32.mrb[29].mxu1  ;;  %v6810_v15 = vpop.f32.mrb[3].mxu0 }
 0x48c   : > { %v6914_v28 = vadd.f32 %v6913_v54, %v6912_v1  ;;  %v6915_v17 = vpop.f32.mrb[30].mxu1  ;;  %v4598_v25 = vadd.f32 %v6808_v50, %v9838_v62  ;;  %v6811_v6 = vadd.f32 %v6810_v15, %v6809_v31 }
 0x48d   : > { %v6916_v53 = vpop.f32.mrb[31].mxu1 }
 0x48e   : > { %v6917_v4 = vadd.f32 %v6916_v53, %v6915_v17  ;;  %v9932_v7 = vadd.f32 %v6914_v28, %v4590_v36  ;;  %v4601_v30 = vadd.f32 %v6811_v6, %v9840_v0 }
 0x490   : > { %v9935_v2 = vadd.f32 %v6917_v4, %v4593_v45  ;;  %v6812_v37 = vpop.f32.mrb[4].mxu0 }
 0x491   : > { %v6813_v29 = vpop.f32.mrb[5].mxu0 }
 0x492   : > { %v6918_v5 = vpop.f32.mrb[32].mxu1  ;;  %v6814_v9 = vadd.f32 %v6813_v29, %v6812_v37  ;;  %v6815_v11 = vpop.f32.mrb[6].mxu0 }
 0x493   : > { %v6919_v13 = vpop.f32.mrb[33].mxu1  ;;  %v6816_v26 = vpop.f32.mrb[7].mxu0 }
 0x494   : > { %v6920_v39 = vadd.f32 %v6919_v13, %v6918_v5  ;;  %v6921_v41 = vpop.f32.mrb[34].mxu1  ;;  %v4606_v62 = vadd.f32 %v6814_v9, %v9844_v55  ;;  %v6817_v32 = vadd.f32 %v6816_v26, %v6815_v11 }
 0x495   : > { %v6922_v16 = vpop.f32.mrb[35].mxu1 }
 0x496   : > { %v6923_v34 = vadd.f32 %v6922_v16, %v6921_v41  ;;  %v9938_v3 = vadd.f32 %v6920_v39, %v4598_v25  ;;  %v4609_v0 = vadd.f32 %v6817_v32, %v9846_v12 }
 0x498   : > { %v9941_v36 = vadd.f32 %v6923_v34, %v4601_v30  ;;  %v6818_v58 = vpop.f32.mrb[8].mxu0 }
 0x499   : > { %v6819_v48 = vpop.f32.mrb[9].mxu0 }
 0x49a   : > { %v6924_v8 = vpop.f32.mrb[36].mxu1  ;;  %v6820_v45 = vadd.f32 %v6819_v48, %v6818_v58  ;;  %v6821_v33 = vpop.f32.mrb[10].mxu0 }
 0x49b   : > { %v6925_v21 = vpop.f32.mrb[37].mxu1  ;;  %v6822_v50 = vpop.f32.mrb[11].mxu0 }
 0x49c   : > { %v6926_v1 = vadd.f32 %v6925_v21, %v6924_v8  ;;  %v6927_v31 = vpop.f32.mrb[38].mxu1  ;;  %v4614_v55 = vadd.f32 %v6820_v45, %v9850_v49  ;;  %v6823_v54 = vadd.f32 %v6822_v50, %v6821_v33 }
 0x49d   : > { %v6928_v28 = vpop.f32.mrb[39].mxu1 }
 0x49e   : > { %v6929_v15 = vadd.f32 %v6928_v28, %v6927_v31  ;;  %v9944_v17 = vadd.f32 %v6926_v1, %v4606_v62  ;;  %v4617_v12 = vadd.f32 %v6823_v54, %v9852_v44 }
 0x4a0   : > { %v9947_v25 = vadd.f32 %v6929_v15, %v4609_v0  ;;  %v6824_v6 = vpop.f32.mrb[12].mxu0 }
 0x4a1   : > { %v6825_v53 = vpop.f32.mrb[13].mxu0 }
 0x4a2   : > { %v6930_v4 = vpop.f32.mrb[40].mxu1  ;;  %v6826_v30 = vadd.f32 %v6825_v53, %v6824_v6  ;;  %v6827_v37 = vpop.f32.mrb[14].mxu0 }
 0x4a3   : > { %v6931_v29 = vpop.f32.mrb[41].mxu1  ;;  %v6828_v9 = vpop.f32.mrb[15].mxu0 }
 0x4a4   : > { %v6932_v5 = vadd.f32 %v6931_v29, %v6930_v4  ;;  %v6933_v11 = vpop.f32.mrb[42].mxu1  ;;  %v4622_v49 = vadd.f32 %v6826_v30, %v9857_v63  ;;  %v6829_v13 = vadd.f32 %v6828_v9, %v6827_v37 }
 0x4a5   : > { %v6934_v39 = vpop.f32.mrb[43].mxu1 }
 0x4a6   : > { %v6935_v26 = vadd.f32 %v6934_v39, %v6933_v11  ;;  %v9950_v41 = vadd.f32 %v6932_v5, %v4614_v55  ;;  %v4625_v44 = vadd.f32 %v6829_v13, %v9860_v47 }
 0x4a8   : > { %v9953_v62 = vadd.f32 %v6935_v26, %v4617_v12  ;;  %v7115_v32 = vpop.f32.mrb[16].mxu0 }
 0x4a9   : > { %v4832_v16 = vadd.f32 %v7115_v32, %v9869_v61  ;;  %v4823_v0 = vpop.f32.mrb[17].mxu0 }
 0x4aa   : > { %v6936_v34 = vpop.f32.mrb[44].mxu1  ;;  %v4824_v58 = vadd.f32 %v4823_v0, %v9863_v19  ;;  %v7116_v8 = vpop.f32.mrb[18].mxu0 }
 0x4ab   : > { %v6937_v48 = vpop.f32.mrb[45].mxu1  ;;  %v4835_v63 = vadd.f32 %v7116_v8, %v9872_v59  ;;  %v4826_v21 = vpop.f32.mrb[19].mxu0  ;;  %v4952_v47 = vmax.f32 %v4832_v16, 0.0 }
 0x4ac   : > { %v6938_v45 = vadd.f32 %v6937_v48, %v6936_v34  ;;  %v6939_v33 = vpop.f32.mrb[46].mxu1  ;;  %v4827_v1 = vadd.f32 %v4826_v21, %v9866_v10  ;;  %v4950_v61 = vmax.f32 %v4824_v58, 0.0 }
 0x4ad   : > { %v6940_v50 = vpop.f32.mrb[47].mxu1  ;;  %v4953_v31 = vmax.f32 %v4835_v63, 0.0 }
 0x4ae   : > { %v6941_v55 = vadd.f32 %v6940_v50, %v6939_v33  ;;  %v9959_v54 = vadd.f32 %v6938_v45, %v4622_v49  ;;  %v4951_v28 = vmax.f32 %v4827_v1, 0.0 }
 0x4af   : > { %v9961_v15 = vpack.c.bf16 %v4953_v31, %v4952_v47 }
 0x4b0   : > { %v9963_v19 = vadd.f32 %v6941_v55, %v4625_v44  ;;  %v9965_v12 = vpack.c.bf16 %v4951_v28, %v4950_v61  ;;  %v7119_v6 = vpop.f32.mrb[20].mxu0 }
 0x4b1   : > { %v4848_v59 = vadd.f32 %v7119_v6, %v9881_v24  ;;  %v4839_v53 = vpop.f32.mrb[21].mxu0 }
 0x4b2   : > { %v4840_v10 = vadd.f32 %v4839_v53, %v9875_v60  ;;  %v7120_v4 = vpop.f32.mrb[22].mxu0 }
 0x4b3   : > { %v4851_v30 = vadd.f32 %v7120_v4, %v9884_v52  ;;  %v4842_v37 = vpop.f32.mrb[23].mxu0  ;;  %v4956_v5 = vmax.f32 %v4848_v59, 0.0 }
 0x4b4   : > { %v4843_v29 = vadd.f32 %v4842_v37, %v9878_v22  ;;  %v4954_v11 = vmax.f32 %v4840_v10, 0.0 }
 0x4b5   : > { %v4957_v9 = vmax.f32 %v4851_v30, 0.0 }
 0x4b6   : > { %v4955_v49 = vmax.f32 %v4843_v29, 0.0 }
 0x4b7   : > { %v9971_v13 = vpack.c.bf16 %v4957_v9, %v4956_v5 }
 0x4b8   : > { %v9973_v39 = vpack.c.bf16 %v4955_v49, %v4954_v11  ;;  %v7123_v26 = vpop.f32.mrb[24].mxu0 }
 0x4b9   : > { %v4864_v24 = vadd.f32 %v7123_v26, %v9893_v40  ;;  %v4855_v44 = vpop.f32.mrb[25].mxu0 }
 0x4ba   : > { %v4856_v60 = vadd.f32 %v4855_v44, %v9887_v14  ;;  %v7124_v32 = vpop.f32.mrb[26].mxu0 }
 0x4bb   : > { %v4867_v52 = vadd.f32 %v7124_v32, %v9896_v51  ;;  %v4858_v16 = vpop.f32.mrb[27].mxu0  ;;  %v4960_v34 = vmax.f32 %v4864_v24, 0.0 }
 0x4bc   : > { %v4859_v22 = vadd.f32 %v4858_v16, %v9890_v18  ;;  %v4958_v58 = vmax.f32 %v4856_v60, 0.0 }
 0x4bd   : > { %v4961_v0 = vmax.f32 %v4867_v52, 0.0 }
 0x4be   : > { %v4959_v48 = vmax.f32 %v4859_v22, 0.0 }
 0x4bf   : > { %v9979_v8 = vpack.c.bf16 %v4961_v0, %v4960_v34 }
 0x4c0   : > { %v9981_v45 = vpack.c.bf16 %v4959_v48, %v4958_v58  ;;  %v7127_v63 = vpop.f32.mrb[28].mxu0 }
 0x4c1   : > { %v4880_v40 = vadd.f32 %v7127_v63, %v9905_v57  ;;  %v4871_v33 = vpop.f32.mrb[29].mxu0 }
 0x4c2   : > { %v4872_v14 = vadd.f32 %v4871_v33, %v9899_v35  ;;  %v7128_v21 = vpop.f32.mrb[30].mxu0 }
 0x4c3   : > { %v4883_v51 = vadd.f32 %v7128_v21, %v9908_v43  ;;  %v4874_v1 = vpop.f32.mrb[31].mxu0  ;;  %v4964_v50 = vmax.f32 %v4880_v40, 0.0 }
 0x4c4   : > { %v4875_v18 = vadd.f32 %v4874_v1, %v9902_v38  ;;  %v4962_v31 = vmax.f32 %v4872_v14, 0.0 }
 0x4c5   : > { %v4965_v47 = vmax.f32 %v4883_v51, 0.0 }
 0x4c6   : > { %v4963_v55 = vmax.f32 %v4875_v18, 0.0 }
 0x4c7   : > { %v9987_v61 = vpack.c.bf16 %v4965_v47, %v4964_v50 }
 0x4c8   : > { %v9989_v28 = vpack.c.bf16 %v4963_v55, %v4962_v31  ;;  %v7131_v6 = vpop.f32.mrb[32].mxu0 }
 0x4c9   : > { %v4896_v57 = vadd.f32 %v7131_v6, %v9920_v27  ;;  %v4887_v59 = vpop.f32.mrb[33].mxu0 }
 0x4ca   : > { %v4888_v35 = vadd.f32 %v4887_v59, %v9914_v56  ;;  %v7132_v53 = vpop.f32.mrb[34].mxu0 }
 0x4cb   : > { %v4899_v43 = vadd.f32 %v7132_v53, %v9923_v46  ;;  %v4890_v10 = vpop.f32.mrb[35].mxu0  ;;  %v4968_v4 = vmax.f32 %v4896_v57, 0.0 }
 0x4cc   : > { %v4891_v38 = vadd.f32 %v4890_v10, %v9917_v42  ;;  %v4966_v37 = vmax.f32 %v4888_v35, 0.0 }
 0x4cd   : > { %v4969_v30 = vmax.f32 %v4899_v43, 0.0 }
 0x4ce   : > { %v4967_v29 = vmax.f32 %v4891_v38, 0.0 }
 0x4cf   : > { %v7149_v5 = vpack.c.bf16 %v4969_v30, %v4968_v4 }
 0x4d0   : > { %v7145_v9 = vpack.c.bf16 %v4967_v29, %v4966_v37  ;;  %v7135_v11 = vpop.f32.mrb[36].mxu0 }
 0x4d1   : > { %v4912_v49 = vadd.f32 %v7135_v11, %v9932_v7  ;;  %v4903_v26 = vpop.f32.mrb[37].mxu0 }
 0x4d2   : > { %v4904_v27 = vadd.f32 %v4903_v26, %v9926_v20  ;;  %v7136_v24 = vpop.f32.mrb[38].mxu0  ;;  %7146 = vmatprep.subr.bf16.mxu1 %v7145_v9 }
 0x4d3   : > { %v4915_v56 = vadd.f32 %v7136_v24, %v9935_v2  ;;  %v4906_v46 = vpop.f32.mrb[39].mxu0  ;;  %7148 = vmatpush3.bf16.msra.mxu1 %v9965_v12  ;;  %v4972_v44 = vmax.f32 %v4912_v49, 0.0 }
 0x4d4   : > { %v4907_v42 = vadd.f32 %v4906_v46, %v9929_v23  ;;  %7150 = vmatprep.subr.bf16.mxu1 %v7149_v5  ;;  %v4970_v32 = vmax.f32 %v4904_v27, 0.0 }
 0x4d5   : > { %v4973_v60 = vmax.f32 %v4915_v56, 0.0 }
 0x4d6   : > { %v4971_v52 = vmax.f32 %v4907_v42, 0.0 }
 0x4d7   : > { %v7157_v16 = vpack.c.bf16 %v4973_v60, %v4972_v44  ;;  %7152 = vmatpush3.bf16.msra.mxu1 %v9961_v15 }
 0x4d8   : > { %v7153_v7 = vpack.c.bf16 %v4971_v52, %v4970_v32  ;;  %v7139_v22 = vpop.f32.mrb[40].mxu0 }
 0x4d9   : > { %v4928_v20 = vadd.f32 %v7139_v22, %v9944_v17  ;;  %v4919_v34 = vpop.f32.mrb[41].mxu0 }
 0x4da   : > { %v4920_v2 = vadd.f32 %v4919_v34, %v9938_v3  ;;  %v7140_v0 = vpop.f32.mrb[42].mxu0  ;;  %7154 = vmatprep.subr.bf16.mxu1 %v7153_v7 }
 0x4db   : > { %v4931_v12 = vadd.f32 %v7140_v0, %v9947_v25  ;;  %v4922_v23 = vpop.f32.mrb[43].mxu0  ;;  %7156 = vmatpush3.bf16.msra.mxu1 %v9973_v39  ;;  %v4976_v48 = vmax.f32 %v4928_v20, 0.0 }
 0x4dc   : > { %v4923_v58 = vadd.f32 %v4922_v23, %v9941_v36  ;;  %7158 = vmatprep.subr.bf16.mxu1 %v7157_v16  ;;  %v4974_v15 = vmax.f32 %v4920_v2, 0.0 }
 0x4dd   : > { %v4977_v63 = vmax.f32 %v4931_v12, 0.0 }
 0x4de   : > { %v4975_v40 = vmax.f32 %v4923_v58, 0.0 }
 0x4df   : > { %v7165_v33 = vpack.c.bf16 %v4977_v63, %v4976_v48  ;;  %7160 = vmatpush3.bf16.msra.mxu1 %v9971_v13 }
 0x4e0   : > { %v7161_v17 = vpack.c.bf16 %v4975_v40, %v4974_v15  ;;  %v7143_v14 = vpop.f32.mrb[44].mxu0 }
 0x4e1   : > { %v4944_v3 = vadd.f32 %v7143_v14, %v9959_v54  ;;  %v4935_v21 = vpop.f32.mrb[45].mxu0 }
 0x4e2   : > { %v4936_v25 = vadd.f32 %v4935_v21, %v9950_v41  ;;  %v7144_v51 = vpop.f32.mrb[46].mxu0  ;;  %7162 = vmatprep.subr.bf16.mxu1 %v7161_v17  ;;  %v4982_v41 = vld [vmem:[%s10032_s7] sm:$0xff] }
 0x4e3   : > { %v4947_v39 = vadd.f32 %v7144_v51, %v9963_v19  ;;  %v4938_v36 = vpop.f32.mrb[47].mxu0  ;;  %7164 = vmatpush3.bf16.msra.mxu1 %v9981_v45  ;;  %v4980_v18 = vmax.f32 %v4944_v3, 0.0  ;;  %v4984_v19 = vld [vmem:[#allocation14] sm:$0xff] }
 0x4e4   : > { %v4939_v1 = vadd.f32 %v4938_v36, %v9953_v62  ;;  %7166 = vmatprep.subr.bf16.mxu1 %v7165_v33  ;;  %v4978_v50 = vmax.f32 %v4936_v25, 0.0 }
 0x4e5   : > { %v4981_v13 = vmax.f32 %v4947_v39, 0.0 }
 0x4e6   : > { %v4979_v47 = vmax.f32 %v4939_v1, 0.0 }
 0x4e7   : > { %v7173_v31 = vpack.c.bf16 %v4981_v13, %v4980_v18  ;;  %7168 = vmatpush3.bf16.msra.mxu1 %v9979_v8 }
 0x4e8   : > { %v7169_v54 = vpack.c.bf16 %v4979_v47, %v4978_v50 }
 0x4ea   : > { %7170 = vmatprep.subr.bf16.mxu1 %v7169_v54 }
 0x4eb   : > { %7172 = vmatpush3.bf16.msra.mxu1 %v9989_v28 }
 0x4ec   : > { %7174 = vmatprep.subr.bf16.mxu1 %v7173_v31 }
 0x4ef   : > { %7176 = vmatpush3.bf16.msra.mxu1 %v9987_v61 }
 0x4f2   : > { %5050 = vmatmul.mubr.f32.vlgmr.msra.gmra.mrb[48].mxu1 %v4982_v41 }
 0x5c5   : > { %v6998_v62 = vpop.f32.mrb[48].mxu1 }
 0x5c6   : > { %v6999_v45 = vpop.f32.mrb[49].mxu1 }
 0x5c7   : > { %v7000_v55 = vadd.f32 %v6999_v45, %v6998_v62 }
 0x5c9   : > { %v5052_v8 = vadd.f32 %v7000_v55, %v4984_v19 }
 0x5cb   : > { %5055 = vst [vmem:[%s424_s11] sm:$0xff] %v5052_v8 }
 0x5cc PF: > { %s23_s30 = sadd.s32 1, %s7700_s30  }
 0x5cd   : > { %p20_p11 = scmp.ge.s32.totalorder %s23_s30, 4  }
 0x5cf   :  { %22 = sbr.rel (!%p20_p11) target bundleno = 4 (0x4), region = 118 }
 0x5d6   :  { %5075 = vsyncpa [#allocation5], 1 }
 0x5d7   :  { %5077 = vsyncpa [#allocation5 + $0x1], 1 }
 0x5d8   :  { %5078 = vsyncpa [#allocation7], 1 }
 0x5d9   :  { %5079 = vsyncpa [#allocation10], 1 }
 0x5da   :  { %5080 = vsyncpa [#allocation13], 1 }

</bundles_post_ra>
